<compile_context>
chip_gen: v5e
topology: v5e:2x2
jax: 0.10.0
libtpu: 0.0.40
codegen_flags: <defaults>
</compile_context>

<pallas_src>
import jax
import jax.numpy as jnp
from jax import lax
from jax.experimental import pallas as pl
from jax.experimental.pallas import tpu as pltpu

EPS = 1e-5


# ------------------------------ Pallas kernel -------------------------------
def _make_outc_kernel(H, W, Cin, Cmid, Cout, Cmax):
    """Builds the kernel body with all shapes baked in as Python constants."""

    def conv3x3(h, cin, w_ref, bias, pad_ref, col_ref):
        """3x3 'same' conv of h:(H, W, cin) -> (H*W, cout) via one im2col matmul."""
        # Interior of the shared padded scratch is fully overwritten for exactly the
        # channels this conv reads; the 1-pixel halo was zeroed at the top of the step.
        pad_ref[1:H + 1, 1:W + 1, :cin] = h
        # im2col: gather the 9 shifted windows into one (H*W, 9*cin) buffer ...
        for k in range(9):
            kh, kw = divmod(k, 3)
            col_ref[:, k * cin:(k + 1) * cin] = (
                pad_ref[kh:kh + H, kw:kw + W, :cin].reshape(H * W, cin))
        # ... and contract over all 9*cin inputs with a single MXU matmul.
        return jnp.dot(col_ref[:, :9 * cin], w_ref[...],
                       preferred_element_type=jnp.float32) + bias

    def kernel(x_ref, vec_ref, w1_ref, w2_ref, w3_ref, w4_ref, o_ref,
               pad_ref, col_ref):
        # Zero only the 1-pixel halo of the shared padded scratch (never the interior:
        # it is rewritten before every read).  Done every grid step so correctness does
        # not depend on scratch persistence when the batch axis is split across cores.
        zrow = jnp.zeros((1, W + 2, Cmax), jnp.float32)
        zcol = jnp.zeros((H + 2, 1, Cmax), jnp.float32)
        pad_ref[0:1, :, :] = zrow
        pad_ref[H + 1:H + 2, :, :] = zrow
        pad_ref[:, 0:1, :] = zcol
        pad_ref[:, W + 1:W + 2, :] = zcol

        x = x_ref[0]                                   # (H, W, Cin)

        # BN1 + ReLU (the only BN not folded into a conv; it precedes the first conv).
        h = jnp.maximum(x * vec_ref[0:1, :Cin] + vec_ref[1:2, :Cin], 0.0)

        # conv1 (BN2 folded in) -> ReLU
        y = conv3x3(h, Cin, w1_ref, vec_ref[2:3, :Cmid], pad_ref, col_ref)
        h = jnp.maximum(y, 0.0).reshape(H, W, Cmid)
        # conv2 (BN3 folded in) -> ReLU
        y = conv3x3(h, Cmid, w2_ref, vec_ref[3:4, :Cmid], pad_ref, col_ref)
        h = jnp.maximum(y, 0.0).reshape(H, W, Cmid)
        # conv3 (BN4 folded in) -> ReLU
        y = conv3x3(h, Cmid, w3_ref, vec_ref[4:5, :Cout], pad_ref, col_ref)
        h = jnp.maximum(y, 0.0).reshape(H, W, Cout)
        # conv4 (trailing 1x1 conv folded in) -> output (no nonlinearity after it)
        y = conv3x3(h, Cout, w4_ref, vec_ref[5:6, :Cout], pad_ref, col_ref)
        o_ref[0] = y.reshape(H, W, Cout)

    return kernel


# --------------------------- host-side param folds --------------------------
def _fold_params(params):
    """Fold BN2/3/4 into the preceding convs and the final 1x1 conv into conv4.

    Returns (vecs, w1c, w2c, w3c, w4c):
      vecs : (6, Cmax) rows = [s1, t1, b1', b2', b3', b4'] (zero-padded to Cmax cols)
      w*c  : im2col-flattened weights, shape (9*Cin_i, Cout_i)
    """
    (s1, t1, s2, t2, s3, t3, s4, t4,
     w1, b1, w2, b2, w3, b3, w4, b4, w5, b5) = params
    Cin, Cmid = w1.shape[2], w1.shape[3]
    Cout = w3.shape[3]
    Cmax = max(Cin, Cmid, Cout)

    # BN_{k+1}(conv_k(x)) == conv_k'(x): scale output channels, adjust bias.
    w1f, b1f = w1 * s2, b1 * s2 + t2
    w2f, b2f = w2 * s3, b2 * s3 + t3
    w3f, b3f = w3 * s4, b3 * s4 + t4
    # conv5 (1x1) directly follows conv4 with no nonlinearity -> compose linearly.
    w4f = jnp.einsum("hwio,oj->hwij", w4, w5)
    b4f = b4 @ w5 + b5

    def pad_cols(v):
        return jnp.pad(v, ((0, 0), (0, Cmax - v.shape[1])))

    vecs = jnp.concatenate(
        [pad_cols(v) for v in (s1, t1, b1f, b2f, b3f, b4f)], axis=0)  # (6, Cmax)

    def flat(w):  # HWIO -> (9*Cin, Cout), row order (kh, kw, ci) matches im2col
        kh, kw, ci, co = w.shape
        return w.reshape(kh * kw * ci, co)

    return vecs, flat(w1f), flat(w2f), flat(w3f), flat(w4f)


# --------------------------------- wrapper -----------------------------------
def outc_pallas(x_nchw, params):
    x = jnp.transpose(x_nchw, (0, 2, 3, 1)).astype(jnp.float32)   # NCHW -> NHWC
    B, H, W, Cin = x.shape
    Cmid = params[8].shape[-1]    # w1: (3, 3, Cin, Cmid)
    Cout = params[12].shape[-1]   # w3: (3, 3, Cmid, Cout)
    Cmax = max(Cin, Cmid, Cout)

    folded = _fold_params(params)                 # (vecs, w1c, w2c, w3c, w4c)
    kernel = _make_outc_kernel(H, W, Cin, Cmid, Cout, Cmax)

    in_specs = [pl.BlockSpec((1, H, W, Cin), lambda b: (b, 0, 0, 0))]
    in_specs += [pl.BlockSpec(p.shape, lambda b: (0, 0)) for p in folded]

    out = pl.pallas_call(
        kernel,
        out_shape=jax.ShapeDtypeStruct((B, H, W, Cout), jnp.float32),
        grid=(B,),
        in_specs=in_specs,
        out_specs=pl.BlockSpec((1, H, W, Cout), lambda b: (b, 0, 0, 0)),
        scratch_shapes=[
            pltpu.VMEM((H + 2, W + 2, Cmax), jnp.float32),   # shared padded image
            pltpu.VMEM((H * W, 9 * Cmax), jnp.float32),      # shared im2col buffer
        ],
        compiler_params=pltpu.CompilerParams(
            dimension_semantics=("parallel",)),  # batch steps independent (v7x megacore)
    )(x, *folded)
    return jnp.transpose(out, (0, 3, 1, 2))   # back to NCHW


# ------------------------- pure-JAX reference (unfolded) ---------------------
def _conv2d_same(x, w, b):
    return lax.conv_general_dilated(
        x, w, window_strides=(1, 1), padding="SAME",
        dimension_numbers=("NHWC", "HWIO", "NHWC")) + b


def outc_ref(x_nchw, params):
    (s1, t1, s2, t2, s3, t3, s4, t4,
     w1, b1, w2, b2, w3, b3, w4, b4, w5, b5) = params
    h = jnp.transpose(x_nchw, (0, 2, 3, 1)).astype(jnp.float32)
    h = _conv2d_same(jnp.maximum(h * s1 + t1, 0.0), w1, b1)
    h = _conv2d_same(jnp.maximum(h * s2 + t2, 0.0), w2, b2)
    h = _conv2d_same(jnp.maximum(h * s3 + t3, 0.0), w3, b3)
    h = _conv2d_same(jnp.maximum(h * s4 + t4, 0.0), w4, b4)
    h = jnp.einsum("bhwc,cd->bhwd", h, w5) + b5
    return jnp.transpose(h, (0, 3, 1, 2))


# ------------------------- parameter construction ----------------------------
def make_params(key, c_in, c_mid, c_out):
    ks = iter(jax.random.split(key, 32))

    def bn(c):
        gamma = jax.random.normal(next(ks), (1, c), jnp.float32) * 0.2 + 1.0
        beta = jax.random.normal(next(ks), (1, c), jnp.float32) * 0.1
        mean = jax.random.normal(next(ks), (1, c), jnp.float32) * 0.1
        var = jax.random.uniform(next(ks), (1, c), jnp.float32, 0.5, 1.5)
        scale = gamma / jnp.sqrt(var + EPS)
        shift = beta - mean * scale
        return scale, shift

    def conv(cin, cout, k=3):
        w = jax.random.normal(next(ks), (k, k, cin, cout), jnp.float32) * 0.1
        b = jax.random.normal(next(ks), (1, cout), jnp.float32) * 0.1
        return w, b

    # BasicConv(c_in -> c_mid): BN(c_in), conv c_in->c_mid, BN(c_mid), conv c_mid->c_mid
    s1, t1 = bn(c_in)
    w1, b1 = conv(c_in, c_mid)
    s2, t2 = bn(c_mid)
    w2, b2 = conv(c_mid, c_mid)
    # BasicConv(c_mid -> c_out): BN(c_mid), conv c_mid->c_out, BN(c_out), conv c_out->c_out
    s3, t3 = bn(c_mid)
    w3, b3 = conv(c_mid, c_out)
    s4, t4 = bn(c_out)
    w4, b4 = conv(c_out, c_out)
    # final 1x1 conv: c_out -> c_out
    w5 = jax.random.normal(next(ks), (c_out, c_out), jnp.float32) * 0.1
    b5 = jax.random.normal(next(ks), (1, c_out), jnp.float32) * 0.1

    return (s1, t1, s2, t2, s3, t3, s4, t4,
            w1, b1, w2, b2, w3, b3, w4, b4, w5, b5)


if __name__ == "__main__":
    B, C_IN, C_MID, C_OUT, H, W = 2, 4, 8, 4, 16, 16

    key = jax.random.PRNGKey(0)
    kx, kp = jax.random.split(key)
    x = jax.random.normal(kx, (B, C_IN, H, W), jnp.float32)  # NCHW, like PyTorch
    params = make_params(kp, C_IN, C_MID, C_OUT)

    y = outc_pallas(x, params)
    y = jax.block_until_ready(y)

    y_ref = outc_ref(x, params)
    assert y.shape == (B, C_OUT, H, W)
    assert jnp.allclose(y, y_ref, rtol=1e-3, atol=1e-3), (
        float(jnp.max(jnp.abs(y - y_ref))))

    print("KERNEL_OK")
</pallas_src>

<mosaic_0001>
module attributes {stable_mosaic.version = 11 : i64} {
  func.func @kernel(%arg0: i32, %arg1: memref<1x16x16x4xf32, #tpu.memory_space<vmem>>, %arg2: memref<6x8xf32, #tpu.memory_space<vmem>>, %arg3: memref<36x8xf32, #tpu.memory_space<vmem>>, %arg4: memref<72x8xf32, #tpu.memory_space<vmem>>, %arg5: memref<72x4xf32, #tpu.memory_space<vmem>>, %arg6: memref<36x4xf32, #tpu.memory_space<vmem>>, %arg7: memref<1x16x16x4xf32, #tpu.memory_space<vmem>>, %arg8: memref<18x18x8xf32, #tpu.memory_space<vmem>>, %arg9: memref<256x72xf32, #tpu.memory_space<vmem>>) attributes {dimension_semantics = [#tpu.dimension_semantics<parallel>], iteration_bounds = array<i64: 2>, scalar_prefetch = 0 : i64, scratch_operands = 2 : i64, tpu.core_type = #tpu.core_type<tc>, window_params = [{transform_indices = @transform_0, window_bounds = array<i64: 1, 16, 16, 4>}, {pipeline_mode = #tpu.pipeline_mode<synchronous>, transform_indices = @transform_1, window_bounds = array<i64: 6, 8>}, {pipeline_mode = #tpu.pipeline_mode<synchronous>, transform_indices = @transform_2, window_bounds = array<i64: 36, 8>}, {pipeline_mode = #tpu.pipeline_mode<synchronous>, transform_indices = @transform_3, window_bounds = array<i64: 72, 8>}, {pipeline_mode = #tpu.pipeline_mode<synchronous>, transform_indices = @transform_4, window_bounds = array<i64: 72, 4>}, {pipeline_mode = #tpu.pipeline_mode<synchronous>, transform_indices = @transform_5, window_bounds = array<i64: 36, 4>}, {transform_indices = @transform_6, window_bounds = array<i64: 1, 16, 16, 4>}]} {
    %cst = arith.constant 0.000000e+00 : f32
    %0 = vector.broadcast %cst : f32 to vector<1x18x8xf32>
    %cst_0 = arith.constant 0.000000e+00 : f32
    %1 = vector.broadcast %cst_0 : f32 to vector<18x1x8xf32>
    %c0 = arith.constant 0 : index
    %c0_1 = arith.constant 0 : index
    %c0_2 = arith.constant 0 : index
    %2 = vector.load %arg8[%c0, %c0_1, %c0_2] : memref<18x18x8xf32, #tpu.memory_space<vmem>>, vector<1x18x8xf32>
    tpu.vector_store %arg8[%c0, %c0_1, %c0_2], %0 {strides = array<i32>} : memref<18x18x8xf32, #tpu.memory_space<vmem>>, vector<1x18x8xf32>,
    %c17 = arith.constant 17 : index
    %c0_3 = arith.constant 0 : index
    %c0_4 = arith.constant 0 : index
    %3 = vector.load %arg8[%c17, %c0_3, %c0_4] : memref<18x18x8xf32, #tpu.memory_space<vmem>>, vector<1x18x8xf32>
    tpu.vector_store %arg8[%c17, %c0_3, %c0_4], %0 {strides = array<i32>} : memref<18x18x8xf32, #tpu.memory_space<vmem>>, vector<1x18x8xf32>,
    %c0_5 = arith.constant 0 : index
    %c0_6 = arith.constant 0 : index
    %c0_7 = arith.constant 0 : index
    %4 = vector.load %arg8[%c0_5, %c0_6, %c0_7] : memref<18x18x8xf32, #tpu.memory_space<vmem>>, vector<18x1x8xf32>
    tpu.vector_store %arg8[%c0_5, %c0_6, %c0_7], %1 {strides = array<i32>} : memref<18x18x8xf32, #tpu.memory_space<vmem>>, vector<18x1x8xf32>,
    %c0_8 = arith.constant 0 : index
    %c17_9 = arith.constant 17 : index
    %c0_10 = arith.constant 0 : index
    %5 = vector.load %arg8[%c0_8, %c17_9, %c0_10] : memref<18x18x8xf32, #tpu.memory_space<vmem>>, vector<18x1x8xf32>
    tpu.vector_store %arg8[%c0_8, %c17_9, %c0_10], %1 {strides = array<i32>} : memref<18x18x8xf32, #tpu.memory_space<vmem>>, vector<18x1x8xf32>,
    %c0_11 = arith.constant 0 : index
    %c0_12 = arith.constant 0 : index
    %c0_13 = arith.constant 0 : index
    %c0_14 = arith.constant 0 : index
    %6 = vector.load %arg1[%c0_11, %c0_12, %c0_13, %c0_14] : memref<1x16x16x4xf32, #tpu.memory_space<vmem>>, vector<1x16x16x4xf32>
    %7 = vector.shape_cast %6 : vector<1x16x16x4xf32> to vector<16x16x4xf32>
    %c0_15 = arith.constant 0 : index
    %c0_16 = arith.constant 0 : index
    %8 = vector.load %arg2[%c0_15, %c0_16] : memref<6x8xf32, #tpu.memory_space<vmem>>, vector<1x4xf32>
    %9 = vector.shape_cast %8 : vector<1x4xf32> to vector<1x1x4xf32>
    %10 = vector.broadcast %9 : vector<1x1x4xf32> to vector<16x16x4xf32>
    %11 = arith.mulf %7, %10 : vector<16x16x4xf32>
    %c1 = arith.constant 1 : index
    %c0_17 = arith.constant 0 : index
    %12 = vector.load %arg2[%c1, %c0_17] : memref<6x8xf32, #tpu.memory_space<vmem>>, vector<1x4xf32>
    %13 = vector.shape_cast %12 : vector<1x4xf32> to vector<1x1x4xf32>
    %14 = vector.broadcast %13 : vector<1x1x4xf32> to vector<16x16x4xf32>
    %15 = arith.addf %11, %14 : vector<16x16x4xf32>
    %cst_18 = arith.constant 0.000000e+00 : f32
    %16 = vector.broadcast %cst_18 : f32 to vector<16x16x4xf32>
    %17 = arith.maximumf %15, %16 : vector<16x16x4xf32>
    %c2 = arith.constant 2 : index
    %c0_19 = arith.constant 0 : index
    %18 = vector.load %arg2[%c2, %c0_19] : memref<6x8xf32, #tpu.memory_space<vmem>>, vector<1x8xf32>
    %c1_20 = arith.constant 1 : index
    %c1_21 = arith.constant 1 : index
    %c0_22 = arith.constant 0 : index
    %19 = vector.load %arg8[%c1_20, %c1_21, %c0_22] : memref<18x18x8xf32, #tpu.memory_space<vmem>>, vector<16x16x4xf32>
    tpu.vector_store %arg8[%c1_20, %c1_21, %c0_22], %17 {strides = array<i32>} : memref<18x18x8xf32, #tpu.memory_space<vmem>>, vector<16x16x4xf32>,
    %c0_23 = arith.constant 0 : index
    %c0_24 = arith.constant 0 : index
    %c0_25 = arith.constant 0 : index
    %20 = vector.load %arg8[%c0_23, %c0_24, %c0_25] : memref<18x18x8xf32, #tpu.memory_space<vmem>>, vector<16x16x4xf32>
    %21 = vector.shape_cast %20 : vector<16x16x4xf32> to vector<256x4xf32>
    %c0_26 = arith.constant 0 : index
    %c0_27 = arith.constant 0 : index
    %22 = vector.load %arg9[%c0_26, %c0_27] : memref<256x72xf32, #tpu.memory_space<vmem>>, vector<256x4xf32>
    tpu.vector_store %arg9[%c0_26, %c0_27], %21 {strides = array<i32>} : memref<256x72xf32, #tpu.memory_space<vmem>>, vector<256x4xf32>,
    %c0_28 = arith.constant 0 : index
    %c1_29 = arith.constant 1 : index
    %c0_30 = arith.constant 0 : index
    %23 = vector.load %arg8[%c0_28, %c1_29, %c0_30] : memref<18x18x8xf32, #tpu.memory_space<vmem>>, vector<16x16x4xf32>
    %24 = vector.shape_cast %23 : vector<16x16x4xf32> to vector<256x4xf32>
    %c0_31 = arith.constant 0 : index
    %c4 = arith.constant 4 : index
    %25 = vector.load %arg9[%c0_31, %c4] : memref<256x72xf32, #tpu.memory_space<vmem>>, vector<256x4xf32>
    tpu.vector_store %arg9[%c0_31, %c4], %24 {strides = array<i32>} : memref<256x72xf32, #tpu.memory_space<vmem>>, vector<256x4xf32>,
    %c0_32 = arith.constant 0 : index
    %c2_33 = arith.constant 2 : index
    %c0_34 = arith.constant 0 : index
    %26 = vector.load %arg8[%c0_32, %c2_33, %c0_34] : memref<18x18x8xf32, #tpu.memory_space<vmem>>, vector<16x16x4xf32>
    %27 = vector.shape_cast %26 : vector<16x16x4xf32> to vector<256x4xf32>
    %c0_35 = arith.constant 0 : index
    %c8 = arith.constant 8 : index
    %28 = vector.load %arg9[%c0_35, %c8] : memref<256x72xf32, #tpu.memory_space<vmem>>, vector<256x4xf32>
    tpu.vector_store %arg9[%c0_35, %c8], %27 {strides = array<i32>} : memref<256x72xf32, #tpu.memory_space<vmem>>, vector<256x4xf32>,
    %c1_36 = arith.constant 1 : index
    %c0_37 = arith.constant 0 : index
    %c0_38 = arith.constant 0 : index
    %29 = vector.load %arg8[%c1_36, %c0_37, %c0_38] : memref<18x18x8xf32, #tpu.memory_space<vmem>>, vector<16x16x4xf32>
    %30 = vector.shape_cast %29 : vector<16x16x4xf32> to vector<256x4xf32>
    %c0_39 = arith.constant 0 : index
    %c12 = arith.constant 12 : index
    %31 = vector.load %arg9[%c0_39, %c12] : memref<256x72xf32, #tpu.memory_space<vmem>>, vector<256x4xf32>
    tpu.vector_store %arg9[%c0_39, %c12], %30 {strides = array<i32>} : memref<256x72xf32, #tpu.memory_space<vmem>>, vector<256x4xf32>,
    %c1_40 = arith.constant 1 : index
    %c1_41 = arith.constant 1 : index
    %c0_42 = arith.constant 0 : index
    %32 = vector.load %arg8[%c1_40, %c1_41, %c0_42] : memref<18x18x8xf32, #tpu.memory_space<vmem>>, vector<16x16x4xf32>
    %33 = vector.shape_cast %32 : vector<16x16x4xf32> to vector<256x4xf32>
    %c0_43 = arith.constant 0 : index
    %c16 = arith.constant 16 : index
    %34 = vector.load %arg9[%c0_43, %c16] : memref<256x72xf32, #tpu.memory_space<vmem>>, vector<256x4xf32>
    tpu.vector_store %arg9[%c0_43, %c16], %33 {strides = array<i32>} : memref<256x72xf32, #tpu.memory_space<vmem>>, vector<256x4xf32>,
    %c1_44 = arith.constant 1 : index
    %c2_45 = arith.constant 2 : index
    %c0_46 = arith.constant 0 : index
    %35 = vector.load %arg8[%c1_44, %c2_45, %c0_46] : memref<18x18x8xf32, #tpu.memory_space<vmem>>, vector<16x16x4xf32>
    %36 = vector.shape_cast %35 : vector<16x16x4xf32> to vector<256x4xf32>
    %c0_47 = arith.constant 0 : index
    %c20 = arith.constant 20 : index
    %37 = vector.load %arg9[%c0_47, %c20] : memref<256x72xf32, #tpu.memory_space<vmem>>, vector<256x4xf32>
    tpu.vector_store %arg9[%c0_47, %c20], %36 {strides = array<i32>} : memref<256x72xf32, #tpu.memory_space<vmem>>, vector<256x4xf32>,
    %c2_48 = arith.constant 2 : index
    %c0_49 = arith.constant 0 : index
    %c0_50 = arith.constant 0 : index
    %38 = vector.load %arg8[%c2_48, %c0_49, %c0_50] : memref<18x18x8xf32, #tpu.memory_space<vmem>>, vector<16x16x4xf32>
    %39 = vector.shape_cast %38 : vector<16x16x4xf32> to vector<256x4xf32>
    %c0_51 = arith.constant 0 : index
    %c24 = arith.constant 24 : index
    %40 = vector.load %arg9[%c0_51, %c24] : memref<256x72xf32, #tpu.memory_space<vmem>>, vector<256x4xf32>
    tpu.vector_store %arg9[%c0_51, %c24], %39 {strides = array<i32>} : memref<256x72xf32, #tpu.memory_space<vmem>>, vector<256x4xf32>,
    %c2_52 = arith.constant 2 : index
    %c1_53 = arith.constant 1 : index
    %c0_54 = arith.constant 0 : index
    %41 = vector.load %arg8[%c2_52, %c1_53, %c0_54] : memref<18x18x8xf32, #tpu.memory_space<vmem>>, vector<16x16x4xf32>
    %42 = vector.shape_cast %41 : vector<16x16x4xf32> to vector<256x4xf32>
    %c0_55 = arith.constant 0 : index
    %c28 = arith.constant 28 : index
    %43 = vector.load %arg9[%c0_55, %c28] : memref<256x72xf32, #tpu.memory_space<vmem>>, vector<256x4xf32>
    tpu.vector_store %arg9[%c0_55, %c28], %42 {strides = array<i32>} : memref<256x72xf32, #tpu.memory_space<vmem>>, vector<256x4xf32>,
    %c2_56 = arith.constant 2 : index
    %c2_57 = arith.constant 2 : index
    %c0_58 = arith.constant 0 : index
    %44 = vector.load %arg8[%c2_56, %c2_57, %c0_58] : memref<18x18x8xf32, #tpu.memory_space<vmem>>, vector<16x16x4xf32>
    %45 = vector.shape_cast %44 : vector<16x16x4xf32> to vector<256x4xf32>
    %c0_59 = arith.constant 0 : index
    %c32 = arith.constant 32 : index
    %46 = vector.load %arg9[%c0_59, %c32] : memref<256x72xf32, #tpu.memory_space<vmem>>, vector<256x4xf32>
    tpu.vector_store %arg9[%c0_59, %c32], %45 {strides = array<i32>} : memref<256x72xf32, #tpu.memory_space<vmem>>, vector<256x4xf32>,
    %c0_60 = arith.constant 0 : index
    %c0_61 = arith.constant 0 : index
    %47 = vector.load %arg9[%c0_60, %c0_61] : memref<256x72xf32, #tpu.memory_space<vmem>>, vector<256x36xf32>
    %c0_62 = arith.constant 0 : index
    %c0_63 = arith.constant 0 : index
    %48 = vector.load %arg3[%c0_62, %c0_63] : memref<36x8xf32, #tpu.memory_space<vmem>>, vector<36x8xf32>
    %cst_64 = arith.constant dense<0.000000e+00> : vector<256x8xf32>
    %49 = tpu.matmul %47, %48, %cst_64 {dimension_numbers = #tpu.dot_dimension_numbers<[1], [0], [0], [1], [0, 0, 1, 1], [], []>} : vector<256x36xf32>, vector<36x8xf32>, vector<256x8xf32> -> vector<256x8xf32>
    %50 = vector.broadcast %18 : vector<1x8xf32> to vector<256x8xf32>
    %51 = arith.addf %49, %50 : vector<256x8xf32>
    %cst_65 = arith.constant 0.000000e+00 : f32
    %52 = vector.broadcast %cst_65 : f32 to vector<256x8xf32>
    %53 = arith.maximumf %51, %52 : vector<256x8xf32>
    %54 = vector.shape_cast %53 : vector<256x8xf32> to vector<16x16x8xf32>
    %c3 = arith.constant 3 : index
    %c0_66 = arith.constant 0 : index
    %55 = vector.load %arg2[%c3, %c0_66] : memref<6x8xf32, #tpu.memory_space<vmem>>, vector<1x8xf32>
    %c1_67 = arith.constant 1 : index
    %c1_68 = arith.constant 1 : index
    %c0_69 = arith.constant 0 : index
    %56 = vector.load %arg8[%c1_67, %c1_68, %c0_69] : memref<18x18x8xf32, #tpu.memory_space<vmem>>, vector<16x16x8xf32>
    tpu.vector_store %arg8[%c1_67, %c1_68, %c0_69], %54 {strides = array<i32>} : memref<18x18x8xf32, #tpu.memory_space<vmem>>, vector<16x16x8xf32>,
    %c0_70 = arith.constant 0 : index
    %c0_71 = arith.constant 0 : index
    %c0_72 = arith.constant 0 : index
    %57 = vector.load %arg8[%c0_70, %c0_71, %c0_72] : memref<18x18x8xf32, #tpu.memory_space<vmem>>, vector<16x16x8xf32>
    %58 = vector.shape_cast %57 : vector<16x16x8xf32> to vector<256x8xf32>
    %c0_73 = arith.constant 0 : index
    %c0_74 = arith.constant 0 : index
    %59 = vector.load %arg9[%c0_73, %c0_74] : memref<256x72xf32, #tpu.memory_space<vmem>>, vector<256x8xf32>
    tpu.vector_store %arg9[%c0_73, %c0_74], %58 {strides = array<i32>} : memref<256x72xf32, #tpu.memory_space<vmem>>, vector<256x8xf32>,
    %c0_75 = arith.constant 0 : index
    %c1_76 = arith.constant 1 : index
    %c0_77 = arith.constant 0 : index
    %60 = vector.load %arg8[%c0_75, %c1_76, %c0_77] : memref<18x18x8xf32, #tpu.memory_space<vmem>>, vector<16x16x8xf32>
    %61 = vector.shape_cast %60 : vector<16x16x8xf32> to vector<256x8xf32>
    %c0_78 = arith.constant 0 : index
    %c8_79 = arith.constant 8 : index
    %62 = vector.load %arg9[%c0_78, %c8_79] : memref<256x72xf32, #tpu.memory_space<vmem>>, vector<256x8xf32>
    tpu.vector_store %arg9[%c0_78, %c8_79], %61 {strides = array<i32>} : memref<256x72xf32, #tpu.memory_space<vmem>>, vector<256x8xf32>,
    %c0_80 = arith.constant 0 : index
    %c2_81 = arith.constant 2 : index
    %c0_82 = arith.constant 0 : index
    %63 = vector.load %arg8[%c0_80, %c2_81, %c0_82] : memref<18x18x8xf32, #tpu.memory_space<vmem>>, vector<16x16x8xf32>
    %64 = vector.shape_cast %63 : vector<16x16x8xf32> to vector<256x8xf32>
    %c0_83 = arith.constant 0 : index
    %c16_84 = arith.constant 16 : index
    %65 = vector.load %arg9[%c0_83, %c16_84] : memref<256x72xf32, #tpu.memory_space<vmem>>, vector<256x8xf32>
    tpu.vector_store %arg9[%c0_83, %c16_84], %64 {strides = array<i32>} : memref<256x72xf32, #tpu.memory_space<vmem>>, vector<256x8xf32>,
    %c1_85 = arith.constant 1 : index
    %c0_86 = arith.constant 0 : index
    %c0_87 = arith.constant 0 : index
    %66 = vector.load %arg8[%c1_85, %c0_86, %c0_87] : memref<18x18x8xf32, #tpu.memory_space<vmem>>, vector<16x16x8xf32>
    %67 = vector.shape_cast %66 : vector<16x16x8xf32> to vector<256x8xf32>
    %c0_88 = arith.constant 0 : index
    %c24_89 = arith.constant 24 : index
    %68 = vector.load %arg9[%c0_88, %c24_89] : memref<256x72xf32, #tpu.memory_space<vmem>>, vector<256x8xf32>
    tpu.vector_store %arg9[%c0_88, %c24_89], %67 {strides = array<i32>} : memref<256x72xf32, #tpu.memory_space<vmem>>, vector<256x8xf32>,
    %c1_90 = arith.constant 1 : index
    %c1_91 = arith.constant 1 : index
    %c0_92 = arith.constant 0 : index
    %69 = vector.load %arg8[%c1_90, %c1_91, %c0_92] : memref<18x18x8xf32, #tpu.memory_space<vmem>>, vector<16x16x8xf32>
    %70 = vector.shape_cast %69 : vector<16x16x8xf32> to vector<256x8xf32>
    %c0_93 = arith.constant 0 : index
    %c32_94 = arith.constant 32 : index
    %71 = vector.load %arg9[%c0_93, %c32_94] : memref<256x72xf32, #tpu.memory_space<vmem>>, vector<256x8xf32>
    tpu.vector_store %arg9[%c0_93, %c32_94], %70 {strides = array<i32>} : memref<256x72xf32, #tpu.memory_space<vmem>>, vector<256x8xf32>,
    %c1_95 = arith.constant 1 : index
    %c2_96 = arith.constant 2 : index
    %c0_97 = arith.constant 0 : index
    %72 = vector.load %arg8[%c1_95, %c2_96, %c0_97] : memref<18x18x8xf32, #tpu.memory_space<vmem>>, vector<16x16x8xf32>
    %73 = vector.shape_cast %72 : vector<16x16x8xf32> to vector<256x8xf32>
    %c0_98 = arith.constant 0 : index
    %c40 = arith.constant 40 : index
    %74 = vector.load %arg9[%c0_98, %c40] : memref<256x72xf32, #tpu.memory_space<vmem>>, vector<256x8xf32>
    tpu.vector_store %arg9[%c0_98, %c40], %73 {strides = array<i32>} : memref<256x72xf32, #tpu.memory_space<vmem>>, vector<256x8xf32>,
    %c2_99 = arith.constant 2 : index
    %c0_100 = arith.constant 0 : index
    %c0_101 = arith.constant 0 : index
    %75 = vector.load %arg8[%c2_99, %c0_100, %c0_101] : memref<18x18x8xf32, #tpu.memory_space<vmem>>, vector<16x16x8xf32>
    %76 = vector.shape_cast %75 : vector<16x16x8xf32> to vector<256x8xf32>
    %c0_102 = arith.constant 0 : index
    %c48 = arith.constant 48 : index
    %77 = vector.load %arg9[%c0_102, %c48] : memref<256x72xf32, #tpu.memory_space<vmem>>, vector<256x8xf32>
    tpu.vector_store %arg9[%c0_102, %c48], %76 {strides = array<i32>} : memref<256x72xf32, #tpu.memory_space<vmem>>, vector<256x8xf32>,
    %c2_103 = arith.constant 2 : index
    %c1_104 = arith.constant 1 : index
    %c0_105 = arith.constant 0 : index
    %78 = vector.load %arg8[%c2_103, %c1_104, %c0_105] : memref<18x18x8xf32, #tpu.memory_space<vmem>>, vector<16x16x8xf32>
    %79 = vector.shape_cast %78 : vector<16x16x8xf32> to vector<256x8xf32>
    %c0_106 = arith.constant 0 : index
    %c56 = arith.constant 56 : index
    %80 = vector.load %arg9[%c0_106, %c56] : memref<256x72xf32, #tpu.memory_space<vmem>>, vector<256x8xf32>
    tpu.vector_store %arg9[%c0_106, %c56], %79 {strides = array<i32>} : memref<256x72xf32, #tpu.memory_space<vmem>>, vector<256x8xf32>,
    %c2_107 = arith.constant 2 : index
    %c2_108 = arith.constant 2 : index
    %c0_109 = arith.constant 0 : index
    %81 = vector.load %arg8[%c2_107, %c2_108, %c0_109] : memref<18x18x8xf32, #tpu.memory_space<vmem>>, vector<16x16x8xf32>
    %82 = vector.shape_cast %81 : vector<16x16x8xf32> to vector<256x8xf32>
    %c0_110 = arith.constant 0 : index
    %c64 = arith.constant 64 : index
    %83 = vector.load %arg9[%c0_110, %c64] : memref<256x72xf32, #tpu.memory_space<vmem>>, vector<256x8xf32>
    tpu.vector_store %arg9[%c0_110, %c64], %82 {strides = array<i32>} : memref<256x72xf32, #tpu.memory_space<vmem>>, vector<256x8xf32>,
    %c0_111 = arith.constant 0 : index
    %c0_112 = arith.constant 0 : index
    %84 = vector.load %arg9[%c0_111, %c0_112] : memref<256x72xf32, #tpu.memory_space<vmem>>, vector<256x72xf32>
    %c0_113 = arith.constant 0 : index
    %c0_114 = arith.constant 0 : index
    %85 = vector.load %arg4[%c0_113, %c0_114] : memref<72x8xf32, #tpu.memory_space<vmem>>, vector<72x8xf32>
    %cst_115 = arith.constant dense<0.000000e+00> : vector<256x8xf32>
    %86 = tpu.matmul %84, %85, %cst_115 {dimension_numbers = #tpu.dot_dimension_numbers<[1], [0], [0], [1], [0, 0, 1, 1], [], []>} : vector<256x72xf32>, vector<72x8xf32>, vector<256x8xf32> -> vector<256x8xf32>
    %87 = vector.broadcast %55 : vector<1x8xf32> to vector<256x8xf32>
    %88 = arith.addf %86, %87 : vector<256x8xf32>
    %cst_116 = arith.constant 0.000000e+00 : f32
    %89 = vector.broadcast %cst_116 : f32 to vector<256x8xf32>
    %90 = arith.maximumf %88, %89 : vector<256x8xf32>
    %91 = vector.shape_cast %90 : vector<256x8xf32> to vector<16x16x8xf32>
    %c4_117 = arith.constant 4 : index
    %c0_118 = arith.constant 0 : index
    %92 = vector.load %arg2[%c4_117, %c0_118] : memref<6x8xf32, #tpu.memory_space<vmem>>, vector<1x4xf32>
    %c1_119 = arith.constant 1 : index
    %c1_120 = arith.constant 1 : index
    %c0_121 = arith.constant 0 : index
    %93 = vector.load %arg8[%c1_119, %c1_120, %c0_121] : memref<18x18x8xf32, #tpu.memory_space<vmem>>, vector<16x16x8xf32>
    tpu.vector_store %arg8[%c1_119, %c1_120, %c0_121], %91 {strides = array<i32>} : memref<18x18x8xf32, #tpu.memory_space<vmem>>, vector<16x16x8xf32>,
    %c0_122 = arith.constant 0 : index
    %c0_123 = arith.constant 0 : index
    %c0_124 = arith.constant 0 : index
    %94 = vector.load %arg8[%c0_122, %c0_123, %c0_124] : memref<18x18x8xf32, #tpu.memory_space<vmem>>, vector<16x16x8xf32>
    %95 = vector.shape_cast %94 : vector<16x16x8xf32> to vector<256x8xf32>
    %c0_125 = arith.constant 0 : index
    %c0_126 = arith.constant 0 : index
    %96 = vector.load %arg9[%c0_125, %c0_126] : memref<256x72xf32, #tpu.memory_space<vmem>>, vector<256x8xf32>
    tpu.vector_store %arg9[%c0_125, %c0_126], %95 {strides = array<i32>} : memref<256x72xf32, #tpu.memory_space<vmem>>, vector<256x8xf32>,
    %c0_127 = arith.constant 0 : index
    %c1_128 = arith.constant 1 : index
    %c0_129 = arith.constant 0 : index
    %97 = vector.load %arg8[%c0_127, %c1_128, %c0_129] : memref<18x18x8xf32, #tpu.memory_space<vmem>>, vector<16x16x8xf32>
    %98 = vector.shape_cast %97 : vector<16x16x8xf32> to vector<256x8xf32>
    %c0_130 = arith.constant 0 : index
    %c8_131 = arith.constant 8 : index
    %99 = vector.load %arg9[%c0_130, %c8_131] : memref<256x72xf32, #tpu.memory_space<vmem>>, vector<256x8xf32>
    tpu.vector_store %arg9[%c0_130, %c8_131], %98 {strides = array<i32>} : memref<256x72xf32, #tpu.memory_space<vmem>>, vector<256x8xf32>,
    %c0_132 = arith.constant 0 : index
    %c2_133 = arith.constant 2 : index
    %c0_134 = arith.constant 0 : index
    %100 = vector.load %arg8[%c0_132, %c2_133, %c0_134] : memref<18x18x8xf32, #tpu.memory_space<vmem>>, vector<16x16x8xf32>
    %101 = vector.shape_cast %100 : vector<16x16x8xf32> to vector<256x8xf32>
    %c0_135 = arith.constant 0 : index
    %c16_136 = arith.constant 16 : index
    %102 = vector.load %arg9[%c0_135, %c16_136] : memref<256x72xf32, #tpu.memory_space<vmem>>, vector<256x8xf32>
    tpu.vector_store %arg9[%c0_135, %c16_136], %101 {strides = array<i32>} : memref<256x72xf32, #tpu.memory_space<vmem>>, vector<256x8xf32>,
    %c1_137 = arith.constant 1 : index
    %c0_138 = arith.constant 0 : index
    %c0_139 = arith.constant 0 : index
    %103 = vector.load %arg8[%c1_137, %c0_138, %c0_139] : memref<18x18x8xf32, #tpu.memory_space<vmem>>, vector<16x16x8xf32>
    %104 = vector.shape_cast %103 : vector<16x16x8xf32> to vector<256x8xf32>
    %c0_140 = arith.constant 0 : index
    %c24_141 = arith.constant 24 : index
    %105 = vector.load %arg9[%c0_140, %c24_141] : memref<256x72xf32, #tpu.memory_space<vmem>>, vector<256x8xf32>
    tpu.vector_store %arg9[%c0_140, %c24_141], %104 {strides = array<i32>} : memref<256x72xf32, #tpu.memory_space<vmem>>, vector<256x8xf32>,
    %c1_142 = arith.constant 1 : index
    %c1_143 = arith.constant 1 : index
    %c0_144 = arith.constant 0 : index
    %106 = vector.load %arg8[%c1_142, %c1_143, %c0_144] : memref<18x18x8xf32, #tpu.memory_space<vmem>>, vector<16x16x8xf32>
    %107 = vector.shape_cast %106 : vector<16x16x8xf32> to vector<256x8xf32>
    %c0_145 = arith.constant 0 : index
    %c32_146 = arith.constant 32 : index
    %108 = vector.load %arg9[%c0_145, %c32_146] : memref<256x72xf32, #tpu.memory_space<vmem>>, vector<256x8xf32>
    tpu.vector_store %arg9[%c0_145, %c32_146], %107 {strides = array<i32>} : memref<256x72xf32, #tpu.memory_space<vmem>>, vector<256x8xf32>,
    %c1_147 = arith.constant 1 : index
    %c2_148 = arith.constant 2 : index
    %c0_149 = arith.constant 0 : index
    %109 = vector.load %arg8[%c1_147, %c2_148, %c0_149] : memref<18x18x8xf32, #tpu.memory_space<vmem>>, vector<16x16x8xf32>
    %110 = vector.shape_cast %109 : vector<16x16x8xf32> to vector<256x8xf32>
    %c0_150 = arith.constant 0 : index
    %c40_151 = arith.constant 40 : index
    %111 = vector.load %arg9[%c0_150, %c40_151] : memref<256x72xf32, #tpu.memory_space<vmem>>, vector<256x8xf32>
    tpu.vector_store %arg9[%c0_150, %c40_151], %110 {strides = array<i32>} : memref<256x72xf32, #tpu.memory_space<vmem>>, vector<256x8xf32>,
    %c2_152 = arith.constant 2 : index
    %c0_153 = arith.constant 0 : index
    %c0_154 = arith.constant 0 : index
    %112 = vector.load %arg8[%c2_152, %c0_153, %c0_154] : memref<18x18x8xf32, #tpu.memory_space<vmem>>, vector<16x16x8xf32>
    %113 = vector.shape_cast %112 : vector<16x16x8xf32> to vector<256x8xf32>
    %c0_155 = arith.constant 0 : index
    %c48_156 = arith.constant 48 : index
    %114 = vector.load %arg9[%c0_155, %c48_156] : memref<256x72xf32, #tpu.memory_space<vmem>>, vector<256x8xf32>
    tpu.vector_store %arg9[%c0_155, %c48_156], %113 {strides = array<i32>} : memref<256x72xf32, #tpu.memory_space<vmem>>, vector<256x8xf32>,
    %c2_157 = arith.constant 2 : index
    %c1_158 = arith.constant 1 : index
    %c0_159 = arith.constant 0 : index
    %115 = vector.load %arg8[%c2_157, %c1_158, %c0_159] : memref<18x18x8xf32, #tpu.memory_space<vmem>>, vector<16x16x8xf32>
    %116 = vector.shape_cast %115 : vector<16x16x8xf32> to vector<256x8xf32>
    %c0_160 = arith.constant 0 : index
    %c56_161 = arith.constant 56 : index
    %117 = vector.load %arg9[%c0_160, %c56_161] : memref<256x72xf32, #tpu.memory_space<vmem>>, vector<256x8xf32>
    tpu.vector_store %arg9[%c0_160, %c56_161], %116 {strides = array<i32>} : memref<256x72xf32, #tpu.memory_space<vmem>>, vector<256x8xf32>,
    %c2_162 = arith.constant 2 : index
    %c2_163 = arith.constant 2 : index
    %c0_164 = arith.constant 0 : index
    %118 = vector.load %arg8[%c2_162, %c2_163, %c0_164] : memref<18x18x8xf32, #tpu.memory_space<vmem>>, vector<16x16x8xf32>
    %119 = vector.shape_cast %118 : vector<16x16x8xf32> to vector<256x8xf32>
    %c0_165 = arith.constant 0 : index
    %c64_166 = arith.constant 64 : index
    %120 = vector.load %arg9[%c0_165, %c64_166] : memref<256x72xf32, #tpu.memory_space<vmem>>, vector<256x8xf32>
    tpu.vector_store %arg9[%c0_165, %c64_166], %119 {strides = array<i32>} : memref<256x72xf32, #tpu.memory_space<vmem>>, vector<256x8xf32>,
    %c0_167 = arith.constant 0 : index
    %c0_168 = arith.constant 0 : index
    %121 = vector.load %arg9[%c0_167, %c0_168] : memref<256x72xf32, #tpu.memory_space<vmem>>, vector<256x72xf32>
    %c0_169 = arith.constant 0 : index
    %c0_170 = arith.constant 0 : index
    %122 = vector.load %arg5[%c0_169, %c0_170] : memref<72x4xf32, #tpu.memory_space<vmem>>, vector<72x4xf32>
    %cst_171 = arith.constant dense<0.000000e+00> : vector<256x4xf32>
    %123 = tpu.matmul %121, %122, %cst_171 {dimension_numbers = #tpu.dot_dimension_numbers<[1], [0], [0], [1], [0, 0, 1, 1], [], []>} : vector<256x72xf32>, vector<72x4xf32>, vector<256x4xf32> -> vector<256x4xf32>
    %124 = vector.broadcast %92 : vector<1x4xf32> to vector<256x4xf32>
    %125 = arith.addf %123, %124 : vector<256x4xf32>
    %cst_172 = arith.constant 0.000000e+00 : f32
    %126 = vector.broadcast %cst_172 : f32 to vector<256x4xf32>
    %127 = arith.maximumf %125, %126 : vector<256x4xf32>
    %128 = vector.shape_cast %127 : vector<256x4xf32> to vector<16x16x4xf32>
    %c5 = arith.constant 5 : index
    %c0_173 = arith.constant 0 : index
    %129 = vector.load %arg2[%c5, %c0_173] : memref<6x8xf32, #tpu.memory_space<vmem>>, vector<1x4xf32>
    %c1_174 = arith.constant 1 : index
    %c1_175 = arith.constant 1 : index
    %c0_176 = arith.constant 0 : index
    %130 = vector.load %arg8[%c1_174, %c1_175, %c0_176] : memref<18x18x8xf32, #tpu.memory_space<vmem>>, vector<16x16x4xf32>
    tpu.vector_store %arg8[%c1_174, %c1_175, %c0_176], %128 {strides = array<i32>} : memref<18x18x8xf32, #tpu.memory_space<vmem>>, vector<16x16x4xf32>,
    %c0_177 = arith.constant 0 : index
    %c0_178 = arith.constant 0 : index
    %c0_179 = arith.constant 0 : index
    %131 = vector.load %arg8[%c0_177, %c0_178, %c0_179] : memref<18x18x8xf32, #tpu.memory_space<vmem>>, vector<16x16x4xf32>
    %132 = vector.shape_cast %131 : vector<16x16x4xf32> to vector<256x4xf32>
    %c0_180 = arith.constant 0 : index
    %c0_181 = arith.constant 0 : index
    %133 = vector.load %arg9[%c0_180, %c0_181] : memref<256x72xf32, #tpu.memory_space<vmem>>, vector<256x4xf32>
    tpu.vector_store %arg9[%c0_180, %c0_181], %132 {strides = array<i32>} : memref<256x72xf32, #tpu.memory_space<vmem>>, vector<256x4xf32>,
    %c0_182 = arith.constant 0 : index
    %c1_183 = arith.constant 1 : index
    %c0_184 = arith.constant 0 : index
    %134 = vector.load %arg8[%c0_182, %c1_183, %c0_184] : memref<18x18x8xf32, #tpu.memory_space<vmem>>, vector<16x16x4xf32>
    %135 = vector.shape_cast %134 : vector<16x16x4xf32> to vector<256x4xf32>
    %c0_185 = arith.constant 0 : index
    %c4_186 = arith.constant 4 : index
    %136 = vector.load %arg9[%c0_185, %c4_186] : memref<256x72xf32, #tpu.memory_space<vmem>>, vector<256x4xf32>
    tpu.vector_store %arg9[%c0_185, %c4_186], %135 {strides = array<i32>} : memref<256x72xf32, #tpu.memory_space<vmem>>, vector<256x4xf32>,
    %c0_187 = arith.constant 0 : index
    %c2_188 = arith.constant 2 : index
    %c0_189 = arith.constant 0 : index
    %137 = vector.load %arg8[%c0_187, %c2_188, %c0_189] : memref<18x18x8xf32, #tpu.memory_space<vmem>>, vector<16x16x4xf32>
    %138 = vector.shape_cast %137 : vector<16x16x4xf32> to vector<256x4xf32>
    %c0_190 = arith.constant 0 : index
    %c8_191 = arith.constant 8 : index
    %139 = vector.load %arg9[%c0_190, %c8_191] : memref<256x72xf32, #tpu.memory_space<vmem>>, vector<256x4xf32>
    tpu.vector_store %arg9[%c0_190, %c8_191], %138 {strides = array<i32>} : memref<256x72xf32, #tpu.memory_space<vmem>>, vector<256x4xf32>,
    %c1_192 = arith.constant 1 : index
    %c0_193 = arith.constant 0 : index
    %c0_194 = arith.constant 0 : index
    %140 = vector.load %arg8[%c1_192, %c0_193, %c0_194] : memref<18x18x8xf32, #tpu.memory_space<vmem>>, vector<16x16x4xf32>
    %141 = vector.shape_cast %140 : vector<16x16x4xf32> to vector<256x4xf32>
    %c0_195 = arith.constant 0 : index
    %c12_196 = arith.constant 12 : index
    %142 = vector.load %arg9[%c0_195, %c12_196] : memref<256x72xf32, #tpu.memory_space<vmem>>, vector<256x4xf32>
    tpu.vector_store %arg9[%c0_195, %c12_196], %141 {strides = array<i32>} : memref<256x72xf32, #tpu.memory_space<vmem>>, vector<256x4xf32>,
    %c1_197 = arith.constant 1 : index
    %c1_198 = arith.constant 1 : index
    %c0_199 = arith.constant 0 : index
    %143 = vector.load %arg8[%c1_197, %c1_198, %c0_199] : memref<18x18x8xf32, #tpu.memory_space<vmem>>, vector<16x16x4xf32>
    %144 = vector.shape_cast %143 : vector<16x16x4xf32> to vector<256x4xf32>
    %c0_200 = arith.constant 0 : index
    %c16_201 = arith.constant 16 : index
    %145 = vector.load %arg9[%c0_200, %c16_201] : memref<256x72xf32, #tpu.memory_space<vmem>>, vector<256x4xf32>
    tpu.vector_store %arg9[%c0_200, %c16_201], %144 {strides = array<i32>} : memref<256x72xf32, #tpu.memory_space<vmem>>, vector<256x4xf32>,
    %c1_202 = arith.constant 1 : index
    %c2_203 = arith.constant 2 : index
    %c0_204 = arith.constant 0 : index
    %146 = vector.load %arg8[%c1_202, %c2_203, %c0_204] : memref<18x18x8xf32, #tpu.memory_space<vmem>>, vector<16x16x4xf32>
    %147 = vector.shape_cast %146 : vector<16x16x4xf32> to vector<256x4xf32>
    %c0_205 = arith.constant 0 : index
    %c20_206 = arith.constant 20 : index
    %148 = vector.load %arg9[%c0_205, %c20_206] : memref<256x72xf32, #tpu.memory_space<vmem>>, vector<256x4xf32>
    tpu.vector_store %arg9[%c0_205, %c20_206], %147 {strides = array<i32>} : memref<256x72xf32, #tpu.memory_space<vmem>>, vector<256x4xf32>,
    %c2_207 = arith.constant 2 : index
    %c0_208 = arith.constant 0 : index
    %c0_209 = arith.constant 0 : index
    %149 = vector.load %arg8[%c2_207, %c0_208, %c0_209] : memref<18x18x8xf32, #tpu.memory_space<vmem>>, vector<16x16x4xf32>
    %150 = vector.shape_cast %149 : vector<16x16x4xf32> to vector<256x4xf32>
    %c0_210 = arith.constant 0 : index
    %c24_211 = arith.constant 24 : index
    %151 = vector.load %arg9[%c0_210, %c24_211] : memref<256x72xf32, #tpu.memory_space<vmem>>, vector<256x4xf32>
    tpu.vector_store %arg9[%c0_210, %c24_211], %150 {strides = array<i32>} : memref<256x72xf32, #tpu.memory_space<vmem>>, vector<256x4xf32>,
    %c2_212 = arith.constant 2 : index
    %c1_213 = arith.constant 1 : index
    %c0_214 = arith.constant 0 : index
    %152 = vector.load %arg8[%c2_212, %c1_213, %c0_214] : memref<18x18x8xf32, #tpu.memory_space<vmem>>, vector<16x16x4xf32>
    %153 = vector.shape_cast %152 : vector<16x16x4xf32> to vector<256x4xf32>
    %c0_215 = arith.constant 0 : index
    %c28_216 = arith.constant 28 : index
    %154 = vector.load %arg9[%c0_215, %c28_216] : memref<256x72xf32, #tpu.memory_space<vmem>>, vector<256x4xf32>
    tpu.vector_store %arg9[%c0_215, %c28_216], %153 {strides = array<i32>} : memref<256x72xf32, #tpu.memory_space<vmem>>, vector<256x4xf32>,
    %c2_217 = arith.constant 2 : index
    %c2_218 = arith.constant 2 : index
    %c0_219 = arith.constant 0 : index
    %155 = vector.load %arg8[%c2_217, %c2_218, %c0_219] : memref<18x18x8xf32, #tpu.memory_space<vmem>>, vector<16x16x4xf32>
    %156 = vector.shape_cast %155 : vector<16x16x4xf32> to vector<256x4xf32>
    %c0_220 = arith.constant 0 : index
    %c32_221 = arith.constant 32 : index
    %157 = vector.load %arg9[%c0_220, %c32_221] : memref<256x72xf32, #tpu.memory_space<vmem>>, vector<256x4xf32>
    tpu.vector_store %arg9[%c0_220, %c32_221], %156 {strides = array<i32>} : memref<256x72xf32, #tpu.memory_space<vmem>>, vector<256x4xf32>,
    %c0_222 = arith.constant 0 : index
    %c0_223 = arith.constant 0 : index
    %158 = vector.load %arg9[%c0_222, %c0_223] : memref<256x72xf32, #tpu.memory_space<vmem>>, vector<256x36xf32>
    %c0_224 = arith.constant 0 : index
    %c0_225 = arith.constant 0 : index
    %159 = vector.load %arg6[%c0_224, %c0_225] : memref<36x4xf32, #tpu.memory_space<vmem>>, vector<36x4xf32>
    %cst_226 = arith.constant dense<0.000000e+00> : vector<256x4xf32>
    %160 = tpu.matmul %158, %159, %cst_226 {dimension_numbers = #tpu.dot_dimension_numbers<[1], [0], [0], [1], [0, 0, 1, 1], [], []>} : vector<256x36xf32>, vector<36x4xf32>, vector<256x4xf32> -> vector<256x4xf32>
    %161 = vector.broadcast %129 : vector<1x4xf32> to vector<256x4xf32>
    %162 = arith.addf %160, %161 : vector<256x4xf32>
    %163 = vector.shape_cast %162 : vector<256x4xf32> to vector<16x16x4xf32>
    %c0_227 = arith.constant 0 : index
    %c0_228 = arith.constant 0 : index
    %c0_229 = arith.constant 0 : index
    %c0_230 = arith.constant 0 : index
    %164 = vector.load %arg7[%c0_227, %c0_228, %c0_229, %c0_230] : memref<1x16x16x4xf32, #tpu.memory_space<vmem>>, vector<1x16x16x4xf32>
    %165 = vector.shape_cast %164 : vector<1x16x16x4xf32> to vector<16x16x4xf32>
    %166 = vector.shape_cast %163 : vector<16x16x4xf32> to vector<1x16x16x4xf32>
    tpu.vector_store %arg7[%c0_227, %c0_228, %c0_229, %c0_230], %166 {strides = array<i32>} : memref<1x16x16x4xf32, #tpu.memory_space<vmem>>, vector<1x16x16x4xf32>,
    return
  }
  func.func @transform_0(%arg0: i32) -> (i32, i32, i32, i32) {
    %c0_i32 = arith.constant 0 : i32
    %c0_i32_0 = arith.constant 0 : i32
    %c0_i32_1 = arith.constant 0 : i32
    %c0_i32_2 = arith.constant 0 : i32
    return %arg0, %c0_i32, %c0_i32_0, %c0_i32_1 : i32, i32, i32, i32
  }
  func.func @transform_1(%arg0: i32) -> (i32, i32) {
    %c0_i32 = arith.constant 0 : i32
    %c0_i32_0 = arith.constant 0 : i32
    %c0_i32_1 = arith.constant 0 : i32
    return %c0_i32, %c0_i32_0 : i32, i32
  }
  func.func @transform_2(%arg0: i32) -> (i32, i32) {
    %c0_i32 = arith.constant 0 : i32
    %c0_i32_0 = arith.constant 0 : i32
    %c0_i32_1 = arith.constant 0 : i32
    return %c0_i32, %c0_i32_0 : i32, i32
  }
  func.func @transform_3(%arg0: i32) -> (i32, i32) {
    %c0_i32 = arith.constant 0 : i32
    %c0_i32_0 = arith.constant 0 : i32
    %c0_i32_1 = arith.constant 0 : i32
    return %c0_i32, %c0_i32_0 : i32, i32
  }
  func.func @transform_4(%arg0: i32) -> (i32, i32) {
    %c0_i32 = arith.constant 0 : i32
    %c0_i32_0 = arith.constant 0 : i32
    %c0_i32_1 = arith.constant 0 : i32
    return %c0_i32, %c0_i32_0 : i32, i32
  }
  func.func @transform_5(%arg0: i32) -> (i32, i32) {
    %c0_i32 = arith.constant 0 : i32
    %c0_i32_0 = arith.constant 0 : i32
    %c0_i32_1 = arith.constant 0 : i32
    return %c0_i32, %c0_i32_0 : i32, i32
  }
  func.func @transform_6(%arg0: i32) -> (i32, i32, i32, i32) {
    %c0_i32 = arith.constant 0 : i32
    %c0_i32_0 = arith.constant 0 : i32
    %c0_i32_1 = arith.constant 0 : i32
    %c0_i32_2 = arith.constant 0 : i32
    return %arg0, %c0_i32, %c0_i32_0, %c0_i32_1 : i32, i32, i32, i32
  }
}

</mosaic_0001>

<bundles_post_ra>
// kernel: tpu_custom_call.1
= control target key start
LH: loop header
LB: loop body
LE: loop exit
PB: predicated region body
PF: predicated region fallthrough
CT: control target
= control target key end

     0   :  { %s8395_s21 = smov 0   ;;  %s12768_s0 = inlined_call_operand.vmem [shape: f32[2,16,16,4], index: 0, kind: input, shape index: {}]   ;;  %s12769_s1 = inlined_call_operand.vmem [shape: f32[6,8], index: 1, kind: input, shape index: {}]   ;;  %s12770_s2 = inlined_call_operand.vmem [shape: f32[36,8], index: 2, kind: input, shape index: {}]   ;;  %s12771_s3 = inlined_call_operand.vmem [shape: f32[72,8], index: 3, kind: input, shape index: {}]   ;;  %s12772_s4 = inlined_call_operand.vmem [shape: f32[72,4], index: 4, kind: input, shape index: {}]   ;;  %s12773_s5 = inlined_call_operand.vmem [shape: f32[36,4], index: 5, kind: input, shape index: {}]   ;;  %s12774_s6 = inlined_call_operand.vmem [shape: f32[2,16,16,4], index: 6, kind: output, shape index: {}]  }
   0x1 LB: > { %s8169_s22 = sadd.s32 4294967295, %s8345_s21   ;;  %p8173_p0 = scmp.ge.s32.totalorder %s8345_s21, 1  ;;  %s8345_s21 = sphi %s8395_s21, %s16_s21  }
   0x2   : > { %p212_p1 = scmp.lt.s32.totalorder %s8345_s21, 3 }
   0x4   : > { %p213_p2 = pnand %p8173_p0, %p212_p1 }
   0x6   : > { %216 = sbr.rel (%p213_p2) target bundleno = 3963 (0xf7b), region = 44 }
   0xb   : > { %vm252_vm0 = vcmask 64512   ;;  %p242_p3 = scmp.lt.s32.totalorder %s8169_s22, 1  ;;  %v8347_v0 = vmov 0.0   ;;  %vm255_vm1 = vcmask 58368   ;;  %v8412_v1 = vld [vmem:[%s12769_s1] ss:$0 sm:$0xff] }
   0xc   : > { %253 = vst.msk [vmem:[#allocation2] sm:$0xff] %vm252_vm0, %v8347_v0  ;;  %v8430_v2 = vld [vmem:[%s12769_s1 + $0x1] ss:$0 sm:$0xff]  ;;  %vm432_vm2 = vcmask 31744   ;;  %s8348_s7 = smov 4   ;;  %vm261_vm3 = vcmask 57344  }
   0xd   : > { %254 = vst.msk [vmem:[#allocation2 + $0x8] sm:$0xff] %vm252_vm0, %v8347_v0  ;;  %s13143_s22 = smov (!%p242_p3, %s8169_s22), 1  ;;  %s8349_s8 = smov 8   ;;  %vm689_vm4 = vcmask 64544   ;;  %vm882_vm5 = vcmask 97344   ;;  %vm1075_vm6 = vcmask 130144  }
   0xe   : > { %258 = vst.msk [vmem:[#allocation2 + $0x198] sm:$0xff] %vm252_vm0, %v8347_v0  ;;  %s8310_s25 = sshll.u32 %s13143_s22, 8  ;;  %s8350_s9 = smov 12   ;;  %vm1268_vm7 = vcmask 162944   ;;  %vm12817_vm8 = vcmask 195744   ;;  %vm12816_vm9 = vcmask 228544  }
   0xf   : > { %259 = vst.msk [vmem:[#allocation2 + $0x1a0] sm:$0xff] %vm252_vm0, %v8347_v0  ;;  %s8425_s28 = scalar_lea.vmem %s12768_s0, %s8310_s25  ;;  %s8351_s10 = smov 16   ;;  %vm12815_vm10 = vcmask 261344   ;;  %vm2209_vm11 = vcmask 1043456   ;;  %vm12814_vm12 = vcmask 294144   ;;  %vm12813_vm13 = vcmask 293888  }
  0x10   : > { %256 = vst.msk [vmem:[#allocation2 + $0x10] sm:$0x3] %vm255_vm1, %v8347_v0  ;;  %v298_v3 = vld [vmem:[%s8425_s28] sm:$0xff]  ;;  %v299_v5 = vld [vmem:[%s8425_s28 + $0x8] sm:$0xff]  ;;  %v305_v9 = vld [vmem:[%s8425_s28 + $0x38] sm:$0xff]  ;;  %s8352_s11 = smov 20   ;;  %s12518_s26 = scalar_lea.vmem %s12774_s6, %s8310_s25 }
  0x11   : > { %260 = vst.msk [vmem:[#allocation2 + $0x1a8] sm:$0x3] %vm255_vm1, %v8347_v0  ;;  %v302_v4 = vld [vmem:[%s8425_s28 + $0x20] sm:$0xff]  ;;  %v332_v6 = vmul.f32 %v8412_v1, %v298_v3  ;;  %v333_v8 = vmul.f32 %v8412_v1, %v299_v5  ;;  %v300_v10 = vld [vmem:[%s8425_s28 + $0x10] sm:$0xff]  ;;  %v303_v11 = vld [vmem:[%s8425_s28 + $0x28] sm:$0xff]  ;;  %v339_v12 = vmul.f32 %v8412_v1, %v305_v9  ;;  %s8353_s12 = smov 24  }
  0x12   : > { %v336_v7 = vmul.f32 %v8412_v1, %v302_v4  ;;  %v334_v13 = vmul.f32 %v8412_v1, %v300_v10  ;;  %v337_v14 = vmul.f32 %v8412_v1, %v303_v11  ;;  %v308_v15 = vld [vmem:[%s8425_s28 + $0x50] sm:$0xff]  ;;  %v301_v16 = vld [vmem:[%s8425_s28 + $0x18] sm:$0xff]  ;;  %v306_v26 = vld [vmem:[%s8425_s28 + $0x40] sm:$0xff]  ;;  %280 = vst.msk [vmem:[#allocation2 + $0x11] sm:$0x1] %vm261_vm3, %v8347_v0  ;;  %s8354_s13 = smov 28  }
  0x13   : > { %v366_v18 = vadd.f32 %v8430_v2, %v332_v6  ;;  %v367_v20 = vadd.f32 %v8430_v2, %v333_v8  ;;  %v342_v21 = vmul.f32 %v8412_v1, %v308_v15  ;;  %v373_v22 = vadd.f32 %v8430_v2, %v339_v12  ;;  %v311_v27 = vld [vmem:[%s8425_s28 + $0x68] sm:$0xff]  ;;  %v304_v28 = vld [vmem:[%s8425_s28 + $0x30] sm:$0xff]  ;;  %v309_v33 = vld [vmem:[%s8425_s28 + $0x58] sm:$0xff]  ;;  %262 = vst.msk [vmem:[#allocation2] sm:$0x1] %vm261_vm3, %v8347_v0  ;;  %s8355_s14 = smov 32  }
  0x14   : > { %v529_v17 = vld [vmem:[#allocation2 + $0x1] sm:$0xff]  ;;  %v370_v19 = vadd.f32 %v8430_v2, %v336_v7  ;;  %v368_v23 = vadd.f32 %v8430_v2, %v334_v13  ;;  %v371_v24 = vadd.f32 %v8430_v2, %v337_v14  ;;  %v335_v25 = vmul.f32 %v8412_v1, %v301_v16  ;;  %v312_v51 = vld [vmem:[%s8425_s28 + $0x70] sm:$0xff]  ;;  %v317_v61 = vld [vmem:[%s8425_s28 + $0x98] sm:$0xff]  ;;  %263 = vst.msk [vmem:[#allocation2 + $0x18] sm:$0x1] %vm261_vm3, %v8347_v0  ;;  %s8356_s30 = smov 40  }
  0x15   : > { %593 = vrot.lane.b32.xlu0 %v529_v17, %s8348_s7  ;;  %v398_v29 = vmax.f32 %v366_v18, 0.0  ;;  %v399_v31 = vmax.f32 %v367_v20, 0.0  ;;  %v376_v32 = vadd.f32 %v8430_v2, %v342_v21  ;;  %v314_v34 = vld [vmem:[%s8425_s28 + $0x80] sm:$0xff]  ;;  %v307_v35 = vld [vmem:[%s8425_s28 + $0x48] sm:$0xff]  ;;  %v405_v36 = vmax.f32 %v373_v22, 0.0  ;;  %v313_v20 = vld [vmem:[%s8425_s28 + $0x78] sm:$0xff] }
  0x16   : > { %v402_v30 = vmax.f32 %v370_v19, 0.0  ;;  %v369_v37 = vadd.f32 %v8430_v2, %v335_v25  ;;  %v400_v38 = vmax.f32 %v368_v23, 0.0  ;;  %v340_v39 = vmul.f32 %v8412_v1, %v306_v26  ;;  %v310_v62 = vld [vmem:[%s8425_s28 + $0x60] sm:$0xff]  ;;  %v315_v12 = vld [vmem:[%s8425_s28 + $0x88] sm:$0xff]  ;;  %v320_v19 = vld [vmem:[%s8425_s28 + $0xb0] sm:$0xff]  ;;  %s8357_s15 = smov 48  }
  0x17   : > { %433 = vst.msk [vmem:[#allocation2 + $0x19] sm:$0xff] %vm432_vm2, %v398_v29  ;;  %v345_v40 = vmul.f32 %v8412_v1, %v311_v27  ;;  %v338_v41 = vmul.f32 %v8412_v1, %v304_v28  ;;  %v403_v42 = vmax.f32 %v371_v24, 0.0  ;;  %v343_v43 = vmul.f32 %v8412_v1, %v309_v33  ;;  %v530_v46 = vld [vmem:[#allocation2 + $0x9] sm:$0xff]  ;;  %v318_v28 = vld [vmem:[%s8425_s28 + $0xa0] sm:$0xff]  ;;  %s8358_s16 = smov 56   ;;  %s8359_s17 = smov 64  }
  0x18   : > { %437 = vst.msk [vmem:[#allocation2 + $0x49] sm:$0xff] %vm432_vm2, %v402_v30  ;;  %v348_v44 = vmul.f32 %v8412_v1, %v314_v34  ;;  %v341_v45 = vmul.f32 %v8412_v1, %v307_v35  ;;  %v408_v47 = vmax.f32 %v376_v32, 0.0  ;;  %v374_v48 = vadd.f32 %v8430_v2, %v340_v39  ;;  %v323_v34 = vld [vmem:[%s8425_s28 + $0xc8] sm:$0xff]  ;;  %v316_v35 = vld [vmem:[%s8425_s28 + $0x90] sm:$0xff] }
  0x19   : > { %434 = vst.msk [vmem:[#allocation2 + $0x21] sm:$0xff] %vm432_vm2, %v399_v31  ;;  %v379_v49 = vadd.f32 %v8430_v2, %v345_v40  ;;  %v372_v50 = vadd.f32 %v8430_v2, %v338_v41  ;;  %v401_v52 = vmax.f32 %v369_v37, 0.0  ;;  %v377_v53 = vadd.f32 %v8430_v2, %v343_v43  ;;  %v321_v43 = vld [vmem:[%s8425_s28 + $0xb8] sm:$0xff] }
  0x1a   : > { %440 = vst.msk [vmem:[#allocation2 + $0x69] sm:$0xff] %vm432_vm2, %v405_v36  ;;  %v346_v54 = vmul.f32 %v8412_v1, %v312_v51  ;;  %v406_v55 = vmax.f32 %v374_v48, 0.0  ;;  %v382_v56 = vadd.f32 %v8430_v2, %v348_v44  ;;  %v375_v58 = vadd.f32 %v8430_v2, %v341_v45 }
  0x1b   : > { %435 = vst.msk [vmem:[#allocation2 + $0x31] sm:$0xff] %vm432_vm2, %v400_v38  ;;  %v411_v57 = vmax.f32 %v379_v49, 0.0  ;;  %v404_v59 = vmax.f32 %v372_v50, 0.0  ;;  %v409_v3 = vmax.f32 %v377_v53, 0.0  ;;  %v351_v4 = vmul.f32 %v8412_v1, %v317_v61  ;;  %v326_v49 = vld [vmem:[%s8425_s28 + $0xe0] sm:$0xff]  ;;  %v319_v50 = vld [vmem:[%s8425_s28 + $0xa8] sm:$0xff] }
  0x1c   : > { %438 = vst.msk [vmem:[#allocation2 + $0x51] sm:$0xff] %vm432_vm2, %v403_v42  ;;  %v380_v60 = vadd.f32 %v8430_v2, %v346_v54  ;;  %v344_v5 = vmul.f32 %v8412_v1, %v310_v62  ;;  %v414_v6 = vmax.f32 %v382_v56, 0.0  ;;  %v407_v7 = vmax.f32 %v375_v58, 0.0  ;;  %v324_v58 = vld [vmem:[%s8425_s28 + $0xd0] sm:$0xff] }
  0x1d   : > { %595 = vrot.lane.b32.xlu0 %v530_v46, %s8348_s7  ;;  %443 = vst.msk [vmem:[#allocation2 + $0x91] sm:$0xff] %vm432_vm2, %v408_v47  ;;  %v385_v8 = vadd.f32 %v8430_v2, %v351_v4  ;;  %v349_v15 = vmul.f32 %v8412_v1, %v315_v12  ;;  %v354_v22 = vmul.f32 %v8412_v1, %v320_v19  ;;  %vm2615_vm14 = vcmask 130112  }
  0x1e   : > { %v531_v63 = vld [vmem:[#allocation2 + $0x19] sm:$0xff]  ;;  %436 = vst.msk [vmem:[#allocation2 + $0x39] sm:$0xff] %vm432_vm2, %v401_v52  ;;  %v378_v9 = vadd.f32 %v8430_v2, %v344_v5  ;;  %v412_v11 = vmax.f32 %v380_v60, 0.0  ;;  %v347_v23 = vmul.f32 %v8412_v1, %v313_v20  ;;  %v352_v31 = vmul.f32 %v8412_v1, %v318_v28 }
  0x1f   : > { %597 = vrot.lane.b32.xlu1 %v531_v63, %s8348_s7  ;;  %441 = vst.msk [vmem:[#allocation2 + $0x79] sm:$0xff] %vm432_vm2, %v406_v55  ;;  %v535_v10 = vld [vmem:[#allocation2 + $0x49] sm:$0xff]  ;;  %v417_v14 = vmax.f32 %v385_v8, 0.0  ;;  %v383_v18 = vadd.f32 %v8430_v2, %v349_v15  ;;  %v388_v25 = vadd.f32 %v8430_v2, %v354_v22  ;;  %v357_v37 = vmul.f32 %v8412_v1, %v323_v34  ;;  %v322_v15 = vld [vmem:[%s8425_s28 + $0xc0] sm:$0xff] }
  0x20   : > { %446 = vst.msk [vmem:[#allocation2 + $0xb1] sm:$0xff] %vm432_vm2, %v411_v57  ;;  %v410_v16 = vmax.f32 %v378_v9, 0.0  ;;  %v532_v17 = vld [vmem:[#allocation2 + $0x21] sm:$0xff]  ;;  %v381_v26 = vadd.f32 %v8430_v2, %v347_v23  ;;  %v386_v33 = vadd.f32 %v8430_v2, %v352_v31  ;;  %v350_v38 = vmul.f32 %v8412_v1, %v316_v35 }
  0x21   : > { %439 = vst.msk [vmem:[#allocation2 + $0x61] sm:$0xff] %vm432_vm2, %v404_v59  ;;  %v415_v21 = vmax.f32 %v383_v18, 0.0  ;;  %v538_v27 = vld [vmem:[#allocation2 + $0x69] sm:$0xff]  ;;  %v420_v29 = vmax.f32 %v388_v25, 0.0  ;;  %v391_v40 = vadd.f32 %v8430_v2, %v357_v37  ;;  %v355_v46 = vmul.f32 %v8412_v1, %v321_v43  ;;  %v465_v31 = vld [vmem:[#allocation2] sm:$0xff] }
  0x22   : > { %v533_v13 = vld [vmem:[#allocation2 + $0x31] sm:$0xff]  ;;  %444 = vst.msk [vmem:[#allocation2 + $0x99] sm:$0xff] %vm432_vm2, %v409_v3  ;;  %v413_v30 = vmax.f32 %v381_v26, 0.0  ;;  %v418_v36 = vmax.f32 %v386_v33, 0.0  ;;  %v384_v41 = vadd.f32 %v8430_v2, %v350_v38  ;;  %v360_v52 = vmul.f32 %v8412_v1, %v326_v49  ;;  %v466_v35 = vld [vmem:[#allocation2 + $0x8] sm:$0xff] }
  0x23   : > { %601 = vrot.lane.b32.xlu2 %v533_v13, %s8348_s7  ;;  %449 = vst.msk [vmem:[#allocation2 + $0xd9] sm:$0xff] %vm432_vm2, %v414_v6  ;;  %v536_v32 = vld [vmem:[#allocation2 + $0x51] sm:$0xff]  ;;  %v423_v44 = vmax.f32 %v391_v40, 0.0  ;;  %v389_v48 = vadd.f32 %v8430_v2, %v355_v46  ;;  %v353_v53 = vmul.f32 %v8412_v1, %v319_v50  ;;  %v358_v61 = vmul.f32 %v8412_v1, %v324_v58  ;;  %v722_v46 = vld [vmem:[#allocation2 + $0x2] sm:$0xff] }
  0x24   : > { %442 = vst.msk [vmem:[#allocation2 + $0x81] sm:$0xff] %vm432_vm2, %v407_v7  ;;  %v541_v42 = vld [vmem:[#allocation2 + $0x91] sm:$0xff]  ;;  %v416_v45 = vmax.f32 %v384_v41, 0.0  ;;  %v394_v55 = vadd.f32 %v8430_v2, %v360_v52  ;;  %v356_v19 = vmul.f32 %v8412_v1, %v322_v15  ;;  %v8713_v41 = vld [vmem:[#allocation2 + $0x1a] sm:$0xff]  ;;  %vm2808_vm15 = vcmask 195712  }
  0x25   : > { %605 = vrot.lane.b32.xlu0 %v535_v10, %s8348_s7  ;;  %447 = vst.msk [vmem:[#allocation2 + $0xc1] sm:$0xff] %vm432_vm2, %v412_v11  ;;  %v8514_v24 = vld [vmem:[#allocation2 + $0x39] sm:$0xff]  ;;  %v421_v51 = vmax.f32 %v389_v48, 0.0  ;;  %v387_v56 = vadd.f32 %v8430_v2, %v353_v53  ;;  %v392_v63 = vadd.f32 %v8430_v2, %v358_v61  ;;  %v8749_v52 = vld [vmem:[#allocation2 + $0x50] sm:$0xff]  ;;  %vm3001_vm1 = vcmask 261312  }
  0x26   : > { %452 = vst.msk [vmem:[#allocation2 + $0xf9] sm:$0xff] %vm432_vm2, %v417_v14  ;;  %v539_v47 = vld [vmem:[#allocation2 + $0x79] sm:$0xff]  ;;  %v426_v59 = vmax.f32 %v394_v55, 0.0  ;;  %v390_v22 = vadd.f32 %v8430_v2, %v356_v19 }
  0x27   : > { %599 = vrot.lane.b32.xlu1 %v532_v17, %s8348_s7  ;;  %445 = vst.msk [vmem:[#allocation2 + $0xa9] sm:$0xff] %vm432_vm2, %v410_v16  ;;  %v544_v57 = vld [vmem:[#allocation2 + $0xb1] sm:$0xff]  ;;  %v419_v60 = vmax.f32 %v387_v56, 0.0  ;;  %v424_v3 = vmax.f32 %v392_v63, 0.0  ;;  %v327_v16 = vld [vmem:[%s8425_s28 + $0xe8] sm:$0xff] }
  0x28   : > { %450 = vst.msk [vmem:[#allocation2 + $0xe1] sm:$0xff] %vm432_vm2, %v415_v21  ;;  %v8532_v39 = vld [vmem:[#allocation2 + $0x61] sm:$0xff]  ;;  %v325_v17 = vld [vmem:[%s8425_s28 + $0xd8] sm:$0xff]  ;;  %v361_v20 = vmul.f32 %v8412_v1, %v327_v16  ;;  %v422_v28 = vmax.f32 %v390_v22, 0.0 }
  0x29   : > { %455 = vst.msk [vmem:[#allocation2 + $0x121] sm:$0xff] %vm432_vm2, %v420_v29  ;;  %v542_v62 = vld [vmem:[#allocation2 + $0x99] sm:$0xff]  ;;  %v359_v21 = vmul.f32 %v8412_v1, %v325_v17  ;;  %v8739_v49 = vld [vmem:[#allocation2 + $0x68] sm:$0xff] }
  0x2a   : > { %448 = vst.msk [vmem:[#allocation2 + $0xc9] sm:$0xff] %vm432_vm2, %v413_v30  ;;  %v547_v5 = vld [vmem:[#allocation2 + $0xd9] sm:$0xff]  ;;  %v395_v25 = vadd.f32 %v8430_v2, %v361_v20 }
  0x2b   : > { %603 = vrot.lane.b32.xlu2 %v8514_v24, %s8348_s7  ;;  %453 = vst.msk [vmem:[#allocation2 + $0x109] sm:$0xff] %vm432_vm2, %v418_v36  ;;  %v8550_v54 = vld [vmem:[#allocation2 + $0x81] sm:$0xff]  ;;  %v393_v26 = vadd.f32 %v8430_v2, %v359_v21  ;;  %v8696_v36 = vld [vmem:[#allocation2 + $0x38] sm:$0xff] }
  0x2c   : > { %458 = vst.msk [vmem:[#allocation2 + $0x141] sm:$0xff] %vm432_vm2, %v423_v44  ;;  %v545_v6 = vld [vmem:[#allocation2 + $0xc1] sm:$0xff]  ;;  %v427_v29 = vmax.f32 %v395_v25, 0.0  ;;  %v8700_v37 = vld [vmem:[#allocation2 + $0x32] sm:$0xff] }
  0x2d   : > { %611 = vrot.lane.b32.xlu0 %v538_v27, %s8348_s7  ;;  %451 = vst.msk [vmem:[#allocation2 + $0xf1] sm:$0xff] %vm432_vm2, %v416_v45  ;;  %v550_v8 = vld [vmem:[#allocation2 + $0xf9] sm:$0xff]  ;;  %v425_v30 = vmax.f32 %v393_v26, 0.0 }
  0x2e   : > { %456 = vst.msk [vmem:[#allocation2 + $0x129] sm:$0xff] %vm432_vm2, %v421_v51  ;;  %v8564_v4 = vld [vmem:[#allocation2 + $0xa9] sm:$0xff]  ;;  %v8703_v38 = vld [vmem:[#allocation2 + $0x18] sm:$0xff]  ;;  %v8727_v45 = vld [vmem:[#allocation2 + $0x20] sm:$0xff] }
  0x2f   : > { %607 = vrot.lane.b32.xlu1 %v536_v32, %s8348_s7  ;;  %461 = vst.msk [vmem:[#allocation2 + $0x169] sm:$0xff] %vm432_vm2, %v426_v59  ;;  %v548_v9 = vld [vmem:[#allocation2 + $0xe1] sm:$0xff]  ;;  %v723_v32 = vld [vmem:[#allocation2 + $0xa] sm:$0xff]  ;;  %v8837_v26 = vld [vmem:[#allocation2 + $0x92] sm:$0xff] }
  0x30   : > { %454 = vst.msk [vmem:[#allocation2 + $0x111] sm:$0xff] %vm432_vm2, %v419_v60  ;;  %v553_v11 = vld [vmem:[#allocation2 + $0x121] sm:$0xff]  ;;  %v8812_v17 = vld [vmem:[#allocation2 + $0xaa] sm:$0xff] }
  0x31   : > { %459 = vst.msk [vmem:[#allocation2 + $0x151] sm:$0xff] %vm432_vm2, %v424_v3  ;;  %v8579_v7 = vld [vmem:[#allocation2 + $0xc9] sm:$0xff]  ;;  %v8741_v50 = vld [vmem:[#allocation2 + $0x80] sm:$0xff] }
  0x32   : > { %264 = vst.msk [vmem:[#allocation2 + $0x30] sm:$0x1] %vm261_vm3, %v8347_v0  ;;  %v551_v12 = vld [vmem:[#allocation2 + $0x109] sm:$0xff]  ;;  %v8745_v51 = vld [vmem:[#allocation2 + $0x7a] sm:$0xff] }
  0x33   : > { %609 = vrot.lane.b32.xlu2 %v8532_v39, %s8348_s7  ;;  %265 = vst.msk [vmem:[#allocation2 + $0x48] sm:$0x1] %vm261_vm3, %v8347_v0  ;;  %v556_v14 = vld [vmem:[#allocation2 + $0x141] sm:$0xff] }
  0x34   : > { %266 = vst.msk [vmem:[#allocation2 + $0x60] sm:$0x1] %vm261_vm3, %v8347_v0  ;;  %v8601_v10 = vld [vmem:[#allocation2 + $0xf1] sm:$0xff] }
  0x35   : > { %617 = vrot.lane.b32.xlu0 %v541_v42, %s8348_s7  ;;  %267 = vst.msk [vmem:[#allocation2 + $0x78] sm:$0x1] %vm261_vm3, %v8347_v0  ;;  %v8639_v18 = vld [vmem:[#allocation2 + $0x129] sm:$0xff] }
  0x36   : > { %268 = vst.msk [vmem:[#allocation2 + $0x90] sm:$0x1] %vm261_vm3, %v8347_v0  ;;  %v8657_v23 = vld [vmem:[#allocation2 + $0x169] sm:$0xff] }
  0x37   : > { %613 = vrot.lane.b32.xlu1 %v539_v47, %s8348_s7  ;;  %269 = vst.msk [vmem:[#allocation2 + $0xa8] sm:$0x1] %vm261_vm3, %v8347_v0  ;;  %v8623_v13 = vld [vmem:[#allocation2 + $0x111] sm:$0xff] }
  0x38   : > { %270 = vst.msk [vmem:[#allocation2 + $0xc0] sm:$0x1] %vm261_vm3, %v8347_v0  ;;  %v8669_v27 = vld [vmem:[#allocation2 + $0x151] sm:$0xff] }
  0x39   : > { %271 = vst.msk [vmem:[#allocation2 + $0xd8] sm:$0x1] %vm261_vm3, %v8347_v0  ;;  %v8683_v33 = vld [vmem:[#allocation2 + $0x30] sm:$0xff] }
  0x3a   : > { %272 = vst.msk [vmem:[#allocation2 + $0xf0] sm:$0x1] %vm261_vm3, %v8347_v0  ;;  %v8717_v42 = vld [vmem:[#allocation2 + $0x48] sm:$0xff] }
  0x3b   : > { %615 = vrot.lane.b32.xlu2 %v8550_v54, %s8348_s7  ;;  %273 = vst.msk [vmem:[#allocation2 + $0x108] sm:$0x1] %vm261_vm3, %v8347_v0  ;;  %v8719_v43 = vld [vmem:[#allocation2 + $0x60] sm:$0xff] }
  0x3c   : > { %274 = vst.msk [vmem:[#allocation2 + $0x120] sm:$0x1] %vm261_vm3, %v8347_v0  ;;  %v8775_v61 = vld [vmem:[#allocation2 + $0x78] sm:$0xff] }
  0x3d   : > { %623 = vrot.lane.b32.xlu0 %v544_v57, %s8348_s7  ;;  %275 = vst.msk [vmem:[#allocation2 + $0x138] sm:$0x1] %vm261_vm3, %v8347_v0  ;;  %v8759_v57 = vld [vmem:[#allocation2 + $0x62] sm:$0xff]  ;;  %v8765_v58 = vld [vmem:[#allocation2 + $0x90] sm:$0xff] }
  0x3e   : > { %276 = vst.msk [vmem:[#allocation2 + $0x150] sm:$0x1] %vm261_vm3, %v8347_v0  ;;  %v8767_v59 = vld [vmem:[#allocation2 + $0xa8] sm:$0xff] }
  0x3f   : > { %619 = vrot.lane.b32.xlu1 %v542_v62, %s8348_s7  ;;  %277 = vst.msk [vmem:[#allocation2 + $0x168] sm:$0x1] %vm261_vm3, %v8347_v0  ;;  %v8783_v62 = vld [vmem:[#allocation2 + $0x4a] sm:$0xff]  ;;  %v8828_v25 = vld [vmem:[#allocation2 + $0xc0] sm:$0xff] }
  0x40   : > { %278 = vst.msk [vmem:[#allocation2 + $0x180] sm:$0x1] %vm261_vm3, %v8347_v0  ;;  %v8818_v19 = vld [vmem:[#allocation2 + $0xd8] sm:$0xff] }
  0x41   : > { %279 = vst.msk [vmem:[#allocation2 + $0x198] sm:$0x1] %vm261_vm3, %v8347_v0  ;;  %v8820_v20 = vld [vmem:[#allocation2 + $0xf0] sm:$0xff] }
  0x42   : > { %281 = vst.msk [vmem:[#allocation2 + $0x29] sm:$0x1] %vm261_vm3, %v8347_v0 }
  0x43   : > { %621 = vrot.lane.b32.xlu2 %v8564_v4, %s8348_s7  ;;  %282 = vst.msk [vmem:[#allocation2 + $0x41] sm:$0x1] %vm261_vm3, %v8347_v0 }
  0x44   : > { %283 = vst.msk [vmem:[#allocation2 + $0x59] sm:$0x1] %vm261_vm3, %v8347_v0 }
  0x45   : > { %629 = vrot.lane.b32.xlu0 %v547_v5, %s8348_s7  ;;  %284 = vst.msk [vmem:[#allocation2 + $0x71] sm:$0x1] %vm261_vm3, %v8347_v0 }
  0x46   : > { %285 = vst.msk [vmem:[#allocation2 + $0x89] sm:$0x1] %vm261_vm3, %v8347_v0 }
  0x47   : > { %625 = vrot.lane.b32.xlu1 %v545_v6, %s8348_s7  ;;  %286 = vst.msk [vmem:[#allocation2 + $0xa1] sm:$0x1] %vm261_vm3, %v8347_v0  ;;  %v8791_v6 = vld [vmem:[#allocation2 + $0xb0] sm:$0xff] }
  0x48   : > { %287 = vst.msk [vmem:[#allocation2 + $0xb9] sm:$0x1] %vm261_vm3, %v8347_v0 }
  0x49   : > { %288 = vst.msk [vmem:[#allocation2 + $0xd1] sm:$0x1] %vm261_vm3, %v8347_v0  ;;  %v8757_v53 = vld [vmem:[#allocation2 + $0x22] sm:$0xff] }
  0x4a   : > { %289 = vst.msk [vmem:[#allocation2 + $0xe9] sm:$0x1] %vm261_vm3, %v8347_v0  ;;  %v8735_v48 = vld [vmem:[#allocation2 + $0x3a] sm:$0xff] }
  0x4b   : > { %627 = vrot.lane.b32.xlu2 %v8579_v7, %s8348_s7  ;;  %290 = vst.msk [vmem:[#allocation2 + $0x101] sm:$0x1] %vm261_vm3, %v8347_v0  ;;  %v8723_v44 = vld [vmem:[#allocation2 + $0x52] sm:$0xff] }
  0x4c   : > { %291 = vst.msk [vmem:[#allocation2 + $0x119] sm:$0x1] %vm261_vm3, %v8347_v0 }
  0x4d   : > { %635 = vrot.lane.b32.xlu0 %v550_v8, %s8348_s7  ;;  %292 = vst.msk [vmem:[#allocation2 + $0x131] sm:$0x1] %vm261_vm3, %v8347_v0  ;;  %v8785_v5 = vld [vmem:[#allocation2 + $0x82] sm:$0xff] }
  0x4e   : > { %293 = vst.msk [vmem:[#allocation2 + $0x149] sm:$0x1] %vm261_vm3, %v8347_v0  ;;  %v8771_v60 = vld [vmem:[#allocation2 + $0x9a] sm:$0xff]  ;;  %v8793_v8 = vld [vmem:[#allocation2 + $0xc8] sm:$0xff] }
  0x4f   : > { %631 = vrot.lane.b32.xlu1 %v548_v9, %s8348_s7  ;;  %294 = vst.msk [vmem:[#allocation2 + $0x161] sm:$0x1] %vm261_vm3, %v8347_v0 }
  0x50   : > { %295 = vst.msk [vmem:[#allocation2 + $0x179] sm:$0x1] %vm261_vm3, %v8347_v0 }
  0x51   : > { %296 = vst.msk [vmem:[#allocation2 + $0x191] sm:$0x1] %vm261_vm3, %v8347_v0  ;;  %v8824_v22 = vld [vmem:[#allocation2 + $0xe2] sm:$0xff] }
  0x52   : > { %297 = vst.msk [vmem:[#allocation2 + $0x1a9] sm:$0x1] %vm261_vm3, %v8347_v0  ;;  %vm3194_vm3 = vcmask 326912  }
  0x53   : > { %633 = vrot.lane.b32.xlu2 %v8601_v10, %s8348_s7  ;;  %457 = vst.msk [vmem:[#allocation2 + $0x139] sm:$0xff] %vm432_vm2, %v422_v28 }
  0x54   : > { %462 = vst.msk [vmem:[#allocation2 + $0x171] sm:$0xff] %vm432_vm2, %v427_v29 }
  0x55   : > { %641 = vrot.lane.b32.xlu0 %v553_v11, %s8348_s7  ;;  %460 = vst.msk [vmem:[#allocation2 + $0x159] sm:$0xff] %vm432_vm2, %v425_v30  ;;  %v8797_v11 = vld [vmem:[#allocation2 + $0xc2] sm:$0xff]  ;;  %v8839_v30 = vld [vmem:[#allocation2 + $0xca] sm:$0xff] }
  0x56   : > { %497 = vst.msk [vmem:[#allocation3] sm:$0xff] %vm432_vm2, %v465_v31  ;;  %v8845_v31 = vld [vmem:[#allocation2 + $0xf8] sm:$0xff] }
  0x57   : > { %637 = vrot.lane.b32.xlu1 %v551_v12, %s8348_s7  ;;  %501 = vst.msk [vmem:[#allocation3 + $0x20] sm:$0xff] %vm432_vm2, %v8683_v33  ;;  %v8801_v12 = vld [vmem:[#allocation2 + $0x98] sm:$0xff] }
  0x58   : > { %498 = vst.msk [vmem:[#allocation3 + $0x8] sm:$0xff] %vm432_vm2, %v466_v35 }
  0x59   : > { %502 = vst.msk [vmem:[#allocation3 + $0x28] sm:$0xff] %vm432_vm2, %v8696_v36 }
  0x5a   : > { %v8690_v34 = vld [vmem:[#allocation2 + $0x139] sm:$0xff]  ;;  %499 = vst.msk [vmem:[#allocation3 + $0x10] sm:$0xff] %vm432_vm2, %v8703_v38 }
  0x5b   : > { %639 = vrot.lane.b32.xlu2 %v8623_v13, %s8348_s7  ;;  %v8694_v0 = vld [vmem:[#allocation2 + $0x171] sm:$0xff]  ;;  %503 = vst.msk [vmem:[#allocation3 + $0x30] sm:$0xff] %vm432_vm2, %v8717_v42 }
  0x5c   : > { %v8711_v40 = vld [vmem:[#allocation2 + $0x159] sm:$0xff]  ;;  %505 = vst.msk [vmem:[#allocation3 + $0x40] sm:$0xff] %vm432_vm2, %v8719_v43 }
  0x5d   : > { %647 = vrot.lane.b32.xlu0 %v556_v14, %s8348_s7  ;;  %500 = vst.msk [vmem:[#allocation3 + $0x18] sm:$0xff] %vm432_vm2, %v8727_v45  ;;  %v8810_v14 = vld [vmem:[#allocation2 + $0x6a] sm:$0xff] }
  0x5e   : > { %506 = vst.msk [vmem:[#allocation3 + $0x48] sm:$0xff] %vm432_vm2, %v8739_v49 }
  0x5f   : > { %643 = vrot.lane.b32.xlu1 %v8639_v18, %s8348_s7  ;;  %508 = vst.msk [vmem:[#allocation3 + $0x58] sm:$0xff] %vm432_vm2, %v8741_v50 }
  0x60   : > { %504 = vst.msk [vmem:[#allocation3 + $0x38] sm:$0xff] %vm432_vm2, %v8749_v52 }
  0x61   : > { %509 = vst.msk [vmem:[#allocation3 + $0x60] sm:$0xff] %vm432_vm2, %v8765_v58 }
  0x62   : > { %511 = vst.msk [vmem:[#allocation3 + $0x70] sm:$0xff] %vm432_vm2, %v8767_v59 }
  0x63   : > { %645 = vrot.lane.b32.xlu2 %v8690_v34, %s8348_s7  ;;  %507 = vst.msk [vmem:[#allocation3 + $0x50] sm:$0xff] %vm432_vm2, %v8775_v61 }
  0x64   : > { %12856 = vst [vmem:[#allocation4_spill] sm:$0xff] %v8797_v11 }
  0x65   : > { %653 = vrot.lane.b32.xlu0 %v8657_v23, %s8348_s7  ;;  %512 = vst.msk [vmem:[#allocation3 + $0x78] sm:$0xff] %vm432_vm2, %v8791_v6 }
  0x66   : > { %514 = vst.msk [vmem:[#allocation3 + $0x88] sm:$0xff] %vm432_vm2, %v8793_v8 }
  0x67   : > { %649 = vrot.lane.b32.xlu1 %v8669_v27, %s8348_s7  ;;  %510 = vst.msk [vmem:[#allocation3 + $0x68] sm:$0xff] %vm432_vm2, %v8801_v12 }
  0x68   : > { %12857 = vst [vmem:[#allocation5_spill] sm:$0xff] %v8812_v17 }
  0x69   : > { %12858 = vst [vmem:[#allocation6_spill] sm:$0xff] %v8824_v22 }
  0x6a   : > { %515 = vst.msk [vmem:[#allocation3 + $0x90] sm:$0xff] %vm432_vm2, %v8818_v19 }
  0x6b   : > { %651 = vrot.lane.b32.xlu2 %v8711_v40, %s8348_s7  ;;  %517 = vst.msk [vmem:[#allocation3 + $0xa0] sm:$0xff] %vm432_vm2, %v8820_v20 }
  0x6c   : > { %513 = vst.msk [vmem:[#allocation3 + $0x80] sm:$0xff] %vm432_vm2, %v8828_v25 }
  0x6d   : > { %788 = vrot.lane.b32.xlu0 %v723_v32, %s8349_s8  ;;  %12859 = vst [vmem:[#allocation7_spill] sm:$0xff] %v8839_v30  ;;  %v8847_v32 = vld [vmem:[#allocation2 + $0x110] sm:$0xff] }
  0x6e   : > { %518 = vst.msk [vmem:[#allocation3 + $0xa8] sm:$0xff] %vm432_vm2, %v8845_v31 }
  0x6f   : > { %655 = vrot.lane.b32.xlu1 %v8694_v0, %s8348_s7  ;;  %520 = vst.msk [vmem:[#allocation3 + $0xb8] sm:$0xff] %vm432_vm2, %v8847_v32 }
  0x73   : > { %786 = vrot.lane.b32.xlu2 %v722_v46, %s8349_s8  ;;  %v8851_v46 = vld [vmem:[#allocation2 + $0x10a] sm:$0xff] }
  0x74   : > { %12860 = vst [vmem:[#allocation8_spill] sm:$0xff] %v8851_v46 }
  0x75   : > { %794 = vrot.lane.b32.xlu0 %v8700_v37, %s8349_s8 }
  0x77   : > { %790 = vrot.lane.b32.xlu1 %v8713_v41, %s8349_s8 }
  0x7b   : > { %792 = vrot.lane.b32.xlu2 %v8757_v53, %s8349_s8 }
  0x7d   : > { %800 = vrot.lane.b32.xlu0 %v8723_v44, %s8349_s8  ;;  %v602_v47 = vpop.permute.xlu2 %601 }
  0x7e   : > { %694 = vst.msk [vmem:[#allocation3 + $0x20] sm:$0xff] %vm689_vm4, %v602_v47  ;;  %v8855_v47 = vld [vmem:[#allocation2 + $0xe0] sm:$0xff] }
  0x7f   : > { %796 = vrot.lane.b32.xlu1 %v8735_v48, %s8349_s8  ;;  %516 = vst.msk [vmem:[#allocation3 + $0x98] sm:$0xff] %vm432_vm2, %v8855_v47 }
  0x83   : > { %798 = vrot.lane.b32.xlu2 %v8783_v62, %s8349_s8 }
  0x85   : > { %806 = vrot.lane.b32.xlu0 %v8745_v51, %s8349_s8  ;;  %v604_v55 = vpop.permute.xlu2 %603 }
  0x86   : > { %695 = vst.msk [vmem:[#allocation3 + $0x28] sm:$0xff] %vm689_vm4, %v604_v55  ;;  %v8864_v55 = vld [vmem:[#allocation2 + $0xb2] sm:$0xff] }
  0x87   : > { %v594_v56 = vpop.permute.xlu0 %593  ;;  %802 = vrot.lane.b32.xlu1 %v8759_v57, %s8349_s8 }
  0x88   : > { %690 = vst.msk [vmem:[#allocation3] sm:$0xff] %vm689_vm4, %v594_v56 }
  0x8b   : > { %804 = vrot.lane.b32.xlu2 %v8810_v14, %s8349_s8 }
  0x8d   : > { %812 = vrot.lane.b32.xlu0 %v8771_v60, %s8349_s8  ;;  %v610_v63 = vpop.permute.xlu2 %609 }
  0x8e   : > { %698 = vst.msk [vmem:[#allocation3 + $0x40] sm:$0xff] %vm689_vm4, %v610_v63 }
  0x8f   : > { %v596_v3 = vpop.permute.xlu0 %595  ;;  %808 = vrot.lane.b32.xlu1 %v8785_v5, %s8349_s8 }
  0x90   : > { %691 = vst.msk [vmem:[#allocation3 + $0x8] sm:$0xff] %vm689_vm4, %v596_v3  ;;  %v8866_v3 = vld [vmem:[#allocation2 + $0xf2] sm:$0xff] }
  0x91   : > { %v598_v9 = vpop.permute.xlu1 %597  ;;  %12861 = vst [vmem:[#allocation9_spill] sm:$0xff] %v8866_v3 }
  0x92   : > { %692 = vst.msk [vmem:[#allocation3 + $0x10] sm:$0xff] %vm689_vm4, %v598_v9  ;;  %v8872_v9 = vld [vmem:[#allocation2 + $0x120] sm:$0xff] }
  0x93   : > { %810 = vrot.lane.b32.xlu2 %v8837_v26, %s8349_s8  ;;  %521 = vst.msk [vmem:[#allocation3 + $0xc0] sm:$0xff] %vm432_vm2, %v8872_v9 }
  0x95   : > { %818 = vrot.lane.b32.xlu0 %v8797_v11, %s8349_s8  ;;  %v616_v15 = vpop.permute.xlu2 %615  ;;  %v8935_v11 = vld [vmem:[#allocation2 + $0x150] sm:$0xff] }
  0x96   : > { %701 = vst.msk [vmem:[#allocation3 + $0x58] sm:$0xff] %vm689_vm4, %v616_v15  ;;  %v8874_v15 = vld [vmem:[#allocation2 + $0x138] sm:$0xff] }
  0x97   : > { %v606_v16 = vpop.permute.xlu0 %605  ;;  %814 = vrot.lane.b32.xlu1 %v8812_v17, %s8349_s8  ;;  %523 = vst.msk [vmem:[#allocation3 + $0xd0] sm:$0xff] %vm432_vm2, %v8874_v15  ;;  %v8930_v17 = vld [vmem:[#allocation2 + $0x172] sm:$0xff] }
  0x98   : > { %696 = vst.msk [vmem:[#allocation3 + $0x30] sm:$0xff] %vm689_vm4, %v606_v16 }
  0x99   : > { %v600_v21 = vpop.permute.xlu1 %599  ;;  %12867 = vst [vmem:[#allocation15_spill] sm:$0xff] %v8930_v17 }
  0x9a   : > { %693 = vst.msk [vmem:[#allocation3 + $0x18] sm:$0xff] %vm689_vm4, %v600_v21  ;;  %v8878_v21 = vld [vmem:[#allocation2 + $0x12a] sm:$0xff] }
  0x9b   : > { %816 = vrot.lane.b32.xlu2 %v8864_v55, %s8349_s8  ;;  %12862 = vst [vmem:[#allocation10_spill] sm:$0xff] %v8878_v21 }
  0x9c   : > { %525 = vst.msk [vmem:[#allocation3 + $0xe0] sm:$0xff] %vm432_vm2, %v8935_v11 }
  0x9d   : > { %824 = vrot.lane.b32.xlu0 %v8824_v22, %s8349_s8  ;;  %v622_v28 = vpop.permute.xlu2 %621  ;;  %v8920_v22 = vld [vmem:[#allocation2 + $0x13a] sm:$0xff] }
  0x9e   : > { %704 = vst.msk [vmem:[#allocation3 + $0x70] sm:$0xff] %vm689_vm4, %v622_v28  ;;  %v8885_v28 = vld [vmem:[#allocation2 + $0x108] sm:$0xff] }
  0x9f   : > { %v612_v29 = vpop.permute.xlu0 %611  ;;  %820 = vrot.lane.b32.xlu1 %v8839_v30, %s8349_s8  ;;  %519 = vst.msk [vmem:[#allocation3 + $0xb0] sm:$0xff] %vm432_vm2, %v8885_v28 }
  0xa0   : > { %699 = vst.msk [vmem:[#allocation3 + $0x48] sm:$0xff] %vm689_vm4, %v612_v29  ;;  %v8891_v29 = vld [vmem:[#allocation2 + $0xda] sm:$0xff] }
  0xa1   : > { %v608_v35 = vpop.permute.xlu1 %607  ;;  %12866 = vst [vmem:[#allocation14_spill] sm:$0xff] %v8920_v22 }
  0xa2   : > { %697 = vst.msk [vmem:[#allocation3 + $0x38] sm:$0xff] %vm689_vm4, %v608_v35 }
  0xa3   : > { %822 = vrot.lane.b32.xlu2 %v8891_v29, %s8349_s8 }
  0xa5   : > { %830 = vrot.lane.b32.xlu0 %v8851_v46, %s8349_s8  ;;  %v628_v56 = vpop.permute.xlu2 %627  ;;  %v8905_v46 = vld [vmem:[#allocation2 + $0x152] sm:$0xff] }
  0xa6   : > { %707 = vst.msk [vmem:[#allocation3 + $0x88] sm:$0xff] %vm689_vm4, %v628_v56 }
  0xa7   : > { %v618_v63 = vpop.permute.xlu0 %617  ;;  %826 = vrot.lane.b32.xlu1 %v8866_v3, %s8349_s8  ;;  %v8901_v3 = vld [vmem:[#allocation2 + $0x158] sm:$0xff]  ;;  %12864 = vst [vmem:[#allocation12_spill] sm:$0xff] %v8905_v46 }
  0xa8   : > { %702 = vst.msk [vmem:[#allocation3 + $0x60] sm:$0xff] %vm689_vm4, %v618_v63  ;;  %v8893_v63 = vld [vmem:[#allocation2 + $0x112] sm:$0xff] }
  0xa9   : > { %v614_v16 = vpop.permute.xlu1 %613  ;;  %12863 = vst [vmem:[#allocation11_spill] sm:$0xff] %v8893_v63 }
  0xaa   : > { %700 = vst.msk [vmem:[#allocation3 + $0x50] sm:$0xff] %vm689_vm4, %v614_v16  ;;  %v8899_v16 = vld [vmem:[#allocation2 + $0x140] sm:$0xff] }
  0xab   : > { %524 = vst.msk [vmem:[#allocation3 + $0xd8] sm:$0xff] %vm432_vm2, %v8899_v16 }
  0xac   : > { %526 = vst.msk [vmem:[#allocation3 + $0xe8] sm:$0xff] %vm432_vm2, %v8901_v3 }
  0xad   : > { %836 = vrot.lane.b32.xlu0 %v8878_v21, %s8349_s8  ;;  %v634_v35 = vpop.permute.xlu2 %633 }
  0xae   : > { %710 = vst.msk [vmem:[#allocation3 + $0xa0] sm:$0xff] %vm689_vm4, %v634_v35  ;;  %v8912_v35 = vld [vmem:[#allocation2 + $0x128] sm:$0xff] }
  0xaf   : > { %v624_v56 = vpop.permute.xlu0 %623  ;;  %832 = vrot.lane.b32.xlu1 %v8893_v63, %s8349_s8  ;;  %522 = vst.msk [vmem:[#allocation3 + $0xc8] sm:$0xff] %vm432_vm2, %v8912_v35 }
  0xb0   : > { %705 = vst.msk [vmem:[#allocation3 + $0x78] sm:$0xff] %vm689_vm4, %v624_v56  ;;  %v8918_v56 = vld [vmem:[#allocation2 + $0xfa] sm:$0xff] }
  0xb1   : > { %v620_v21 = vpop.permute.xlu1 %619  ;;  %12865 = vst [vmem:[#allocation13_spill] sm:$0xff] %v8918_v56  ;;  %828 = vrot.lane.b32.xlu2 %v8918_v56, %s8349_s8  ;;  %v8957_v56 = vld [vmem:[#allocation2 + $0x142] sm:$0xff] }
  0xb2   : > { %703 = vst.msk [vmem:[#allocation3 + $0x68] sm:$0xff] %vm689_vm4, %v620_v21  ;;  %v8926_v21 = vld [vmem:[#allocation2 + $0x168] sm:$0xff] }
  0xb3   : > { %527 = vst.msk [vmem:[#allocation3 + $0xf0] sm:$0xff] %vm432_vm2, %v8926_v21 }
  0xb5   : > { %842 = vrot.lane.b32.xlu0 %v8905_v46, %s8349_s8  ;;  %v640_v63 = vpop.permute.xlu2 %639 }
  0xb6   : > { %713 = vst.msk [vmem:[#allocation3 + $0xb8] sm:$0xff] %vm689_vm4, %v640_v63 }
  0xb7   : > { %v630_v30 = vpop.permute.xlu0 %629  ;;  %838 = vrot.lane.b32.xlu1 %v8920_v22, %s8349_s8  ;;  %v8943_v22 = vld [vmem:[#allocation2 + $0x15a] sm:$0xff] }
  0xb8   : > { %708 = vst.msk [vmem:[#allocation3 + $0x90] sm:$0xff] %vm689_vm4, %v630_v30  ;;  %v8941_v30 = vld [vmem:[#allocation2 + $0x122] sm:$0xff] }
  0xb9   : > { %v626_v46 = vpop.permute.xlu1 %625  ;;  %12868 = vst [vmem:[#allocation16_spill] sm:$0xff] %v8941_v30  ;;  %834 = vrot.lane.b32.xlu2 %v8941_v30, %s8349_s8 }
  0xba   : > { %706 = vst.msk [vmem:[#allocation3 + $0x80] sm:$0xff] %vm689_vm4, %v626_v46 }
  0xbb   : > { %12869 = vst [vmem:[#allocation17_spill] sm:$0xff] %v8943_v22 }
  0xbd   : > { %848 = vrot.lane.b32.xlu0 %v8930_v17, %s8349_s8  ;;  %v8951_v17 = vld [vmem:[#allocation2 + $0x170] sm:$0xff] }
  0xbe   : > { %528 = vst.msk [vmem:[#allocation3 + $0xf8] sm:$0xff] %vm432_vm2, %v8951_v17 }
  0xbf   : > { %v636_v63 = vpop.permute.xlu0 %635  ;;  %844 = vrot.lane.b32.xlu1 %v8943_v22, %s8349_s8  ;;  %v646_v22 = vpop.permute.xlu2 %645 }
  0xc0   : > { %711 = vst.msk [vmem:[#allocation3 + $0xa8] sm:$0xff] %vm689_vm4, %v636_v63 }
  0xc1   : > { %v632_v46 = vpop.permute.xlu1 %631  ;;  %840 = vrot.lane.b32.xlu2 %v8957_v56, %s8349_s8  ;;  %716 = vst.msk [vmem:[#allocation3 + $0xd0] sm:$0xff] %vm689_vm4, %v646_v22 }
  0xc2   : > { %709 = vst.msk [vmem:[#allocation3 + $0x98] sm:$0xff] %vm689_vm4, %v632_v46 }
  0xc5   : > { %983 = vrot.lane.b32.xlu0 %v8683_v33, %s8350_s9  ;;  %v8968_v33 = vld [vmem:[#allocation2 + $0x16a] sm:$0xff] }
  0xc7   : > { %v642_v63 = vpop.permute.xlu0 %641  ;;  %979 = vrot.lane.b32.xlu1 %v8703_v38, %s8350_s9 }
  0xc8   : > { %714 = vst.msk [vmem:[#allocation3 + $0xc0] sm:$0xff] %vm689_vm4, %v642_v63  ;;  %v652_v63 = vpop.permute.xlu2 %651 }
  0xc9   : > { %v638_v46 = vpop.permute.xlu1 %637  ;;  %846 = vrot.lane.b32.xlu2 %v8968_v33, %s8349_s8  ;;  %719 = vst.msk [vmem:[#allocation3 + $0xe8] sm:$0xff] %vm689_vm4, %v652_v63 }
  0xca   : > { %712 = vst.msk [vmem:[#allocation3 + $0xb0] sm:$0xff] %vm689_vm4, %v638_v46 }
  0xcd   : > { %989 = vrot.lane.b32.xlu0 %v8749_v52, %s8350_s9 }
  0xcf   : > { %v648_v30 = vpop.permute.xlu0 %647  ;;  %985 = vrot.lane.b32.xlu1 %v8696_v36, %s8350_s9 }
  0xd0   : > { %717 = vst.msk [vmem:[#allocation3 + $0xd8] sm:$0xff] %vm689_vm4, %v648_v30  ;;  %v787_v22 = vpop.permute.xlu2 %786 }
  0xd1   : > { %v644_v38 = vpop.permute.xlu1 %643  ;;  %981 = vrot.lane.b32.xlu2 %v8727_v45, %s8350_s9  ;;  %883 = vst.msk [vmem:[#allocation3] sm:$0xff] %vm882_vm5, %v787_v22 }
  0xd2   : > { %715 = vst.msk [vmem:[#allocation3 + $0xc8] sm:$0xff] %vm689_vm4, %v644_v38  ;;  %v328_v38 = vld [vmem:[%s8425_s28 + $0xf0] sm:$0xff] }
  0xd5   : > { %995 = vrot.lane.b32.xlu0 %v8775_v61, %s8350_s9 }
  0xd7   : > { %v654_v52 = vpop.permute.xlu0 %653  ;;  %991 = vrot.lane.b32.xlu1 %v8719_v43, %s8350_s9 }
  0xd8   : > { %720 = vst.msk [vmem:[#allocation3 + $0xf0] sm:$0xff] %vm689_vm4, %v654_v52  ;;  %v793_v43 = vpop.permute.xlu2 %792  ;;  %v362_v52 = vmul.f32 %v8412_v1, %v328_v38 }
  0xd9   : > { %v650_v36 = vpop.permute.xlu1 %649  ;;  %987 = vrot.lane.b32.xlu2 %v8717_v42, %s8350_s9  ;;  %886 = vst.msk [vmem:[#allocation3 + $0x18] sm:$0xff] %vm882_vm5, %v793_v43 }
  0xda   : > { %718 = vst.msk [vmem:[#allocation3 + $0xe0] sm:$0xff] %vm689_vm4, %v650_v36 }
  0xdd   : > { %1001 = vrot.lane.b32.xlu0 %v8801_v12, %s8350_s9 }
  0xdf   : > { %v789_v30 = vpop.permute.xlu0 %788  ;;  %997 = vrot.lane.b32.xlu1 %v8741_v50, %s8350_s9 }
  0xe0   : > { %884 = vst.msk [vmem:[#allocation3 + $0x8] sm:$0xff] %vm882_vm5, %v789_v30  ;;  %v799_v42 = vpop.permute.xlu2 %798 }
  0xe1   : > { %v656_v45 = vpop.permute.xlu1 %655  ;;  %993 = vrot.lane.b32.xlu2 %v8739_v49, %s8350_s9  ;;  %889 = vst.msk [vmem:[#allocation3 + $0x30] sm:$0xff] %vm882_vm5, %v799_v42  ;;  %v396_v49 = vadd.f32 %v8430_v2, %v362_v52 }
  0xe2   : > { %721 = vst.msk [vmem:[#allocation3 + $0xf8] sm:$0xff] %vm689_vm4, %v656_v45 }
  0xe3   : > { %v428_v36 = vmax.f32 %v396_v49, 0.0  ;;  %v1108_v49 = vld [vmem:[#allocation2 + $0x19] sm:$0xff] }
  0xe5   : > { %1007 = vrot.lane.b32.xlu0 %v8828_v25, %s8350_s9  ;;  %463 = vst.msk [vmem:[#allocation2 + $0x181] sm:$0xff] %vm432_vm2, %v428_v36 }
  0xe7   : > { %v795_v46 = vpop.permute.xlu0 %794  ;;  %1003 = vrot.lane.b32.xlu1 %v8767_v59, %s8350_s9 }
  0xe8   : > { %887 = vst.msk [vmem:[#allocation3 + $0x20] sm:$0xff] %vm882_vm5, %v795_v46  ;;  %v805_v59 = vpop.permute.xlu2 %804 }
  0xe9   : > { %v791_v50 = vpop.permute.xlu1 %790  ;;  %999 = vrot.lane.b32.xlu2 %v8765_v58, %s8350_s9  ;;  %892 = vst.msk [vmem:[#allocation3 + $0x48] sm:$0xff] %vm882_vm5, %v805_v59 }
  0xea   : > { %885 = vst.msk [vmem:[#allocation3 + $0x10] sm:$0xff] %vm882_vm5, %v791_v50 }
  0xed   : > { %1013 = vrot.lane.b32.xlu0 %v8855_v47, %s8350_s9 }
  0xef   : > { %v801_v63 = vpop.permute.xlu0 %800  ;;  %1009 = vrot.lane.b32.xlu1 %v8793_v8, %s8350_s9  ;;  %v329_v8 = vld [vmem:[%s8425_s28 + $0xf8] sm:$0xff] }
  0xf0   : > { %890 = vst.msk [vmem:[#allocation3 + $0x38] sm:$0xff] %vm882_vm5, %v801_v63  ;;  %v811_v43 = vpop.permute.xlu2 %810  ;;  %v363_v45 = vmul.f32 %v8412_v1, %v329_v8 }
  0xf1   : > { %v797_v22 = vpop.permute.xlu1 %796  ;;  %1005 = vrot.lane.b32.xlu2 %v8791_v6, %s8350_s9  ;;  %895 = vst.msk [vmem:[#allocation3 + $0x60] sm:$0xff] %vm882_vm5, %v811_v43  ;;  %v1109_v43 = vld [vmem:[#allocation2 + $0x21] sm:$0xff] }
  0xf2   : > { %888 = vst.msk [vmem:[#allocation3 + $0x28] sm:$0xff] %vm882_vm5, %v797_v22  ;;  %v397_v42 = vadd.f32 %v8430_v2, %v363_v45  ;;  %v9058_v22 = vld [vmem:[#allocation2 + $0x180] sm:$0xff] }
  0xf4   : > { %v429_v38 = vmax.f32 %v397_v42, 0.0 }
  0xf5   : > { %1019 = vrot.lane.b32.xlu0 %v8885_v28, %s8350_s9 }
  0xf6   : > { %464 = vst.msk [vmem:[#allocation2 + $0x189] sm:$0xff] %vm432_vm2, %v429_v38 }
  0xf7   : > { %v807_v30 = vpop.permute.xlu0 %806  ;;  %1015 = vrot.lane.b32.xlu1 %v8820_v20, %s8350_s9 }
  0xf8   : > { %893 = vst.msk [vmem:[#allocation3 + $0x50] sm:$0xff] %vm882_vm5, %v807_v30  ;;  %v817_v1 = vpop.permute.xlu2 %816 }
  0xf9   : > { %v803_v46 = vpop.permute.xlu1 %802  ;;  %1011 = vrot.lane.b32.xlu2 %v8818_v19, %s8350_s9  ;;  %898 = vst.msk [vmem:[#allocation3 + $0x78] sm:$0xff] %vm882_vm5, %v817_v1 }
  0xfa   : > { %891 = vst.msk [vmem:[#allocation3 + $0x40] sm:$0xff] %vm882_vm5, %v803_v46 }
  0xfd   : > { %1025 = vrot.lane.b32.xlu0 %v8912_v35, %s8350_s9  ;;  %v9077_v42 = vld [vmem:[#allocation2 + $0x188] sm:$0xff] }
  0xff   : > { %v813_v50 = vpop.permute.xlu0 %812  ;;  %1021 = vrot.lane.b32.xlu1 %v8847_v32, %s8350_s9 }
 0x100   : > { %896 = vst.msk [vmem:[#allocation3 + $0x68] sm:$0xff] %vm882_vm5, %v813_v50  ;;  %v823_v63 = vpop.permute.xlu2 %822  ;;  %v9079_v50 = vld [vmem:[#allocation2 + $0x49] sm:$0xff] }
 0x101   : > { %v809_v20 = vpop.permute.xlu1 %808  ;;  %1017 = vrot.lane.b32.xlu2 %v8845_v31, %s8350_s9  ;;  %901 = vst.msk [vmem:[#allocation3 + $0x90] sm:$0xff] %vm882_vm5, %v823_v63 }
 0x102   : > { %894 = vst.msk [vmem:[#allocation3 + $0x58] sm:$0xff] %vm882_vm5, %v809_v20 }
 0x105   : > { %1031 = vrot.lane.b32.xlu0 %v8935_v11, %s8350_s9 }
 0x107   : > { %v819_v2 = vpop.permute.xlu0 %818  ;;  %1027 = vrot.lane.b32.xlu1 %v8874_v15, %s8350_s9 }
 0x108   : > { %899 = vst.msk [vmem:[#allocation3 + $0x80] sm:$0xff] %vm882_vm5, %v819_v2  ;;  %v9092_v2 = vld [vmem:[#allocation2 + $0x69] sm:$0xff] }
 0x109   : > { %v815_v32 = vpop.permute.xlu1 %814  ;;  %1023 = vrot.lane.b32.xlu2 %v8872_v9, %s8350_s9 }
 0x10a   : > { %897 = vst.msk [vmem:[#allocation3 + $0x70] sm:$0xff] %vm882_vm5, %v815_v32 }
 0x10b   : > { %v829_v15 = vpop.permute.xlu2 %828 }
 0x10c   : > { %904 = vst.msk [vmem:[#allocation3 + $0xa8] sm:$0xff] %vm882_vm5, %v829_v15 }
 0x10d   : > { %1037 = vrot.lane.b32.xlu0 %v8951_v17, %s8350_s9 }
 0x10f   : > { %v825_v52 = vpop.permute.xlu0 %824  ;;  %1033 = vrot.lane.b32.xlu1 %v8901_v3, %s8350_s9 }
 0x110   : > { %902 = vst.msk [vmem:[#allocation3 + $0x98] sm:$0xff] %vm882_vm5, %v825_v52 }
 0x111   : > { %v821_v59 = vpop.permute.xlu1 %820  ;;  %1029 = vrot.lane.b32.xlu2 %v8899_v16, %s8350_s9 }
 0x112   : > { %900 = vst.msk [vmem:[#allocation3 + $0x88] sm:$0xff] %vm882_vm5, %v821_v59 }
 0x113   : > { %v835_v3 = vpop.permute.xlu2 %834 }
 0x114   : > { %907 = vst.msk [vmem:[#allocation3 + $0xc0] sm:$0xff] %vm882_vm5, %v835_v3  ;;  %v9118_v3 = vld [vmem:[#allocation2 + $0xb1] sm:$0xff] }
 0x115   : > { %1172 = vrot.lane.b32.xlu0 %v1108_v49, %s8351_s10  ;;  %v9105_v49 = vld [vmem:[#allocation2 + $0x91] sm:$0xff] }
 0x117   : > { %v831_v36 = vpop.permute.xlu0 %830  ;;  %1039 = vrot.lane.b32.xlu1 %v9058_v22, %s8350_s9 }
 0x118   : > { %905 = vst.msk [vmem:[#allocation3 + $0xb0] sm:$0xff] %vm882_vm5, %v831_v36 }
 0x119   : > { %v827_v30 = vpop.permute.xlu1 %826  ;;  %1035 = vrot.lane.b32.xlu2 %v8926_v21, %s8350_s9 }
 0x11a   : > { %903 = vst.msk [vmem:[#allocation3 + $0xa0] sm:$0xff] %vm882_vm5, %v827_v30 }
 0x11b   : > { %v841_v45 = vpop.permute.xlu2 %840 }
 0x11c   : > { %910 = vst.msk [vmem:[#allocation3 + $0xd8] sm:$0xff] %vm882_vm5, %v841_v45  ;;  %v9131_v45 = vld [vmem:[#allocation2 + $0xd9] sm:$0xff] }
 0x11d   : > { %1178 = vrot.lane.b32.xlu0 %v8514_v24, %s8351_s10 }
 0x11f   : > { %v837_v8 = vpop.permute.xlu0 %836  ;;  %1174 = vrot.lane.b32.xlu1 %v1109_v43, %s8351_s10 }
 0x120   : > { %908 = vst.msk [vmem:[#allocation3 + $0xc8] sm:$0xff] %vm882_vm5, %v837_v8 }
 0x121   : > { %v833_v46 = vpop.permute.xlu1 %832  ;;  %1041 = vrot.lane.b32.xlu2 %v9077_v42, %s8350_s9 }
 0x122   : > { %906 = vst.msk [vmem:[#allocation3 + $0xb8] sm:$0xff] %vm882_vm5, %v833_v46 }
 0x123   : > { %v847_v38 = vpop.permute.xlu2 %846 }
 0x124   : > { %913 = vst.msk [vmem:[#allocation3 + $0xf0] sm:$0xff] %vm882_vm5, %v847_v38 }
 0x125   : > { %1184 = vrot.lane.b32.xlu0 %v8532_v39, %s8351_s10  ;;  %v9090_v39 = vld [vmem:[#allocation2 + $0x31] sm:$0xff] }
 0x127   : > { %v843_v24 = vpop.permute.xlu0 %842  ;;  %1180 = vrot.lane.b32.xlu1 %v9079_v50, %s8351_s10 }
 0x128   : > { %911 = vst.msk [vmem:[#allocation3 + $0xe0] sm:$0xff] %vm882_vm5, %v843_v24 }
 0x129   : > { %v839_v1 = vpop.permute.xlu1 %838  ;;  %1176 = vrot.lane.b32.xlu2 %v9090_v39, %s8351_s10 }
 0x12a   : > { %909 = vst.msk [vmem:[#allocation3 + $0xd0] sm:$0xff] %vm882_vm5, %v839_v1  ;;  %v9144_v1 = vld [vmem:[#allocation2 + $0xf9] sm:$0xff] }
 0x12b   : > { %v982_v63 = vpop.permute.xlu2 %981 }
 0x12c   : > { %1077 = vst.msk [vmem:[#allocation3 + $0x8] sm:$0xff] %vm1075_vm6, %v982_v63 }
 0x12d   : > { %1190 = vrot.lane.b32.xlu0 %v8550_v54, %s8351_s10  ;;  %v9103_v54 = vld [vmem:[#allocation2 + $0x51] sm:$0xff] }
 0x12f   : > { %v849_v20 = vpop.permute.xlu0 %848  ;;  %1186 = vrot.lane.b32.xlu1 %v9092_v2, %s8351_s10 }
 0x130   : > { %914 = vst.msk [vmem:[#allocation3 + $0xf8] sm:$0xff] %vm882_vm5, %v849_v20 }
 0x131   : > { %v845_v32 = vpop.permute.xlu1 %844  ;;  %1182 = vrot.lane.b32.xlu2 %v9103_v54, %s8351_s10 }
 0x132   : > { %912 = vst.msk [vmem:[#allocation3 + $0xe8] sm:$0xff] %vm882_vm5, %v845_v32 }
 0x133   : > { %v988_v15 = vpop.permute.xlu2 %987 }
 0x134   : > { %1080 = vst.msk [vmem:[#allocation3 + $0x20] sm:$0xff] %vm1075_vm6, %v988_v15 }
 0x135   : > { %1196 = vrot.lane.b32.xlu0 %v8564_v4, %s8351_s10  ;;  %v9116_v4 = vld [vmem:[#allocation2 + $0x79] sm:$0xff] }
 0x137   : > { %v984_v52 = vpop.permute.xlu0 %983  ;;  %1192 = vrot.lane.b32.xlu1 %v9105_v49, %s8351_s10 }
 0x138   : > { %1078 = vst.msk [vmem:[#allocation3 + $0x10] sm:$0xff] %vm1075_vm6, %v984_v52  ;;  %v9157_v52 = vld [vmem:[#allocation2 + $0x121] sm:$0xff] }
 0x139   : > { %v980_v59 = vpop.permute.xlu1 %979  ;;  %1188 = vrot.lane.b32.xlu2 %v9116_v4, %s8351_s10 }
 0x13a   : > { %1076 = vst.msk [vmem:[#allocation3] sm:$0xff] %vm1075_vm6, %v980_v59 }
 0x13b   : > { %v994_v30 = vpop.permute.xlu2 %993 }
 0x13c   : > { %1083 = vst.msk [vmem:[#allocation3 + $0x38] sm:$0xff] %vm1075_vm6, %v994_v30  ;;  %v9170_v30 = vld [vmem:[#allocation2 + $0x141] sm:$0xff] }
 0x13d   : > { %1202 = vrot.lane.b32.xlu0 %v8579_v7, %s8351_s10  ;;  %v9129_v7 = vld [vmem:[#allocation2 + $0x99] sm:$0xff] }
 0x13f   : > { %v990_v36 = vpop.permute.xlu0 %989  ;;  %1198 = vrot.lane.b32.xlu1 %v9118_v3, %s8351_s10 }
 0x140   : > { %1081 = vst.msk [vmem:[#allocation3 + $0x28] sm:$0xff] %vm1075_vm6, %v990_v36 }
 0x141   : > { %v986_v8 = vpop.permute.xlu1 %985  ;;  %1194 = vrot.lane.b32.xlu2 %v9129_v7, %s8351_s10 }
 0x142   : > { %1079 = vst.msk [vmem:[#allocation3 + $0x18] sm:$0xff] %vm1075_vm6, %v986_v8  ;;  %v9177_v8 = vld [vmem:[#allocation2 + $0x181] sm:$0xff] }
 0x143   : > { %v1000_v46 = vpop.permute.xlu2 %999 }
 0x144   : > { %1086 = vst.msk [vmem:[#allocation3 + $0x50] sm:$0xff] %vm1075_vm6, %v1000_v46 }
 0x145   : > { %1208 = vrot.lane.b32.xlu0 %v8601_v10, %s8351_s10  ;;  %v9142_v10 = vld [vmem:[#allocation2 + $0xc1] sm:$0xff] }
 0x147   : > { %v996_v43 = vpop.permute.xlu0 %995  ;;  %1204 = vrot.lane.b32.xlu1 %v9131_v45, %s8351_s10 }
 0x148   : > { %1084 = vst.msk [vmem:[#allocation3 + $0x40] sm:$0xff] %vm1075_vm6, %v996_v43 }
 0x149   : > { %v992_v24 = vpop.permute.xlu1 %991  ;;  %1200 = vrot.lane.b32.xlu2 %v9142_v10, %s8351_s10 }
 0x14a   : > { %1082 = vst.msk [vmem:[#allocation3 + $0x30] sm:$0xff] %vm1075_vm6, %v992_v24 }
 0x14b   : > { %v1006_v20 = vpop.permute.xlu2 %1005 }
 0x14c   : > { %1089 = vst.msk [vmem:[#allocation3 + $0x68] sm:$0xff] %vm1075_vm6, %v1006_v20 }
 0x14d   : > { %1214 = vrot.lane.b32.xlu0 %v8623_v13, %s8351_s10  ;;  %v9155_v13 = vld [vmem:[#allocation2 + $0xe1] sm:$0xff] }
 0x14f   : > { %v1002_v38 = vpop.permute.xlu0 %1001  ;;  %1210 = vrot.lane.b32.xlu1 %v9144_v1, %s8351_s10 }
 0x150   : > { %1087 = vst.msk [vmem:[#allocation3 + $0x58] sm:$0xff] %vm1075_vm6, %v1002_v38 }
 0x151   : > { %v998_v63 = vpop.permute.xlu1 %997  ;;  %1206 = vrot.lane.b32.xlu2 %v9155_v13, %s8351_s10 }
 0x152   : > { %1085 = vst.msk [vmem:[#allocation3 + $0x48] sm:$0xff] %vm1075_vm6, %v998_v63  ;;  %v9192_v63 = vld [vmem:[#allocation2 + $0x189] sm:$0xff] }
 0x153   : > { %v1012_v15 = vpop.permute.xlu2 %1011 }
 0x154   : > { %1092 = vst.msk [vmem:[#allocation3 + $0x80] sm:$0xff] %vm1075_vm6, %v1012_v15 }
 0x155   : > { %1220 = vrot.lane.b32.xlu0 %v8690_v34, %s8351_s10  ;;  %v9168_v34 = vld [vmem:[#allocation2 + $0x109] sm:$0xff] }
 0x157   : > { %v1008_v32 = vpop.permute.xlu0 %1007  ;;  %1216 = vrot.lane.b32.xlu1 %v9157_v52, %s8351_s10 }
 0x158   : > { %1090 = vst.msk [vmem:[#allocation3 + $0x70] sm:$0xff] %vm1075_vm6, %v1008_v32 }
 0x159   : > { %v1004_v59 = vpop.permute.xlu1 %1003  ;;  %1212 = vrot.lane.b32.xlu2 %v9168_v34, %s8351_s10 }
 0x15a   : > { %1088 = vst.msk [vmem:[#allocation3 + $0x60] sm:$0xff] %vm1075_vm6, %v1004_v59  ;;  %v12871_v59 = vld [vmem:[#allocation13_spill] sm:$0xff] }
 0x15b   : > { %v1018_v43 = vpop.permute.xlu2 %1017 }
 0x15c   : > { %1095 = vst.msk [vmem:[#allocation3 + $0x98] sm:$0xff] %vm1075_vm6, %v1018_v43 }
 0x15d   : > { %1226 = vrot.lane.b32.xlu0 %v8711_v40, %s8351_s10 }
 0x15f   : > { %v1014_v36 = vpop.permute.xlu0 %1013  ;;  %1222 = vrot.lane.b32.xlu1 %v9170_v30, %s8351_s10 }
 0x160   : > { %1093 = vst.msk [vmem:[#allocation3 + $0x88] sm:$0xff] %vm1075_vm6, %v1014_v36 }
 0x161   : > { %v1010_v46 = vpop.permute.xlu1 %1009  ;;  %1218 = vrot.lane.b32.xlu2 %v8639_v18, %s8351_s10 }
 0x162   : > { %1091 = vst.msk [vmem:[#allocation3 + $0x78] sm:$0xff] %vm1075_vm6, %v1010_v46 }
 0x163   : > { %v1024_v24 = vpop.permute.xlu2 %1023 }
 0x164   : > { %1098 = vst.msk [vmem:[#allocation3 + $0xb0] sm:$0xff] %vm1075_vm6, %v1024_v24 }
 0x165   : > { %1232 = vrot.lane.b32.xlu0 %v9177_v8, %s8351_s10 }
 0x167   : > { %v1020_v40 = vpop.permute.xlu0 %1019  ;;  %1228 = vrot.lane.b32.xlu1 %v8657_v23, %s8351_s10 }
 0x168   : > { %1096 = vst.msk [vmem:[#allocation3 + $0xa0] sm:$0xff] %vm1075_vm6, %v1020_v40  ;;  %v12874_v40 = vld [vmem:[#allocation16_spill] sm:$0xff] }
 0x169   : > { %v1016_v38 = vpop.permute.xlu1 %1015  ;;  %1224 = vrot.lane.b32.xlu2 %v8669_v27, %s8351_s10 }
 0x16a   : > { %1094 = vst.msk [vmem:[#allocation3 + $0x90] sm:$0xff] %vm1075_vm6, %v1016_v38  ;;  %v12875_v38 = vld [vmem:[#allocation7_spill] sm:$0xff] }
 0x16b   : > { %v1030_v18 = vpop.permute.xlu2 %1029 }
 0x16c   : > { %1101 = vst.msk [vmem:[#allocation3 + $0xc8] sm:$0xff] %vm1075_vm6, %v1030_v18 }
 0x16d   : > { %1367 = vrot.lane.b32.xlu0 %v8757_v53, %s8352_s11 }
 0x16f   : > { %v1026_v20 = vpop.permute.xlu0 %1025  ;;  %1234 = vrot.lane.b32.xlu1 %v9192_v63, %s8351_s10 }
 0x170   : > { %1099 = vst.msk [vmem:[#allocation3 + $0xb8] sm:$0xff] %vm1075_vm6, %v1026_v20  ;;  %v12876_v20 = vld [vmem:[#allocation8_spill] sm:$0xff] }
 0x171   : > { %v1022_v23 = vpop.permute.xlu1 %1021  ;;  %1230 = vrot.lane.b32.xlu2 %v8694_v0, %s8351_s10 }
 0x172   : > { %1097 = vst.msk [vmem:[#allocation3 + $0xa8] sm:$0xff] %vm1075_vm6, %v1022_v23 }
 0x173   : > { %v1036_v27 = vpop.permute.xlu2 %1035 }
 0x174   : > { %1104 = vst.msk [vmem:[#allocation3 + $0xe0] sm:$0xff] %vm1075_vm6, %v1036_v27  ;;  %v12877_v27 = vld [vmem:[#allocation9_spill] sm:$0xff] }
 0x175   : > { %1373 = vrot.lane.b32.xlu0 %v8783_v62, %s8352_s11 }
 0x177   : > { %v1032_v53 = vpop.permute.xlu0 %1031  ;;  %1369 = vrot.lane.b32.xlu1 %v8700_v37, %s8352_s11 }
 0x178   : > { %1102 = vst.msk [vmem:[#allocation3 + $0xd0] sm:$0xff] %vm1075_vm6, %v1032_v53 }
 0x179   : > { %v1028_v32 = vpop.permute.xlu1 %1027  ;;  %1365 = vrot.lane.b32.xlu2 %v8713_v41, %s8352_s11 }
 0x17a   : > { %1100 = vst.msk [vmem:[#allocation3 + $0xc0] sm:$0xff] %vm1075_vm6, %v1028_v32  ;;  %v12878_v32 = vld [vmem:[#allocation10_spill] sm:$0xff] }
 0x17b   : > { %v1042_v0 = vpop.permute.xlu2 %1041 }
 0x17c   : > { %1107 = vst.msk [vmem:[#allocation3 + $0xf8] sm:$0xff] %vm1075_vm6, %v1042_v0 }
 0x17d   : > { %1379 = vrot.lane.b32.xlu0 %v8810_v14, %s8352_s11 }
 0x17f   : > { %v1038_v15 = vpop.permute.xlu0 %1037  ;;  %1375 = vrot.lane.b32.xlu1 %v8723_v44, %s8352_s11 }
 0x180   : > { %1105 = vst.msk [vmem:[#allocation3 + $0xe8] sm:$0xff] %vm1075_vm6, %v1038_v15 }
 0x181   : > { %v1034_v37 = vpop.permute.xlu1 %1033  ;;  %1371 = vrot.lane.b32.xlu2 %v8735_v48, %s8352_s11 }
 0x182   : > { %1103 = vst.msk [vmem:[#allocation3 + $0xd8] sm:$0xff] %vm1075_vm6, %v1034_v37 }
 0x183   : > { %v1177_v41 = vpop.permute.xlu2 %1176 }
 0x184   : > { %1271 = vst.msk [vmem:[#allocation3 + $0x10] sm:$0xff] %vm1268_vm7, %v1177_v41  ;;  %v9280_v41 = vld [vmem:[#allocation2 + $0x18a] sm:$0xff] }
 0x185   : > { %1385 = vrot.lane.b32.xlu0 %v8837_v26, %s8352_s11 }
 0x187   : > { %v1173_v62 = vpop.permute.xlu0 %1172  ;;  %1381 = vrot.lane.b32.xlu1 %v8745_v51, %s8352_s11 }
 0x188   : > { %1269 = vst.msk [vmem:[#allocation3] sm:$0xff] %vm1268_vm7, %v1173_v62  ;;  %v12880_v62 = vld [vmem:[#allocation12_spill] sm:$0xff] }
 0x189   : > { %v1040_v44 = vpop.permute.xlu1 %1039  ;;  %1377 = vrot.lane.b32.xlu2 %v8759_v57, %s8352_s11  ;;  %v12870_v57 = vld [vmem:[#allocation4_spill] sm:$0xff] }
 0x18a   : > { %1106 = vst.msk [vmem:[#allocation3 + $0xf0] sm:$0xff] %vm1075_vm6, %v1040_v44 }
 0x18b   : > { %v1183_v48 = vpop.permute.xlu2 %1182 }
 0x18c   : > { %1274 = vst.msk [vmem:[#allocation3 + $0x28] sm:$0xff] %vm1268_vm7, %v1183_v48  ;;  %v12881_v48 = vld [vmem:[#allocation14_spill] sm:$0xff] }
 0x18d   : > { %1391 = vrot.lane.b32.xlu0 %v8864_v55, %s8352_s11 }
 0x18f   : > { %v1179_v14 = vpop.permute.xlu0 %1178  ;;  %1387 = vrot.lane.b32.xlu1 %v8771_v60, %s8352_s11 }
 0x190   : > { %1272 = vst.msk [vmem:[#allocation3 + $0x18] sm:$0xff] %vm1268_vm7, %v1179_v14 }
 0x191   : > { %v1175_v51 = vpop.permute.xlu1 %1174  ;;  %1383 = vrot.lane.b32.xlu2 %v8785_v5, %s8352_s11  ;;  %v12873_v5 = vld [vmem:[#allocation6_spill] sm:$0xff] }
 0x192   : > { %1270 = vst.msk [vmem:[#allocation3 + $0x8] sm:$0xff] %vm1268_vm7, %v1175_v51  ;;  %v12882_v51 = vld [vmem:[#allocation15_spill] sm:$0xff] }
 0x193   : > { %v1189_v55 = vpop.permute.xlu2 %1188 }
 0x194   : > { %1277 = vst.msk [vmem:[#allocation3 + $0x40] sm:$0xff] %vm1268_vm7, %v1189_v55 }
 0x195   : > { %1397 = vrot.lane.b32.xlu0 %v8891_v29, %s8352_s11  ;;  %v12872_v29 = vld [vmem:[#allocation5_spill] sm:$0xff] }
 0x197   : > { %v1185_v26 = vpop.permute.xlu0 %1184  ;;  %1393 = vrot.lane.b32.xlu1 %v12870_v57, %s8352_s11 }
 0x198   : > { %1275 = vst.msk [vmem:[#allocation3 + $0x30] sm:$0xff] %vm1268_vm7, %v1185_v26  ;;  %v1497_v26 = vld [vmem:[#allocation2 + $0x48] sm:$0xff] }
 0x199   : > { %v1181_v60 = vpop.permute.xlu1 %1180  ;;  %1389 = vrot.lane.b32.xlu2 %v12872_v29, %s8352_s11  ;;  %v1500_v29 = vld [vmem:[#allocation2 + $0x68] sm:$0xff] }
 0x19a   : > { %1273 = vst.msk [vmem:[#allocation3 + $0x20] sm:$0xff] %vm1268_vm7, %v1181_v60 }
 0x19b   : > { %v1195_v43 = vpop.permute.xlu2 %1194 }
 0x19c   : > { %1280 = vst.msk [vmem:[#allocation3 + $0x58] sm:$0xff] %vm1268_vm7, %v1195_v43 }
 0x19d   : > { %1403 = vrot.lane.b32.xlu0 %v12871_v59, %s8352_s11  ;;  %v1495_v59 = vld [vmem:[#allocation2 + $0x30] sm:$0xff] }
 0x19f   : > { %v1191_v36 = vpop.permute.xlu0 %1190  ;;  %1399 = vrot.lane.b32.xlu1 %v12873_v5, %s8352_s11 }
 0x1a0   : > { %1278 = vst.msk [vmem:[#allocation3 + $0x48] sm:$0xff] %vm1268_vm7, %v1191_v36  ;;  %v12883_v36 = vld [vmem:[#allocation17_spill] sm:$0xff] }
 0x1a1   : > { %v1187_v46 = vpop.permute.xlu1 %1186  ;;  %1395 = vrot.lane.b32.xlu2 %v12875_v38, %s8352_s11 }
 0x1a2   : > { %1276 = vst.msk [vmem:[#allocation3 + $0x38] sm:$0xff] %vm1268_vm7, %v1187_v46  ;;  %v9301_v46 = vld [vmem:[#allocation2 + $0x182] sm:$0xff] }
 0x1a3   : > { %v1201_v18 = vpop.permute.xlu2 %1200 }
 0x1a4   : > { %1283 = vst.msk [vmem:[#allocation3 + $0x70] sm:$0xff] %vm1268_vm7, %v1201_v18  ;;  %v1496_v18 = vld [vmem:[#allocation2 + $0x38] sm:$0xff] }
 0x1a5   : > { %1409 = vrot.lane.b32.xlu0 %v12874_v40, %s8352_s11 }
 0x1a7   : > { %v1197_v24 = vpop.permute.xlu0 %1196  ;;  %1405 = vrot.lane.b32.xlu1 %v12876_v20, %s8352_s11 }
 0x1a8   : > { %1281 = vst.msk [vmem:[#allocation3 + $0x60] sm:$0xff] %vm1268_vm7, %v1197_v24  ;;  %v1498_v24 = vld [vmem:[#allocation2 + $0x50] sm:$0xff] }
 0x1a9   : > { %v1193_v23 = vpop.permute.xlu1 %1192  ;;  %1401 = vrot.lane.b32.xlu2 %v12877_v27, %s8352_s11 }
 0x1aa   : > { %1279 = vst.msk [vmem:[#allocation3 + $0x50] sm:$0xff] %vm1268_vm7, %v1193_v23 }
 0x1ab   : > { %v1207_v15 = vpop.permute.xlu2 %1206 }
 0x1ac   : > { %1286 = vst.msk [vmem:[#allocation3 + $0x88] sm:$0xff] %vm1268_vm7, %v1207_v15 }
 0x1ad   : > { %1415 = vrot.lane.b32.xlu0 %v8957_v56, %s8352_s11  ;;  %v12879_v56 = vld [vmem:[#allocation11_spill] sm:$0xff] }
 0x1af   : > { %v1203_v53 = vpop.permute.xlu0 %1202  ;;  %1411 = vrot.lane.b32.xlu1 %v12878_v32, %s8352_s11 }
 0x1b0   : > { %1284 = vst.msk [vmem:[#allocation3 + $0x78] sm:$0xff] %vm1268_vm7, %v1203_v53 }
 0x1b1   : > { %v1199_v0 = vpop.permute.xlu1 %1198  ;;  %1407 = vrot.lane.b32.xlu2 %v12879_v56, %s8352_s11  ;;  %v1505_v56 = vld [vmem:[#allocation2 + $0xa8] sm:$0xff] }
 0x1b2   : > { %1282 = vst.msk [vmem:[#allocation3 + $0x68] sm:$0xff] %vm1268_vm7, %v1199_v0  ;;  %v1502_v0 = vld [vmem:[#allocation2 + $0x80] sm:$0xff] }
 0x1b3   : > { %v1213_v44 = vpop.permute.xlu2 %1212 }
 0x1b4   : > { %1289 = vst.msk [vmem:[#allocation3 + $0xa0] sm:$0xff] %vm1268_vm7, %v1213_v44  ;;  %v1508_v44 = vld [vmem:[#allocation2 + $0xc8] sm:$0xff] }
 0x1b5   : > { %1421 = vrot.lane.b32.xlu0 %v8968_v33, %s8352_s11 }
 0x1b7   : > { %v1209_v37 = vpop.permute.xlu0 %1208  ;;  %1417 = vrot.lane.b32.xlu1 %v12880_v62, %s8352_s11 }
 0x1b8   : > { %1287 = vst.msk [vmem:[#allocation3 + $0x90] sm:$0xff] %vm1268_vm7, %v1209_v37 }
 0x1b9   : > { %v1205_v14 = vpop.permute.xlu1 %1204  ;;  %1413 = vrot.lane.b32.xlu2 %v12881_v48, %s8352_s11 }
 0x1ba   : > { %1285 = vst.msk [vmem:[#allocation3 + $0x80] sm:$0xff] %vm1268_vm7, %v1205_v14 }
 0x1bb   : > { %v1219_v57 = vpop.permute.xlu2 %1218 }
 0x1bc   : > { %1292 = vst.msk [vmem:[#allocation3 + $0xb8] sm:$0xff] %vm1268_vm7, %v1219_v57  ;;  %v1517_v57 = vld [vmem:[#allocation2 + $0x138] sm:$0xff] }
 0x1bd   : > { %1427 = vrot.lane.b32.xlu0 %v9280_v41, %s8352_s11 }
 0x1bf   : > { %v1215_v33 = vpop.permute.xlu0 %1214  ;;  %1423 = vrot.lane.b32.xlu1 %v12882_v51, %s8352_s11  ;;  %v1514_v51 = vld [vmem:[#allocation2 + $0x110] sm:$0xff] }
 0x1c0   : > { %1290 = vst.msk [vmem:[#allocation3 + $0xa8] sm:$0xff] %vm1268_vm7, %v1215_v33  ;;  %v1511_v33 = vld [vmem:[#allocation2 + $0xf0] sm:$0xff] }
 0x1c1   : > { %v1211_v55 = vpop.permute.xlu1 %1210  ;;  %1419 = vrot.lane.b32.xlu2 %v12883_v36, %s8352_s11 }
 0x1c2   : > { %1288 = vst.msk [vmem:[#allocation3 + $0x98] sm:$0xff] %vm1268_vm7, %v1211_v55 }
 0x1c3   : > { %v1225_v5 = vpop.permute.xlu2 %1224 }
 0x1c4   : > { %1295 = vst.msk [vmem:[#allocation3 + $0xd0] sm:$0xff] %vm1268_vm7, %v1225_v5 }
 0x1c5   : > { %1563 = vrot.lane.b32.xlu0 %v1497_v26, %s8353_s12 }
 0x1c7   : > { %v1221_v60 = vpop.permute.xlu0 %1220  ;;  %1559 = vrot.lane.b32.xlu1 %v1495_v59, %s8353_s12  ;;  %v1525_v59 = vld [vmem:[#allocation2 + $0x198] sm:$0xff] }
 0x1c8   : > { %1293 = vst.msk [vmem:[#allocation3 + $0xc0] sm:$0xff] %vm1268_vm7, %v1221_v60 }
 0x1c9   : > { %v1217_v43 = vpop.permute.xlu1 %1216  ;;  %1425 = vrot.lane.b32.xlu2 %v9301_v46, %s8352_s11 }
 0x1ca   : > { %1291 = vst.msk [vmem:[#allocation3 + $0xb0] sm:$0xff] %vm1268_vm7, %v1217_v43 }
 0x1cb   : > { %v1231_v38 = vpop.permute.xlu2 %1230 }
 0x1cc   : > { %1298 = vst.msk [vmem:[#allocation3 + $0xe8] sm:$0xff] %vm1268_vm7, %v1231_v38 }
 0x1cd   : > { %1569 = vrot.lane.b32.xlu0 %v1500_v29, %s8353_s12 }
 0x1cf   : > { %v1227_v40 = vpop.permute.xlu0 %1226  ;;  %1565 = vrot.lane.b32.xlu1 %v1498_v24, %s8353_s12  ;;  %v1692_v24 = vld [vmem:[#allocation2 + $0x61] sm:$0xff] }
 0x1d0   : > { %1296 = vst.msk [vmem:[#allocation3 + $0xd8] sm:$0xff] %vm1268_vm7, %v1227_v40  ;;  %v1526_v40 = vld [vmem:[#allocation2 + $0x1a0] sm:$0xff] }
 0x1d1   : > { %v1223_v20 = vpop.permute.xlu1 %1222  ;;  %1561 = vrot.lane.b32.xlu2 %v1496_v18, %s8353_s12 }
 0x1d2   : > { %1294 = vst.msk [vmem:[#allocation3 + $0xc8] sm:$0xff] %vm1268_vm7, %v1223_v20 }
 0x1d3   : > { %v1366_v53 = vpop.permute.xlu2 %1365 }
 0x1d4   : > { %1462 = vst.msk [vmem:[#allocation3] sm:$0xff] %vm12817_vm8, %v1366_v53  ;;  %v1698_v53 = vld [vmem:[#allocation2 + $0xa9] sm:$0xff] }
 0x1d5   : > { %1575 = vrot.lane.b32.xlu0 %v8765_v58, %s8353_s12  ;;  %v1499_v58 = vld [vmem:[#allocation2 + $0x60] sm:$0xff] }
 0x1d7   : > { %v1233_v23 = vpop.permute.xlu0 %1232  ;;  %1571 = vrot.lane.b32.xlu1 %v8775_v61, %s8353_s12 }
 0x1d8   : > { %1299 = vst.msk [vmem:[#allocation3 + $0xf0] sm:$0xff] %vm1268_vm7, %v1233_v23 }
 0x1d9   : > { %v1229_v27 = vpop.permute.xlu1 %1228  ;;  %1567 = vrot.lane.b32.xlu2 %v1499_v58, %s8353_s12 }
 0x1da   : > { %1297 = vst.msk [vmem:[#allocation3 + $0xe0] sm:$0xff] %vm1268_vm7, %v1229_v27 }
 0x1db   : > { %v1372_v15 = vpop.permute.xlu2 %1371 }
 0x1dc   : > { %1465 = vst.msk [vmem:[#allocation3 + $0x18] sm:$0xff] %vm12817_vm8, %v1372_v15 }
 0x1dd   : > { %1581 = vrot.lane.b32.xlu0 %v8791_v6, %s8353_s12 }
 0x1df   : > { %v1368_v32 = vpop.permute.xlu0 %1367  ;;  %1577 = vrot.lane.b32.xlu1 %v8801_v12, %s8353_s12 }
 0x1e0   : > { %1463 = vst.msk [vmem:[#allocation3 + $0x8] sm:$0xff] %vm12817_vm8, %v1368_v32 }
 0x1e1   : > { %v1235_v61 = vpop.permute.xlu1 %1234  ;;  %1573 = vrot.lane.b32.xlu2 %v1502_v0, %s8353_s12 }
 0x1e2   : > { %1300 = vst.msk [vmem:[#allocation3 + $0xf8] sm:$0xff] %vm1268_vm7, %v1235_v61 }
 0x1e3   : > { %v1378_v37 = vpop.permute.xlu2 %1377 }
 0x1e4   : > { %1468 = vst.msk [vmem:[#allocation3 + $0x30] sm:$0xff] %vm12817_vm8, %v1378_v37 }
 0x1e5   : > { %1587 = vrot.lane.b32.xlu0 %v8818_v19, %s8353_s12 }
 0x1e7   : > { %v1374_v6 = vpop.permute.xlu0 %1373  ;;  %1583 = vrot.lane.b32.xlu1 %v8828_v25, %s8353_s12 }
 0x1e8   : > { %1466 = vst.msk [vmem:[#allocation3 + $0x20] sm:$0xff] %vm12817_vm8, %v1374_v6 }
 0x1e9   : > { %v1370_v12 = vpop.permute.xlu1 %1369  ;;  %1579 = vrot.lane.b32.xlu2 %v1505_v56, %s8353_s12 }
 0x1ea   : > { %1464 = vst.msk [vmem:[#allocation3 + $0x10] sm:$0xff] %vm12817_vm8, %v1370_v12 }
 0x1eb   : > { %v1384_v62 = vpop.permute.xlu2 %1383 }
 0x1ec   : > { %1471 = vst.msk [vmem:[#allocation3 + $0x48] sm:$0xff] %vm12817_vm8, %v1384_v62 }
 0x1ed   : > { %1593 = vrot.lane.b32.xlu0 %v8845_v31, %s8353_s12 }
 0x1ef   : > { %v1380_v19 = vpop.permute.xlu0 %1379  ;;  %1589 = vrot.lane.b32.xlu1 %v8855_v47, %s8353_s12 }
 0x1f0   : > { %1469 = vst.msk [vmem:[#allocation3 + $0x38] sm:$0xff] %vm12817_vm8, %v1380_v19  ;;  %v1710_v19 = vld [vmem:[#allocation2 + $0x139] sm:$0xff] }
 0x1f1   : > { %v1376_v25 = vpop.permute.xlu1 %1375  ;;  %1585 = vrot.lane.b32.xlu2 %v1508_v44, %s8353_s12 }
 0x1f2   : > { %1467 = vst.msk [vmem:[#allocation3 + $0x28] sm:$0xff] %vm12817_vm8, %v1376_v25 }
 0x1f3   : > { %v1390_v14 = vpop.permute.xlu2 %1389 }
 0x1f4   : > { %1474 = vst.msk [vmem:[#allocation3 + $0x60] sm:$0xff] %vm12817_vm8, %v1390_v14 }
 0x1f5   : > { %1599 = vrot.lane.b32.xlu0 %v8872_v9, %s8353_s12 }
 0x1f7   : > { %v1386_v31 = vpop.permute.xlu0 %1385  ;;  %1595 = vrot.lane.b32.xlu1 %v8885_v28, %s8353_s12 }
 0x1f8   : > { %1472 = vst.msk [vmem:[#allocation3 + $0x50] sm:$0xff] %vm12817_vm8, %v1386_v31  ;;  %v1713_v31 = vld [vmem:[#allocation2 + $0x159] sm:$0xff] }
 0x1f9   : > { %v1382_v47 = vpop.permute.xlu1 %1381  ;;  %1591 = vrot.lane.b32.xlu2 %v1511_v33, %s8353_s12 }
 0x1fa   : > { %1470 = vst.msk [vmem:[#allocation3 + $0x40] sm:$0xff] %vm12817_vm8, %v1382_v47 }
 0x1fb   : > { %v1396_v48 = vpop.permute.xlu2 %1395 }
 0x1fc   : > { %1477 = vst.msk [vmem:[#allocation3 + $0x78] sm:$0xff] %vm12817_vm8, %v1396_v48 }
 0x1fd   : > { %1605 = vrot.lane.b32.xlu0 %v8899_v16, %s8353_s12 }
 0x1ff   : > { %v1392_v9 = vpop.permute.xlu0 %1391  ;;  %1601 = vrot.lane.b32.xlu1 %v8912_v35, %s8353_s12 }
 0x200   : > { %1475 = vst.msk [vmem:[#allocation3 + $0x68] sm:$0xff] %vm12817_vm8, %v1392_v9 }
 0x201   : > { %v1388_v28 = vpop.permute.xlu1 %1387  ;;  %1597 = vrot.lane.b32.xlu2 %v1514_v51, %s8353_s12 }
 0x202   : > { %1473 = vst.msk [vmem:[#allocation3 + $0x58] sm:$0xff] %vm12817_vm8, %v1388_v28  ;;  %v1714_v28 = vld [vmem:[#allocation2 + $0x169] sm:$0xff] }
 0x203   : > { %v1402_v26 = vpop.permute.xlu2 %1401 }
 0x204   : > { %1480 = vst.msk [vmem:[#allocation3 + $0x90] sm:$0xff] %vm12817_vm8, %v1402_v26 }
 0x205   : > { %1611 = vrot.lane.b32.xlu0 %v8926_v21, %s8353_s12 }
 0x207   : > { %v1398_v16 = vpop.permute.xlu0 %1397  ;;  %1607 = vrot.lane.b32.xlu1 %v8935_v11, %s8353_s12 }
 0x208   : > { %1478 = vst.msk [vmem:[#allocation3 + $0x80] sm:$0xff] %vm12817_vm8, %v1398_v16  ;;  %v1719_v16 = vld [vmem:[#allocation2 + $0x1a1] sm:$0xff] }
 0x209   : > { %v1394_v35 = vpop.permute.xlu1 %1393  ;;  %1603 = vrot.lane.b32.xlu2 %v1517_v57, %s8353_s12  ;;  %v1883_v57 = vld [vmem:[#allocation2 + $0x4a] sm:$0xff] }
 0x20a   : > { %1476 = vst.msk [vmem:[#allocation3 + $0x70] sm:$0xff] %vm12817_vm8, %v1394_v35 }
 0x20b   : > { %v1408_v55 = vpop.permute.xlu2 %1407 }
 0x20c   : > { %1483 = vst.msk [vmem:[#allocation3 + $0xa8] sm:$0xff] %vm12817_vm8, %v1408_v55 }
 0x20d   : > { %1617 = vrot.lane.b32.xlu0 %v9077_v42, %s8353_s12  ;;  %v1520_v42 = vld [vmem:[#allocation2 + $0x158] sm:$0xff] }
 0x20f   : > { %v1404_v21 = vpop.permute.xlu0 %1403  ;;  %1613 = vrot.lane.b32.xlu1 %v8951_v17, %s8353_s12 }
 0x210   : > { %1481 = vst.msk [vmem:[#allocation3 + $0x98] sm:$0xff] %vm12817_vm8, %v1404_v21 }
 0x211   : > { %v1400_v11 = vpop.permute.xlu1 %1399  ;;  %1609 = vrot.lane.b32.xlu2 %v1520_v42, %s8353_s12 }
 0x212   : > { %1479 = vst.msk [vmem:[#allocation3 + $0x88] sm:$0xff] %vm12817_vm8, %v1400_v11  ;;  %v1881_v11 = vld [vmem:[#allocation2 + $0x32] sm:$0xff] }
 0x213   : > { %v1414_v17 = vpop.permute.xlu2 %1413 }
 0x214   : > { %1486 = vst.msk [vmem:[#allocation3 + $0xc0] sm:$0xff] %vm12817_vm8, %v1414_v17  ;;  %v1888_v17 = vld [vmem:[#allocation2 + $0x82] sm:$0xff] }
 0x215   : > { %1752 = vrot.lane.b32.xlu0 %v9090_v39, %s8354_s13  ;;  %v1689_v39 = vld [vmem:[#allocation2 + $0x39] sm:$0xff] }
 0x217   : > { %v1410_v60 = vpop.permute.xlu0 %1409  ;;  %1619 = vrot.lane.b32.xlu1 %v1525_v59, %s8353_s12 }
 0x218   : > { %1484 = vst.msk [vmem:[#allocation3 + $0xb0] sm:$0xff] %vm12817_vm8, %v1410_v60  ;;  %v1886_v60 = vld [vmem:[#allocation2 + $0x6a] sm:$0xff] }
 0x219   : > { %v1406_v36 = vpop.permute.xlu1 %1405  ;;  %1615 = vrot.lane.b32.xlu2 %v9058_v22, %s8353_s12 }
 0x21a   : > { %1482 = vst.msk [vmem:[#allocation3 + $0xa0] sm:$0xff] %vm12817_vm8, %v1406_v36  ;;  %v1884_v36 = vld [vmem:[#allocation2 + $0x52] sm:$0xff] }
 0x21b   : > { %v1420_v5 = vpop.permute.xlu2 %1419 }
 0x21c   : > { %1489 = vst.msk [vmem:[#allocation3 + $0xd8] sm:$0xff] %vm12817_vm8, %v1420_v5 }
 0x21d   : > { %1758 = vrot.lane.b32.xlu0 %v9103_v54, %s8354_s13 }
 0x21f   : > { %v1416_v29 = vpop.permute.xlu0 %1415  ;;  %1754 = vrot.lane.b32.xlu1 %v1689_v39, %s8354_s13 }
 0x220   : > { %1487 = vst.msk [vmem:[#allocation3 + $0xc8] sm:$0xff] %vm12817_vm8, %v1416_v29 }
 0x221   : > { %v1412_v43 = vpop.permute.xlu1 %1411  ;;  %1621 = vrot.lane.b32.xlu2 %v1526_v40, %s8353_s12 }
 0x222   : > { %1485 = vst.msk [vmem:[#allocation3 + $0xb8] sm:$0xff] %vm12817_vm8, %v1412_v43  ;;  %v1889_v43 = vld [vmem:[#allocation2 + $0x92] sm:$0xff] }
 0x223   : > { %v1426_v22 = vpop.permute.xlu2 %1425 }
 0x224   : > { %1492 = vst.msk [vmem:[#allocation3 + $0xf0] sm:$0xff] %vm12817_vm8, %v1426_v22  ;;  %v1887_v22 = vld [vmem:[#allocation2 + $0x7a] sm:$0xff] }
 0x225   : > { %1764 = vrot.lane.b32.xlu0 %v9116_v4, %s8354_s13  ;;  %v1695_v4 = vld [vmem:[#allocation2 + $0x81] sm:$0xff] }
 0x227   : > { %v1422_v54 = vpop.permute.xlu0 %1421  ;;  %1760 = vrot.lane.b32.xlu1 %v1692_v24, %s8354_s13 }
 0x228   : > { %1490 = vst.msk [vmem:[#allocation3 + $0xe0] sm:$0xff] %vm12817_vm8, %v1422_v54 }
 0x229   : > { %v1418_v38 = vpop.permute.xlu1 %1417  ;;  %1756 = vrot.lane.b32.xlu2 %v9079_v50, %s8354_s13 }
 0x22a   : > { %1488 = vst.msk [vmem:[#allocation3 + $0xd0] sm:$0xff] %vm12817_vm8, %v1418_v38 }
 0x22b   : > { %v1562_v18 = vpop.permute.xlu2 %1561 }
 0x22c   : > { %1657 = vst.msk [vmem:[#allocation3 + $0x8] sm:$0xff] %vm12816_vm9, %v1562_v18  ;;  %v1891_v18 = vld [vmem:[#allocation2 + $0xaa] sm:$0xff] }
 0x22d   : > { %1770 = vrot.lane.b32.xlu0 %v9129_v7, %s8354_s13 }
 0x22f   : > { %v1428_v20 = vpop.permute.xlu0 %1427  ;;  %1766 = vrot.lane.b32.xlu1 %v1695_v4, %s8354_s13 }
 0x230   : > { %1493 = vst.msk [vmem:[#allocation3 + $0xf8] sm:$0xff] %vm12817_vm8, %v1428_v20 }
 0x231   : > { %v1424_v23 = vpop.permute.xlu1 %1423  ;;  %1762 = vrot.lane.b32.xlu2 %v9092_v2, %s8354_s13 }
 0x232   : > { %1491 = vst.msk [vmem:[#allocation3 + $0xe8] sm:$0xff] %vm12817_vm8, %v1424_v23  ;;  %vm4041_vm8 = vcmask 588800  }
 0x233   : > { %v1568_v50 = vpop.permute.xlu2 %1567 }
 0x234   : > { %1660 = vst.msk [vmem:[#allocation3 + $0x20] sm:$0xff] %vm12816_vm9, %v1568_v50  ;;  %v1892_v50 = vld [vmem:[#allocation2 + $0xb2] sm:$0xff] }
 0x235   : > { %1776 = vrot.lane.b32.xlu0 %v9142_v10, %s8354_s13  ;;  %v1701_v10 = vld [vmem:[#allocation2 + $0xc9] sm:$0xff] }
 0x237   : > { %v1564_v7 = vpop.permute.xlu0 %1563  ;;  %1772 = vrot.lane.b32.xlu1 %v1698_v53, %s8354_s13 }
 0x238   : > { %1658 = vst.msk [vmem:[#allocation3 + $0x10] sm:$0xff] %vm12816_vm9, %v1564_v7 }
 0x239   : > { %v1560_v27 = vpop.permute.xlu1 %1559  ;;  %1768 = vrot.lane.b32.xlu2 %v9105_v49, %s8354_s13  ;;  %v1709_v49 = vld [vmem:[#allocation2 + $0x129] sm:$0xff] }
 0x23a   : > { %1656 = vst.msk [vmem:[#allocation3] sm:$0xff] %vm12816_vm9, %v1560_v27 }
 0x23b   : > { %v1574_v2 = vpop.permute.xlu2 %1573 }
 0x23c   : > { %1663 = vst.msk [vmem:[#allocation3 + $0x38] sm:$0xff] %vm12816_vm9, %v1574_v2  ;;  %v1890_v2 = vld [vmem:[#allocation2 + $0x9a] sm:$0xff] }
 0x23d   : > { %1782 = vrot.lane.b32.xlu0 %v9155_v13, %s8354_s13  ;;  %v1704_v13 = vld [vmem:[#allocation2 + $0xf1] sm:$0xff] }
 0x23f   : > { %v1570_v58 = vpop.permute.xlu0 %1569  ;;  %1778 = vrot.lane.b32.xlu1 %v1701_v10, %s8354_s13 }
 0x240   : > { %1661 = vst.msk [vmem:[#allocation3 + $0x28] sm:$0xff] %vm12816_vm9, %v1570_v58 }
 0x241   : > { %v1566_v32 = vpop.permute.xlu1 %1565  ;;  %1774 = vrot.lane.b32.xlu2 %v9118_v3, %s8354_s13  ;;  %v1712_v3 = vld [vmem:[#allocation2 + $0x151] sm:$0xff] }
 0x242   : > { %1659 = vst.msk [vmem:[#allocation3 + $0x18] sm:$0xff] %vm12816_vm9, %v1566_v32 }
 0x243   : > { %v1580_v61 = vpop.permute.xlu2 %1579 }
 0x244   : > { %1666 = vst.msk [vmem:[#allocation3 + $0x50] sm:$0xff] %vm12816_vm9, %v1580_v61  ;;  %v2110_v61 = vld [vmem:[%s12770_s2 + $0x20] sm:$0xf] }
 0x245   : > { %1788 = vrot.lane.b32.xlu0 %v9168_v34, %s8354_s13  ;;  %v1707_v34 = vld [vmem:[#allocation2 + $0x111] sm:$0xff]  ;;  %8178 = vmatpush.msk.msra.mxu0 %vm2209_vm11, %v2110_v61 }
 0x247   : > { %v1576_v15 = vpop.permute.xlu0 %1575  ;;  %1784 = vrot.lane.b32.xlu1 %v1704_v13, %s8354_s13 }
 0x248   : > { %1664 = vst.msk [vmem:[#allocation3 + $0x40] sm:$0xff] %vm12816_vm9, %v1576_v15 }
 0x249   : > { %v1572_v0 = vpop.permute.xlu1 %1571  ;;  %1780 = vrot.lane.b32.xlu2 %v9131_v45, %s8354_s13  ;;  %v1715_v45 = vld [vmem:[#allocation2 + $0x171] sm:$0xff] }
 0x24a   : > { %1662 = vst.msk [vmem:[#allocation3 + $0x30] sm:$0xff] %vm12816_vm9, %v1572_v0 }
 0x24b   : > { %v1586_v37 = vpop.permute.xlu2 %1585 }
 0x24c   : > { %1669 = vst.msk [vmem:[#allocation3 + $0x68] sm:$0xff] %vm12816_vm9, %v1586_v37  ;;  %v1895_v37 = vld [vmem:[#allocation2 + $0xda] sm:$0xff] }
 0x24d   : > { %1794 = vrot.lane.b32.xlu0 %v1709_v49, %s8354_s13  ;;  %v1894_v49 = vld [vmem:[#allocation2 + $0xca] sm:$0xff] }
 0x24f   : > { %v1582_v6 = vpop.permute.xlu0 %1581  ;;  %1790 = vrot.lane.b32.xlu1 %v1707_v34, %s8354_s13 }
 0x250   : > { %1667 = vst.msk [vmem:[#allocation3 + $0x58] sm:$0xff] %vm12816_vm9, %v1582_v6 }
 0x251   : > { %v1578_v12 = vpop.permute.xlu1 %1577  ;;  %1786 = vrot.lane.b32.xlu2 %v9144_v1, %s8354_s13  ;;  %v1718_v1 = vld [vmem:[#allocation2 + $0x199] sm:$0xff] }
 0x252   : > { %1665 = vst.msk [vmem:[#allocation3 + $0x48] sm:$0xff] %vm12816_vm9, %v1578_v12  ;;  %v2108_v12 = vld [vmem:[%s12770_s2 + $0x10] sm:$0xff] }
 0x253   : > { %v1592_v62 = vpop.permute.xlu2 %1591 }
 0x254   : > { %1672 = vst.msk [vmem:[#allocation3 + $0x80] sm:$0xff] %vm12816_vm9, %v1592_v62 }
 0x255   : > { %1800 = vrot.lane.b32.xlu0 %v1712_v3, %s8354_s13  ;;  %v2109_v3 = vld [vmem:[%s12770_s2 + $0x18] sm:$0xff] }
 0x256   : > { %2225 = vmatpush.msra.mxu0 %v2109_v3 }
 0x257   : > { %v1588_v56 = vpop.permute.xlu0 %1587  ;;  %1796 = vrot.lane.b32.xlu1 %v1710_v19, %s8354_s13 }
 0x258   : > { %1670 = vst.msk [vmem:[#allocation3 + $0x70] sm:$0xff] %vm12816_vm9, %v1588_v56  ;;  %v2107_v56 = vld [vmem:[%s12770_s2 + $0x8] sm:$0xff]  ;;  %2226 = vmatpush.msra.mxu0 %v2108_v12 }
 0x259   : > { %v1584_v25 = vpop.permute.xlu1 %1583  ;;  %1792 = vrot.lane.b32.xlu2 %v9157_v52, %s8354_s13  ;;  %v1882_v52 = vld [vmem:[#allocation2 + $0x3a] sm:$0xff] }
 0x25a   : > { %1668 = vst.msk [vmem:[#allocation3 + $0x60] sm:$0xff] %vm12816_vm9, %v1584_v25  ;;  %2227 = vmatpush.msra.mxu0 %v2107_v56  ;;  %v2455_v12 = vld [vmem:[#allocation2 + $0x1] sm:$0xff] }
 0x25b   : > { %v1598_v14 = vpop.permute.xlu2 %1597 }
 0x25c   : > { %1675 = vst.msk [vmem:[#allocation3 + $0x98] sm:$0xff] %vm12816_vm9, %v1598_v14 }
 0x25d   : > { %1806 = vrot.lane.b32.xlu0 %v1715_v45, %s8354_s13  ;;  %v2106_v45 = vld [vmem:[%s12770_s2] sm:$0xff] }
 0x25e   : > { %2228 = vmatpush.msra.mxu0 %v2106_v45  ;;  %v2456_v45 = vld [vmem:[#allocation2 + $0x9] sm:$0xff] }
 0x25f   : > { %v1594_v44 = vpop.permute.xlu0 %1593  ;;  %1802 = vrot.lane.b32.xlu1 %v1713_v31, %s8354_s13 }
 0x260   : > { %1673 = vst.msk [vmem:[#allocation3 + $0x88] sm:$0xff] %vm12816_vm9, %v1594_v44  ;;  %v1893_v44 = vld [vmem:[#allocation2 + $0xc2] sm:$0xff] }
 0x261   : > { %v1590_v47 = vpop.permute.xlu1 %1589  ;;  %1798 = vrot.lane.b32.xlu2 %v9170_v30, %s8354_s13  ;;  %v1885_v30 = vld [vmem:[#allocation2 + $0x62] sm:$0xff] }
 0x262   : > { %1671 = vst.msk [vmem:[#allocation3 + $0x78] sm:$0xff] %vm12816_vm9, %v1590_v47  ;;  %v1897_v47 = vld [vmem:[#allocation2 + $0xf2] sm:$0xff] }
 0x263   : > { %v1604_v9 = vpop.permute.xlu2 %1603 }
 0x264   : > { %1678 = vst.msk [vmem:[#allocation3 + $0xb0] sm:$0xff] %vm12816_vm9, %v1604_v9 }
 0x265   : > { %1812 = vrot.lane.b32.xlu0 %v1718_v1, %s8354_s13 }
 0x267   : > { %v1600_v33 = vpop.permute.xlu0 %1599  ;;  %1808 = vrot.lane.b32.xlu1 %v9177_v8, %s8354_s13 }
 0x268   : > { %1676 = vst.msk [vmem:[#allocation3 + $0xa0] sm:$0xff] %vm12816_vm9, %v1600_v33  ;;  %v1898_v33 = vld [vmem:[#allocation2 + $0xfa] sm:$0xff] }
 0x269   : > { %v1596_v48 = vpop.permute.xlu1 %1595  ;;  %1804 = vrot.lane.b32.xlu2 %v1714_v28, %s8354_s13  ;;  %v1896_v28 = vld [vmem:[#allocation2 + $0xe2] sm:$0xff] }
 0x26a   : > { %1674 = vst.msk [vmem:[#allocation3 + $0x90] sm:$0xff] %vm12816_vm9, %v1596_v48 }
 0x26b   : > { %v1610_v8 = vpop.permute.xlu2 %1609 }
 0x26c   : > { %1681 = vst.msk [vmem:[#allocation3 + $0xc8] sm:$0xff] %vm12816_vm9, %v1610_v8  ;;  %v1900_v8 = vld [vmem:[#allocation2 + $0x112] sm:$0xff] }
 0x26d   : > { %1947 = vrot.lane.b32.xlu0 %v1882_v52, %s8355_s14 }
 0x26f   : > { %v1606_v51 = vpop.permute.xlu0 %1605  ;;  %1814 = vrot.lane.b32.xlu1 %v1719_v16, %s8354_s13 }
 0x270   : > { %1679 = vst.msk [vmem:[#allocation3 + $0xb8] sm:$0xff] %vm12816_vm9, %v1606_v51 }
 0x271   : > { %v1602_v26 = vpop.permute.xlu1 %1601  ;;  %1810 = vrot.lane.b32.xlu2 %v9192_v63, %s8354_s13 }
 0x272   : > { %1677 = vst.msk [vmem:[#allocation3 + $0xa8] sm:$0xff] %vm12816_vm9, %v1602_v26 }
 0x273   : > { %v1616_v21 = vpop.permute.xlu2 %1615 }
 0x274   : > { %1684 = vst.msk [vmem:[#allocation3 + $0xe0] sm:$0xff] %vm12816_vm9, %v1616_v21 }
 0x275   : > { %1953 = vrot.lane.b32.xlu0 %v1885_v30, %s8355_s14 }
 0x277   : > { %v1612_v35 = vpop.permute.xlu0 %1611  ;;  %1949 = vrot.lane.b32.xlu1 %v1883_v57, %s8355_s14 }
 0x278   : > { %1682 = vst.msk [vmem:[#allocation3 + $0xd0] sm:$0xff] %vm12816_vm9, %v1612_v35 }
 0x279   : > { %v1608_v55 = vpop.permute.xlu1 %1607  ;;  %1945 = vrot.lane.b32.xlu2 %v1881_v11, %s8355_s14 }
 0x27a   : > { %1680 = vst.msk [vmem:[#allocation3 + $0xc0] sm:$0xff] %vm12816_vm9, %v1608_v55  ;;  %v1901_v55 = vld [vmem:[#allocation2 + $0x122] sm:$0xff] }
 0x27b   : > { %v1622_v59 = vpop.permute.xlu2 %1621 }
 0x27c   : > { %1687 = vst.msk [vmem:[#allocation3 + $0xf8] sm:$0xff] %vm12816_vm9, %v1622_v59  ;;  %v1899_v59 = vld [vmem:[#allocation2 + $0x10a] sm:$0xff] }
 0x27d   : > { %1959 = vrot.lane.b32.xlu0 %v1888_v17, %s8355_s14 }
 0x27f   : > { %v1618_v42 = vpop.permute.xlu0 %1617  ;;  %1955 = vrot.lane.b32.xlu1 %v1886_v60, %s8355_s14 }
 0x280   : > { %1685 = vst.msk [vmem:[#allocation3 + $0xe8] sm:$0xff] %vm12816_vm9, %v1618_v42 }
 0x281   : > { %v1614_v63 = vpop.permute.xlu1 %1613  ;;  %1951 = vrot.lane.b32.xlu2 %v1884_v36, %s8355_s14 }
 0x282   : > { %1683 = vst.msk [vmem:[#allocation3 + $0xd8] sm:$0xff] %vm12816_vm9, %v1614_v63 }
 0x283   : > { %v1757_v39 = vpop.permute.xlu2 %1756 }
 0x284   : > { %1851 = vst.msk [vmem:[#allocation3 + $0x10] sm:$0xff] %vm12815_vm10, %v1757_v39 }
 0x285   : > { %1965 = vrot.lane.b32.xlu0 %v1891_v18, %s8355_s14 }
 0x287   : > { %v1753_v29 = vpop.permute.xlu0 %1752  ;;  %1961 = vrot.lane.b32.xlu1 %v1889_v43, %s8355_s14  ;;  %v1904_v43 = vld [vmem:[#allocation2 + $0x142] sm:$0xff] }
 0x288   : > { %1849 = vst.msk [vmem:[#allocation3] sm:$0xff] %vm12815_vm10, %v1753_v29  ;;  %v1903_v29 = vld [vmem:[#allocation2 + $0x13a] sm:$0xff] }
 0x289   : > { %v1620_v5 = vpop.permute.xlu1 %1619  ;;  %1957 = vrot.lane.b32.xlu2 %v1887_v22, %s8355_s14 }
 0x28a   : > { %1686 = vst.msk [vmem:[#allocation3 + $0xf0] sm:$0xff] %vm12816_vm9, %v1620_v5  ;;  %vm3966_vm9 = vcmask 589312  }
 0x28b   : > { %v1763_v54 = vpop.permute.xlu2 %1762 }
 0x28c   : > { %1854 = vst.msk [vmem:[#allocation3 + $0x28] sm:$0xff] %vm12815_vm10, %v1763_v54 }
 0x28d   : > { %1971 = vrot.lane.b32.xlu0 %v1894_v49, %s8355_s14 }
 0x28f   : > { %v1759_v40 = vpop.permute.xlu0 %1758  ;;  %1967 = vrot.lane.b32.xlu1 %v1892_v50, %s8355_s14  ;;  %v1905_v50 = vld [vmem:[#allocation2 + $0x152] sm:$0xff] }
 0x290   : > { %1852 = vst.msk [vmem:[#allocation3 + $0x18] sm:$0xff] %vm12815_vm10, %v1759_v40 }
 0x291   : > { %v1755_v24 = vpop.permute.xlu1 %1754  ;;  %1963 = vrot.lane.b32.xlu2 %v1890_v2, %s8355_s14 }
 0x292   : > { %1850 = vst.msk [vmem:[#allocation3 + $0x8] sm:$0xff] %vm12815_vm10, %v1755_v24  ;;  %v1902_v24 = vld [vmem:[#allocation2 + $0x12a] sm:$0xff] }
 0x293   : > { %v1769_v20 = vpop.permute.xlu2 %1768 }
 0x294   : > { %1857 = vst.msk [vmem:[#allocation3 + $0x40] sm:$0xff] %vm12815_vm10, %v1769_v20  ;;  %v1906_v20 = vld [vmem:[#allocation2 + $0x15a] sm:$0xff] }
 0x295   : > { %1977 = vrot.lane.b32.xlu0 %v1897_v47, %s8355_s14 }
 0x297   : > { %v1765_v38 = vpop.permute.xlu0 %1764  ;;  %1973 = vrot.lane.b32.xlu1 %v1895_v37, %s8355_s14  ;;  %v1911_v37 = vld [vmem:[#allocation2 + $0x19a] sm:$0xff] }
 0x298   : > { %1855 = vst.msk [vmem:[#allocation3 + $0x30] sm:$0xff] %vm12815_vm10, %v1765_v38 }
 0x299   : > { %v1761_v4 = vpop.permute.xlu1 %1760  ;;  %1969 = vrot.lane.b32.xlu2 %v1893_v44, %s8355_s14 }
 0x29a   : > { %1853 = vst.msk [vmem:[#allocation3 + $0x20] sm:$0xff] %vm12815_vm10, %v1761_v4 }
 0x29b   : > { %v1775_v7 = vpop.permute.xlu2 %1774 }
 0x29c   : > { %1860 = vst.msk [vmem:[#allocation3 + $0x58] sm:$0xff] %vm12815_vm10, %v1775_v7 }
 0x29d   : > { %1983 = vrot.lane.b32.xlu0 %v1900_v8, %s8355_s14 }
 0x29f   : > { %v1771_v23 = vpop.permute.xlu0 %1770  ;;  %1979 = vrot.lane.b32.xlu1 %v1898_v33, %s8355_s14 }
 0x2a0   : > { %1858 = vst.msk [vmem:[#allocation3 + $0x48] sm:$0xff] %vm12815_vm10, %v1771_v23  ;;  %v1907_v23 = vld [vmem:[#allocation2 + $0x16a] sm:$0xff] }
 0x2a1   : > { %v1767_v53 = vpop.permute.xlu1 %1766  ;;  %1975 = vrot.lane.b32.xlu2 %v1896_v28, %s8355_s14 }
 0x2a2   : > { %1856 = vst.msk [vmem:[#allocation3 + $0x38] sm:$0xff] %vm12815_vm10, %v1767_v53 }
 0x2a3   : > { %v1781_v58 = vpop.permute.xlu2 %1780 }
 0x2a4   : > { %1863 = vst.msk [vmem:[#allocation3 + $0x70] sm:$0xff] %vm12815_vm10, %v1781_v58 }
 0x2a5   : > { %1989 = vrot.lane.b32.xlu0 %v1903_v29, %s8355_s14 }
 0x2a7   : > { %v1777_v27 = vpop.permute.xlu0 %1776  ;;  %1985 = vrot.lane.b32.xlu1 %v1901_v55, %s8355_s14 }
 0x2a8   : > { %1861 = vst.msk [vmem:[#allocation3 + $0x60] sm:$0xff] %vm12815_vm10, %v1777_v27 }
 0x2a9   : > { %v1773_v10 = vpop.permute.xlu1 %1772  ;;  %1981 = vrot.lane.b32.xlu2 %v1899_v59, %s8355_s14 }
 0x2aa   : > { %1859 = vst.msk [vmem:[#allocation3 + $0x50] sm:$0xff] %vm12815_vm10, %v1773_v10 }
 0x2ab   : > { %v1787_v15 = vpop.permute.xlu2 %1786 }
 0x2ac   : > { %1866 = vst.msk [vmem:[#allocation3 + $0x88] sm:$0xff] %vm12815_vm10, %v1787_v15 }
 0x2ad   : > { %1995 = vrot.lane.b32.xlu0 %v1906_v20, %s8355_s14 }
 0x2af   : > { %v1783_v32 = vpop.permute.xlu0 %1782  ;;  %1991 = vrot.lane.b32.xlu1 %v1904_v43, %s8355_s14 }
 0x2b0   : > { %1864 = vst.msk [vmem:[#allocation3 + $0x78] sm:$0xff] %vm12815_vm10, %v1783_v32 }
 0x2b1   : > { %v1779_v13 = vpop.permute.xlu1 %1778  ;;  %1987 = vrot.lane.b32.xlu2 %v1902_v24, %s8355_s14 }
 0x2b2   : > { %1862 = vst.msk [vmem:[#allocation3 + $0x68] sm:$0xff] %vm12815_vm10, %v1779_v13 }
 0x2b3   : > { %v1793_v6 = vpop.permute.xlu2 %1792 }
 0x2b4   : > { %1869 = vst.msk [vmem:[#allocation3 + $0xa0] sm:$0xff] %vm12815_vm10, %v1793_v6  ;;  %v1912_v6 = vld [vmem:[#allocation2 + $0x1a2] sm:$0xff] }
 0x2b5   : > { %2001 = vrot.lane.b32.xlu0 %v9301_v46, %s8355_s14 }
 0x2b7   : > { %v1789_v0 = vpop.permute.xlu0 %1788  ;;  %1997 = vrot.lane.b32.xlu1 %v1907_v23, %s8355_s14 }
 0x2b8   : > { %1867 = vst.msk [vmem:[#allocation3 + $0x90] sm:$0xff] %vm12815_vm10, %v1789_v0 }
 0x2b9   : > { %v1785_v34 = vpop.permute.xlu1 %1784  ;;  %1993 = vrot.lane.b32.xlu2 %v1905_v50, %s8355_s14 }
 0x2ba   : > { %1865 = vst.msk [vmem:[#allocation3 + $0x80] sm:$0xff] %vm12815_vm10, %v1785_v34 }
 0x2bb   : > { %v1799_v62 = vpop.permute.xlu2 %1798 }
 0x2bc   : > { %1872 = vst.msk [vmem:[#allocation3 + $0xb8] sm:$0xff] %vm12815_vm10, %v1799_v62 }
 0x2bd   : > { %2007 = vrot.lane.b32.xlu0 %v1912_v6, %s8355_s14 }
 0x2bf   : > { %v1795_v19 = vpop.permute.xlu0 %1794  ;;  %2003 = vrot.lane.b32.xlu1 %v9280_v41, %s8355_s14  ;;  %v1908_v41 = vld [vmem:[#allocation2 + $0x172] sm:$0xff] }
 0x2c0   : > { %1870 = vst.msk [vmem:[#allocation3 + $0xa8] sm:$0xff] %vm12815_vm10, %v1795_v19 }
 0x2c1   : > { %v1791_v25 = vpop.permute.xlu1 %1790  ;;  %1999 = vrot.lane.b32.xlu2 %v1908_v41, %s8355_s14 }
 0x2c2   : > { %1868 = vst.msk [vmem:[#allocation3 + $0x98] sm:$0xff] %vm12815_vm10, %v1791_v25  ;;  %v9593_v25 = vld [vmem:[%s12769_s1 + $0x2] ss:$0 sm:$0xff] }
 0x2c3   : > { %v1805_v1 = vpop.permute.xlu2 %1804 }
 0x2c4   : > { %1875 = vst.msk [vmem:[#allocation3 + $0xd0] sm:$0xff] %vm12815_vm10, %v1805_v1 }
 0x2c7   : > { %v1801_v31 = vpop.permute.xlu0 %1800  ;;  %2519 = vrot.lane.b32.xlu1 %v2455_v12, %s8349_s8 }
 0x2c8   : > { %1873 = vst.msk [vmem:[#allocation3 + $0xc0] sm:$0xff] %vm12815_vm10, %v1801_v31 }
 0x2c9   : > { %v1797_v14 = vpop.permute.xlu1 %1796  ;;  %2005 = vrot.lane.b32.xlu2 %v1911_v37, %s8355_s14 }
 0x2ca   : > { %1871 = vst.msk [vmem:[#allocation3 + $0xb0] sm:$0xff] %vm12815_vm10, %v1797_v14 }
 0x2cb   : > { %v1811_v9 = vpop.permute.xlu2 %1810 }
 0x2cc   : > { %1878 = vst.msk [vmem:[#allocation3 + $0xe8] sm:$0xff] %vm12815_vm10, %v1811_v9 }
 0x2cf   : > { %v1807_v52 = vpop.permute.xlu0 %1806 }
 0x2d0   : > { %1876 = vst.msk [vmem:[#allocation3 + $0xd8] sm:$0xff] %vm12815_vm10, %v1807_v52 }
 0x2d1   : > { %v1803_v48 = vpop.permute.xlu1 %1802  ;;  %2521 = vrot.lane.b32.xlu2 %v2456_v45, %s8349_s8 }
 0x2d2   : > { %1874 = vst.msk [vmem:[#allocation3 + $0xc8] sm:$0xff] %vm12815_vm10, %v1803_v48 }
 0x2d3   : > { %v1946_v16 = vpop.permute.xlu2 %1945 }
 0x2d4   : > { %2042 = vst.msk [vmem:[#allocation3] sm:$0xff] %vm12814_vm12, %v1946_v16 }
 0x2d7   : > { %v1813_v51 = vpop.permute.xlu0 %1812 }
 0x2d8   : > { %1879 = vst.msk [vmem:[#allocation3 + $0xf0] sm:$0xff] %vm12815_vm10, %v1813_v51 }
 0x2d9   : > { %v1809_v30 = vpop.permute.xlu1 %1808 }
 0x2da   : > { %1877 = vst.msk [vmem:[#allocation3 + $0xe0] sm:$0xff] %vm12815_vm10, %v1809_v30 }
 0x2db   : > { %v2074_v35 = vld [vmem:[#allocation3] sm:$0xff]  ;;  %v1952_v57 = vpop.permute.xlu2 %1951 }
 0x2dc   : > { %8179 = vmatmul.msk.f32.vlgmr.msra.gmra.mxu0 %vm12813_vm13, %v2074_v35  ;;  %2045 = vst.msk [vmem:[#allocation3 + $0x18] sm:$0xff] %vm12814_vm12, %v1952_v57 }
 0x2df   : > { %v1948_v26 = vpop.permute.xlu0 %1947 }
 0x2e0   : > { %2043 = vst.msk [vmem:[#allocation3 + $0x8] sm:$0xff] %vm12814_vm12, %v1948_v26 }
 0x2e1   : > { %v1815_v21 = vpop.permute.xlu1 %1814 }
 0x2e2   : > { %1880 = vst.msk [vmem:[#allocation3 + $0xf8] sm:$0xff] %vm12815_vm10, %v1815_v21  ;;  %vm3773_vm10 = vcmask 523712  }
 0x2e3   : > { %v1958_v63 = vpop.permute.xlu2 %1957  ;;  %v2077_v5 = vld [vmem:[#allocation3 + $0x18] sm:$0xff] }
 0x2e4   : > { %2048 = vst.msk [vmem:[#allocation3 + $0x30] sm:$0xff] %vm12814_vm12, %v1958_v63 }
 0x2e7   : > { %v1954_v11 = vpop.permute.xlu0 %1953  ;;  %v2075_v42 = vld [vmem:[#allocation3 + $0x8] sm:$0xff] }
 0x2e8   : > { %2046 = vst.msk [vmem:[#allocation3 + $0x20] sm:$0xff] %vm12814_vm12, %v1954_v11  ;;  %8180 = vmatmul.msk.f32.gmra.mxu0 %vm12813_vm13, %v2075_v42 }
 0x2e9   : > { %v1950_v60 = vpop.permute.xlu1 %1949 }
 0x2ea   : > { %2044 = vst.msk [vmem:[#allocation3 + $0x10] sm:$0xff] %vm12814_vm12, %v1950_v60 }
 0x2eb   : > { %v1964_v22 = vpop.permute.xlu2 %1963  ;;  %v2080_v18 = vld [vmem:[#allocation3 + $0x30] sm:$0xff] }
 0x2ec   : > { %2051 = vst.msk [vmem:[#allocation3 + $0x48] sm:$0xff] %vm12814_vm12, %v1964_v22 }
 0x2ef   : > { %v1960_v39 = vpop.permute.xlu0 %1959  ;;  %v2078_v54 = vld [vmem:[#allocation3 + $0x20] sm:$0xff] }
 0x2f0   : > { %2049 = vst.msk [vmem:[#allocation3 + $0x38] sm:$0xff] %vm12814_vm12, %v1960_v39 }
 0x2f1   : > { %v2076_v17 = vld [vmem:[#allocation3 + $0x10] sm:$0xff]  ;;  %v1956_v36 = vpop.permute.xlu1 %1955 }
 0x2f2   : > { %8181 = vmatmul.msk.f32.gmra.mxu0 %vm12813_vm13, %v2076_v17  ;;  %2047 = vst.msk [vmem:[#allocation3 + $0x28] sm:$0xff] %vm12814_vm12, %v1956_v36 }
 0x2f3   : > { %v1970_v27 = vpop.permute.xlu2 %1969  ;;  %v2083_v46 = vld [vmem:[#allocation3 + $0x48] sm:$0xff] }
 0x2f4   : > { %2054 = vst.msk [vmem:[#allocation3 + $0x60] sm:$0xff] %vm12814_vm12, %v1970_v27 }
 0x2f7   : > { %v1966_v4 = vpop.permute.xlu0 %1965  ;;  %v2081_v53 = vld [vmem:[#allocation3 + $0x38] sm:$0xff] }
 0x2f8   : > { %2052 = vst.msk [vmem:[#allocation3 + $0x50] sm:$0xff] %vm12814_vm12, %v1966_v4 }
 0x2f9   : > { %v1962_v40 = vpop.permute.xlu1 %1961  ;;  %v2079_v38 = vld [vmem:[#allocation3 + $0x28] sm:$0xff] }
 0x2fa   : > { %8182 = vmatmul.msk.f32.gmra.mxu0 %vm12813_vm13, %v2077_v5  ;;  %2050 = vst.msk [vmem:[#allocation3 + $0x40] sm:$0xff] %vm12814_vm12, %v1962_v40 }
 0x2fb   : > { %v1976_v32 = vpop.permute.xlu2 %1975  ;;  %v2086_v61 = vld [vmem:[#allocation3 + $0x60] sm:$0xff] }
 0x2fc   : > { %2057 = vst.msk [vmem:[#allocation3 + $0x78] sm:$0xff] %vm12814_vm12, %v1976_v32 }
 0x2ff   : > { %v1972_v10 = vpop.permute.xlu0 %1971  ;;  %v2084_v15 = vld [vmem:[#allocation3 + $0x50] sm:$0xff] }
 0x300   : > { %2055 = vst.msk [vmem:[#allocation3 + $0x68] sm:$0xff] %vm12814_vm12, %v1972_v10 }
 0x301   : > { %v1968_v7 = vpop.permute.xlu1 %1967  ;;  %v2082_v58 = vld [vmem:[#allocation3 + $0x40] sm:$0xff] }
 0x302   : > { %8183 = vmatmul.msk.f32.gmra.mxu0 %vm12813_vm13, %v2078_v54  ;;  %2053 = vst.msk [vmem:[#allocation3 + $0x58] sm:$0xff] %vm12814_vm12, %v1968_v7 }
 0x303   : > { %v1982_v3 = vpop.permute.xlu2 %1981  ;;  %v2089_v62 = vld [vmem:[#allocation3 + $0x78] sm:$0xff] }
 0x304   : > { %2060 = vst.msk [vmem:[#allocation3 + $0x90] sm:$0xff] %vm12814_vm12, %v1982_v3 }
 0x307   : > { %v1978_v49 = vpop.permute.xlu0 %1977  ;;  %v2087_v34 = vld [vmem:[#allocation3 + $0x68] sm:$0xff] }
 0x308   : > { %2058 = vst.msk [vmem:[#allocation3 + $0x80] sm:$0xff] %vm12814_vm12, %v1978_v49 }
 0x309   : > { %v1974_v2 = vpop.permute.xlu1 %1973  ;;  %v2085_v13 = vld [vmem:[#allocation3 + $0x58] sm:$0xff] }
 0x30a   : > { %8184 = vmatmul.msk.f32.gmra.mxu0 %vm12813_vm13, %v2079_v38  ;;  %2056 = vst.msk [vmem:[#allocation3 + $0x70] sm:$0xff] %vm12814_vm12, %v1974_v2 }
 0x30b   : > { %v1988_v33 = vpop.permute.xlu2 %1987  ;;  %v2092_v26 = vld [vmem:[#allocation3 + $0x90] sm:$0xff] }
 0x30c   : > { %2063 = vst.msk [vmem:[#allocation3 + $0xa8] sm:$0xff] %vm12814_vm12, %v1988_v33 }
 0x30f   : > { %v1984_v19 = vpop.permute.xlu0 %1983  ;;  %v2090_v14 = vld [vmem:[#allocation3 + $0x80] sm:$0xff] }
 0x310   : > { %2061 = vst.msk [vmem:[#allocation3 + $0x98] sm:$0xff] %vm12814_vm12, %v1984_v19 }
 0x311   : > { %v1980_v0 = vpop.permute.xlu1 %1979  ;;  %v2088_v56 = vld [vmem:[#allocation3 + $0x70] sm:$0xff] }
 0x312   : > { %8185 = vmatmul.msk.f32.gmra.mxu0 %vm12813_vm13, %v2080_v18  ;;  %2059 = vst.msk [vmem:[#allocation3 + $0x88] sm:$0xff] %vm12814_vm12, %v1980_v0 }
 0x313   : > { %v1994_v29 = vpop.permute.xlu2 %1993  ;;  %v2095_v20 = vld [vmem:[#allocation3 + $0xa8] sm:$0xff] }
 0x314   : > { %2066 = vst.msk [vmem:[#allocation3 + $0xc0] sm:$0xff] %vm12814_vm12, %v1994_v29 }
 0x317   : > { %v1990_v30 = vpop.permute.xlu0 %1989  ;;  %v2093_v60 = vld [vmem:[#allocation3 + $0x98] sm:$0xff] }
 0x318   : > { %2064 = vst.msk [vmem:[#allocation3 + $0xb0] sm:$0xff] %vm12814_vm12, %v1990_v30 }
 0x319   : > { %v1986_v44 = vpop.permute.xlu1 %1985  ;;  %v2091_v48 = vld [vmem:[#allocation3 + $0x88] sm:$0xff] }
 0x31a   : > { %8186 = vmatmul.msk.f32.gmra.mxu0 %vm12813_vm13, %v2081_v53  ;;  %2062 = vst.msk [vmem:[#allocation3 + $0xa0] sm:$0xff] %vm12814_vm12, %v1986_v44 }
 0x31b   : > { %v2000_v32 = vpop.permute.xlu2 %1999  ;;  %v2098_v3 = vld [vmem:[#allocation3 + $0xc0] sm:$0xff] }
 0x31c   : > { %2069 = vst.msk [vmem:[#allocation3 + $0xd8] sm:$0xff] %vm12814_vm12, %v2000_v32 }
 0x31f   : > { %v1996_v22 = vpop.permute.xlu0 %1995  ;;  %v2096_v27 = vld [vmem:[#allocation3 + $0xb0] sm:$0xff] }
 0x320   : > { %2067 = vst.msk [vmem:[#allocation3 + $0xc8] sm:$0xff] %vm12814_vm12, %v1996_v22 }
 0x321   : > { %v1992_v11 = vpop.permute.xlu1 %1991  ;;  %v2094_v5 = vld [vmem:[#allocation3 + $0xa0] sm:$0xff] }
 0x322   : > { %8187 = vmatmul.msk.f32.gmra.mxu0 %vm12813_vm13, %v2082_v58  ;;  %2065 = vst.msk [vmem:[#allocation3 + $0xb8] sm:$0xff] %vm12814_vm12, %v1992_v11 }
 0x327   : > { %v2002_v6 = vpop.permute.xlu0 %2001 }
 0x328   : > { %2070 = vst.msk [vmem:[#allocation3 + $0xe0] sm:$0xff] %vm12814_vm12, %v2002_v6 }
 0x329   : > { %v1998_v53 = vpop.permute.xlu1 %1997  ;;  %v2097_v41 = vld [vmem:[#allocation3 + $0xb8] sm:$0xff] }
 0x32a   : > { %8188 = vmatmul.msk.f32.gmra.mxu0 %vm12813_vm13, %v2083_v46  ;;  %2068 = vst.msk [vmem:[#allocation3 + $0xd0] sm:$0xff] %vm12814_vm12, %v1998_v53 }
 0x32f   : > { %v2008_v11 = vpop.permute.xlu0 %2007 }
 0x330   : > { %2073 = vst.msk [vmem:[#allocation3 + $0xf8] sm:$0xff] %vm12814_vm12, %v2008_v11 }
 0x331   : > { %v2004_v45 = vpop.permute.xlu1 %2003 }
 0x332   : > { %8189 = vmatmul.msk.f32.gmra.mxu0 %vm12813_vm13, %v2084_v15  ;;  %2071 = vst.msk [vmem:[#allocation3 + $0xe8] sm:$0xff] %vm12814_vm12, %v2004_v45 }
 0x33a   : > { %8190 = vmatmul.msk.f32.gmra.mxu0 %vm12813_vm13, %v2085_v13 }
 0x342   : > { %8191 = vmatmul.msk.f32.gmra.mxu0 %vm12813_vm13, %v2086_v61 }
 0x34a   : > { %8192 = vmatmul.msk.f32.gmra.mxu0 %vm12813_vm13, %v2087_v34 }
 0x352   : > { %8193 = vmatmul.msk.f32.gmra.mxu0 %vm12813_vm13, %v2088_v56 }
 0x359   : > { %v2230_v31 = vpop.f32.mrf.mxu0 }
 0x35a   : > { %8194 = vmatmul.msk.f32.gmra.mxu0 %vm12813_vm13, %v2089_v62  ;;  %v2231_v1 = vadd.f32 %v9593_v25, %v2230_v31  ;;  %v2006_v62 = vpop.permute.xlu2 %2005  ;;  %v2099_v31 = vld [vmem:[#allocation3 + $0xc8] sm:$0xff] }
 0x35b   : > { %2072 = vst.msk [vmem:[#allocation3 + $0xf0] sm:$0xff] %vm12814_vm12, %v2006_v62  ;;  %vm3580_vm12 = vcmask 458112  }
 0x35c   : > { %v2326_v47 = vmax.f32 %v2231_v1, 0.0 }
 0x35e   : > { %2359 = vst.msk [vmem:[#allocation2 + $0x19] sm:$0xff] %vm252_vm0, %v2326_v47 }
 0x362   : > { %8195 = vmatmul.msk.f32.gmra.mxu0 %vm12813_vm13, %v2090_v14 }
 0x365   : > { %v2233_v52 = vpop.f32.mrf.mxu0  ;;  %v2457_v51 = vld [vmem:[#allocation2 + $0x19] sm:$0xff] }
 0x366   : > { %v2234_v9 = vadd.f32 %v9593_v25, %v2233_v52  ;;  %v9602_v16 = vld [vmem:[#allocation2 + $0x18] sm:$0xff]  ;;  %2523 = vrot.lane.b32.xlu0 %v2457_v51, %s8349_s8  ;;  %v2392_v52 = vld [vmem:[#allocation2 + $0x8] sm:$0xff] }
 0x367   : > { %2425 = vst.msk [vmem:[#allocation3 + $0x10] sm:$0xff] %vm252_vm0, %v9602_v16 }
 0x368   : > { %v2327_v28 = vmax.f32 %v2234_v9, 0.0  ;;  %2424 = vst.msk [vmem:[#allocation3 + $0x8] sm:$0xff] %vm252_vm0, %v2392_v52 }
 0x36a   : > { %8196 = vmatmul.msk.f32.gmra.mxu0 %vm12813_vm13, %v2091_v48  ;;  %2360 = vst.msk [vmem:[#allocation2 + $0x21] sm:$0xff] %vm252_vm0, %v2327_v28  ;;  %v2100_v48 = vld [vmem:[#allocation3 + $0xd0] sm:$0xff]  ;;  %v2522_v28 = vpop.permute.xlu2 %2521 }
 0x36b   : > { %2617 = vst.msk [vmem:[#allocation3 + $0x8] sm:$0xff] %vm2615_vm14, %v2522_v28 }
 0x36f   : > { %v2236_v8 = vpop.f32.mrf.mxu0 }
 0x370   : > { %v2237_v35 = vadd.f32 %v9593_v25, %v2236_v8 }
 0x371   : > { %v2458_v21 = vld [vmem:[#allocation2 + $0x21] sm:$0xff] }
 0x372   : > { %v2328_v57 = vmax.f32 %v2237_v35, 0.0  ;;  %8197 = vmatmul.msk.f32.gmra.mxu0 %vm12813_vm13, %v2092_v26  ;;  %v9611_v55 = vld [vmem:[#allocation2 + $0x20] sm:$0xff]  ;;  %2525 = vrot.lane.b32.xlu1 %v2458_v21, %s8349_s8 }
 0x373   : > { %2426 = vst.msk [vmem:[#allocation3 + $0x18] sm:$0xff] %vm252_vm0, %v9611_v55 }
 0x374   : > { %2361 = vst.msk [vmem:[#allocation2 + $0x31] sm:$0xff] %vm252_vm0, %v2328_v57  ;;  %v2101_v57 = vld [vmem:[#allocation3 + $0xd8] sm:$0xff] }
 0x377   : > { %v2239_v42 = vpop.f32.mrf.mxu0 }
 0x378   : > { %v2240_v59 = vadd.f32 %v9593_v25, %v2239_v42 }
 0x37a   : > { %v2329_v63 = vmax.f32 %v2240_v59, 0.0  ;;  %8198 = vmatmul.msk.f32.gmra.mxu0 %vm12813_vm13, %v2093_v60 }
 0x37b   : > { %v2459_v17 = vld [vmem:[#allocation2 + $0x31] sm:$0xff] }
 0x37c   : > { %v9620_v36 = vld [vmem:[#allocation2 + $0x30] sm:$0xff]  ;;  %2362 = vst.msk [vmem:[#allocation2 + $0x39] sm:$0xff] %vm252_vm0, %v2329_v63  ;;  %2527 = vrot.lane.b32.xlu2 %v2459_v17, %s8349_s8  ;;  %v2391_v63 = vld [vmem:[#allocation2] sm:$0xff]  ;;  %v2520_v17 = vpop.permute.xlu1 %2519 }
 0x37d   : > { %2427 = vst.msk [vmem:[#allocation3 + $0x20] sm:$0xff] %vm252_vm0, %v9620_v36 }
 0x37e   : > { %2423 = vst.msk [vmem:[#allocation3] sm:$0xff] %vm252_vm0, %v2391_v63 }
 0x37f   : > { %v2242_v39 = vpop.f32.mrf.mxu0  ;;  %2616 = vst.msk [vmem:[#allocation3] sm:$0xff] %vm2615_vm14, %v2520_v17 }
 0x380   : > { %v2243_v43 = vadd.f32 %v9593_v25, %v2242_v39  ;;  %v2102_v39 = vld [vmem:[#allocation3 + $0xe0] sm:$0xff] }
 0x382   : > { %v2330_v40 = vmax.f32 %v2243_v43, 0.0  ;;  %8199 = vmatmul.msk.f32.gmra.mxu0 %vm12813_vm13, %v2094_v5 }
 0x383   : > { %v2460_v54 = vld [vmem:[#allocation2 + $0x39] sm:$0xff] }
 0x384   : > { %v9629_v24 = vld [vmem:[#allocation2 + $0x38] sm:$0xff]  ;;  %2363 = vst.msk [vmem:[#allocation2 + $0x49] sm:$0xff] %vm252_vm0, %v2330_v40  ;;  %2529 = vrot.lane.b32.xlu0 %v2460_v54, %s8349_s8 }
 0x385   : > { %2428 = vst.msk [vmem:[#allocation3 + $0x28] sm:$0xff] %vm252_vm0, %v9629_v24 }
 0x387   : > { %v2245_v38 = vpop.f32.mrf.mxu0 }
 0x388   : > { %v2246_v4 = vadd.f32 %v9593_v25, %v2245_v38  ;;  %v2103_v38 = vld [vmem:[#allocation3 + $0xe8] sm:$0xff] }
 0x38a   : > { %v2331_v18 = vmax.f32 %v2246_v4, 0.0  ;;  %8200 = vmatmul.msk.f32.gmra.mxu0 %vm12813_vm13, %v2095_v20 }
 0x38b   : > { %v2461_v23 = vld [vmem:[#allocation2 + $0x49] sm:$0xff] }
 0x38c   : > { %v9638_v7 = vld [vmem:[#allocation2 + $0x48] sm:$0xff]  ;;  %2364 = vst.msk [vmem:[#allocation2 + $0x51] sm:$0xff] %vm252_vm0, %v2331_v18  ;;  %2531 = vrot.lane.b32.xlu1 %v2461_v23, %s8349_s8 }
 0x38d   : > { %2429 = vst.msk [vmem:[#allocation3 + $0x30] sm:$0xff] %vm252_vm0, %v9638_v7 }
 0x38f   : > { %v2248_v50 = vpop.f32.mrf.mxu0 }
 0x390   : > { %v2249_v58 = vadd.f32 %v9593_v25, %v2248_v50 }
 0x392   : > { %v2332_v10 = vmax.f32 %v2249_v58, 0.0  ;;  %8201 = vmatmul.msk.f32.gmra.mxu0 %vm12813_vm13, %v2096_v27 }
 0x393   : > { %v9647_v46 = vld [vmem:[#allocation2 + $0x51] sm:$0xff] }
 0x394   : > { %v9649_v2 = vld [vmem:[#allocation2 + $0x50] sm:$0xff]  ;;  %2365 = vst.msk [vmem:[#allocation2 + $0x61] sm:$0xff] %vm252_vm0, %v2332_v10  ;;  %2533 = vrot.lane.b32.xlu2 %v9647_v46, %s8349_s8 }
 0x395   : > { %2430 = vst.msk [vmem:[#allocation3 + $0x38] sm:$0xff] %vm252_vm0, %v9649_v2 }
 0x397   : > { %v2251_v15 = vpop.f32.mrf.mxu0 }
 0x398   : > { %v2252_v13 = vadd.f32 %v9593_v25, %v2251_v15 }
 0x39a   : > { %v2333_v49 = vmax.f32 %v2252_v13, 0.0  ;;  %8202 = vmatmul.msk.f32.gmra.mxu0 %vm12813_vm13, %v2097_v41 }
 0x39b   : > { %v9659_v61 = vld [vmem:[#allocation2 + $0x61] sm:$0xff] }
 0x39c   : > { %v9661_v0 = vld [vmem:[#allocation2 + $0x60] sm:$0xff]  ;;  %2366 = vst.msk [vmem:[#allocation2 + $0x69] sm:$0xff] %vm252_vm0, %v2333_v49  ;;  %2535 = vrot.lane.b32.xlu0 %v9659_v61, %s8349_s8 }
 0x39d   : > { %2431 = vst.msk [vmem:[#allocation3 + $0x40] sm:$0xff] %vm252_vm0, %v9661_v0 }
 0x39f   : > { %v2254_v34 = vpop.f32.mrf.mxu0 }
 0x3a0   : > { %v2255_v37 = vadd.f32 %v9593_v25, %v2254_v34 }
 0x3a2   : > { %v2334_v12 = vmax.f32 %v2255_v37, 0.0  ;;  %8203 = vmatmul.msk.f32.gmra.mxu0 %vm12813_vm13, %v2098_v3 }
 0x3a3   : > { %v9671_v56 = vld [vmem:[#allocation2 + $0x69] sm:$0xff] }
 0x3a4   : > { %v9673_v19 = vld [vmem:[#allocation2 + $0x68] sm:$0xff]  ;;  %2367 = vst.msk [vmem:[#allocation2 + $0x79] sm:$0xff] %vm252_vm0, %v2334_v12  ;;  %2537 = vrot.lane.b32.xlu1 %v9671_v56, %s8349_s8 }
 0x3a5   : > { %2432 = vst.msk [vmem:[#allocation3 + $0x48] sm:$0xff] %vm252_vm0, %v9673_v19 }
 0x3a7   : > { %v2257_v44 = vpop.f32.mrf.mxu0 }
 0x3a8   : > { %v2258_v1 = vadd.f32 %v9593_v25, %v2257_v44 }
 0x3aa   : > { %v2335_v14 = vmax.f32 %v2258_v1, 0.0  ;;  %8204 = vmatmul.msk.f32.gmra.mxu0 %vm12813_vm13, %v2099_v31 }
 0x3ab   : > { %v9684_v47 = vld [vmem:[#allocation2 + $0x79] sm:$0xff] }
 0x3ac   : > { %v9686_v33 = vld [vmem:[#allocation2 + $0x78] sm:$0xff]  ;;  %2368 = vst.msk [vmem:[#allocation2 + $0x81] sm:$0xff] %vm252_vm0, %v2335_v14  ;;  %2539 = vrot.lane.b32.xlu2 %v9684_v47, %s8349_s8 }
 0x3ad   : > { %2433 = vst.msk [vmem:[#allocation3 + $0x50] sm:$0xff] %vm252_vm0, %v9686_v33 }
 0x3af   : > { %v2260_v9 = vpop.f32.mrf.mxu0 }
 0x3b0   : > { %v2261_v51 = vadd.f32 %v9593_v25, %v2260_v9 }
 0x3b2   : > { %v2336_v30 = vmax.f32 %v2261_v51, 0.0  ;;  %8205 = vmatmul.msk.f32.gmra.mxu0 %vm12813_vm13, %v2100_v48 }
 0x3b3   : > { %v9697_v8 = vld [vmem:[#allocation2 + $0x81] sm:$0xff] }
 0x3b4   : > { %v9699_v26 = vld [vmem:[#allocation2 + $0x80] sm:$0xff]  ;;  %2369 = vst.msk [vmem:[#allocation2 + $0x91] sm:$0xff] %vm252_vm0, %v2336_v30  ;;  %2541 = vrot.lane.b32.xlu0 %v9697_v8, %s8349_s8 }
 0x3b5   : > { %2434 = vst.msk [vmem:[#allocation3 + $0x58] sm:$0xff] %vm252_vm0, %v9699_v26 }
 0x3b7   : > { %v2263_v35 = vpop.f32.mrf.mxu0 }
 0x3b8   : > { %v2264_v21 = vadd.f32 %v9593_v25, %v2263_v35 }
 0x3ba   : > { %v2337_v42 = vmax.f32 %v2264_v21, 0.0  ;;  %8206 = vmatmul.msk.f32.gmra.mxu0 %vm12813_vm13, %v2101_v57 }
 0x3bb   : > { %v9709_v60 = vld [vmem:[#allocation2 + $0x91] sm:$0xff] }
 0x3bc   : > { %v9711_v59 = vld [vmem:[#allocation2 + $0x90] sm:$0xff]  ;;  %2370 = vst.msk [vmem:[#allocation2 + $0x99] sm:$0xff] %vm252_vm0, %v2337_v42  ;;  %2543 = vrot.lane.b32.xlu1 %v9709_v60, %s8349_s8 }
 0x3bd   : > { %2435 = vst.msk [vmem:[#allocation3 + $0x60] sm:$0xff] %vm252_vm0, %v9711_v59 }
 0x3bf   : > { %v2266_v29 = vpop.f32.mrf.mxu0 }
 0x3c0   : > { %v2267_v5 = vadd.f32 %v9593_v25, %v2266_v29 }
 0x3c2   : > { %v2338_v43 = vmax.f32 %v2267_v5, 0.0  ;;  %8207 = vmatmul.msk.f32.gmra.mxu0 %vm12813_vm13, %v2102_v39 }
 0x3c3   : > { %v9722_v40 = vld [vmem:[#allocation2 + $0x99] sm:$0xff] }
 0x3c4   : > { %v9724_v54 = vld [vmem:[#allocation2 + $0x98] sm:$0xff]  ;;  %2371 = vst.msk [vmem:[#allocation2 + $0xa9] sm:$0xff] %vm252_vm0, %v2338_v43  ;;  %2545 = vrot.lane.b32.xlu2 %v9722_v40, %s8349_s8 }
 0x3c5   : > { %2436 = vst.msk [vmem:[#allocation3 + $0x68] sm:$0xff] %vm252_vm0, %v9724_v54 }
 0x3c7   : > { %v2269_v22 = vpop.f32.mrf.mxu0 }
 0x3c8   : > { %v2270_v20 = vadd.f32 %v9593_v25, %v2269_v22 }
 0x3ca   : > { %v2339_v4 = vmax.f32 %v2270_v20, 0.0  ;;  %8208 = vmatmul.msk.f32.gmra.mxu0 %vm12813_vm13, %v2103_v38 }
 0x3cb   : > { %v9733_v18 = vld [vmem:[#allocation2 + $0xa9] sm:$0xff] }
 0x3cc   : > { %v9735_v23 = vld [vmem:[#allocation2 + $0xa8] sm:$0xff]  ;;  %2372 = vst.msk [vmem:[#allocation2 + $0xb1] sm:$0xff] %vm252_vm0, %v2339_v4  ;;  %2547 = vrot.lane.b32.xlu0 %v9733_v18, %s8349_s8 }
 0x3cd   : > { %2437 = vst.msk [vmem:[#allocation3 + $0x70] sm:$0xff] %vm252_vm0, %v9735_v23 }
 0x3cf   : > { %v2272_v53 = vpop.f32.mrf.mxu0 }
 0x3d0   : > { %v2273_v50 = vadd.f32 %v9593_v25, %v2272_v53 }
 0x3d2   : > { %v2340_v27 = vmax.f32 %v2273_v50, 0.0 }
 0x3d3   : > { %v9743_v58 = vld [vmem:[#allocation2 + $0xb1] sm:$0xff] }
 0x3d4   : > { %v9745_v10 = vld [vmem:[#allocation2 + $0xb0] sm:$0xff]  ;;  %2373 = vst.msk [vmem:[#allocation2 + $0xc1] sm:$0xff] %vm252_vm0, %v2340_v27  ;;  %2549 = vrot.lane.b32.xlu1 %v9743_v58, %s8349_s8 }
 0x3d5   : > { %2438 = vst.msk [vmem:[#allocation3 + $0x78] sm:$0xff] %vm252_vm0, %v9745_v10 }
 0x3d6   : > { %v2528_v32 = vpop.permute.xlu2 %2527 }
 0x3d7   : > { %2620 = vst.msk [vmem:[#allocation3 + $0x20] sm:$0xff] %vm2615_vm14, %v2528_v32  ;;  %v2275_v15 = vpop.f32.mrf.mxu0 }
 0x3d8   : > { %v2276_v41 = vadd.f32 %v9593_v25, %v2275_v15  ;;  %v2524_v34 = vpop.permute.xlu0 %2523 }
 0x3d9   : > { %2618 = vst.msk [vmem:[#allocation3 + $0x10] sm:$0xff] %vm2615_vm14, %v2524_v34 }
 0x3da   : > { %v2341_v13 = vmax.f32 %v2276_v41, 0.0 }
 0x3db   : > { %v9754_v49 = vld [vmem:[#allocation2 + $0xc1] sm:$0xff] }
 0x3dc   : > { %v9756_v6 = vld [vmem:[#allocation2 + $0xc0] sm:$0xff]  ;;  %2374 = vst.msk [vmem:[#allocation2 + $0xc9] sm:$0xff] %vm252_vm0, %v2341_v13  ;;  %2551 = vrot.lane.b32.xlu2 %v9754_v49, %s8349_s8 }
 0x3dd   : > { %2439 = vst.msk [vmem:[#allocation3 + $0x80] sm:$0xff] %vm252_vm0, %v9756_v6 }
 0x3df   : > { %v2278_v3 = vpop.f32.mrf.mxu0 }
 0x3e0   : > { %v2279_v37 = vadd.f32 %v9593_v25, %v2278_v3 }
 0x3e2   : > { %v2342_v12 = vmax.f32 %v2279_v37, 0.0 }
 0x3e3   : > { %v9765_v45 = vld [vmem:[#allocation2 + $0xc9] sm:$0xff] }
 0x3e4   : > { %v9767_v62 = vld [vmem:[#allocation2 + $0xc8] sm:$0xff]  ;;  %2375 = vst.msk [vmem:[#allocation2 + $0xd9] sm:$0xff] %vm252_vm0, %v2342_v12  ;;  %2553 = vrot.lane.b32.xlu0 %v9765_v45, %s8349_s8  ;;  %v2526_v44 = vpop.permute.xlu1 %2525 }
 0x3e5   : > { %2440 = vst.msk [vmem:[#allocation3 + $0x88] sm:$0xff] %vm252_vm0, %v9767_v62 }
 0x3e6   : > { %2619 = vst.msk [vmem:[#allocation3 + $0x18] sm:$0xff] %vm2615_vm14, %v2526_v44 }
 0x3e7   : > { %v2281_v31 = vpop.f32.mrf.mxu0 }
 0x3e8   : > { %v2282_v1 = vadd.f32 %v9593_v25, %v2281_v31 }
 0x3ea   : > { %v2343_v14 = vmax.f32 %v2282_v1, 0.0 }
 0x3eb   : > { %v9776_v52 = vld [vmem:[#allocation2 + $0xd9] sm:$0xff] }
 0x3ec   : > { %v9778_v9 = vld [vmem:[#allocation2 + $0xd8] sm:$0xff]  ;;  %2376 = vst.msk [vmem:[#allocation2 + $0xe1] sm:$0xff] %vm252_vm0, %v2343_v14  ;;  %2555 = vrot.lane.b32.xlu1 %v9776_v52, %s8349_s8 }
 0x3ed   : > { %2441 = vst.msk [vmem:[#allocation3 + $0x90] sm:$0xff] %vm252_vm0, %v9778_v9 }
 0x3ee   : > { %v2534_v48 = vpop.permute.xlu2 %2533 }
 0x3ef   : > { %2623 = vst.msk [vmem:[#allocation3 + $0x38] sm:$0xff] %vm2615_vm14, %v2534_v48  ;;  %v2284_v28 = vpop.f32.mrf.mxu0 }
 0x3f0   : > { %v2285_v51 = vadd.f32 %v9593_v25, %v2284_v28 }
 0x3f2   : > { %v2344_v30 = vmax.f32 %v2285_v51, 0.0 }
 0x3f3   : > { %v9787_v35 = vld [vmem:[#allocation2 + $0xe1] sm:$0xff] }
 0x3f4   : > { %v9789_v57 = vld [vmem:[#allocation2 + $0xe0] sm:$0xff]  ;;  %2377 = vst.msk [vmem:[#allocation2 + $0xf1] sm:$0xff] %vm252_vm0, %v2344_v30  ;;  %2557 = vrot.lane.b32.xlu2 %v9787_v35, %s8349_s8 }
 0x3f5   : > { %2442 = vst.msk [vmem:[#allocation3 + $0x98] sm:$0xff] %vm252_vm0, %v9789_v57 }
 0x3f6   : > { %v2530_v21 = vpop.permute.xlu0 %2529 }
 0x3f7   : > { %2621 = vst.msk [vmem:[#allocation3 + $0x28] sm:$0xff] %vm2615_vm14, %v2530_v21  ;;  %v2287_v11 = vpop.f32.mrf.mxu0 }
 0x3f8   : > { %v2288_v42 = vadd.f32 %v9593_v25, %v2287_v11 }
 0x3fa   : > { %v2345_v63 = vmax.f32 %v2288_v42, 0.0 }
 0x3fb   : > { %v9798_v17 = vld [vmem:[#allocation2 + $0xf1] sm:$0xff] }
 0x3fc   : > { %v9800_v29 = vld [vmem:[#allocation2 + $0xf0] sm:$0xff]  ;;  %2378 = vst.msk [vmem:[#allocation2 + $0xf9] sm:$0xff] %vm252_vm0, %v2345_v63  ;;  %2559 = vrot.lane.b32.xlu0 %v9798_v17, %s8349_s8 }
 0x3fd   : > { %2443 = vst.msk [vmem:[#allocation3 + $0xa0] sm:$0xff] %vm252_vm0, %v9800_v29 }
 0x3fe   : > { %v2532_v39 = vpop.permute.xlu1 %2531 }
 0x3ff   : > { %2622 = vst.msk [vmem:[#allocation3 + $0x30] sm:$0xff] %vm2615_vm14, %v2532_v39  ;;  %v2290_v5 = vpop.f32.mrf.mxu0 }
 0x400   : > { %v2291_v43 = vadd.f32 %v9593_v25, %v2290_v5 }
 0x402   : > { %v2346_v22 = vmax.f32 %v2291_v43, 0.0 }
 0x403   : > { %v9809_v38 = vld [vmem:[#allocation2 + $0xf9] sm:$0xff] }
 0x404   : > { %v9811_v20 = vld [vmem:[#allocation2 + $0xf8] sm:$0xff]  ;;  %2379 = vst.msk [vmem:[#allocation2 + $0x109] sm:$0xff] %vm252_vm0, %v2346_v22  ;;  %2561 = vrot.lane.b32.xlu1 %v9809_v38, %s8349_s8 }
 0x405   : > { %2444 = vst.msk [vmem:[#allocation3 + $0xa8] sm:$0xff] %vm252_vm0, %v9811_v20 }
 0x406   : > { %v2540_v4 = vpop.permute.xlu2 %2539 }
 0x407   : > { %2626 = vst.msk [vmem:[#allocation3 + $0x50] sm:$0xff] %vm2615_vm14, %v2540_v4  ;;  %v2293_v53 = vpop.f32.mrf.mxu0 }
 0x408   : > { %v2294_v50 = vadd.f32 %v9593_v25, %v2293_v53 }
 0x40a   : > { %v2347_v27 = vmax.f32 %v2294_v50, 0.0 }
 0x40b   : > { %v9820_v32 = vld [vmem:[#allocation2 + $0x109] sm:$0xff] }
 0x40c   : > { %v9822_v15 = vld [vmem:[#allocation2 + $0x108] sm:$0xff]  ;;  %2380 = vst.msk [vmem:[#allocation2 + $0x111] sm:$0xff] %vm252_vm0, %v2347_v27  ;;  %2563 = vrot.lane.b32.xlu2 %v9820_v32, %s8349_s8  ;;  %v2104_v27 = vld [vmem:[#allocation3 + $0xf0] sm:$0xff] }
 0x40d   : > { %2445 = vst.msk [vmem:[#allocation3 + $0xb0] sm:$0xff] %vm252_vm0, %v9822_v15  ;;  %8209 = vmatmul.msk.f32.gmra.mxu0 %vm12813_vm13, %v2104_v27 }
 0x40e   : > { %v2536_v41 = vpop.permute.xlu0 %2535 }
 0x40f   : > { %2624 = vst.msk [vmem:[#allocation3 + $0x40] sm:$0xff] %vm2615_vm14, %v2536_v41  ;;  %v2296_v13 = vpop.f32.mrf.mxu0 }
 0x410   : > { %v2297_v34 = vadd.f32 %v9593_v25, %v2296_v13 }
 0x412   : > { %v2348_v3 = vmax.f32 %v2297_v34, 0.0 }
 0x413   : > { %v9831_v37 = vld [vmem:[#allocation2 + $0x111] sm:$0xff] }
 0x414   : > { %v9833_v12 = vld [vmem:[#allocation2 + $0x110] sm:$0xff]  ;;  %2381 = vst.msk [vmem:[#allocation2 + $0x121] sm:$0xff] %vm252_vm0, %v2348_v3  ;;  %2565 = vrot.lane.b32.xlu0 %v9831_v37, %s8349_s8 }
 0x415   : > { %2446 = vst.msk [vmem:[#allocation3 + $0xb8] sm:$0xff] %vm252_vm0, %v9833_v12 }
 0x416   : > { %v2538_v44 = vpop.permute.xlu1 %2537 }
 0x417   : > { %2625 = vst.msk [vmem:[#allocation3 + $0x48] sm:$0xff] %vm2615_vm14, %v2538_v44  ;;  %v2299_v31 = vpop.f32.mrf.mxu0 }
 0x418   : > { %v2300_v1 = vadd.f32 %v9593_v25, %v2299_v31 }
 0x41a   : > { %v2349_v14 = vmax.f32 %v2300_v1, 0.0 }
 0x41b   : > { %v9842_v48 = vld [vmem:[#allocation2 + $0x121] sm:$0xff] }
 0x41c   : > { %v9844_v28 = vld [vmem:[#allocation2 + $0x120] sm:$0xff]  ;;  %2382 = vst.msk [vmem:[#allocation2 + $0x129] sm:$0xff] %vm252_vm0, %v2349_v14  ;;  %2567 = vrot.lane.b32.xlu1 %v9842_v48, %s8349_s8  ;;  %v2105_v14 = vld [vmem:[#allocation3 + $0xf8] sm:$0xff] }
 0x41d   : > { %2447 = vst.msk [vmem:[#allocation3 + $0xc0] sm:$0xff] %vm252_vm0, %v9844_v28  ;;  %8210 = vmatmul.msk.f32.gmra.mxu0 %vm12813_vm13, %v2105_v14  ;;  %vm3387_vm13 = vcmask 392512  }
 0x41e   : > { %v2546_v51 = vpop.permute.xlu2 %2545 }
 0x41f   : > { %2629 = vst.msk [vmem:[#allocation3 + $0x68] sm:$0xff] %vm2615_vm14, %v2546_v51  ;;  %v2302_v30 = vpop.f32.mrf.mxu0 }
 0x420   : > { %v2303_v21 = vadd.f32 %v9593_v25, %v2302_v30 }
 0x422   : > { %v2350_v11 = vmax.f32 %v2303_v21, 0.0 }
 0x423   : > { %v9853_v42 = vld [vmem:[#allocation2 + $0x129] sm:$0xff] }
 0x424   : > { %v9855_v63 = vld [vmem:[#allocation2 + $0x128] sm:$0xff]  ;;  %2383 = vst.msk [vmem:[#allocation2 + $0x139] sm:$0xff] %vm252_vm0, %v2350_v11  ;;  %2569 = vrot.lane.b32.xlu2 %v9853_v42, %s8349_s8 }
 0x425   : > { %2448 = vst.msk [vmem:[#allocation3 + $0xc8] sm:$0xff] %vm252_vm0, %v9855_v63 }
 0x426   : > { %v2542_v39 = vpop.permute.xlu0 %2541 }
 0x427   : > { %2627 = vst.msk [vmem:[#allocation3 + $0x58] sm:$0xff] %vm2615_vm14, %v2542_v39  ;;  %v2305_v5 = vpop.f32.mrf.mxu0 }
 0x428   : > { %v2306_v43 = vadd.f32 %v9593_v25, %v2305_v5 }
 0x42a   : > { %v2351_v22 = vmax.f32 %v2306_v43, 0.0 }
 0x42b   : > { %v9864_v4 = vld [vmem:[#allocation2 + $0x139] sm:$0xff] }
 0x42c   : > { %v9866_v53 = vld [vmem:[#allocation2 + $0x138] sm:$0xff]  ;;  %2384 = vst.msk [vmem:[#allocation2 + $0x141] sm:$0xff] %vm252_vm0, %v2351_v22  ;;  %2571 = vrot.lane.b32.xlu0 %v9864_v4, %s8349_s8 }
 0x42d   : > { %2449 = vst.msk [vmem:[#allocation3 + $0xd0] sm:$0xff] %vm252_vm0, %v9866_v53 }
 0x42e   : > { %v2544_v50 = vpop.permute.xlu1 %2543 }
 0x42f   : > { %2628 = vst.msk [vmem:[#allocation3 + $0x60] sm:$0xff] %vm2615_vm14, %v2544_v50  ;;  %v2308_v41 = vpop.f32.mrf.mxu0 }
 0x430   : > { %v2309_v13 = vadd.f32 %v9593_v25, %v2308_v41 }
 0x432   : > { %v2352_v34 = vmax.f32 %v2309_v13, 0.0 }
 0x433   : > { %v9876_v3 = vld [vmem:[#allocation2 + $0x141] sm:$0xff] }
 0x434   : > { %2385 = vst.msk [vmem:[#allocation2 + $0x151] sm:$0xff] %vm252_vm0, %v2352_v34  ;;  %2573 = vrot.lane.b32.xlu1 %v9876_v3, %s8349_s8  ;;  %v9881_v44 = vld [vmem:[#allocation2 + $0x140] sm:$0xff] }
 0x435   : > { %2450 = vst.msk [vmem:[#allocation3 + $0xd8] sm:$0xff] %vm252_vm0, %v9881_v44 }
 0x436   : > { %v2552_v31 = vpop.permute.xlu2 %2551 }
 0x437   : > { %2632 = vst.msk [vmem:[#allocation3 + $0x80] sm:$0xff] %vm2615_vm14, %v2552_v31  ;;  %v2311_v1 = vpop.f32.mrf.mxu0  ;;  %v2648_v31 = vld [vmem:[#allocation2 + $0x2] sm:$0xff] }
 0x438   : > { %v2312_v51 = vadd.f32 %v9593_v25, %v2311_v1 }
 0x43a   : > { %v2353_v30 = vmax.f32 %v2312_v51, 0.0 }
 0x43b   : > { %v9888_v21 = vld [vmem:[#allocation2 + $0x151] sm:$0xff] }
 0x43c   : > { %v9890_v11 = vld [vmem:[#allocation2 + $0x150] sm:$0xff]  ;;  %2386 = vst.msk [vmem:[#allocation2 + $0x159] sm:$0xff] %vm252_vm0, %v2353_v30  ;;  %2575 = vrot.lane.b32.xlu2 %v9888_v21, %s8349_s8 }
 0x43d   : > { %2451 = vst.msk [vmem:[#allocation3 + $0xe0] sm:$0xff] %vm252_vm0, %v9890_v11 }
 0x43e   : > { %v2548_v39 = vpop.permute.xlu0 %2547 }
 0x43f   : > { %2630 = vst.msk [vmem:[#allocation3 + $0x70] sm:$0xff] %vm2615_vm14, %v2548_v39  ;;  %v2314_v5 = vpop.f32.mrf.mxu0  ;;  %v2649_v39 = vld [vmem:[#allocation2 + $0xa] sm:$0xff] }
 0x440   : > { %v2315_v43 = vadd.f32 %v9593_v25, %v2314_v5  ;;  %v9921_v5 = vld [vmem:[#allocation2 + $0x22] sm:$0xff] }
 0x441   : > { %12884 = vst [vmem:[#allocation4_spill] sm:$0xff] %v9921_v5 }
 0x442   : > { %v2354_v22 = vmax.f32 %v2315_v43, 0.0 }
 0x443   : > { %v9899_v50 = vld [vmem:[#allocation2 + $0x159] sm:$0xff] }
 0x444   : > { %2387 = vst.msk [vmem:[#allocation2 + $0x169] sm:$0xff] %vm252_vm0, %v2354_v22  ;;  %2577 = vrot.lane.b32.xlu0 %v9899_v50, %s8349_s8  ;;  %v9904_v27 = vld [vmem:[#allocation2 + $0x158] sm:$0xff] }
 0x445   : > { %2452 = vst.msk [vmem:[#allocation3 + $0xe8] sm:$0xff] %vm252_vm0, %v9904_v27 }
 0x446   : > { %v2550_v41 = vpop.permute.xlu1 %2549 }
 0x447   : > { %2631 = vst.msk [vmem:[#allocation3 + $0x78] sm:$0xff] %vm2615_vm14, %v2550_v41  ;;  %v2317_v13 = vpop.f32.mrf.mxu0 }
 0x448   : > { %v2318_v34 = vadd.f32 %v9593_v25, %v2317_v13  ;;  %v9935_v13 = vld [vmem:[#allocation2 + $0x4a] sm:$0xff] }
 0x449   : > { %12885 = vst [vmem:[#allocation13_spill] sm:$0xff] %v9935_v13 }
 0x44a   : > { %v2355_v1 = vmax.f32 %v2318_v34, 0.0  ;;  %v9937_v34 = vld [vmem:[#allocation2 + $0x32] sm:$0xff] }
 0x44b   : > { %v9910_v14 = vld [vmem:[#allocation2 + $0x169] sm:$0xff]  ;;  %12886 = vst [vmem:[#allocation5_spill] sm:$0xff] %v9937_v34 }
 0x44c   : > { %v9912_v51 = vld [vmem:[#allocation2 + $0x168] sm:$0xff]  ;;  %2388 = vst.msk [vmem:[#allocation2 + $0x171] sm:$0xff] %vm252_vm0, %v2355_v1  ;;  %2579 = vrot.lane.b32.xlu1 %v9910_v14, %s8349_s8  ;;  %2712 = vrot.lane.b32.xlu0 %v2648_v31, %s8351_s10  ;;  %v9943_v31 = vld [vmem:[#allocation2 + $0x1a] sm:$0xff] }
 0x44d   : > { %2453 = vst.msk [vmem:[#allocation3 + $0xf0] sm:$0xff] %vm252_vm0, %v9912_v51 }
 0x44e   : > { %v2558_v30 = vpop.permute.xlu2 %2557 }
 0x44f   : > { %2635 = vst.msk [vmem:[#allocation3 + $0x98] sm:$0xff] %vm2615_vm14, %v2558_v30  ;;  %v9948_v30 = vld [vmem:[#allocation2 + $0x6a] sm:$0xff] }
 0x450   : > { %12887 = vst [vmem:[#allocation6_spill] sm:$0xff] %v9948_v30 }
 0x453   : > { %v9923_v43 = vld [vmem:[#allocation2 + $0x171] sm:$0xff] }
 0x454   : > { %2714 = vrot.lane.b32.xlu1 %v2649_v39, %s8351_s10  ;;  %2718 = vrot.lane.b32.xlu0 %v9921_v5, %s8351_s10  ;;  %v9928_v22 = vld [vmem:[#allocation2 + $0x170] sm:$0xff] }
 0x455   : > { %2581 = vrot.lane.b32.xlu2 %v9923_v43, %s8349_s8  ;;  %2454 = vst.msk [vmem:[#allocation3 + $0xf8] sm:$0xff] %vm252_vm0, %v9928_v22  ;;  %v9950_v39 = vld [vmem:[#allocation2 + $0x52] sm:$0xff] }
 0x456   : > { %v2554_v41 = vpop.permute.xlu0 %2553  ;;  %12888 = vst [vmem:[#allocation16_spill] sm:$0xff] %v9950_v39  ;;  %v9974_v5 = vld [vmem:[#allocation2 + $0xb2] sm:$0xff] }
 0x457   : > { %2633 = vst.msk [vmem:[#allocation3 + $0x88] sm:$0xff] %vm2615_vm14, %v2554_v41  ;;  %v9956_v41 = vld [vmem:[#allocation2 + $0x3a] sm:$0xff] }
 0x458   : > { %12892 = vst [vmem:[#allocation10_spill] sm:$0xff] %v9974_v5 }
 0x45c   : > { %2724 = vrot.lane.b32.xlu0 %v9935_v13, %s8351_s10  ;;  %2720 = vrot.lane.b32.xlu1 %v9937_v34, %s8351_s10  ;;  %v9961_v13 = vld [vmem:[#allocation2 + $0x92] sm:$0xff] }
 0x45d   : > { %2716 = vrot.lane.b32.xlu2 %v9943_v31, %s8351_s10  ;;  %12889 = vst [vmem:[#allocation7_spill] sm:$0xff] %v9961_v13 }
 0x45e   : > { %v2556_v1 = vpop.permute.xlu1 %2555 }
 0x45f   : > { %2634 = vst.msk [vmem:[#allocation3 + $0x90] sm:$0xff] %vm2615_vm14, %v2556_v1  ;;  %v9963_v1 = vld [vmem:[#allocation2 + $0x7a] sm:$0xff] }
 0x460   : > { %12890 = vst [vmem:[#allocation8_spill] sm:$0xff] %v9963_v1 }
 0x464   : > { %2730 = vrot.lane.b32.xlu0 %v9948_v30, %s8351_s10  ;;  %2726 = vrot.lane.b32.xlu1 %v9950_v39, %s8351_s10  ;;  %v9969_v30 = vld [vmem:[#allocation2 + $0x62] sm:$0xff] }
 0x465   : > { %2722 = vrot.lane.b32.xlu2 %v9956_v41, %s8351_s10  ;;  %12891 = vst [vmem:[#allocation9_spill] sm:$0xff] %v9969_v30 }
 0x466   : > { %v2564_v34 = vpop.permute.xlu2 %2563 }
 0x467   : > { %2638 = vst.msk [vmem:[#allocation3 + $0xb0] sm:$0xff] %vm2615_vm14, %v2564_v34  ;;  %v9976_v34 = vld [vmem:[#allocation2 + $0x9a] sm:$0xff] }
 0x468   : > { %12893 = vst [vmem:[#allocation11_spill] sm:$0xff] %v9976_v34 }
 0x46c   : > { %2736 = vrot.lane.b32.xlu0 %v9961_v13, %s8351_s10  ;;  %2732 = vrot.lane.b32.xlu1 %v9963_v1, %s8351_s10  ;;  %v9982_v13 = vld [vmem:[#allocation2 + $0x82] sm:$0xff] }
 0x46d   : > { %2728 = vrot.lane.b32.xlu2 %v9969_v30, %s8351_s10  ;;  %12894 = vst [vmem:[#allocation12_spill] sm:$0xff] %v9982_v13  ;;  %v9987_v30 = vld [vmem:[#allocation2 + $0xda] sm:$0xff] }
 0x46e   : > { %v2560_v39 = vpop.permute.xlu0 %2559  ;;  %12895 = vst [vmem:[#allocation14_spill] sm:$0xff] %v9987_v30 }
 0x46f   : > { %2636 = vst.msk [vmem:[#allocation3 + $0xa0] sm:$0xff] %vm2615_vm14, %v2560_v39  ;;  %v9989_v39 = vld [vmem:[#allocation2 + $0xc2] sm:$0xff] }
 0x470   : > { %12896 = vst [vmem:[#allocation15_spill] sm:$0xff] %v9989_v39 }
 0x474   : > { %2742 = vrot.lane.b32.xlu0 %v9974_v5, %s8351_s10  ;;  %2738 = vrot.lane.b32.xlu1 %v9976_v34, %s8351_s10  ;;  %v9995_v5 = vld [vmem:[#allocation2 + $0xaa] sm:$0xff] }
 0x475   : > { %2734 = vrot.lane.b32.xlu2 %v9982_v13, %s8351_s10  ;;  %12897 = vst [vmem:[#allocation17_spill] sm:$0xff] %v9995_v5  ;;  %v10000_v13 = vld [vmem:[#allocation2 + $0xfa] sm:$0xff] }
 0x476   : > { %v2562_v1 = vpop.permute.xlu1 %2561  ;;  %12898 = vst [vmem:[#allocation18_spill] sm:$0xff] %v10000_v13 }
 0x477   : > { %2637 = vst.msk [vmem:[#allocation3 + $0xa8] sm:$0xff] %vm2615_vm14, %v2562_v1  ;;  %v10002_v1 = vld [vmem:[#allocation2 + $0xe2] sm:$0xff] }
 0x478   : > { %12899 = vst [vmem:[#allocation19_spill] sm:$0xff] %v10002_v1 }
 0x47c   : > { %2748 = vrot.lane.b32.xlu0 %v9987_v30, %s8351_s10  ;;  %2744 = vrot.lane.b32.xlu1 %v9989_v39, %s8351_s10  ;;  %v10008_v30 = vld [vmem:[#allocation2 + $0xca] sm:$0xff] }
 0x47d   : > { %2740 = vrot.lane.b32.xlu2 %v9995_v5, %s8351_s10  ;;  %12900 = vst [vmem:[#allocation20_spill] sm:$0xff] %v10008_v30  ;;  %v10013_v5 = vld [vmem:[#allocation2 + $0x122] sm:$0xff] }
 0x47e   : > { %v2570_v34 = vpop.permute.xlu2 %2569  ;;  %12901 = vst [vmem:[#allocation21_spill] sm:$0xff] %v10013_v5 }
 0x47f   : > { %2641 = vst.msk [vmem:[#allocation3 + $0xc8] sm:$0xff] %vm2615_vm14, %v2570_v34  ;;  %v10015_v34 = vld [vmem:[#allocation2 + $0x10a] sm:$0xff] }
 0x480   : > { %12902 = vst [vmem:[#allocation22_spill] sm:$0xff] %v10015_v34 }
 0x484   : > { %2754 = vrot.lane.b32.xlu0 %v10000_v13, %s8351_s10  ;;  %2750 = vrot.lane.b32.xlu1 %v10002_v1, %s8351_s10  ;;  %v10021_v13 = vld [vmem:[#allocation2 + $0xf2] sm:$0xff] }
 0x485   : > { %2746 = vrot.lane.b32.xlu2 %v10008_v30, %s8351_s10  ;;  %12903 = vst [vmem:[#allocation23_spill] sm:$0xff] %v10021_v13  ;;  %v10026_v30 = vld [vmem:[#allocation2 + $0x142] sm:$0xff] }
 0x486   : > { %v2566_v39 = vpop.permute.xlu0 %2565  ;;  %12904 = vst [vmem:[#allocation24_spill] sm:$0xff] %v10026_v30 }
 0x487   : > { %2639 = vst.msk [vmem:[#allocation3 + $0xb8] sm:$0xff] %vm2615_vm14, %v2566_v39  ;;  %v10028_v39 = vld [vmem:[#allocation2 + $0x12a] sm:$0xff] }
 0x488   : > { %12905 = vst [vmem:[#allocation25_spill] sm:$0xff] %v10028_v39 }
 0x48c   : > { %2760 = vrot.lane.b32.xlu0 %v10013_v5, %s8351_s10  ;;  %2756 = vrot.lane.b32.xlu1 %v10015_v34, %s8351_s10  ;;  %v10034_v5 = vld [vmem:[#allocation2 + $0x112] sm:$0xff] }
 0x48d   : > { %2752 = vrot.lane.b32.xlu2 %v10021_v13, %s8351_s10  ;;  %12906 = vst [vmem:[#allocation26_spill] sm:$0xff] %v10034_v5  ;;  %v10039_v13 = vld [vmem:[#allocation2 + $0x16a] sm:$0xff] }
 0x48e   : > { %v2568_v1 = vpop.permute.xlu1 %2567 }
 0x48f   : > { %2640 = vst.msk [vmem:[#allocation3 + $0xc0] sm:$0xff] %vm2615_vm14, %v2568_v1  ;;  %v10041_v1 = vld [vmem:[#allocation2 + $0x152] sm:$0xff] }
 0x490   : > { %12907 = vst [vmem:[#allocation27_spill] sm:$0xff] %v10041_v1 }
 0x494   : > { %2766 = vrot.lane.b32.xlu0 %v10026_v30, %s8351_s10  ;;  %2762 = vrot.lane.b32.xlu1 %v10028_v39, %s8351_s10  ;;  %v10047_v30 = vld [vmem:[#allocation2 + $0x13a] sm:$0xff] }
 0x495   : > { %2758 = vrot.lane.b32.xlu2 %v10034_v5, %s8351_s10  ;;  %v10052_v5 = vld [vmem:[#allocation2 + $0x172] sm:$0xff] }
 0x496   : > { %v2576_v34 = vpop.permute.xlu2 %2575 }
 0x497   : > { %2644 = vst.msk [vmem:[#allocation3 + $0xe0] sm:$0xff] %vm2615_vm14, %v2576_v34  ;;  %v10058_v34 = vld [vmem:[#allocation2 + $0x15a] sm:$0xff] }
 0x49c   : > { %2772 = vrot.lane.b32.xlu0 %v10039_v13, %s8351_s10  ;;  %2768 = vrot.lane.b32.xlu1 %v10041_v1, %s8351_s10 }
 0x49d   : > { %2764 = vrot.lane.b32.xlu2 %v10047_v30, %s8351_s10 }
 0x49e   : > { %v2572_v39 = vpop.permute.xlu0 %2571 }
 0x49f   : > { %2642 = vst.msk [vmem:[#allocation3 + $0xd0] sm:$0xff] %vm2615_vm14, %v2572_v39 }
 0x4a4   : > { %2907 = vrot.lane.b32.xlu0 %v9611_v55, %s8353_s12  ;;  %2774 = vrot.lane.b32.xlu1 %v10052_v5, %s8351_s10 }
 0x4a5   : > { %2770 = vrot.lane.b32.xlu2 %v10058_v34, %s8351_s10 }
 0x4a6   : > { %v2574_v1 = vpop.permute.xlu1 %2573 }
 0x4a7   : > { %2643 = vst.msk [vmem:[#allocation3 + $0xd8] sm:$0xff] %vm2615_vm14, %v2574_v1 }
 0x4ac   : > { %2913 = vrot.lane.b32.xlu0 %v9638_v7, %s8353_s12  ;;  %2909 = vrot.lane.b32.xlu1 %v9620_v36, %s8353_s12 }
 0x4ad   : > { %2905 = vrot.lane.b32.xlu2 %v9602_v16, %s8353_s12  ;;  %v2320_v16 = vpop.f32.mrf.mxu0 }
 0x4ae   : > { %v2321_v39 = vadd.f32 %v9593_v25, %v2320_v16 }
 0x4af   : > { %v2582_v55 = vpop.permute.xlu2 %2581 }
 0x4b0   : > { %2647 = vst.msk [vmem:[#allocation3 + $0xf8] sm:$0xff] %vm2615_vm14, %v2582_v55 }
 0x4b4   : > { %2919 = vrot.lane.b32.xlu0 %v9673_v19, %s8353_s12  ;;  %2915 = vrot.lane.b32.xlu1 %v9649_v2, %s8353_s12  ;;  %v2356_v2 = vmax.f32 %v2321_v39, 0.0 }
 0x4b5   : > { %2911 = vrot.lane.b32.xlu2 %v9629_v24, %s8353_s12  ;;  %v2323_v55 = vpop.f32.mrf.mxu0 }
 0x4b6   : > { %v2578_v7 = vpop.permute.xlu0 %2577  ;;  %2389 = vst.msk [vmem:[#allocation2 + $0x181] sm:$0xff] %vm252_vm0, %v2356_v2 }
 0x4b7   : > { %2645 = vst.msk [vmem:[#allocation3 + $0xe8] sm:$0xff] %vm2615_vm14, %v2578_v7  ;;  %v2717_v36 = vpop.permute.xlu2 %2716 }
 0x4b8   : > { %2811 = vst.msk [vmem:[#allocation3 + $0x10] sm:$0xff] %vm2808_vm15, %v2717_v36 }
 0x4bc   : > { %2925 = vrot.lane.b32.xlu0 %v9711_v59, %s8353_s12  ;;  %2921 = vrot.lane.b32.xlu1 %v9686_v33, %s8353_s12  ;;  %v2324_v59 = vadd.f32 %v9593_v25, %v2323_v55  ;;  %v3034_v55 = vld [vmem:[#allocation2 + $0x19] sm:$0xff] }
 0x4bd   : > { %2917 = vrot.lane.b32.xlu2 %v9661_v0, %s8353_s12 }
 0x4be   : > { %v2580_v24 = vpop.permute.xlu1 %2579  ;;  %v2713_v19 = vpop.permute.xlu0 %2712  ;;  %v2357_v0 = vmax.f32 %v2324_v59, 0.0  ;;  %v10161_v59 = vld [vmem:[#allocation2 + $0x180] sm:$0xff] }
 0x4bf   : > { %2646 = vst.msk [vmem:[#allocation3 + $0xf0] sm:$0xff] %vm2615_vm14, %v2580_v24  ;;  %v2723_v1 = vpop.permute.xlu2 %2722 }
 0x4c0   : > { %2809 = vst.msk [vmem:[#allocation3] sm:$0xff] %vm2808_vm15, %v2713_v19 }
 0x4c1   : > { %2814 = vst.msk [vmem:[#allocation3 + $0x28] sm:$0xff] %vm2808_vm15, %v2723_v1  ;;  %v10156_v1 = vld [vmem:[#allocation2 + $0x31] sm:$0xff] }
 0x4c2   : > { %2390 = vst.msk [vmem:[#allocation2 + $0x189] sm:$0xff] %vm252_vm0, %v2357_v0 }
 0x4c4   : > { %2931 = vrot.lane.b32.xlu0 %v9745_v10, %s8353_s12  ;;  %2927 = vrot.lane.b32.xlu1 %v9724_v54, %s8353_s12 }
 0x4c5   : > { %2923 = vrot.lane.b32.xlu2 %v9699_v26, %s8353_s12 }
 0x4c6   : > { %v2715_v33 = vpop.permute.xlu1 %2714  ;;  %v2719_v7 = vpop.permute.xlu0 %2718 }
 0x4c7   : > { %2810 = vst.msk [vmem:[#allocation3 + $0x8] sm:$0xff] %vm2808_vm15, %v2715_v33  ;;  %v2729_v36 = vpop.permute.xlu2 %2728 }
 0x4c8   : > { %2812 = vst.msk [vmem:[#allocation3 + $0x18] sm:$0xff] %vm2808_vm15, %v2719_v7 }
 0x4c9   : > { %2817 = vst.msk [vmem:[#allocation3 + $0x40] sm:$0xff] %vm2808_vm15, %v2729_v36  ;;  %v10145_v2 = vld [vmem:[#allocation2 + $0x188] sm:$0xff]  ;;  %v10168_v36 = vld [vmem:[#allocation2 + $0x39] sm:$0xff] }
 0x4cc   : > { %2937 = vrot.lane.b32.xlu0 %v9778_v9, %s8353_s12  ;;  %2933 = vrot.lane.b32.xlu1 %v9756_v6, %s8353_s12 }
 0x4cd   : > { %2929 = vrot.lane.b32.xlu2 %v9735_v23, %s8353_s12 }
 0x4ce   : > { %v2725_v25 = vpop.permute.xlu0 %2724  ;;  %v2721_v26 = vpop.permute.xlu1 %2720 }
 0x4cf   : > { %2815 = vst.msk [vmem:[#allocation3 + $0x30] sm:$0xff] %vm2808_vm15, %v2725_v25  ;;  %v2735_v54 = vpop.permute.xlu2 %2734  ;;  %v3035_v25 = vld [vmem:[#allocation2 + $0x21] sm:$0xff] }
 0x4d0   : > { %2813 = vst.msk [vmem:[#allocation3 + $0x20] sm:$0xff] %vm2808_vm15, %v2721_v26 }
 0x4d1   : > { %2820 = vst.msk [vmem:[#allocation3 + $0x58] sm:$0xff] %vm2808_vm15, %v2735_v54 }
 0x4d4   : > { %2943 = vrot.lane.b32.xlu0 %v9811_v20, %s8353_s12  ;;  %2939 = vrot.lane.b32.xlu1 %v9789_v57, %s8353_s12 }
 0x4d5   : > { %2935 = vrot.lane.b32.xlu2 %v9767_v62, %s8353_s12 }
 0x4d6   : > { %v2731_v10 = vpop.permute.xlu0 %2730  ;;  %v2727_v23 = vpop.permute.xlu1 %2726 }
 0x4d7   : > { %2818 = vst.msk [vmem:[#allocation3 + $0x48] sm:$0xff] %vm2808_vm15, %v2731_v10  ;;  %v2741_v6 = vpop.permute.xlu2 %2740 }
 0x4d8   : > { %2816 = vst.msk [vmem:[#allocation3 + $0x38] sm:$0xff] %vm2808_vm15, %v2727_v23 }
 0x4d9   : > { %2823 = vst.msk [vmem:[#allocation3 + $0x70] sm:$0xff] %vm2808_vm15, %v2741_v6 }
 0x4dc   : > { %2949 = vrot.lane.b32.xlu0 %v9844_v28, %s8353_s12  ;;  %2945 = vrot.lane.b32.xlu1 %v9822_v15, %s8353_s12 }
 0x4dd   : > { %2941 = vrot.lane.b32.xlu2 %v9800_v29, %s8353_s12 }
 0x4de   : > { %v2737_v9 = vpop.permute.xlu0 %2736  ;;  %v2733_v62 = vpop.permute.xlu1 %2732 }
 0x4df   : > { %2821 = vst.msk [vmem:[#allocation3 + $0x60] sm:$0xff] %vm2808_vm15, %v2737_v9  ;;  %v2747_v57 = vpop.permute.xlu2 %2746 }
 0x4e0   : > { %2819 = vst.msk [vmem:[#allocation3 + $0x50] sm:$0xff] %vm2808_vm15, %v2733_v62 }
 0x4e1   : > { %2826 = vst.msk [vmem:[#allocation3 + $0x88] sm:$0xff] %vm2808_vm15, %v2747_v57  ;;  %v10252_v57 = vld [vmem:[#allocation2 + $0x181] sm:$0xff] }
 0x4e4   : > { %2955 = vrot.lane.b32.xlu0 %v9881_v44, %s8353_s12  ;;  %2951 = vrot.lane.b32.xlu1 %v9855_v63, %s8353_s12 }
 0x4e5   : > { %2947 = vrot.lane.b32.xlu2 %v9833_v12, %s8353_s12 }
 0x4e6   : > { %v2743_v20 = vpop.permute.xlu0 %2742  ;;  %v2739_v29 = vpop.permute.xlu1 %2738 }
 0x4e7   : > { %2824 = vst.msk [vmem:[#allocation3 + $0x78] sm:$0xff] %vm2808_vm15, %v2743_v20  ;;  %v2753_v15 = vpop.permute.xlu2 %2752  ;;  %v10267_v20 = vld [vmem:[#allocation2 + $0x189] sm:$0xff] }
 0x4e8   : > { %2822 = vst.msk [vmem:[#allocation3 + $0x68] sm:$0xff] %vm2808_vm15, %v2739_v29 }
 0x4e9   : > { %2829 = vst.msk [vmem:[#allocation3 + $0xa0] sm:$0xff] %vm2808_vm15, %v2753_v15 }
 0x4ec   : > { %2961 = vrot.lane.b32.xlu0 %v9912_v51, %s8353_s12  ;;  %2957 = vrot.lane.b32.xlu1 %v9890_v11, %s8353_s12 }
 0x4ed   : > { %2953 = vrot.lane.b32.xlu2 %v9866_v53, %s8353_s12 }
 0x4ee   : > { %v2749_v63 = vpop.permute.xlu0 %2748  ;;  %v2745_v16 = vpop.permute.xlu1 %2744 }
 0x4ef   : > { %2827 = vst.msk [vmem:[#allocation3 + $0x90] sm:$0xff] %vm2808_vm15, %v2749_v63  ;;  %v2759_v39 = vpop.permute.xlu2 %2758  ;;  %v12909_v63 = vld [vmem:[#allocation9_spill] sm:$0xff] }
 0x4f0   : > { %2825 = vst.msk [vmem:[#allocation3 + $0x80] sm:$0xff] %vm2808_vm15, %v2745_v16  ;;  %v12911_v16 = vld [vmem:[#allocation5_spill] sm:$0xff] }
 0x4f1   : > { %2832 = vst.msk [vmem:[#allocation3 + $0xb8] sm:$0xff] %vm2808_vm15, %v2759_v39 }
 0x4f4   : > { %2967 = vrot.lane.b32.xlu0 %v10145_v2, %s8353_s12  ;;  %2963 = vrot.lane.b32.xlu1 %v9928_v22, %s8353_s12 }
 0x4f5   : > { %2959 = vrot.lane.b32.xlu2 %v9904_v27, %s8353_s12 }
 0x4f6   : > { %v2755_v11 = vpop.permute.xlu0 %2754  ;;  %v2751_v24 = vpop.permute.xlu1 %2750 }
 0x4f7   : > { %2830 = vst.msk [vmem:[#allocation3 + $0xa8] sm:$0xff] %vm2808_vm15, %v2755_v11  ;;  %v2765_v19 = vpop.permute.xlu2 %2764 }
 0x4f8   : > { %2828 = vst.msk [vmem:[#allocation3 + $0x98] sm:$0xff] %vm2808_vm15, %v2751_v24 }
 0x4f9   : > { %2835 = vst.msk [vmem:[#allocation3 + $0xd0] sm:$0xff] %vm2808_vm15, %v2765_v19  ;;  %v12912_v19 = vld [vmem:[#allocation12_spill] sm:$0xff] }
 0x4fc   : > { %3102 = vrot.lane.b32.xlu0 %v10156_v1, %s8355_s14  ;;  %3098 = vrot.lane.b32.xlu1 %v3034_v55, %s8355_s14  ;;  %v12913_v55 = vld [vmem:[#allocation6_spill] sm:$0xff] }
 0x4fd   : > { %2965 = vrot.lane.b32.xlu2 %v10161_v59, %s8353_s12 }
 0x4fe   : > { %v2761_v0 = vpop.permute.xlu0 %2760  ;;  %v2757_v33 = vpop.permute.xlu1 %2756 }
 0x4ff   : > { %2833 = vst.msk [vmem:[#allocation3 + $0xc0] sm:$0xff] %vm2808_vm15, %v2761_v0  ;;  %v2771_v7 = vpop.permute.xlu2 %2770  ;;  %v12914_v0 = vld [vmem:[#allocation16_spill] sm:$0xff] }
 0x500   : > { %2831 = vst.msk [vmem:[#allocation3 + $0xb0] sm:$0xff] %vm2808_vm15, %v2757_v33 }
 0x501   : > { %2838 = vst.msk [vmem:[#allocation3 + $0xe8] sm:$0xff] %vm2808_vm15, %v2771_v7 }
 0x504   : > { %3108 = vrot.lane.b32.xlu0 %v9647_v46, %s8355_s14  ;;  %3104 = vrot.lane.b32.xlu1 %v10168_v36, %s8355_s14  ;;  %v10182_v46 = vld [vmem:[#allocation2 + $0x49] sm:$0xff] }
 0x505   : > { %3100 = vrot.lane.b32.xlu2 %v3035_v25, %s8355_s14 }
 0x506   : > { %v2767_v26 = vpop.permute.xlu0 %2766  ;;  %v2763_v54 = vpop.permute.xlu1 %2762 }
 0x507   : > { %2836 = vst.msk [vmem:[#allocation3 + $0xd8] sm:$0xff] %vm2808_vm15, %v2767_v26  ;;  %v2906_v10 = vpop.permute.xlu2 %2905  ;;  %v12915_v26 = vld [vmem:[#allocation17_spill] sm:$0xff] }
 0x508   : > { %2834 = vst.msk [vmem:[#allocation3 + $0xc8] sm:$0xff] %vm2808_vm15, %v2763_v54  ;;  %v12916_v54 = vld [vmem:[#allocation7_spill] sm:$0xff] }
 0x509   : > { %3002 = vst.msk [vmem:[#allocation3] sm:$0xff] %vm3001_vm1, %v2906_v10  ;;  %v12917_v10 = vld [vmem:[#allocation8_spill] sm:$0xff] }
 0x50c   : > { %3114 = vrot.lane.b32.xlu0 %v9684_v47, %s8355_s14  ;;  %3110 = vrot.lane.b32.xlu1 %v9659_v61, %s8355_s14 }
 0x50d   : > { %3106 = vrot.lane.b32.xlu2 %v10182_v46, %s8355_s14 }
 0x50e   : > { %v2773_v23 = vpop.permute.xlu0 %2772  ;;  %v2769_v6 = vpop.permute.xlu1 %2768 }
 0x50f   : > { %2839 = vst.msk [vmem:[#allocation3 + $0xf0] sm:$0xff] %vm2808_vm15, %v2773_v23  ;;  %v2912_v9 = vpop.permute.xlu2 %2911 }
 0x510   : > { %2837 = vst.msk [vmem:[#allocation3 + $0xe0] sm:$0xff] %vm2808_vm15, %v2769_v6 }
 0x511   : > { %3005 = vst.msk [vmem:[#allocation3 + $0x18] sm:$0xff] %vm3001_vm1, %v2912_v9 }
 0x514   : > { %3120 = vrot.lane.b32.xlu0 %v9722_v40, %s8355_s14  ;;  %3116 = vrot.lane.b32.xlu1 %v9697_v8, %s8355_s14 }
 0x515   : > { %3112 = vrot.lane.b32.xlu2 %v9671_v56, %s8355_s14 }
 0x516   : > { %v2908_v61 = vpop.permute.xlu0 %2907  ;;  %v2775_v47 = vpop.permute.xlu1 %2774 }
 0x517   : > { %3003 = vst.msk [vmem:[#allocation3 + $0x8] sm:$0xff] %vm3001_vm1, %v2908_v61  ;;  %v2918_v62 = vpop.permute.xlu2 %2917  ;;  %v12918_v61 = vld [vmem:[#allocation20_spill] sm:$0xff] }
 0x518   : > { %2840 = vst.msk [vmem:[#allocation3 + $0xf8] sm:$0xff] %vm2808_vm15, %v2775_v47  ;;  %v12919_v47 = vld [vmem:[#allocation10_spill] sm:$0xff] }
 0x519   : > { %3008 = vst.msk [vmem:[#allocation3 + $0x30] sm:$0xff] %vm3001_vm1, %v2918_v62  ;;  %v12920_v62 = vld [vmem:[#allocation11_spill] sm:$0xff] }
 0x51c   : > { %3126 = vrot.lane.b32.xlu0 %v9754_v49, %s8355_s14  ;;  %3122 = vrot.lane.b32.xlu1 %v9733_v18, %s8355_s14 }
 0x51d   : > { %3118 = vrot.lane.b32.xlu2 %v9709_v60, %s8355_s14 }
 0x51e   : > { %v2914_v8 = vpop.permute.xlu0 %2913  ;;  %v2910_v56 = vpop.permute.xlu1 %2909 }
 0x51f   : > { %3006 = vst.msk [vmem:[#allocation3 + $0x20] sm:$0xff] %vm3001_vm1, %v2914_v8  ;;  %v2924_v40 = vpop.permute.xlu2 %2923 }
 0x520   : > { %3004 = vst.msk [vmem:[#allocation3 + $0x10] sm:$0xff] %vm3001_vm1, %v2910_v56 }
 0x521   : > { %3011 = vst.msk [vmem:[#allocation3 + $0x48] sm:$0xff] %vm3001_vm1, %v2924_v40 }
 0x524   : > { %3132 = vrot.lane.b32.xlu0 %v9787_v35, %s8355_s14  ;;  %3128 = vrot.lane.b32.xlu1 %v9765_v45, %s8355_s14 }
 0x525   : > { %3124 = vrot.lane.b32.xlu2 %v9743_v58, %s8355_s14 }
 0x526   : > { %v2920_v18 = vpop.permute.xlu0 %2919  ;;  %v2916_v60 = vpop.permute.xlu1 %2915 }
 0x527   : > { %3009 = vst.msk [vmem:[#allocation3 + $0x38] sm:$0xff] %vm3001_vm1, %v2920_v18  ;;  %v2930_v49 = vpop.permute.xlu2 %2929  ;;  %v12921_v18 = vld [vmem:[#allocation23_spill] sm:$0xff] }
 0x528   : > { %3007 = vst.msk [vmem:[#allocation3 + $0x28] sm:$0xff] %vm3001_vm1, %v2916_v60  ;;  %v12922_v60 = vld [vmem:[#allocation14_spill] sm:$0xff] }
 0x529   : > { %3014 = vst.msk [vmem:[#allocation3 + $0x60] sm:$0xff] %vm3001_vm1, %v2930_v49  ;;  %v12923_v49 = vld [vmem:[#allocation15_spill] sm:$0xff] }
 0x52c   : > { %3138 = vrot.lane.b32.xlu0 %v9820_v32, %s8355_s14  ;;  %3134 = vrot.lane.b32.xlu1 %v9798_v17, %s8355_s14 }
 0x52d   : > { %3130 = vrot.lane.b32.xlu2 %v9776_v52, %s8355_s14 }
 0x52e   : > { %v2926_v45 = vpop.permute.xlu0 %2925  ;;  %v2922_v58 = vpop.permute.xlu1 %2921 }
 0x52f   : > { %3012 = vst.msk [vmem:[#allocation3 + $0x50] sm:$0xff] %vm3001_vm1, %v2926_v45  ;;  %v2936_v35 = vpop.permute.xlu2 %2935 }
 0x530   : > { %3010 = vst.msk [vmem:[#allocation3 + $0x40] sm:$0xff] %vm3001_vm1, %v2922_v58 }
 0x531   : > { %3017 = vst.msk [vmem:[#allocation3 + $0x78] sm:$0xff] %vm3001_vm1, %v2936_v35 }
 0x534   : > { %3144 = vrot.lane.b32.xlu0 %v9853_v42, %s8355_s14  ;;  %3140 = vrot.lane.b32.xlu1 %v9831_v37, %s8355_s14 }
 0x535   : > { %3136 = vrot.lane.b32.xlu2 %v9809_v38, %s8355_s14 }
 0x536   : > { %v2932_v17 = vpop.permute.xlu0 %2931  ;;  %v2928_v52 = vpop.permute.xlu1 %2927 }
 0x537   : > { %3015 = vst.msk [vmem:[#allocation3 + $0x68] sm:$0xff] %vm3001_vm1, %v2932_v17  ;;  %v2942_v32 = vpop.permute.xlu2 %2941  ;;  %v12924_v17 = vld [vmem:[#allocation26_spill] sm:$0xff] }
 0x538   : > { %3013 = vst.msk [vmem:[#allocation3 + $0x58] sm:$0xff] %vm3001_vm1, %v2928_v52  ;;  %v12925_v52 = vld [vmem:[#allocation18_spill] sm:$0xff] }
 0x539   : > { %3020 = vst.msk [vmem:[#allocation3 + $0x90] sm:$0xff] %vm3001_vm1, %v2942_v32  ;;  %v12926_v32 = vld [vmem:[#allocation19_spill] sm:$0xff] }
 0x53c   : > { %3150 = vrot.lane.b32.xlu0 %v9888_v21, %s8355_s14  ;;  %3146 = vrot.lane.b32.xlu1 %v9864_v4, %s8355_s14 }
 0x53d   : > { %3142 = vrot.lane.b32.xlu2 %v9842_v48, %s8355_s14 }
 0x53e   : > { %v2938_v37 = vpop.permute.xlu0 %2937  ;;  %v2934_v38 = vpop.permute.xlu1 %2933 }
 0x53f   : > { %3018 = vst.msk [vmem:[#allocation3 + $0x80] sm:$0xff] %vm3001_vm1, %v2938_v37  ;;  %v2948_v42 = vpop.permute.xlu2 %2947 }
 0x540   : > { %3016 = vst.msk [vmem:[#allocation3 + $0x70] sm:$0xff] %vm3001_vm1, %v2934_v38 }
 0x541   : > { %3023 = vst.msk [vmem:[#allocation3 + $0xa8] sm:$0xff] %vm3001_vm1, %v2948_v42 }
 0x544   : > { %3156 = vrot.lane.b32.xlu0 %v9923_v43, %s8355_s14  ;;  %3152 = vrot.lane.b32.xlu1 %v9899_v50, %s8355_s14 }
 0x545   : > { %3148 = vrot.lane.b32.xlu2 %v9876_v3, %s8355_s14 }
 0x546   : > { %v2944_v4 = vpop.permute.xlu0 %2943  ;;  %v2940_v48 = vpop.permute.xlu1 %2939 }
 0x547   : > { %3021 = vst.msk [vmem:[#allocation3 + $0x98] sm:$0xff] %vm3001_vm1, %v2944_v4  ;;  %v2954_v21 = vpop.permute.xlu2 %2953  ;;  %v12927_v4 = vld [vmem:[#allocation21_spill] sm:$0xff] }
 0x548   : > { %3019 = vst.msk [vmem:[#allocation3 + $0x88] sm:$0xff] %vm3001_vm1, %v2940_v48  ;;  %v12928_v48 = vld [vmem:[#allocation22_spill] sm:$0xff] }
 0x549   : > { %3026 = vst.msk [vmem:[#allocation3 + $0xc0] sm:$0xff] %vm3001_vm1, %v2954_v21 }
 0x54c   : > { %3291 = vrot.lane.b32.xlu0 %v9943_v31, %s8356_s30  ;;  %3158 = vrot.lane.b32.xlu1 %v10252_v57, %s8355_s14  ;;  %v12908_v31 = vld [vmem:[#allocation4_spill] sm:$0xff] }
 0x54d   : > { %3154 = vrot.lane.b32.xlu2 %v9910_v14, %s8355_s14 }
 0x54e   : > { %v2950_v3 = vpop.permute.xlu0 %2949  ;;  %v2946_v50 = vpop.permute.xlu1 %2945 }
 0x54f   : > { %3024 = vst.msk [vmem:[#allocation3 + $0xb0] sm:$0xff] %vm3001_vm1, %v2950_v3  ;;  %v2960_v43 = vpop.permute.xlu2 %2959 }
 0x550   : > { %3022 = vst.msk [vmem:[#allocation3 + $0xa0] sm:$0xff] %vm3001_vm1, %v2946_v50 }
 0x551   : > { %3029 = vst.msk [vmem:[#allocation3 + $0xd8] sm:$0xff] %vm3001_vm1, %v2960_v43  ;;  %v12930_v43 = vld [vmem:[#allocation25_spill] sm:$0xff] }
 0x554   : > { %3297 = vrot.lane.b32.xlu0 %v9956_v41, %s8356_s30  ;;  %3293 = vrot.lane.b32.xlu1 %v12908_v31, %s8356_s30  ;;  %v12910_v41 = vld [vmem:[#allocation13_spill] sm:$0xff] }
 0x555   : > { %3160 = vrot.lane.b32.xlu2 %v10267_v20, %s8355_s14 }
 0x556   : > { %v2956_v14 = vpop.permute.xlu0 %2955  ;;  %v2952_v29 = vpop.permute.xlu1 %2951 }
 0x557   : > { %3027 = vst.msk [vmem:[#allocation3 + $0xc8] sm:$0xff] %vm3001_vm1, %v2956_v14  ;;  %v2966_v15 = vpop.permute.xlu2 %2965 }
 0x558   : > { %3025 = vst.msk [vmem:[#allocation3 + $0xb8] sm:$0xff] %vm3001_vm1, %v2952_v29 }
 0x559   : > { %3032 = vst.msk [vmem:[#allocation3 + $0xf0] sm:$0xff] %vm3001_vm1, %v2966_v15  ;;  %v10346_v15 = vld [vmem:[#allocation2 + $0x182] sm:$0xff] }
 0x55c   : > { %3303 = vrot.lane.b32.xlu0 %v12909_v63, %s8356_s30  ;;  %3299 = vrot.lane.b32.xlu1 %v12910_v41, %s8356_s30 }
 0x55d   : > { %3295 = vrot.lane.b32.xlu2 %v12911_v16, %s8356_s30 }
 0x55e   : > { %v2962_v39 = vpop.permute.xlu0 %2961  ;;  %v2958_v11 = vpop.permute.xlu1 %2957 }
 0x55f   : > { %3030 = vst.msk [vmem:[#allocation3 + $0xe0] sm:$0xff] %vm3001_vm1, %v2962_v39  ;;  %v3101_v24 = vpop.permute.xlu2 %3100  ;;  %v3421_v39 = vld [vmem:[#allocation2 + $0x38] sm:$0xff] }
 0x560   : > { %3028 = vst.msk [vmem:[#allocation3 + $0xd0] sm:$0xff] %vm3001_vm1, %v2958_v11  ;;  %v10357_v11 = vld [vmem:[#allocation2 + $0x18a] sm:$0xff] }
 0x561   : > { %3196 = vst.msk [vmem:[#allocation3 + $0x8] sm:$0xff] %vm3194_vm3, %v3101_v24 }
 0x564   : > { %3309 = vrot.lane.b32.xlu0 %v12912_v19, %s8356_s30  ;;  %3305 = vrot.lane.b32.xlu1 %v12913_v55, %s8356_s30  ;;  %v3424_v55 = vld [vmem:[#allocation2 + $0x60] sm:$0xff] }
 0x565   : > { %3301 = vrot.lane.b32.xlu2 %v12914_v0, %s8356_s30  ;;  %v3422_v0 = vld [vmem:[#allocation2 + $0x48] sm:$0xff] }
 0x566   : > { %v2968_v33 = vpop.permute.xlu0 %2967  ;;  %v2964_v7 = vpop.permute.xlu1 %2963 }
 0x567   : > { %3033 = vst.msk [vmem:[#allocation3 + $0xf8] sm:$0xff] %vm3001_vm1, %v2968_v33  ;;  %v3107_v25 = vpop.permute.xlu2 %3106  ;;  %v3420_v33 = vld [vmem:[#allocation2 + $0x30] sm:$0xff] }
 0x568   : > { %3031 = vst.msk [vmem:[#allocation3 + $0xe8] sm:$0xff] %vm3001_vm1, %v2964_v7 }
 0x569   : > { %3199 = vst.msk [vmem:[#allocation3 + $0x20] sm:$0xff] %vm3194_vm3, %v3107_v25 }
 0x56c   : > { %3315 = vrot.lane.b32.xlu0 %v12915_v26, %s8356_s30  ;;  %3311 = vrot.lane.b32.xlu1 %v12916_v54, %s8356_s30  ;;  %v3427_v26 = vld [vmem:[#allocation2 + $0x80] sm:$0xff]  ;;  %v3425_v54 = vld [vmem:[#allocation2 + $0x68] sm:$0xff] }
 0x56d   : > { %3307 = vrot.lane.b32.xlu2 %v12917_v10, %s8356_s30  ;;  %v3423_v10 = vld [vmem:[#allocation2 + $0x50] sm:$0xff] }
 0x56e   : > { %v3103_v23 = vpop.permute.xlu0 %3102  ;;  %v3099_v6 = vpop.permute.xlu1 %3098 }
 0x56f   : > { %3197 = vst.msk [vmem:[#allocation3 + $0x10] sm:$0xff] %vm3194_vm3, %v3103_v23  ;;  %v3113_v9 = vpop.permute.xlu2 %3112 }
 0x570   : > { %3195 = vst.msk [vmem:[#allocation3] sm:$0xff] %vm3194_vm3, %v3099_v6 }
 0x571   : > { %3202 = vst.msk [vmem:[#allocation3 + $0x38] sm:$0xff] %vm3194_vm3, %v3113_v9 }
 0x574   : > { %3321 = vrot.lane.b32.xlu0 %v12918_v61, %s8356_s30  ;;  %3317 = vrot.lane.b32.xlu1 %v12919_v47, %s8356_s30  ;;  %v3430_v61 = vld [vmem:[#allocation2 + $0xa8] sm:$0xff]  ;;  %v3428_v47 = vld [vmem:[#allocation2 + $0x90] sm:$0xff] }
 0x575   : > { %3313 = vrot.lane.b32.xlu2 %v12920_v62, %s8356_s30  ;;  %v3426_v62 = vld [vmem:[#allocation2 + $0x78] sm:$0xff] }
 0x576   : > { %v3109_v8 = vpop.permute.xlu0 %3108  ;;  %v3105_v56 = vpop.permute.xlu1 %3104 }
 0x577   : > { %3200 = vst.msk [vmem:[#allocation3 + $0x28] sm:$0xff] %vm3194_vm3, %v3109_v8  ;;  %v3119_v40 = vpop.permute.xlu2 %3118 }
 0x578   : > { %3198 = vst.msk [vmem:[#allocation3 + $0x18] sm:$0xff] %vm3194_vm3, %v3105_v56 }
 0x579   : > { %3205 = vst.msk [vmem:[#allocation3 + $0x50] sm:$0xff] %vm3194_vm3, %v3119_v40 }
 0x57c   : > { %3327 = vrot.lane.b32.xlu0 %v12921_v18, %s8356_s30  ;;  %3323 = vrot.lane.b32.xlu1 %v12922_v60, %s8356_s30  ;;  %v3433_v18 = vld [vmem:[#allocation2 + $0xc8] sm:$0xff]  ;;  %v3431_v60 = vld [vmem:[#allocation2 + $0xb0] sm:$0xff] }
 0x57d   : > { %3319 = vrot.lane.b32.xlu2 %v12923_v49, %s8356_s30  ;;  %v3429_v49 = vld [vmem:[#allocation2 + $0x98] sm:$0xff] }
 0x57e   : > { %v3115_v45 = vpop.permute.xlu0 %3114  ;;  %v3111_v58 = vpop.permute.xlu1 %3110 }
 0x57f   : > { %3203 = vst.msk [vmem:[#allocation3 + $0x40] sm:$0xff] %vm3194_vm3, %v3115_v45  ;;  %v3125_v35 = vpop.permute.xlu2 %3124 }
 0x580   : > { %3201 = vst.msk [vmem:[#allocation3 + $0x30] sm:$0xff] %vm3194_vm3, %v3111_v58 }
 0x581   : > { %3208 = vst.msk [vmem:[#allocation3 + $0x68] sm:$0xff] %vm3194_vm3, %v3125_v35 }
 0x584   : > { %3333 = vrot.lane.b32.xlu0 %v12924_v17, %s8356_s30  ;;  %3329 = vrot.lane.b32.xlu1 %v12925_v52, %s8356_s30  ;;  %v3436_v17 = vld [vmem:[#allocation2 + $0xf0] sm:$0xff]  ;;  %v3434_v52 = vld [vmem:[#allocation2 + $0xd8] sm:$0xff] }
 0x585   : > { %3325 = vrot.lane.b32.xlu2 %v12926_v32, %s8356_s30  ;;  %v3432_v32 = vld [vmem:[#allocation2 + $0xc0] sm:$0xff] }
 0x586   : > { %v3121_v37 = vpop.permute.xlu0 %3120  ;;  %v3117_v38 = vpop.permute.xlu1 %3116 }
 0x587   : > { %3206 = vst.msk [vmem:[#allocation3 + $0x58] sm:$0xff] %vm3194_vm3, %v3121_v37  ;;  %v3131_v42 = vpop.permute.xlu2 %3130 }
 0x588   : > { %3204 = vst.msk [vmem:[#allocation3 + $0x48] sm:$0xff] %vm3194_vm3, %v3117_v38 }
 0x589   : > { %3211 = vst.msk [vmem:[#allocation3 + $0x80] sm:$0xff] %vm3194_vm3, %v3131_v42 }
 0x58c   : > { %3339 = vrot.lane.b32.xlu0 %v10047_v30, %s8356_s30  ;;  %3335 = vrot.lane.b32.xlu1 %v12927_v4, %s8356_s30  ;;  %v12929_v30 = vld [vmem:[#allocation24_spill] sm:$0xff]  ;;  %v3437_v4 = vld [vmem:[#allocation2 + $0xf8] sm:$0xff] }
 0x58d   : > { %3331 = vrot.lane.b32.xlu2 %v12928_v48, %s8356_s30  ;;  %v3435_v48 = vld [vmem:[#allocation2 + $0xe0] sm:$0xff] }
 0x58e   : > { %v3127_v21 = vpop.permute.xlu0 %3126  ;;  %v3123_v3 = vpop.permute.xlu1 %3122 }
 0x58f   : > { %3209 = vst.msk [vmem:[#allocation3 + $0x70] sm:$0xff] %vm3194_vm3, %v3127_v21  ;;  %v3137_v50 = vpop.permute.xlu2 %3136 }
 0x590   : > { %3207 = vst.msk [vmem:[#allocation3 + $0x60] sm:$0xff] %vm3194_vm3, %v3123_v3 }
 0x591   : > { %3214 = vst.msk [vmem:[#allocation3 + $0x98] sm:$0xff] %vm3194_vm3, %v3137_v50 }
 0x594   : > { %3345 = vrot.lane.b32.xlu0 %v10058_v34, %s8356_s30  ;;  %3341 = vrot.lane.b32.xlu1 %v12929_v30, %s8356_s30  ;;  %v12931_v34 = vld [vmem:[#allocation27_spill] sm:$0xff] }
 0x595   : > { %3337 = vrot.lane.b32.xlu2 %v12930_v43, %s8356_s30 }
 0x596   : > { %v3133_v31 = vpop.permute.xlu0 %3132  ;;  %v3129_v14 = vpop.permute.xlu1 %3128 }
 0x597   : > { %3212 = vst.msk [vmem:[#allocation3 + $0x88] sm:$0xff] %vm3194_vm3, %v3133_v31  ;;  %v3143_v29 = vpop.permute.xlu2 %3142 }
 0x598   : > { %3210 = vst.msk [vmem:[#allocation3 + $0x78] sm:$0xff] %vm3194_vm3, %v3129_v14 }
 0x599   : > { %3217 = vst.msk [vmem:[#allocation3 + $0xb0] sm:$0xff] %vm3194_vm3, %v3143_v29 }
 0x59c   : > { %3351 = vrot.lane.b32.xlu0 %v10346_v15, %s8356_s30  ;;  %3347 = vrot.lane.b32.xlu1 %v10039_v13, %s8356_s30 }
 0x59d   : > { %3343 = vrot.lane.b32.xlu2 %v12931_v34, %s8356_s30 }
 0x59e   : > { %v3139_v63 = vpop.permute.xlu0 %3138  ;;  %v3135_v41 = vpop.permute.xlu1 %3134 }
 0x59f   : > { %3215 = vst.msk [vmem:[#allocation3 + $0xa0] sm:$0xff] %vm3194_vm3, %v3139_v63  ;;  %v3149_v16 = vpop.permute.xlu2 %3148 }
 0x5a0   : > { %3213 = vst.msk [vmem:[#allocation3 + $0x90] sm:$0xff] %vm3194_vm3, %v3135_v41  ;;  %v3451_v41 = vld [vmem:[#allocation2 + $0x1a0] sm:$0xff] }
 0x5a1   : > { %3220 = vst.msk [vmem:[#allocation3 + $0xc8] sm:$0xff] %vm3194_vm3, %v3149_v16 }
 0x5a4   : > { %3486 = vrot.lane.b32.xlu0 %v3421_v39, %s8357_s15  ;;  %3353 = vrot.lane.b32.xlu1 %v10357_v11, %s8356_s30  ;;  %v3450_v39 = vld [vmem:[#allocation2 + $0x198] sm:$0xff] }
 0x5a5   : > { %3349 = vrot.lane.b32.xlu2 %v10052_v5, %s8356_s30 }
 0x5a6   : > { %v3145_v13 = vpop.permute.xlu0 %3144  ;;  %v3141_v24 = vpop.permute.xlu1 %3140 }
 0x5a7   : > { %3218 = vst.msk [vmem:[#allocation3 + $0xb8] sm:$0xff] %vm3194_vm3, %v3145_v13  ;;  %v3155_v19 = vpop.permute.xlu2 %3154 }
 0x5a8   : > { %3216 = vst.msk [vmem:[#allocation3 + $0xa8] sm:$0xff] %vm3194_vm3, %v3141_v24  ;;  %v3618_v24 = vld [vmem:[#allocation2 + $0x69] sm:$0xff] }
 0x5a9   : > { %3223 = vst.msk [vmem:[#allocation3 + $0xe0] sm:$0xff] %vm3194_vm3, %v3155_v19  ;;  %v3616_v19 = vld [vmem:[#allocation2 + $0x51] sm:$0xff] }
 0x5ac   : > { %3492 = vrot.lane.b32.xlu0 %v3424_v55, %s8357_s15  ;;  %3488 = vrot.lane.b32.xlu1 %v3422_v0, %s8357_s15  ;;  %v3621_v0 = vld [vmem:[#allocation2 + $0x91] sm:$0xff] }
 0x5ad   : > { %3484 = vrot.lane.b32.xlu2 %v3420_v33, %s8357_s15  ;;  %v3619_v33 = vld [vmem:[#allocation2 + $0x79] sm:$0xff] }
 0x5ae   : > { %v3151_v7 = vpop.permute.xlu0 %3150  ;;  %v3147_v5 = vpop.permute.xlu1 %3146 }
 0x5af   : > { %3221 = vst.msk [vmem:[#allocation3 + $0xd0] sm:$0xff] %vm3194_vm3, %v3151_v7  ;;  %v3161_v25 = vpop.permute.xlu2 %3160  ;;  %v3617_v7 = vld [vmem:[#allocation2 + $0x61] sm:$0xff] }
 0x5b0   : > { %3219 = vst.msk [vmem:[#allocation3 + $0xc0] sm:$0xff] %vm3194_vm3, %v3147_v5 }
 0x5b1   : > { %3226 = vst.msk [vmem:[#allocation3 + $0xf8] sm:$0xff] %vm3194_vm3, %v3161_v25 }
 0x5b4   : > { %3498 = vrot.lane.b32.xlu0 %v3427_v26, %s8357_s15  ;;  %3494 = vrot.lane.b32.xlu1 %v3425_v54, %s8357_s15  ;;  %v3624_v26 = vld [vmem:[#allocation2 + $0xb1] sm:$0xff]  ;;  %v3622_v54 = vld [vmem:[#allocation2 + $0x99] sm:$0xff] }
 0x5b5   : > { %3490 = vrot.lane.b32.xlu2 %v3423_v10, %s8357_s15  ;;  %v3620_v10 = vld [vmem:[#allocation2 + $0x81] sm:$0xff] }
 0x5b6   : > { %v3157_v23 = vpop.permute.xlu0 %3156  ;;  %v3153_v6 = vpop.permute.xlu1 %3152 }
 0x5b7   : > { %3224 = vst.msk [vmem:[#allocation3 + $0xe8] sm:$0xff] %vm3194_vm3, %v3157_v23  ;;  %v3296_v9 = vpop.permute.xlu2 %3295 }
 0x5b8   : > { %3222 = vst.msk [vmem:[#allocation3 + $0xd8] sm:$0xff] %vm3194_vm3, %v3153_v6 }
 0x5b9   : > { %3390 = vst.msk [vmem:[#allocation3 + $0x10] sm:$0xff] %vm3387_vm13, %v3296_v9 }
 0x5bc   : > { %3504 = vrot.lane.b32.xlu0 %v3430_v61, %s8357_s15  ;;  %3500 = vrot.lane.b32.xlu1 %v3428_v47, %s8357_s15  ;;  %v3627_v61 = vld [vmem:[#allocation2 + $0xd9] sm:$0xff]  ;;  %v3625_v47 = vld [vmem:[#allocation2 + $0xc1] sm:$0xff] }
 0x5bd   : > { %3496 = vrot.lane.b32.xlu2 %v3426_v62, %s8357_s15  ;;  %v3623_v62 = vld [vmem:[#allocation2 + $0xa9] sm:$0xff] }
 0x5be   : > { %v3292_v8 = vpop.permute.xlu0 %3291  ;;  %v3159_v56 = vpop.permute.xlu1 %3158 }
 0x5bf   : > { %3388 = vst.msk [vmem:[#allocation3] sm:$0xff] %vm3387_vm13, %v3292_v8  ;;  %v3302_v40 = vpop.permute.xlu2 %3301 }
 0x5c0   : > { %3225 = vst.msk [vmem:[#allocation3 + $0xf0] sm:$0xff] %vm3194_vm3, %v3159_v56 }
 0x5c1   : > { %3393 = vst.msk [vmem:[#allocation3 + $0x28] sm:$0xff] %vm3387_vm13, %v3302_v40 }
 0x5c4   : > { %3510 = vrot.lane.b32.xlu0 %v3433_v18, %s8357_s15  ;;  %3506 = vrot.lane.b32.xlu1 %v3431_v60, %s8357_s15  ;;  %v3630_v18 = vld [vmem:[#allocation2 + $0xf9] sm:$0xff]  ;;  %v3628_v60 = vld [vmem:[#allocation2 + $0xe1] sm:$0xff] }
 0x5c5   : > { %3502 = vrot.lane.b32.xlu2 %v3429_v49, %s8357_s15  ;;  %v3626_v49 = vld [vmem:[#allocation2 + $0xc9] sm:$0xff] }
 0x5c6   : > { %v3298_v45 = vpop.permute.xlu0 %3297  ;;  %v3294_v58 = vpop.permute.xlu1 %3293 }
 0x5c7   : > { %3391 = vst.msk [vmem:[#allocation3 + $0x18] sm:$0xff] %vm3387_vm13, %v3298_v45  ;;  %v3308_v35 = vpop.permute.xlu2 %3307 }
 0x5c8   : > { %3389 = vst.msk [vmem:[#allocation3 + $0x8] sm:$0xff] %vm3387_vm13, %v3294_v58 }
 0x5c9   : > { %3396 = vst.msk [vmem:[#allocation3 + $0x40] sm:$0xff] %vm3387_vm13, %v3308_v35 }
 0x5cc   : > { %3516 = vrot.lane.b32.xlu0 %v3436_v17, %s8357_s15  ;;  %3512 = vrot.lane.b32.xlu1 %v3434_v52, %s8357_s15  ;;  %v3633_v17 = vld [vmem:[#allocation2 + $0x121] sm:$0xff]  ;;  %v3631_v52 = vld [vmem:[#allocation2 + $0x109] sm:$0xff] }
 0x5cd   : > { %3508 = vrot.lane.b32.xlu2 %v3432_v32, %s8357_s15  ;;  %v3629_v32 = vld [vmem:[#allocation2 + $0xf1] sm:$0xff] }
 0x5ce   : > { %v3304_v37 = vpop.permute.xlu0 %3303  ;;  %v3300_v38 = vpop.permute.xlu1 %3299 }
 0x5cf   : > { %3394 = vst.msk [vmem:[#allocation3 + $0x30] sm:$0xff] %vm3387_vm13, %v3304_v37  ;;  %v3314_v42 = vpop.permute.xlu2 %3313 }
 0x5d0   : > { %3392 = vst.msk [vmem:[#allocation3 + $0x20] sm:$0xff] %vm3387_vm13, %v3300_v38 }
 0x5d1   : > { %3399 = vst.msk [vmem:[#allocation3 + $0x58] sm:$0xff] %vm3387_vm13, %v3314_v42 }
 0x5d4   : > { %3522 = vrot.lane.b32.xlu0 %v9833_v12, %s8357_s15  ;;  %3518 = vrot.lane.b32.xlu1 %v3437_v4, %s8357_s15  ;;  %v3438_v12 = vld [vmem:[#allocation2 + $0x108] sm:$0xff] }
 0x5d5   : > { %3514 = vrot.lane.b32.xlu2 %v3435_v48, %s8357_s15  ;;  %v3636_v4 = vld [vmem:[#allocation2 + $0x141] sm:$0xff]  ;;  %v3634_v48 = vld [vmem:[#allocation2 + $0x129] sm:$0xff] }
 0x5d6   : > { %v3310_v21 = vpop.permute.xlu0 %3309  ;;  %v3306_v3 = vpop.permute.xlu1 %3305 }
 0x5d7   : > { %3397 = vst.msk [vmem:[#allocation3 + $0x48] sm:$0xff] %vm3387_vm13, %v3310_v21  ;;  %v3320_v50 = vpop.permute.xlu2 %3319  ;;  %v3632_v21 = vld [vmem:[#allocation2 + $0x111] sm:$0xff] }
 0x5d8   : > { %3395 = vst.msk [vmem:[#allocation3 + $0x38] sm:$0xff] %vm3387_vm13, %v3306_v3 }
 0x5d9   : > { %3402 = vst.msk [vmem:[#allocation3 + $0x70] sm:$0xff] %vm3387_vm13, %v3320_v50 }
 0x5dc   : > { %3528 = vrot.lane.b32.xlu0 %v9866_v53, %s8357_s15  ;;  %3524 = vrot.lane.b32.xlu1 %v9844_v28, %s8357_s15  ;;  %v3441_v53 = vld [vmem:[#allocation2 + $0x128] sm:$0xff] }
 0x5dd   : > { %3520 = vrot.lane.b32.xlu2 %v3438_v12, %s8357_s15 }
 0x5de   : > { %v3316_v30 = vpop.permute.xlu0 %3315  ;;  %v3312_v43 = vpop.permute.xlu1 %3311 }
 0x5df   : > { %3400 = vst.msk [vmem:[#allocation3 + $0x60] sm:$0xff] %vm3387_vm13, %v3316_v30  ;;  %v3326_v31 = vpop.permute.xlu2 %3325  ;;  %v3639_v30 = vld [vmem:[#allocation2 + $0x169] sm:$0xff] }
 0x5e0   : > { %3398 = vst.msk [vmem:[#allocation3 + $0x50] sm:$0xff] %vm3387_vm13, %v3312_v43  ;;  %v3637_v43 = vld [vmem:[#allocation2 + $0x151] sm:$0xff] }
 0x5e1   : > { %3405 = vst.msk [vmem:[#allocation3 + $0x88] sm:$0xff] %vm3387_vm13, %v3326_v31  ;;  %v3635_v31 = vld [vmem:[#allocation2 + $0x139] sm:$0xff] }
 0x5e4   : > { %3534 = vrot.lane.b32.xlu0 %v9904_v27, %s8357_s15  ;;  %3530 = vrot.lane.b32.xlu1 %v9881_v44, %s8357_s15  ;;  %v3444_v27 = vld [vmem:[#allocation2 + $0x150] sm:$0xff] }
 0x5e5   : > { %3526 = vrot.lane.b32.xlu2 %v3441_v53, %s8357_s15 }
 0x5e6   : > { %v3322_v28 = vpop.permute.xlu0 %3321  ;;  %v3318_v14 = vpop.permute.xlu1 %3317 }
 0x5e7   : > { %3403 = vst.msk [vmem:[#allocation3 + $0x78] sm:$0xff] %vm3387_vm13, %v3322_v28  ;;  %v3332_v29 = vpop.permute.xlu2 %3331 }
 0x5e8   : > { %3401 = vst.msk [vmem:[#allocation3 + $0x68] sm:$0xff] %vm3387_vm13, %v3318_v14 }
 0x5e9   : > { %3408 = vst.msk [vmem:[#allocation3 + $0xa0] sm:$0xff] %vm3387_vm13, %v3332_v29  ;;  %v3640_v29 = vld [vmem:[#allocation2 + $0x171] sm:$0xff] }
 0x5ec   : > { %3540 = vrot.lane.b32.xlu0 %v10161_v59, %s8357_s15  ;;  %3536 = vrot.lane.b32.xlu1 %v9912_v51, %s8357_s15 }
 0x5ed   : > { %3532 = vrot.lane.b32.xlu2 %v3444_v27, %s8357_s15  ;;  %v3638_v27 = vld [vmem:[#allocation2 + $0x159] sm:$0xff] }
 0x5ee   : > { %v3328_v44 = vpop.permute.xlu0 %3327  ;;  %v3324_v34 = vpop.permute.xlu1 %3323 }
 0x5ef   : > { %3406 = vst.msk [vmem:[#allocation3 + $0x90] sm:$0xff] %vm3387_vm13, %v3328_v44  ;;  %v3338_v63 = vpop.permute.xlu2 %3337 }
 0x5f0   : > { %3404 = vst.msk [vmem:[#allocation3 + $0x80] sm:$0xff] %vm3387_vm13, %v3324_v34 }
 0x5f1   : > { %3411 = vst.msk [vmem:[#allocation3 + $0xb8] sm:$0xff] %vm3387_vm13, %v3338_v63 }
 0x5f4   : > { %3546 = vrot.lane.b32.xlu0 %v3451_v41, %s8357_s15  ;;  %3542 = vrot.lane.b32.xlu1 %v10145_v2, %s8357_s15  ;;  %v3643_v41 = vld [vmem:[#allocation2 + $0x199] sm:$0xff] }
 0x5f5   : > { %3538 = vrot.lane.b32.xlu2 %v9928_v22, %s8357_s15 }
 0x5f6   : > { %v3334_v51 = vpop.permute.xlu0 %3333  ;;  %v3330_v59 = vpop.permute.xlu1 %3329 }
 0x5f7   : > { %3409 = vst.msk [vmem:[#allocation3 + $0xa8] sm:$0xff] %vm3387_vm13, %v3334_v51  ;;  %v3344_v16 = vpop.permute.xlu2 %3343  ;;  %v3806_v51 = vld [vmem:[#allocation2 + $0x32] sm:$0xff] }
 0x5f8   : > { %3407 = vst.msk [vmem:[#allocation3 + $0x98] sm:$0xff] %vm3387_vm13, %v3330_v59 }
 0x5f9   : > { %3414 = vst.msk [vmem:[#allocation3 + $0xd0] sm:$0xff] %vm3387_vm13, %v3344_v16 }
 0x5fc   : > { %3681 = vrot.lane.b32.xlu0 %v10182_v46, %s8358_s16  ;;  %3677 = vrot.lane.b32.xlu1 %v10156_v1, %s8358_s16 }
 0x5fd   : > { %3544 = vrot.lane.b32.xlu2 %v3450_v39, %s8357_s15  ;;  %v3644_v39 = vld [vmem:[#allocation2 + $0x1a1] sm:$0xff] }
 0x5fe   : > { %v3340_v22 = vpop.permute.xlu0 %3339  ;;  %v3336_v2 = vpop.permute.xlu1 %3335 }
 0x5ff   : > { %3412 = vst.msk [vmem:[#allocation3 + $0xc0] sm:$0xff] %vm3387_vm13, %v3340_v22  ;;  %v3350_v13 = vpop.permute.xlu2 %3349  ;;  %v3809_v22 = vld [vmem:[#allocation2 + $0x52] sm:$0xff] }
 0x600   : > { %3410 = vst.msk [vmem:[#allocation3 + $0xb0] sm:$0xff] %vm3387_vm13, %v3336_v2  ;;  %v3807_v2 = vld [vmem:[#allocation2 + $0x3a] sm:$0xff] }
 0x601   : > { %3417 = vst.msk [vmem:[#allocation3 + $0xe8] sm:$0xff] %vm3387_vm13, %v3350_v13 }
 0x604   : > { %3687 = vrot.lane.b32.xlu0 %v3618_v24, %s8358_s16  ;;  %3683 = vrot.lane.b32.xlu1 %v3616_v19, %s8358_s16  ;;  %v3812_v19 = vld [vmem:[#allocation2 + $0x7a] sm:$0xff] }
 0x605   : > { %3679 = vrot.lane.b32.xlu2 %v10168_v36, %s8358_s16 }
 0x606   : > { %v3346_v1 = vpop.permute.xlu0 %3345  ;;  %v3342_v46 = vpop.permute.xlu1 %3341 }
 0x607   : > { %3415 = vst.msk [vmem:[#allocation3 + $0xd8] sm:$0xff] %vm3387_vm13, %v3346_v1  ;;  %v3485_v55 = vpop.permute.xlu2 %3484  ;;  %v3810_v1 = vld [vmem:[#allocation2 + $0x62] sm:$0xff] }
 0x608   : > { %3413 = vst.msk [vmem:[#allocation3 + $0xc8] sm:$0xff] %vm3387_vm13, %v3342_v46  ;;  %v3808_v46 = vld [vmem:[#allocation2 + $0x4a] sm:$0xff] }
 0x609   : > { %3581 = vst.msk [vmem:[#allocation3] sm:$0xff] %vm3580_vm12, %v3485_v55 }
 0x60c   : > { %3693 = vrot.lane.b32.xlu0 %v3621_v0, %s8358_s16  ;;  %3689 = vrot.lane.b32.xlu1 %v3619_v33, %s8358_s16 }
 0x60d   : > { %3685 = vrot.lane.b32.xlu2 %v3617_v7, %s8358_s16  ;;  %v3815_v7 = vld [vmem:[#allocation2 + $0x9a] sm:$0xff] }
 0x60e   : > { %v3352_v36 = vpop.permute.xlu0 %3351  ;;  %v3348_v5 = vpop.permute.xlu1 %3347 }
 0x60f   : > { %3418 = vst.msk [vmem:[#allocation3 + $0xf0] sm:$0xff] %vm3387_vm13, %v3352_v36  ;;  %v3491_v25 = vpop.permute.xlu2 %3490  ;;  %v3813_v36 = vld [vmem:[#allocation2 + $0x82] sm:$0xff] }
 0x610   : > { %3416 = vst.msk [vmem:[#allocation3 + $0xe0] sm:$0xff] %vm3387_vm13, %v3348_v5  ;;  %v3811_v5 = vld [vmem:[#allocation2 + $0x6a] sm:$0xff] }
 0x611   : > { %3584 = vst.msk [vmem:[#allocation3 + $0x18] sm:$0xff] %vm3580_vm12, %v3491_v25 }
 0x614   : > { %3699 = vrot.lane.b32.xlu0 %v3624_v26, %s8358_s16  ;;  %3695 = vrot.lane.b32.xlu1 %v3622_v54, %s8358_s16 }
 0x615   : > { %3691 = vrot.lane.b32.xlu2 %v3620_v10, %s8358_s16  ;;  %v3818_v10 = vld [vmem:[#allocation2 + $0xc2] sm:$0xff] }
 0x616   : > { %v3487_v23 = vpop.permute.xlu0 %3486  ;;  %v3354_v6 = vpop.permute.xlu1 %3353 }
 0x617   : > { %3582 = vst.msk [vmem:[#allocation3 + $0x8] sm:$0xff] %vm3580_vm12, %v3487_v23  ;;  %v3497_v9 = vpop.permute.xlu2 %3496  ;;  %v3816_v23 = vld [vmem:[#allocation2 + $0xaa] sm:$0xff] }
 0x618   : > { %3419 = vst.msk [vmem:[#allocation3 + $0xf8] sm:$0xff] %vm3387_vm13, %v3354_v6  ;;  %v3814_v6 = vld [vmem:[#allocation2 + $0x92] sm:$0xff] }
 0x619   : > { %3587 = vst.msk [vmem:[#allocation3 + $0x30] sm:$0xff] %vm3580_vm12, %v3497_v9 }
 0x61c   : > { %3705 = vrot.lane.b32.xlu0 %v3627_v61, %s8358_s16  ;;  %3701 = vrot.lane.b32.xlu1 %v3625_v47, %s8358_s16 }
 0x61d   : > { %3697 = vrot.lane.b32.xlu2 %v3623_v62, %s8358_s16  ;;  %v3821_v62 = vld [vmem:[#allocation2 + $0xe2] sm:$0xff] }
 0x61e   : > { %v3493_v8 = vpop.permute.xlu0 %3492  ;;  %v3489_v56 = vpop.permute.xlu1 %3488 }
 0x61f   : > { %3585 = vst.msk [vmem:[#allocation3 + $0x20] sm:$0xff] %vm3580_vm12, %v3493_v8  ;;  %v3503_v40 = vpop.permute.xlu2 %3502  ;;  %v3819_v8 = vld [vmem:[#allocation2 + $0xca] sm:$0xff] }
 0x620   : > { %3583 = vst.msk [vmem:[#allocation3 + $0x10] sm:$0xff] %vm3580_vm12, %v3489_v56  ;;  %v3817_v56 = vld [vmem:[#allocation2 + $0xb2] sm:$0xff] }
 0x621   : > { %3590 = vst.msk [vmem:[#allocation3 + $0x48] sm:$0xff] %vm3580_vm12, %v3503_v40 }
 0x624   : > { %3711 = vrot.lane.b32.xlu0 %v3630_v18, %s8358_s16  ;;  %3707 = vrot.lane.b32.xlu1 %v3628_v60, %s8358_s16 }
 0x625   : > { %3703 = vrot.lane.b32.xlu2 %v3626_v49, %s8358_s16  ;;  %v3824_v49 = vld [vmem:[#allocation2 + $0x10a] sm:$0xff] }
 0x626   : > { %v3499_v45 = vpop.permute.xlu0 %3498  ;;  %v3495_v58 = vpop.permute.xlu1 %3494 }
 0x627   : > { %3588 = vst.msk [vmem:[#allocation3 + $0x38] sm:$0xff] %vm3580_vm12, %v3499_v45  ;;  %v3509_v35 = vpop.permute.xlu2 %3508  ;;  %v3822_v45 = vld [vmem:[#allocation2 + $0xf2] sm:$0xff] }
 0x628   : > { %3586 = vst.msk [vmem:[#allocation3 + $0x28] sm:$0xff] %vm3580_vm12, %v3495_v58  ;;  %v3820_v58 = vld [vmem:[#allocation2 + $0xda] sm:$0xff] }
 0x629   : > { %3593 = vst.msk [vmem:[#allocation3 + $0x60] sm:$0xff] %vm3580_vm12, %v3509_v35 }
 0x62c   : > { %3717 = vrot.lane.b32.xlu0 %v3633_v17, %s8358_s16  ;;  %3713 = vrot.lane.b32.xlu1 %v3631_v52, %s8358_s16 }
 0x62d   : > { %3709 = vrot.lane.b32.xlu2 %v3629_v32, %s8358_s16  ;;  %v3827_v32 = vld [vmem:[#allocation2 + $0x12a] sm:$0xff] }
 0x62e   : > { %v3505_v37 = vpop.permute.xlu0 %3504  ;;  %v3501_v38 = vpop.permute.xlu1 %3500 }
 0x62f   : > { %3591 = vst.msk [vmem:[#allocation3 + $0x50] sm:$0xff] %vm3580_vm12, %v3505_v37  ;;  %v3515_v42 = vpop.permute.xlu2 %3514  ;;  %v3825_v37 = vld [vmem:[#allocation2 + $0x112] sm:$0xff] }
 0x630   : > { %3589 = vst.msk [vmem:[#allocation3 + $0x40] sm:$0xff] %vm3580_vm12, %v3501_v38  ;;  %v3823_v38 = vld [vmem:[#allocation2 + $0xfa] sm:$0xff] }
 0x631   : > { %3596 = vst.msk [vmem:[#allocation3 + $0x78] sm:$0xff] %vm3580_vm12, %v3515_v42 }
 0x634   : > { %3723 = vrot.lane.b32.xlu0 %v3636_v4, %s8358_s16  ;;  %3719 = vrot.lane.b32.xlu1 %v3634_v48, %s8358_s16 }
 0x635   : > { %3715 = vrot.lane.b32.xlu2 %v3632_v21, %s8358_s16  ;;  %v3830_v21 = vld [vmem:[#allocation2 + $0x152] sm:$0xff] }
 0x636   : > { %v3511_v3 = vpop.permute.xlu0 %3510  ;;  %v3507_v50 = vpop.permute.xlu1 %3506 }
 0x637   : > { %3594 = vst.msk [vmem:[#allocation3 + $0x68] sm:$0xff] %vm3580_vm12, %v3511_v3  ;;  %v3521_v12 = vpop.permute.xlu2 %3520  ;;  %v3828_v3 = vld [vmem:[#allocation2 + $0x13a] sm:$0xff] }
 0x638   : > { %3592 = vst.msk [vmem:[#allocation3 + $0x58] sm:$0xff] %vm3580_vm12, %v3507_v50  ;;  %v3826_v50 = vld [vmem:[#allocation2 + $0x122] sm:$0xff] }
 0x639   : > { %3599 = vst.msk [vmem:[#allocation3 + $0x90] sm:$0xff] %vm3580_vm12, %v3521_v12 }
 0x63c   : > { %3729 = vrot.lane.b32.xlu0 %v3639_v30, %s8358_s16  ;;  %3725 = vrot.lane.b32.xlu1 %v3637_v43, %s8358_s16 }
 0x63d   : > { %3721 = vrot.lane.b32.xlu2 %v3635_v31, %s8358_s16  ;;  %v4039_v31 = vld [vmem:[%s12771_s3 + $0x40] sm:$0xff] }
 0x63e   : > { %v3517_v53 = vpop.permute.xlu0 %3516  ;;  %v3513_v28 = vpop.permute.xlu1 %3512  ;;  %4145 = vmatpush.msra.mxu1 %v4039_v31 }
 0x63f   : > { %3597 = vst.msk [vmem:[#allocation3 + $0x80] sm:$0xff] %vm3580_vm12, %v3517_v53  ;;  %v3527_v14 = vpop.permute.xlu2 %3526  ;;  %v3833_v53 = vld [vmem:[#allocation2 + $0x172] sm:$0xff] }
 0x640   : > { %3595 = vst.msk [vmem:[#allocation3 + $0x70] sm:$0xff] %vm3580_vm12, %v3513_v28  ;;  %v3831_v28 = vld [vmem:[#allocation2 + $0x15a] sm:$0xff] }
 0x641   : > { %3602 = vst.msk [vmem:[#allocation3 + $0xa8] sm:$0xff] %vm3580_vm12, %v3527_v14  ;;  %v3829_v14 = vld [vmem:[#allocation2 + $0x142] sm:$0xff] }
 0x644   : > { %3735 = vrot.lane.b32.xlu0 %v10267_v20, %s8358_s16  ;;  %3731 = vrot.lane.b32.xlu1 %v3640_v29, %s8358_s16 }
 0x645   : > { %3727 = vrot.lane.b32.xlu2 %v3638_v27, %s8358_s16 }
 0x646   : > { %v3523_v44 = vpop.permute.xlu0 %3522  ;;  %v3519_v34 = vpop.permute.xlu1 %3518 }
 0x647   : > { %3600 = vst.msk [vmem:[#allocation3 + $0x98] sm:$0xff] %vm3580_vm12, %v3523_v44  ;;  %v3533_v63 = vpop.permute.xlu2 %3532 }
 0x648   : > { %3598 = vst.msk [vmem:[#allocation3 + $0x88] sm:$0xff] %vm3580_vm12, %v3519_v34  ;;  %v4038_v34 = vld [vmem:[%s12771_s3 + $0x38] sm:$0xff] }
 0x649   : > { %3605 = vst.msk [vmem:[#allocation3 + $0xc0] sm:$0xff] %vm3580_vm12, %v3533_v63  ;;  %v4037_v63 = vld [vmem:[%s12771_s3 + $0x30] sm:$0xff]  ;;  %4146 = vmatpush.msra.mxu1 %v4038_v34  ;;  %v3837_v34 = vld [vmem:[#allocation2 + $0x1a2] sm:$0xff] }
 0x64b   : > { %4147 = vmatpush.msra.mxu1 %v4037_v63 }
 0x64c   : > { %3870 = vrot.lane.b32.xlu0 %v3806_v51, %s8359_s17  ;;  %3737 = vrot.lane.b32.xlu1 %v3643_v41, %s8358_s16  ;;  %v4036_v41 = vld [vmem:[%s12771_s3 + $0x28] sm:$0xff] }
 0x64d   : > { %3733 = vrot.lane.b32.xlu2 %v10252_v57, %s8358_s16  ;;  %v3832_v51 = vld [vmem:[#allocation2 + $0x16a] sm:$0xff]  ;;  %4148 = vmatpush.msra.mxu1 %v4036_v41  ;;  %v3836_v41 = vld [vmem:[#allocation2 + $0x19a] sm:$0xff] }
 0x64e   : > { %v3529_v20 = vpop.permute.xlu0 %3528  ;;  %v3525_v59 = vpop.permute.xlu1 %3524 }
 0x64f   : > { %3603 = vst.msk [vmem:[#allocation3 + $0xb0] sm:$0xff] %vm3580_vm12, %v3529_v20  ;;  %v3539_v16 = vpop.permute.xlu2 %3538  ;;  %v4035_v20 = vld [vmem:[%s12771_s3 + $0x20] sm:$0xff] }
 0x650   : > { %3601 = vst.msk [vmem:[#allocation3 + $0xa0] sm:$0xff] %vm3580_vm12, %v3525_v59  ;;  %4149 = vmatpush.msra.mxu1 %v4035_v20 }
 0x651   : > { %3608 = vst.msk [vmem:[#allocation3 + $0xd8] sm:$0xff] %vm3580_vm12, %v3539_v16 }
 0x654   : > { %3876 = vrot.lane.b32.xlu0 %v3809_v22, %s8359_s17  ;;  %3872 = vrot.lane.b32.xlu1 %v3807_v2, %s8359_s17  ;;  %v4033_v22 = vld [vmem:[%s12771_s3 + $0x10] sm:$0xff]  ;;  %v4032_v2 = vld [vmem:[%s12771_s3 + $0x8] sm:$0xff] }
 0x655   : > { %3739 = vrot.lane.b32.xlu2 %v3644_v39, %s8358_s16 }
 0x656   : > { %v3535_v13 = vpop.permute.xlu0 %3534  ;;  %v3531_v57 = vpop.permute.xlu1 %3530 }
 0x657   : > { %3606 = vst.msk [vmem:[#allocation3 + $0xc8] sm:$0xff] %vm3580_vm12, %v3535_v13  ;;  %v3545_v24 = vpop.permute.xlu2 %3544  ;;  %v4031_v13 = vld [vmem:[%s12771_s3] sm:$0xff] }
 0x658   : > { %3604 = vst.msk [vmem:[#allocation3 + $0xb8] sm:$0xff] %vm3580_vm12, %v3531_v57 }
 0x659   : > { %3611 = vst.msk [vmem:[#allocation3 + $0xf0] sm:$0xff] %vm3580_vm12, %v3545_v24 }
 0x65c   : > { %3882 = vrot.lane.b32.xlu0 %v3812_v19, %s8359_s17  ;;  %3878 = vrot.lane.b32.xlu1 %v3810_v1, %s8359_s17 }
 0x65d   : > { %3874 = vrot.lane.b32.xlu2 %v3808_v46, %s8359_s17 }
 0x65e   : > { %v3541_v55 = vpop.permute.xlu0 %3540  ;;  %v3537_v0 = vpop.permute.xlu1 %3536 }
 0x65f   : > { %3609 = vst.msk [vmem:[#allocation3 + $0xe0] sm:$0xff] %vm3580_vm12, %v3541_v55  ;;  %v3680_v33 = vpop.permute.xlu2 %3679 }
 0x660   : > { %3607 = vst.msk [vmem:[#allocation3 + $0xd0] sm:$0xff] %vm3580_vm12, %v3537_v0 }
 0x661   : > { %3775 = vst.msk [vmem:[#allocation3 + $0x8] sm:$0xff] %vm3773_vm10, %v3680_v33 }
 0x664   : > { %3888 = vrot.lane.b32.xlu0 %v3815_v7, %s8359_s17  ;;  %3884 = vrot.lane.b32.xlu1 %v3813_v36, %s8359_s17 }
 0x665   : > { %3880 = vrot.lane.b32.xlu2 %v3811_v5, %s8359_s17 }
 0x666   : > { %v3547_v25 = vpop.permute.xlu0 %3546  ;;  %v3543_v26 = vpop.permute.xlu1 %3542 }
 0x667   : > { %3612 = vst.msk [vmem:[#allocation3 + $0xf8] sm:$0xff] %vm3580_vm12, %v3547_v25  ;;  %v3686_v54 = vpop.permute.xlu2 %3685 }
 0x668   : > { %3610 = vst.msk [vmem:[#allocation3 + $0xe8] sm:$0xff] %vm3580_vm12, %v3543_v26 }
 0x669   : > { %3778 = vst.msk [vmem:[#allocation3 + $0x20] sm:$0xff] %vm3773_vm10, %v3686_v54 }
 0x66c   : > { %3894 = vrot.lane.b32.xlu0 %v3818_v10, %s8359_s17  ;;  %3890 = vrot.lane.b32.xlu1 %v3816_v23, %s8359_s17 }
 0x66d   : > { %3886 = vrot.lane.b32.xlu2 %v3814_v6, %s8359_s17 }
 0x66e   : > { %v3682_v9 = vpop.permute.xlu0 %3681  ;;  %v3678_v61 = vpop.permute.xlu1 %3677 }
 0x66f   : > { %3776 = vst.msk [vmem:[#allocation3 + $0x10] sm:$0xff] %vm3773_vm10, %v3682_v9  ;;  %v3692_v47 = vpop.permute.xlu2 %3691 }
 0x670   : > { %3774 = vst.msk [vmem:[#allocation3] sm:$0xff] %vm3773_vm10, %v3678_v61 }
 0x671   : > { %3781 = vst.msk [vmem:[#allocation3 + $0x38] sm:$0xff] %vm3773_vm10, %v3692_v47 }
 0x674   : > { %3900 = vrot.lane.b32.xlu0 %v3821_v62, %s8359_s17  ;;  %3896 = vrot.lane.b32.xlu1 %v3819_v8, %s8359_s17 }
 0x675   : > { %3892 = vrot.lane.b32.xlu2 %v3817_v56, %s8359_s17 }
 0x676   : > { %v3688_v40 = vpop.permute.xlu0 %3687  ;;  %v3684_v18 = vpop.permute.xlu1 %3683 }
 0x677   : > { %3779 = vst.msk [vmem:[#allocation3 + $0x28] sm:$0xff] %vm3773_vm10, %v3688_v40  ;;  %v3698_v60 = vpop.permute.xlu2 %3697 }
 0x678   : > { %3777 = vst.msk [vmem:[#allocation3 + $0x18] sm:$0xff] %vm3773_vm10, %v3684_v18 }
 0x679   : > { %3784 = vst.msk [vmem:[#allocation3 + $0x50] sm:$0xff] %vm3773_vm10, %v3698_v60 }
 0x67c   : > { %3906 = vrot.lane.b32.xlu0 %v3824_v49, %s8359_s17  ;;  %3902 = vrot.lane.b32.xlu1 %v3822_v45, %s8359_s17 }
 0x67d   : > { %3898 = vrot.lane.b32.xlu2 %v3820_v58, %s8359_s17 }
 0x67e   : > { %v3694_v35 = vpop.permute.xlu0 %3693  ;;  %v3690_v17 = vpop.permute.xlu1 %3689 }
 0x67f   : > { %3782 = vst.msk [vmem:[#allocation3 + $0x40] sm:$0xff] %vm3773_vm10, %v3694_v35  ;;  %v3704_v52 = vpop.permute.xlu2 %3703 }
 0x680   : > { %3780 = vst.msk [vmem:[#allocation3 + $0x30] sm:$0xff] %vm3773_vm10, %v3690_v17 }
 0x681   : > { %3787 = vst.msk [vmem:[#allocation3 + $0x68] sm:$0xff] %vm3773_vm10, %v3704_v52 }
 0x684   : > { %3912 = vrot.lane.b32.xlu0 %v3827_v32, %s8359_s17  ;;  %3908 = vrot.lane.b32.xlu1 %v3825_v37, %s8359_s17 }
 0x685   : > { %3904 = vrot.lane.b32.xlu2 %v3823_v38, %s8359_s17 }
 0x686   : > { %v3700_v42 = vpop.permute.xlu0 %3699  ;;  %v3696_v4 = vpop.permute.xlu1 %3695 }
 0x687   : > { %3785 = vst.msk [vmem:[#allocation3 + $0x58] sm:$0xff] %vm3773_vm10, %v3700_v42  ;;  %v3710_v48 = vpop.permute.xlu2 %3709 }
 0x688   : > { %3783 = vst.msk [vmem:[#allocation3 + $0x48] sm:$0xff] %vm3773_vm10, %v3696_v4 }
 0x689   : > { %3790 = vst.msk [vmem:[#allocation3 + $0x80] sm:$0xff] %vm3773_vm10, %v3710_v48 }
 0x68c   : > { %3918 = vrot.lane.b32.xlu0 %v3830_v21, %s8359_s17  ;;  %3914 = vrot.lane.b32.xlu1 %v3828_v3, %s8359_s17 }
 0x68d   : > { %3910 = vrot.lane.b32.xlu2 %v3826_v50, %s8359_s17 }
 0x68e   : > { %v3706_v12 = vpop.permute.xlu0 %3705  ;;  %v3702_v30 = vpop.permute.xlu1 %3701 }
 0x68f   : > { %3788 = vst.msk [vmem:[#allocation3 + $0x70] sm:$0xff] %vm3773_vm10, %v3706_v12  ;;  %v3716_v43 = vpop.permute.xlu2 %3715 }
 0x690   : > { %3786 = vst.msk [vmem:[#allocation3 + $0x60] sm:$0xff] %vm3773_vm10, %v3702_v30 }
 0x691   : > { %3793 = vst.msk [vmem:[#allocation3 + $0x98] sm:$0xff] %vm3773_vm10, %v3716_v43 }
 0x694   : > { %3924 = vrot.lane.b32.xlu0 %v3833_v53, %s8359_s17  ;;  %3920 = vrot.lane.b32.xlu1 %v3831_v28, %s8359_s17 }
 0x695   : > { %3916 = vrot.lane.b32.xlu2 %v3829_v14, %s8359_s17 }
 0x696   : > { %v3712_v29 = vpop.permute.xlu0 %3711  ;;  %v3708_v27 = vpop.permute.xlu1 %3707 }
 0x697   : > { %3791 = vst.msk [vmem:[#allocation3 + $0x88] sm:$0xff] %vm3773_vm10, %v3712_v29  ;;  %v3722_v44 = vpop.permute.xlu2 %3721 }
 0x698   : > { %3789 = vst.msk [vmem:[#allocation3 + $0x78] sm:$0xff] %vm3773_vm10, %v3708_v27 }
 0x699   : > { %3796 = vst.msk [vmem:[#allocation3 + $0xb0] sm:$0xff] %vm3773_vm10, %v3722_v44 }
 0x69c   : > { %3926 = vrot.lane.b32.xlu1 %v10346_v15, %s8359_s17  ;;  %v4034_v15 = vld [vmem:[%s12771_s3 + $0x18] sm:$0xff]  ;;  %3930 = vrot.lane.b32.xlu0 %v3836_v41, %s8359_s17 }
 0x69d   : > { %3922 = vrot.lane.b32.xlu2 %v3832_v51, %s8359_s17  ;;  %4150 = vmatpush.msra.mxu1 %v4034_v15  ;;  %v4380_v51 = vld [vmem:[#allocation2 + $0x1] sm:$0xff] }
 0x69e   : > { %v3718_v59 = vpop.permute.xlu0 %3717  ;;  %v3714_v16 = vpop.permute.xlu1 %3713 }
 0x69f   : > { %3794 = vst.msk [vmem:[#allocation3 + $0xa0] sm:$0xff] %vm3773_vm10, %v3718_v59  ;;  %v3728_v39 = vpop.permute.xlu2 %3727  ;;  %4151 = vmatpush.msra.mxu1 %v4033_v22  ;;  %v4381_v59 = vld [vmem:[#allocation2 + $0x9] sm:$0xff] }
 0x6a0   : > { %3792 = vst.msk [vmem:[#allocation3 + $0x90] sm:$0xff] %vm3773_vm10, %v3714_v16 }
 0x6a1   : > { %3799 = vst.msk [vmem:[#allocation3 + $0xc8] sm:$0xff] %vm3773_vm10, %v3728_v39  ;;  %4152 = vmatpush.msra.mxu1 %v4032_v2  ;;  %v10658_v39 = vld [vmem:[%s12769_s1 + $0x3] ss:$0 sm:$0xff] }
 0x6a3   : > { %4153 = vmatpush.msra.mxu1 %v4031_v13 }
 0x6a4   : > { %3932 = vrot.lane.b32.xlu1 %v3837_v34, %s8359_s17  ;;  %4446 = vrot.lane.b32.xlu0 %v4381_v59, %s8349_s8 }
 0x6a5   : > { %3928 = vrot.lane.b32.xlu2 %v10357_v11, %s8359_s17 }
 0x6a6   : > { %v3724_v57 = vpop.permute.xlu0 %3723  ;;  %v3720_v24 = vpop.permute.xlu1 %3719 }
 0x6a7   : > { %3797 = vst.msk [vmem:[#allocation3 + $0xb8] sm:$0xff] %vm3773_vm10, %v3724_v57  ;;  %v3734_v19 = vpop.permute.xlu2 %3733 }
 0x6a8   : > { %3795 = vst.msk [vmem:[#allocation3 + $0xa8] sm:$0xff] %vm3773_vm10, %v3720_v24 }
 0x6a9   : > { %3802 = vst.msk [vmem:[#allocation3 + $0xe0] sm:$0xff] %vm3773_vm10, %v3734_v19 }
 0x6ad   : > { %4444 = vrot.lane.b32.xlu2 %v4380_v51, %s8349_s8 }
 0x6ae   : > { %v3730_v1 = vpop.permute.xlu0 %3729  ;;  %v3726_v46 = vpop.permute.xlu1 %3725 }
 0x6af   : > { %3800 = vst.msk [vmem:[#allocation3 + $0xd0] sm:$0xff] %vm3773_vm10, %v3730_v1  ;;  %v3740_v11 = vpop.permute.xlu2 %3739 }
 0x6b0   : > { %3798 = vst.msk [vmem:[#allocation3 + $0xc0] sm:$0xff] %vm3773_vm10, %v3726_v46 }
 0x6b1   : > { %3805 = vst.msk [vmem:[#allocation3 + $0xf8] sm:$0xff] %vm3773_vm10, %v3740_v11 }
 0x6b6   : > { %v3736_v55 = vpop.permute.xlu0 %3735  ;;  %v3732_v0 = vpop.permute.xlu1 %3731 }
 0x6b7   : > { %3803 = vst.msk [vmem:[#allocation3 + $0xe8] sm:$0xff] %vm3773_vm10, %v3736_v55  ;;  %v3875_v33 = vpop.permute.xlu2 %3874 }
 0x6b8   : > { %3801 = vst.msk [vmem:[#allocation3 + $0xd8] sm:$0xff] %vm3773_vm10, %v3732_v0 }
 0x6b9   : > { %3969 = vst.msk [vmem:[#allocation3 + $0x10] sm:$0xff] %vm3966_vm9, %v3875_v33 }
 0x6be   : > { %v3871_v7 = vpop.permute.xlu0 %3870  ;;  %v3738_v36 = vpop.permute.xlu1 %3737 }
 0x6bf   : > { %3967 = vst.msk [vmem:[#allocation3] sm:$0xff] %vm3966_vm9, %v3871_v7  ;;  %v3881_v5 = vpop.permute.xlu2 %3880 }
 0x6c0   : > { %3804 = vst.msk [vmem:[#allocation3 + $0xf0] sm:$0xff] %vm3773_vm10, %v3738_v36  ;;  %v4001_v56 = vld [vmem:[#allocation3 + $0x10] sm:$0xff] }
 0x6c1   : > { %3972 = vst.msk [vmem:[#allocation3 + $0x28] sm:$0xff] %vm3966_vm9, %v3881_v5 }
 0x6c6   : > { %v3877_v25 = vpop.permute.xlu0 %3876  ;;  %v3873_v26 = vpop.permute.xlu1 %3872  ;;  %v3999_v54 = vld [vmem:[#allocation3] sm:$0xff] }
 0x6c7   : > { %3970 = vst.msk [vmem:[#allocation3 + $0x18] sm:$0xff] %vm3966_vm9, %v3877_v25  ;;  %v3887_v10 = vpop.permute.xlu2 %3886  ;;  %8211 = vmatmul.msk.f32.vlgmr.msra.gmra.mxu1 %vm4041_vm8, %v3999_v54 }
 0x6c8   : > { %3968 = vst.msk [vmem:[#allocation3 + $0x8] sm:$0xff] %vm3966_vm9, %v3873_v26  ;;  %v4004_v38 = vld [vmem:[#allocation3 + $0x28] sm:$0xff] }
 0x6c9   : > { %3975 = vst.msk [vmem:[#allocation3 + $0x40] sm:$0xff] %vm3966_vm9, %v3887_v10 }
 0x6ce   : > { %v3883_v23 = vpop.permute.xlu0 %3882  ;;  %v3879_v6 = vpop.permute.xlu1 %3878  ;;  %v4002_v49 = vld [vmem:[#allocation3 + $0x18] sm:$0xff] }
 0x6cf   : > { %3973 = vst.msk [vmem:[#allocation3 + $0x30] sm:$0xff] %vm3966_vm9, %v3883_v23  ;;  %v3893_v9 = vpop.permute.xlu2 %3892  ;;  %v4000_v61 = vld [vmem:[#allocation3 + $0x8] sm:$0xff] }
 0x6d0   : > { %3971 = vst.msk [vmem:[#allocation3 + $0x20] sm:$0xff] %vm3966_vm9, %v3879_v6  ;;  %8212 = vmatmul.msk.f32.gmra.mxu1 %vm4041_vm8, %v4000_v61  ;;  %v4007_v53 = vld [vmem:[#allocation3 + $0x40] sm:$0xff] }
 0x6d1   : > { %3978 = vst.msk [vmem:[#allocation3 + $0x58] sm:$0xff] %vm3966_vm9, %v3893_v9 }
 0x6d6   : > { %v3889_v47 = vpop.permute.xlu0 %3888  ;;  %v3885_v62 = vpop.permute.xlu1 %3884  ;;  %v4005_v21 = vld [vmem:[#allocation3 + $0x30] sm:$0xff] }
 0x6d7   : > { %3976 = vst.msk [vmem:[#allocation3 + $0x48] sm:$0xff] %vm3966_vm9, %v3889_v47  ;;  %v3899_v8 = vpop.permute.xlu2 %3898  ;;  %v4003_v17 = vld [vmem:[#allocation3 + $0x20] sm:$0xff] }
 0x6d8   : > { %3974 = vst.msk [vmem:[#allocation3 + $0x38] sm:$0xff] %vm3966_vm9, %v3885_v62  ;;  %8213 = vmatmul.msk.f32.gmra.mxu1 %vm4041_vm8, %v4001_v56  ;;  %v4010_v27 = vld [vmem:[#allocation3 + $0x58] sm:$0xff] }
 0x6d9   : > { %3981 = vst.msk [vmem:[#allocation3 + $0x70] sm:$0xff] %vm3966_vm9, %v3899_v8 }
 0x6de   : > { %v3895_v40 = vpop.permute.xlu0 %3894  ;;  %v3891_v18 = vpop.permute.xlu1 %3890  ;;  %v4008_v14 = vld [vmem:[#allocation3 + $0x48] sm:$0xff] }
 0x6df   : > { %3979 = vst.msk [vmem:[#allocation3 + $0x60] sm:$0xff] %vm3966_vm9, %v3895_v40  ;;  %v3905_v60 = vpop.permute.xlu2 %3904  ;;  %v4006_v30 = vld [vmem:[#allocation3 + $0x38] sm:$0xff] }
 0x6e0   : > { %3977 = vst.msk [vmem:[#allocation3 + $0x50] sm:$0xff] %vm3966_vm9, %v3891_v18  ;;  %8214 = vmatmul.msk.f32.gmra.mxu1 %vm4041_vm8, %v4002_v49  ;;  %v4013_v20 = vld [vmem:[#allocation3 + $0x70] sm:$0xff] }
 0x6e1   : > { %3984 = vst.msk [vmem:[#allocation3 + $0x88] sm:$0xff] %vm3966_vm9, %v3905_v60 }
 0x6e6   : > { %v3901_v45 = vpop.permute.xlu0 %3900  ;;  %v3897_v58 = vpop.permute.xlu1 %3896  ;;  %v4011_v44 = vld [vmem:[#allocation3 + $0x60] sm:$0xff] }
 0x6e7   : > { %3982 = vst.msk [vmem:[#allocation3 + $0x78] sm:$0xff] %vm3966_vm9, %v3901_v45  ;;  %v3911_v35 = vpop.permute.xlu2 %3910  ;;  %v4009_v29 = vld [vmem:[#allocation3 + $0x50] sm:$0xff] }
 0x6e8   : > { %3980 = vst.msk [vmem:[#allocation3 + $0x68] sm:$0xff] %vm3966_vm9, %v3897_v58  ;;  %8215 = vmatmul.msk.f32.gmra.mxu1 %vm4041_vm8, %v4003_v17  ;;  %v4016_v19 = vld [vmem:[#allocation3 + $0x88] sm:$0xff] }
 0x6e9   : > { %3987 = vst.msk [vmem:[#allocation3 + $0xa0] sm:$0xff] %vm3966_vm9, %v3911_v35 }
 0x6ee   : > { %v3907_v52 = vpop.permute.xlu0 %3906  ;;  %v3903_v32 = vpop.permute.xlu1 %3902  ;;  %v4014_v16 = vld [vmem:[#allocation3 + $0x78] sm:$0xff] }
 0x6ef   : > { %3985 = vst.msk [vmem:[#allocation3 + $0x90] sm:$0xff] %vm3966_vm9, %v3907_v52  ;;  %v3917_v37 = vpop.permute.xlu2 %3916  ;;  %v4012_v63 = vld [vmem:[#allocation3 + $0x68] sm:$0xff] }
 0x6f0   : > { %3983 = vst.msk [vmem:[#allocation3 + $0x80] sm:$0xff] %vm3966_vm9, %v3903_v32  ;;  %8216 = vmatmul.msk.f32.gmra.mxu1 %vm4041_vm8, %v4004_v38  ;;  %v4019_v47 = vld [vmem:[#allocation3 + $0xa0] sm:$0xff] }
 0x6f1   : > { %3990 = vst.msk [vmem:[#allocation3 + $0xb8] sm:$0xff] %vm3966_vm9, %v3917_v37 }
 0x6f6   : > { %v3913_v42 = vpop.permute.xlu0 %3912  ;;  %v3909_v4 = vpop.permute.xlu1 %3908  ;;  %v4017_v33 = vld [vmem:[#allocation3 + $0x90] sm:$0xff] }
 0x6f7   : > { %3988 = vst.msk [vmem:[#allocation3 + $0xa8] sm:$0xff] %vm3966_vm9, %v3913_v42  ;;  %v3923_v48 = vpop.permute.xlu2 %3922  ;;  %v4015_v13 = vld [vmem:[#allocation3 + $0x80] sm:$0xff] }
 0x6f8   : > { %3986 = vst.msk [vmem:[#allocation3 + $0x98] sm:$0xff] %vm3966_vm9, %v3909_v4  ;;  %8217 = vmatmul.msk.f32.gmra.mxu1 %vm4041_vm8, %v4005_v21 }
 0x6f9   : > { %3993 = vst.msk [vmem:[#allocation3 + $0xd0] sm:$0xff] %vm3966_vm9, %v3923_v48  ;;  %v4022_v48 = vld [vmem:[#allocation3 + $0xb8] sm:$0xff] }
 0x6fe   : > { %v3919_v3 = vpop.permute.xlu0 %3918  ;;  %v3915_v50 = vpop.permute.xlu1 %3914  ;;  %v4020_v60 = vld [vmem:[#allocation3 + $0xa8] sm:$0xff] }
 0x6ff   : > { %3991 = vst.msk [vmem:[#allocation3 + $0xc0] sm:$0xff] %vm3966_vm9, %v3919_v3  ;;  %v3929_v12 = vpop.permute.xlu2 %3928  ;;  %v4018_v54 = vld [vmem:[#allocation3 + $0x98] sm:$0xff] }
 0x700   : > { %3989 = vst.msk [vmem:[#allocation3 + $0xb0] sm:$0xff] %vm3966_vm9, %v3915_v50  ;;  %8218 = vmatmul.msk.f32.gmra.mxu1 %vm4041_vm8, %v4006_v30 }
 0x701   : > { %3996 = vst.msk [vmem:[#allocation3 + $0xe8] sm:$0xff] %vm3966_vm9, %v3929_v12 }
 0x706   : > { %v3925_v43 = vpop.permute.xlu0 %3924  ;;  %v3921_v31 = vpop.permute.xlu1 %3920 }
 0x707   : > { %3994 = vst.msk [vmem:[#allocation3 + $0xd8] sm:$0xff] %vm3966_vm9, %v3925_v43  ;;  %v4021_v52 = vld [vmem:[#allocation3 + $0xb0] sm:$0xff]  ;;  %v4023_v43 = vld [vmem:[#allocation3 + $0xc0] sm:$0xff] }
 0x708   : > { %3992 = vst.msk [vmem:[#allocation3 + $0xc8] sm:$0xff] %vm3966_vm9, %v3921_v31  ;;  %8219 = vmatmul.msk.f32.gmra.mxu1 %vm4041_vm8, %v4007_v53 }
 0x70e   : > { %v3927_v28 = vpop.permute.xlu1 %3926 }
 0x70f   : > { %3995 = vst.msk [vmem:[#allocation3 + $0xe0] sm:$0xff] %vm3966_vm9, %v3927_v28  ;;  %v4024_v34 = vld [vmem:[#allocation3 + $0xc8] sm:$0xff] }
 0x710   : > { %8220 = vmatmul.msk.f32.gmra.mxu1 %vm4041_vm8, %v4008_v14  ;;  %v4316_v14 = vld [vmem:[#allocation2] sm:$0xff] }
 0x711   : > { %4348 = vst.msk [vmem:[#allocation3] sm:$0xff] %vm252_vm0, %v4316_v14 }
 0x718   : > { %8221 = vmatmul.msk.f32.gmra.mxu1 %vm4041_vm8, %v4009_v29 }
 0x720   : > { %8222 = vmatmul.msk.f32.gmra.mxu1 %vm4041_vm8, %v4010_v27  ;;  %v4445_v27 = vpop.permute.xlu2 %4444 }
 0x721   : > { %4540 = vst.msk [vmem:[#allocation3] sm:$0xff] %vm2615_vm14, %v4445_v27 }
 0x728   : > { %8223 = vmatmul.msk.f32.gmra.mxu1 %vm4041_vm8, %v4011_v44 }
 0x730   : > { %8224 = vmatmul.msk.f32.gmra.mxu1 %vm4041_vm8, %v4012_v63 }
 0x738   : > { %8225 = vmatmul.msk.f32.gmra.mxu1 %vm4041_vm8, %v4013_v20 }
 0x740   : > { %8226 = vmatmul.msk.f32.gmra.mxu1 %vm4041_vm8, %v4014_v16  ;;  %v4025_v16 = vld [vmem:[#allocation3 + $0xd0] sm:$0xff] }
 0x744   : > { %v4155_v15 = vpop.f32.mrf.mxu1 }
 0x745   : > { %v4156_v22 = vadd.f32 %v10658_v39, %v4155_v15 }
 0x747   : > { %v4251_v2 = vmax.f32 %v4156_v22, 0.0 }
 0x748   : > { %8227 = vmatmul.msk.f32.gmra.mxu1 %vm4041_vm8, %v4015_v13  ;;  %v3933_v13 = vpop.permute.xlu1 %3932 }
 0x749   : > { %4284 = vst.msk [vmem:[#allocation2 + $0x19] sm:$0xff] %vm252_vm0, %v4251_v2 }
 0x74a   : > { %3998 = vst.msk [vmem:[#allocation3 + $0xf8] sm:$0xff] %vm3966_vm9, %v3933_v13 }
 0x74d   : > { %v4158_v57 = vpop.f32.mrf.mxu1 }
 0x74e   : > { %v4159_v24 = vadd.f32 %v10658_v39, %v4158_v57 }
 0x750   : > { %v4252_v1 = vmax.f32 %v4159_v24, 0.0  ;;  %8228 = vmatmul.msk.f32.gmra.mxu1 %vm4041_vm8, %v4016_v19  ;;  %v4382_v46 = vld [vmem:[#allocation2 + $0x19] sm:$0xff]  ;;  %v4026_v19 = vld [vmem:[#allocation3 + $0xd8] sm:$0xff] }
 0x751   : > { %v10665_v11 = vld [vmem:[#allocation2 + $0x18] sm:$0xff]  ;;  %4448 = vrot.lane.b32.xlu1 %v4382_v46, %s8349_s8 }
 0x752   : > { %4350 = vst.msk [vmem:[#allocation3 + $0x10] sm:$0xff] %vm252_vm0, %v10665_v11 }
 0x753   : > { %4285 = vst.msk [vmem:[#allocation2 + $0x21] sm:$0xff] %vm252_vm0, %v4252_v1 }
 0x755   : > { %v4161_v55 = vpop.f32.mrf.mxu1 }
 0x756   : > { %v4162_v0 = vadd.f32 %v10658_v39, %v4161_v55 }
 0x758   : > { %v4253_v7 = vmax.f32 %v4162_v0, 0.0  ;;  %8229 = vmatmul.msk.f32.gmra.mxu1 %vm4041_vm8, %v4017_v33  ;;  %v3931_v33 = vpop.permute.xlu0 %3930 }
 0x759   : > { %3997 = vst.msk [vmem:[#allocation3 + $0xf0] sm:$0xff] %vm3966_vm9, %v3931_v33 }
 0x75a   : > { %v4383_v36 = vld [vmem:[#allocation2 + $0x21] sm:$0xff]  ;;  %4286 = vst.msk [vmem:[#allocation2 + $0x31] sm:$0xff] %vm252_vm0, %v4253_v7 }
 0x75b   : > { %v10673_v5 = vld [vmem:[#allocation2 + $0x20] sm:$0xff]  ;;  %4450 = vrot.lane.b32.xlu2 %v4383_v36, %s8349_s8  ;;  %v4027_v36 = vld [vmem:[#allocation3 + $0xe0] sm:$0xff] }
 0x75c   : > { %4351 = vst.msk [vmem:[#allocation3 + $0x18] sm:$0xff] %vm252_vm0, %v10673_v5 }
 0x75d   : > { %v4164_v25 = vpop.f32.mrf.mxu1 }
 0x75e   : > { %v4165_v26 = vadd.f32 %v10658_v39, %v4164_v25 }
 0x760   : > { %v4254_v10 = vmax.f32 %v4165_v26, 0.0  ;;  %8230 = vmatmul.msk.f32.gmra.mxu1 %vm4041_vm8, %v4018_v54 }
 0x761   : > { %v10681_v23 = vld [vmem:[#allocation2 + $0x31] sm:$0xff] }
 0x762   : > { %v10683_v6 = vld [vmem:[#allocation2 + $0x30] sm:$0xff]  ;;  %4287 = vst.msk [vmem:[#allocation2 + $0x39] sm:$0xff] %vm252_vm0, %v4254_v10  ;;  %4452 = vrot.lane.b32.xlu0 %v10681_v23, %s8349_s8  ;;  %v4317_v10 = vld [vmem:[#allocation2 + $0x8] sm:$0xff] }
 0x763   : > { %4352 = vst.msk [vmem:[#allocation3 + $0x20] sm:$0xff] %vm252_vm0, %v10683_v6 }
 0x764   : > { %4349 = vst.msk [vmem:[#allocation3 + $0x8] sm:$0xff] %vm252_vm0, %v4317_v10 }
 0x765   : > { %v4167_v9 = vpop.f32.mrf.mxu1 }
 0x766   : > { %v4168_v61 = vadd.f32 %v10658_v39, %v4167_v9 }
 0x768   : > { %v4255_v62 = vmax.f32 %v4168_v61, 0.0  ;;  %8231 = vmatmul.msk.f32.gmra.mxu1 %vm4041_vm8, %v4019_v47  ;;  %v4447_v61 = vpop.permute.xlu0 %4446 }
 0x769   : > { %v10692_v8 = vld [vmem:[#allocation2 + $0x39] sm:$0xff]  ;;  %4541 = vst.msk [vmem:[#allocation3 + $0x8] sm:$0xff] %vm2615_vm14, %v4447_v61 }
 0x76a   : > { %v10694_v56 = vld [vmem:[#allocation2 + $0x38] sm:$0xff]  ;;  %4288 = vst.msk [vmem:[#allocation2 + $0x49] sm:$0xff] %vm252_vm0, %v4255_v62  ;;  %4454 = vrot.lane.b32.xlu1 %v10692_v8, %s8349_s8 }
 0x76b   : > { %4353 = vst.msk [vmem:[#allocation3 + $0x28] sm:$0xff] %vm252_vm0, %v10694_v56  ;;  %v4028_v62 = vld [vmem:[#allocation3 + $0xe8] sm:$0xff] }
 0x76d   : > { %v4170_v40 = vpop.f32.mrf.mxu1 }
 0x76e   : > { %v4171_v18 = vadd.f32 %v10658_v39, %v4170_v40 }
 0x770   : > { %v4256_v49 = vmax.f32 %v4171_v18, 0.0  ;;  %8232 = vmatmul.msk.f32.gmra.mxu1 %vm4041_vm8, %v4020_v60 }
 0x771   : > { %v10703_v45 = vld [vmem:[#allocation2 + $0x49] sm:$0xff] }
 0x772   : > { %v10705_v58 = vld [vmem:[#allocation2 + $0x48] sm:$0xff]  ;;  %4289 = vst.msk [vmem:[#allocation2 + $0x51] sm:$0xff] %vm252_vm0, %v4256_v49  ;;  %4456 = vrot.lane.b32.xlu2 %v10703_v45, %s8349_s8 }
 0x773   : > { %4354 = vst.msk [vmem:[#allocation3 + $0x30] sm:$0xff] %vm252_vm0, %v10705_v58 }
 0x775   : > { %v4173_v35 = vpop.f32.mrf.mxu1 }
 0x776   : > { %v4174_v17 = vadd.f32 %v10658_v39, %v4173_v35 }
 0x778   : > { %v4257_v32 = vmax.f32 %v4174_v17, 0.0  ;;  %8233 = vmatmul.msk.f32.gmra.mxu1 %vm4041_vm8, %v4021_v52 }
 0x779   : > { %v10714_v37 = vld [vmem:[#allocation2 + $0x51] sm:$0xff] }
 0x77a   : > { %v10716_v38 = vld [vmem:[#allocation2 + $0x50] sm:$0xff]  ;;  %4290 = vst.msk [vmem:[#allocation2 + $0x61] sm:$0xff] %vm252_vm0, %v4257_v32  ;;  %4458 = vrot.lane.b32.xlu0 %v10714_v37, %s8349_s8 }
 0x77b   : > { %4355 = vst.msk [vmem:[#allocation3 + $0x38] sm:$0xff] %vm252_vm0, %v10716_v38 }
 0x77d   : > { %v4176_v42 = vpop.f32.mrf.mxu1 }
 0x77e   : > { %v4177_v4 = vadd.f32 %v10658_v39, %v4176_v42 }
 0x780   : > { %v4258_v21 = vmax.f32 %v4177_v4, 0.0  ;;  %8234 = vmatmul.msk.f32.gmra.mxu1 %vm4041_vm8, %v4022_v48 }
 0x781   : > { %v10725_v3 = vld [vmem:[#allocation2 + $0x61] sm:$0xff] }
 0x782   : > { %v10727_v50 = vld [vmem:[#allocation2 + $0x60] sm:$0xff]  ;;  %4291 = vst.msk [vmem:[#allocation2 + $0x69] sm:$0xff] %vm252_vm0, %v4258_v21  ;;  %4460 = vrot.lane.b32.xlu1 %v10725_v3, %s8349_s8 }
 0x783   : > { %4356 = vst.msk [vmem:[#allocation3 + $0x40] sm:$0xff] %vm252_vm0, %v10727_v50 }
 0x785   : > { %v4179_v12 = vpop.f32.mrf.mxu1 }
 0x786   : > { %v4180_v30 = vadd.f32 %v10658_v39, %v4179_v12 }
 0x788   : > { %v4259_v31 = vmax.f32 %v4180_v30, 0.0  ;;  %8235 = vmatmul.msk.f32.gmra.mxu1 %vm4041_vm8, %v4023_v43 }
 0x789   : > { %v10736_v53 = vld [vmem:[#allocation2 + $0x69] sm:$0xff] }
 0x78a   : > { %v10738_v28 = vld [vmem:[#allocation2 + $0x68] sm:$0xff]  ;;  %4292 = vst.msk [vmem:[#allocation2 + $0x79] sm:$0xff] %vm252_vm0, %v4259_v31  ;;  %4462 = vrot.lane.b32.xlu2 %v10736_v53, %s8349_s8 }
 0x78b   : > { %4357 = vst.msk [vmem:[#allocation3 + $0x48] sm:$0xff] %vm252_vm0, %v10738_v28 }
 0x78d   : > { %v4182_v29 = vpop.f32.mrf.mxu1 }
 0x78e   : > { %v4183_v44 = vadd.f32 %v10658_v39, %v4182_v29 }
 0x790   : > { %v4260_v63 = vmax.f32 %v4183_v44, 0.0  ;;  %8236 = vmatmul.msk.f32.gmra.mxu1 %vm4041_vm8, %v4024_v34 }
 0x791   : > { %v10749_v41 = vld [vmem:[#allocation2 + $0x79] sm:$0xff] }
 0x792   : > { %v10751_v51 = vld [vmem:[#allocation2 + $0x78] sm:$0xff]  ;;  %4293 = vst.msk [vmem:[#allocation2 + $0x81] sm:$0xff] %vm252_vm0, %v4260_v63  ;;  %4464 = vrot.lane.b32.xlu0 %v10749_v41, %s8349_s8 }
 0x793   : > { %4358 = vst.msk [vmem:[#allocation3 + $0x50] sm:$0xff] %vm252_vm0, %v10751_v51 }
 0x795   : > { %v4185_v20 = vpop.f32.mrf.mxu1 }
 0x796   : > { %v4186_v59 = vadd.f32 %v10658_v39, %v4185_v20 }
 0x798   : > { %v4261_v15 = vmax.f32 %v4186_v59, 0.0  ;;  %8237 = vmatmul.msk.f32.gmra.mxu1 %vm4041_vm8, %v4025_v16 }
 0x799   : > { %v10760_v22 = vld [vmem:[#allocation2 + $0x81] sm:$0xff] }
 0x79a   : > { %v10762_v2 = vld [vmem:[#allocation2 + $0x80] sm:$0xff]  ;;  %4294 = vst.msk [vmem:[#allocation2 + $0x91] sm:$0xff] %vm252_vm0, %v4261_v15  ;;  %4466 = vrot.lane.b32.xlu1 %v10760_v22, %s8349_s8 }
 0x79b   : > { %4359 = vst.msk [vmem:[#allocation3 + $0x58] sm:$0xff] %vm252_vm0, %v10762_v2 }
 0x79d   : > { %v4188_v57 = vpop.f32.mrf.mxu1 }
 0x79e   : > { %v4189_v24 = vadd.f32 %v10658_v39, %v4188_v57 }
 0x7a0   : > { %v4262_v1 = vmax.f32 %v4189_v24, 0.0  ;;  %8238 = vmatmul.msk.f32.gmra.mxu1 %vm4041_vm8, %v4026_v19 }
 0x7a1   : > { %v10772_v46 = vld [vmem:[#allocation2 + $0x91] sm:$0xff] }
 0x7a2   : > { %v10774_v55 = vld [vmem:[#allocation2 + $0x90] sm:$0xff]  ;;  %4295 = vst.msk [vmem:[#allocation2 + $0x99] sm:$0xff] %vm252_vm0, %v4262_v1  ;;  %4468 = vrot.lane.b32.xlu2 %v10772_v46, %s8349_s8 }
 0x7a3   : > { %4360 = vst.msk [vmem:[#allocation3 + $0x60] sm:$0xff] %vm252_vm0, %v10774_v55 }
 0x7a5   : > { %v4191_v0 = vpop.f32.mrf.mxu1 }
 0x7a6   : > { %v4192_v7 = vadd.f32 %v10658_v39, %v4191_v0 }
 0x7a8   : > { %v4263_v25 = vmax.f32 %v4192_v7, 0.0  ;;  %8239 = vmatmul.msk.f32.gmra.mxu1 %vm4041_vm8, %v4027_v36 }
 0x7a9   : > { %v10784_v26 = vld [vmem:[#allocation2 + $0x99] sm:$0xff] }
 0x7aa   : > { %v10786_v54 = vld [vmem:[#allocation2 + $0x98] sm:$0xff]  ;;  %4296 = vst.msk [vmem:[#allocation2 + $0xa9] sm:$0xff] %vm252_vm0, %v4263_v25  ;;  %4470 = vrot.lane.b32.xlu0 %v10784_v26, %s8349_s8 }
 0x7ab   : > { %4361 = vst.msk [vmem:[#allocation3 + $0x68] sm:$0xff] %vm252_vm0, %v10786_v54 }
 0x7ad   : > { %v4194_v9 = vpop.f32.mrf.mxu1 }
 0x7ae   : > { %v4195_v47 = vadd.f32 %v10658_v39, %v4194_v9 }
 0x7b0   : > { %v4264_v40 = vmax.f32 %v4195_v47, 0.0  ;;  %8240 = vmatmul.msk.f32.gmra.mxu1 %vm4041_vm8, %v4028_v62 }
 0x7b1   : > { %v10797_v18 = vld [vmem:[#allocation2 + $0xa9] sm:$0xff] }
 0x7b2   : > { %v10799_v60 = vld [vmem:[#allocation2 + $0xa8] sm:$0xff]  ;;  %4297 = vst.msk [vmem:[#allocation2 + $0xb1] sm:$0xff] %vm252_vm0, %v4264_v40  ;;  %4472 = vrot.lane.b32.xlu1 %v10797_v18, %s8349_s8 }
 0x7b3   : > { %4362 = vst.msk [vmem:[#allocation3 + $0x70] sm:$0xff] %vm252_vm0, %v10799_v60 }
 0x7b5   : > { %v4451_v49 = vpop.permute.xlu2 %4450  ;;  %v4197_v35 = vpop.f32.mrf.mxu1 }
 0x7b6   : > { %4543 = vst.msk [vmem:[#allocation3 + $0x18] sm:$0xff] %vm2615_vm14, %v4451_v49  ;;  %v4198_v17 = vadd.f32 %v10658_v39, %v4197_v35 }
 0x7b8   : > { %v4265_v52 = vmax.f32 %v4198_v17, 0.0 }
 0x7b9   : > { %v10808_v32 = vld [vmem:[#allocation2 + $0xb1] sm:$0xff] }
 0x7ba   : > { %v10810_v42 = vld [vmem:[#allocation2 + $0xb0] sm:$0xff]  ;;  %4298 = vst.msk [vmem:[#allocation2 + $0xc1] sm:$0xff] %vm252_vm0, %v4265_v52  ;;  %4474 = vrot.lane.b32.xlu2 %v10808_v32, %s8349_s8 }
 0x7bb   : > { %4363 = vst.msk [vmem:[#allocation3 + $0x78] sm:$0xff] %vm252_vm0, %v10810_v42 }
 0x7bd   : > { %v4200_v4 = vpop.f32.mrf.mxu1 }
 0x7be   : > { %v4201_v48 = vadd.f32 %v10658_v39, %v4200_v4 }
 0x7c0   : > { %v4266_v21 = vmax.f32 %v4201_v48, 0.0 }
 0x7c1   : > { %v10818_v12 = vld [vmem:[#allocation2 + $0xc1] sm:$0xff] }
 0x7c2   : > { %v10820_v30 = vld [vmem:[#allocation2 + $0xc0] sm:$0xff]  ;;  %4299 = vst.msk [vmem:[#allocation2 + $0xc9] sm:$0xff] %vm252_vm0, %v4266_v21  ;;  %4476 = vrot.lane.b32.xlu0 %v10818_v12, %s8349_s8 }
 0x7c3   : > { %v4449_v43 = vpop.permute.xlu1 %4448  ;;  %4364 = vst.msk [vmem:[#allocation3 + $0x80] sm:$0xff] %vm252_vm0, %v10820_v30 }
 0x7c4   : > { %4542 = vst.msk [vmem:[#allocation3 + $0x10] sm:$0xff] %vm2615_vm14, %v4449_v43 }
 0x7c5   : > { %v4203_v31 = vpop.f32.mrf.mxu1 }
 0x7c6   : > { %v4204_v14 = vadd.f32 %v10658_v39, %v4203_v31 }
 0x7c8   : > { %v4267_v29 = vmax.f32 %v4204_v14, 0.0 }
 0x7c9   : > { %v10829_v27 = vld [vmem:[#allocation2 + $0xc9] sm:$0xff] }
 0x7ca   : > { %v10831_v44 = vld [vmem:[#allocation2 + $0xc8] sm:$0xff]  ;;  %4300 = vst.msk [vmem:[#allocation2 + $0xd9] sm:$0xff] %vm252_vm0, %v4267_v29  ;;  %4478 = vrot.lane.b32.xlu1 %v10829_v27, %s8349_s8 }
 0x7cb   : > { %4365 = vst.msk [vmem:[#allocation3 + $0x88] sm:$0xff] %vm252_vm0, %v10831_v44 }
 0x7cc   : > { %v4457_v34 = vpop.permute.xlu2 %4456 }
 0x7cd   : > { %4546 = vst.msk [vmem:[#allocation3 + $0x30] sm:$0xff] %vm2615_vm14, %v4457_v34  ;;  %v4206_v63 = vpop.f32.mrf.mxu1 }
 0x7ce   : > { %v4207_v20 = vadd.f32 %v10658_v39, %v4206_v63 }
 0x7d0   : > { %v4268_v59 = vmax.f32 %v4207_v20, 0.0 }
 0x7d1   : > { %v10840_v16 = vld [vmem:[#allocation2 + $0xd9] sm:$0xff] }
 0x7d2   : > { %v10842_v15 = vld [vmem:[#allocation2 + $0xd8] sm:$0xff]  ;;  %4301 = vst.msk [vmem:[#allocation2 + $0xe1] sm:$0xff] %vm252_vm0, %v4268_v59  ;;  %4480 = vrot.lane.b32.xlu2 %v10840_v16, %s8349_s8 }
 0x7d3   : > { %4366 = vst.msk [vmem:[#allocation3 + $0x90] sm:$0xff] %vm252_vm0, %v10842_v15 }
 0x7d4   : > { %v4453_v13 = vpop.permute.xlu0 %4452 }
 0x7d5   : > { %4544 = vst.msk [vmem:[#allocation3 + $0x20] sm:$0xff] %vm2615_vm14, %v4453_v13  ;;  %v4209_v57 = vpop.f32.mrf.mxu1 }
 0x7d6   : > { %v4210_v24 = vadd.f32 %v10658_v39, %v4209_v57 }
 0x7d8   : > { %v4269_v19 = vmax.f32 %v4210_v24, 0.0 }
 0x7d9   : > { %v10851_v1 = vld [vmem:[#allocation2 + $0xe1] sm:$0xff] }
 0x7da   : > { %v10853_v0 = vld [vmem:[#allocation2 + $0xe0] sm:$0xff]  ;;  %4302 = vst.msk [vmem:[#allocation2 + $0xf1] sm:$0xff] %vm252_vm0, %v4269_v19  ;;  %4482 = vrot.lane.b32.xlu0 %v10851_v1, %s8349_s8 }
 0x7db   : > { %4367 = vst.msk [vmem:[#allocation3 + $0x98] sm:$0xff] %vm252_vm0, %v10853_v0 }
 0x7dc   : > { %v4455_v33 = vpop.permute.xlu1 %4454 }
 0x7dd   : > { %4545 = vst.msk [vmem:[#allocation3 + $0x28] sm:$0xff] %vm2615_vm14, %v4455_v33  ;;  %v4212_v7 = vpop.f32.mrf.mxu1 }
 0x7de   : > { %v4213_v36 = vadd.f32 %v10658_v39, %v4212_v7 }
 0x7e0   : > { %v4270_v25 = vmax.f32 %v4213_v36, 0.0 }
 0x7e1   : > { %v10862_v10 = vld [vmem:[#allocation2 + $0xf1] sm:$0xff] }
 0x7e2   : > { %v10864_v9 = vld [vmem:[#allocation2 + $0xf0] sm:$0xff]  ;;  %4303 = vst.msk [vmem:[#allocation2 + $0xf9] sm:$0xff] %vm252_vm0, %v4270_v25  ;;  %4484 = vrot.lane.b32.xlu1 %v10862_v10, %s8349_s8 }
 0x7e3   : > { %4368 = vst.msk [vmem:[#allocation3 + $0xa0] sm:$0xff] %vm252_vm0, %v10864_v9 }
 0x7e4   : > { %v4463_v61 = vpop.permute.xlu2 %4462 }
 0x7e5   : > { %4549 = vst.msk [vmem:[#allocation3 + $0x48] sm:$0xff] %vm2615_vm14, %v4463_v61  ;;  %v4215_v47 = vpop.f32.mrf.mxu1 }
 0x7e6   : > { %v4216_v62 = vadd.f32 %v10658_v39, %v4215_v47 }
 0x7e8   : > { %v4271_v40 = vmax.f32 %v4216_v62, 0.0 }
 0x7e9   : > { %v10873_v49 = vld [vmem:[#allocation2 + $0xf9] sm:$0xff] }
 0x7ea   : > { %v10875_v35 = vld [vmem:[#allocation2 + $0xf8] sm:$0xff]  ;;  %4304 = vst.msk [vmem:[#allocation2 + $0x109] sm:$0xff] %vm252_vm0, %v4271_v40  ;;  %4486 = vrot.lane.b32.xlu2 %v10873_v49, %s8349_s8 }
 0x7eb   : > { %4369 = vst.msk [vmem:[#allocation3 + $0xa8] sm:$0xff] %vm252_vm0, %v10875_v35 }
 0x7ec   : > { %v4459_v17 = vpop.permute.xlu0 %4458 }
 0x7ed   : > { %4547 = vst.msk [vmem:[#allocation3 + $0x38] sm:$0xff] %vm2615_vm14, %v4459_v17  ;;  %v4218_v52 = vpop.f32.mrf.mxu1 }
 0x7ee   : > { %v4219_v4 = vadd.f32 %v10658_v39, %v4218_v52 }
 0x7f0   : > { %v4272_v48 = vmax.f32 %v4219_v4, 0.0 }
 0x7f1   : > { %v10884_v21 = vld [vmem:[#allocation2 + $0x109] sm:$0xff] }
 0x7f2   : > { %v10886_v43 = vld [vmem:[#allocation2 + $0x108] sm:$0xff]  ;;  %4305 = vst.msk [vmem:[#allocation2 + $0x111] sm:$0xff] %vm252_vm0, %v4272_v48  ;;  %4488 = vrot.lane.b32.xlu0 %v10884_v21, %s8349_s8 }
 0x7f3   : > { %4370 = vst.msk [vmem:[#allocation3 + $0xb0] sm:$0xff] %vm252_vm0, %v10886_v43 }
 0x7f4   : > { %v4461_v31 = vpop.permute.xlu1 %4460 }
 0x7f5   : > { %4548 = vst.msk [vmem:[#allocation3 + $0x40] sm:$0xff] %vm2615_vm14, %v4461_v31  ;;  %v4221_v14 = vpop.f32.mrf.mxu1 }
 0x7f6   : > { %v4222_v29 = vadd.f32 %v10658_v39, %v4221_v14 }
 0x7f8   : > { %v4273_v34 = vmax.f32 %v4222_v29, 0.0  ;;  %v4029_v29 = vld [vmem:[#allocation3 + $0xf0] sm:$0xff] }
 0x7f9   : > { %v10895_v63 = vld [vmem:[#allocation2 + $0x111] sm:$0xff]  ;;  %8241 = vmatmul.msk.f32.gmra.mxu1 %vm4041_vm8, %v4029_v29 }
 0x7fa   : > { %v10897_v20 = vld [vmem:[#allocation2 + $0x110] sm:$0xff]  ;;  %4306 = vst.msk [vmem:[#allocation2 + $0x121] sm:$0xff] %vm252_vm0, %v4273_v34  ;;  %4490 = vrot.lane.b32.xlu1 %v10895_v63, %s8349_s8 }
 0x7fb   : > { %4371 = vst.msk [vmem:[#allocation3 + $0xb8] sm:$0xff] %vm252_vm0, %v10897_v20 }
 0x7fc   : > { %v4469_v59 = vpop.permute.xlu2 %4468 }
 0x7fd   : > { %4552 = vst.msk [vmem:[#allocation3 + $0x60] sm:$0xff] %vm2615_vm14, %v4469_v59  ;;  %v4224_v13 = vpop.f32.mrf.mxu1 }
 0x7fe   : > { %v4225_v57 = vadd.f32 %v10658_v39, %v4224_v13 }
 0x800   : > { %v4274_v24 = vmax.f32 %v4225_v57, 0.0 }
 0x801   : > { %v10906_v19 = vld [vmem:[#allocation2 + $0x121] sm:$0xff] }
 0x802   : > { %v10908_v33 = vld [vmem:[#allocation2 + $0x120] sm:$0xff]  ;;  %4307 = vst.msk [vmem:[#allocation2 + $0x129] sm:$0xff] %vm252_vm0, %v4274_v24  ;;  %4492 = vrot.lane.b32.xlu2 %v10906_v19, %s8349_s8 }
 0x803   : > { %4372 = vst.msk [vmem:[#allocation3 + $0xc0] sm:$0xff] %vm252_vm0, %v10908_v33 }
 0x804   : > { %v4465_v7 = vpop.permute.xlu0 %4464 }
 0x805   : > { %4550 = vst.msk [vmem:[#allocation3 + $0x50] sm:$0xff] %vm2615_vm14, %v4465_v7  ;;  %v4227_v36 = vpop.f32.mrf.mxu1 }
 0x806   : > { %v4228_v25 = vadd.f32 %v10658_v39, %v4227_v36  ;;  %v4030_v36 = vld [vmem:[#allocation3 + $0xf8] sm:$0xff] }
 0x807   : > { %8242 = vmatmul.msk.f32.gmra.mxu1 %vm4041_vm8, %v4030_v36 }
 0x808   : > { %v4275_v61 = vmax.f32 %v4228_v25, 0.0 }
 0x809   : > { %v10917_v47 = vld [vmem:[#allocation2 + $0x129] sm:$0xff] }
 0x80a   : > { %4308 = vst.msk [vmem:[#allocation2 + $0x139] sm:$0xff] %vm252_vm0, %v4275_v61  ;;  %4494 = vrot.lane.b32.xlu0 %v10917_v47, %s8349_s8  ;;  %v10922_v62 = vld [vmem:[#allocation2 + $0x128] sm:$0xff] }
 0x80b   : > { %4373 = vst.msk [vmem:[#allocation3 + $0xc8] sm:$0xff] %vm252_vm0, %v10922_v62 }
 0x80c   : > { %v4467_v40 = vpop.permute.xlu1 %4466 }
 0x80d   : > { %4551 = vst.msk [vmem:[#allocation3 + $0x58] sm:$0xff] %vm2615_vm14, %v4467_v40  ;;  %v4230_v17 = vpop.f32.mrf.mxu1 }
 0x80e   : > { %v4231_v52 = vadd.f32 %v10658_v39, %v4230_v17 }
 0x810   : > { %v4276_v4 = vmax.f32 %v4231_v52, 0.0 }
 0x811   : > { %v10928_v48 = vld [vmem:[#allocation2 + $0x139] sm:$0xff] }
 0x812   : > { %v10930_v31 = vld [vmem:[#allocation2 + $0x138] sm:$0xff]  ;;  %4309 = vst.msk [vmem:[#allocation2 + $0x141] sm:$0xff] %vm252_vm0, %v4276_v4  ;;  %4496 = vrot.lane.b32.xlu1 %v10928_v48, %s8349_s8 }
 0x813   : > { %4374 = vst.msk [vmem:[#allocation3 + $0xd0] sm:$0xff] %vm252_vm0, %v10930_v31 }
 0x814   : > { %v4475_v14 = vpop.permute.xlu2 %4474 }
 0x815   : > { %4555 = vst.msk [vmem:[#allocation3 + $0x78] sm:$0xff] %vm2615_vm14, %v4475_v14  ;;  %v4233_v34 = vpop.f32.mrf.mxu1 }
 0x816   : > { %v4234_v59 = vadd.f32 %v10658_v39, %v4233_v34 }
 0x818   : > { %v4277_v13 = vmax.f32 %v4234_v59, 0.0 }
 0x819   : > { %v10940_v57 = vld [vmem:[#allocation2 + $0x141] sm:$0xff] }
 0x81a   : > { %v10942_v24 = vld [vmem:[#allocation2 + $0x140] sm:$0xff]  ;;  %4310 = vst.msk [vmem:[#allocation2 + $0x151] sm:$0xff] %vm252_vm0, %v4277_v13  ;;  %4498 = vrot.lane.b32.xlu2 %v10940_v57, %s8349_s8 }
 0x81b   : > { %4375 = vst.msk [vmem:[#allocation3 + $0xd8] sm:$0xff] %vm252_vm0, %v10942_v24 }
 0x81c   : > { %v4471_v7 = vpop.permute.xlu0 %4470 }
 0x81d   : > { %4553 = vst.msk [vmem:[#allocation3 + $0x68] sm:$0xff] %vm2615_vm14, %v4471_v7  ;;  %v4236_v25 = vpop.f32.mrf.mxu1 }
 0x81e   : > { %v4237_v61 = vadd.f32 %v10658_v39, %v4236_v25 }
 0x820   : > { %v4278_v40 = vmax.f32 %v4237_v61, 0.0  ;;  %v4572_v61 = vld [vmem:[#allocation2 + $0x2] sm:$0xff] }
 0x821   : > { %v10952_v17 = vld [vmem:[#allocation2 + $0x151] sm:$0xff] }
 0x822   : > { %v10954_v52 = vld [vmem:[#allocation2 + $0x150] sm:$0xff]  ;;  %4311 = vst.msk [vmem:[#allocation2 + $0x159] sm:$0xff] %vm252_vm0, %v4278_v40  ;;  %4500 = vrot.lane.b32.xlu0 %v10952_v17, %s8349_s8 }
 0x823   : > { %4376 = vst.msk [vmem:[#allocation3 + $0xe0] sm:$0xff] %vm252_vm0, %v10954_v52 }
 0x824   : > { %v4473_v4 = vpop.permute.xlu1 %4472 }
 0x825   : > { %4554 = vst.msk [vmem:[#allocation3 + $0x70] sm:$0xff] %vm2615_vm14, %v4473_v4  ;;  %v4239_v14 = vpop.f32.mrf.mxu1 }
 0x826   : > { %v4240_v29 = vadd.f32 %v10658_v39, %v4239_v14 }
 0x828   : > { %v4279_v34 = vmax.f32 %v4240_v29, 0.0 }
 0x829   : > { %v10963_v59 = vld [vmem:[#allocation2 + $0x159] sm:$0xff] }
 0x82a   : > { %4312 = vst.msk [vmem:[#allocation2 + $0x169] sm:$0xff] %vm252_vm0, %v4279_v34  ;;  %4502 = vrot.lane.b32.xlu1 %v10963_v59, %s8349_s8  ;;  %v10968_v13 = vld [vmem:[#allocation2 + $0x158] sm:$0xff]  ;;  %v4573_v34 = vld [vmem:[#allocation2 + $0xa] sm:$0xff] }
 0x82b   : > { %4377 = vst.msk [vmem:[#allocation3 + $0xe8] sm:$0xff] %vm252_vm0, %v10968_v13 }
 0x82c   : > { %v4481_v7 = vpop.permute.xlu2 %4480 }
 0x82d   : > { %4558 = vst.msk [vmem:[#allocation3 + $0x90] sm:$0xff] %vm2615_vm14, %v4481_v7  ;;  %v4242_v36 = vpop.f32.mrf.mxu1  ;;  %v10985_v7 = vld [vmem:[#allocation2 + $0x22] sm:$0xff] }
 0x82e   : > { %v4243_v25 = vadd.f32 %v10658_v39, %v4242_v36  ;;  %12933 = vst [vmem:[#allocation9_spill] sm:$0xff] %v10985_v7 }
 0x830   : > { %v4280_v40 = vmax.f32 %v4243_v25, 0.0 }
 0x831   : > { %v10974_v4 = vld [vmem:[#allocation2 + $0x169] sm:$0xff] }
 0x832   : > { %12932 = vst [vmem:[#allocation4_spill] sm:$0xff] %v10974_v4  ;;  %v10976_v14 = vld [vmem:[#allocation2 + $0x168] sm:$0xff]  ;;  %4636 = vrot.lane.b32.xlu1 %v4572_v61, %s8351_s10  ;;  %4504 = vrot.lane.b32.xlu2 %v10974_v4, %s8349_s8  ;;  %v11012_v4 = vld [vmem:[#allocation2 + $0x3a] sm:$0xff] }
 0x833   : > { %4313 = vst.msk [vmem:[#allocation2 + $0x171] sm:$0xff] %vm252_vm0, %v4280_v40  ;;  %v10999_v40 = vld [vmem:[#allocation2 + $0x1a] sm:$0xff] }
 0x834   : > { %4378 = vst.msk [vmem:[#allocation3 + $0xf0] sm:$0xff] %vm252_vm0, %v10976_v14  ;;  %v4477_v29 = vpop.permute.xlu0 %4476 }
 0x835   : > { %4556 = vst.msk [vmem:[#allocation3 + $0x80] sm:$0xff] %vm2615_vm14, %v4477_v29  ;;  %v11001_v29 = vld [vmem:[#allocation2 + $0x4a] sm:$0xff] }
 0x836   : > { %12934 = vst [vmem:[#allocation13_spill] sm:$0xff] %v10999_v40 }
 0x837   : > { %12935 = vst [vmem:[#allocation5_spill] sm:$0xff] %v11001_v29 }
 0x838   : > { %12937 = vst [vmem:[#allocation6_spill] sm:$0xff] %v11012_v4 }
 0x83a   : > { %v10987_v36 = vld [vmem:[#allocation2 + $0x171] sm:$0xff]  ;;  %4642 = vrot.lane.b32.xlu1 %v10985_v7, %s8351_s10  ;;  %4638 = vrot.lane.b32.xlu2 %v4573_v34, %s8351_s10 }
 0x83b   : > { %4506 = vrot.lane.b32.xlu0 %v10987_v36, %s8349_s8  ;;  %v10993_v25 = vld [vmem:[#allocation2 + $0x170] sm:$0xff] }
 0x83c   : > { %4379 = vst.msk [vmem:[#allocation3 + $0xf8] sm:$0xff] %vm252_vm0, %v10993_v25  ;;  %v4479_v61 = vpop.permute.xlu1 %4478  ;;  %v11007_v7 = vld [vmem:[#allocation2 + $0x32] sm:$0xff] }
 0x83d   : > { %4557 = vst.msk [vmem:[#allocation3 + $0x88] sm:$0xff] %vm2615_vm14, %v4479_v61  ;;  %v11014_v61 = vld [vmem:[#allocation2 + $0x6a] sm:$0xff] }
 0x83e   : > { %12936 = vst [vmem:[#allocation12_spill] sm:$0xff] %v11007_v7 }
 0x83f   : > { %12938 = vst [vmem:[#allocation16_spill] sm:$0xff] %v11014_v61 }
 0x842   : > { %4648 = vrot.lane.b32.xlu1 %v11001_v29, %s8351_s10  ;;  %4644 = vrot.lane.b32.xlu2 %v11007_v7, %s8351_s10  ;;  %v11025_v7 = vld [vmem:[#allocation2 + $0x62] sm:$0xff] }
 0x843   : > { %4640 = vrot.lane.b32.xlu0 %v10999_v40, %s8351_s10  ;;  %v11020_v40 = vld [vmem:[#allocation2 + $0x52] sm:$0xff]  ;;  %12940 = vst [vmem:[#allocation7_spill] sm:$0xff] %v11025_v7 }
 0x844   : > { %v4487_v34 = vpop.permute.xlu2 %4486  ;;  %12939 = vst [vmem:[#allocation17_spill] sm:$0xff] %v11020_v40 }
 0x845   : > { %4561 = vst.msk [vmem:[#allocation3 + $0xa8] sm:$0xff] %vm2615_vm14, %v4487_v34  ;;  %v11027_v34 = vld [vmem:[#allocation2 + $0x92] sm:$0xff] }
 0x846   : > { %12941 = vst [vmem:[#allocation8_spill] sm:$0xff] %v11027_v34 }
 0x84a   : > { %4654 = vrot.lane.b32.xlu1 %v11014_v61, %s8351_s10  ;;  %4650 = vrot.lane.b32.xlu2 %v11020_v40, %s8351_s10  ;;  %v11038_v40 = vld [vmem:[#allocation2 + $0x82] sm:$0xff] }
 0x84b   : > { %4646 = vrot.lane.b32.xlu0 %v11012_v4, %s8351_s10  ;;  %v11033_v4 = vld [vmem:[#allocation2 + $0x7a] sm:$0xff]  ;;  %12943 = vst [vmem:[#allocation10_spill] sm:$0xff] %v11038_v40 }
 0x84c   : > { %v4483_v29 = vpop.permute.xlu0 %4482  ;;  %12942 = vst [vmem:[#allocation20_spill] sm:$0xff] %v11033_v4 }
 0x84d   : > { %4559 = vst.msk [vmem:[#allocation3 + $0x98] sm:$0xff] %vm2615_vm14, %v4483_v29  ;;  %v11040_v29 = vld [vmem:[#allocation2 + $0xb2] sm:$0xff] }
 0x84e   : > { %12944 = vst [vmem:[#allocation11_spill] sm:$0xff] %v11040_v29 }
 0x852   : > { %4660 = vrot.lane.b32.xlu1 %v11027_v34, %s8351_s10  ;;  %4656 = vrot.lane.b32.xlu2 %v11033_v4, %s8351_s10  ;;  %v11051_v4 = vld [vmem:[#allocation2 + $0xaa] sm:$0xff] }
 0x853   : > { %4652 = vrot.lane.b32.xlu0 %v11025_v7, %s8351_s10  ;;  %v11046_v7 = vld [vmem:[#allocation2 + $0x9a] sm:$0xff]  ;;  %12946 = vst [vmem:[#allocation14_spill] sm:$0xff] %v11051_v4 }
 0x854   : > { %v4485_v61 = vpop.permute.xlu1 %4484  ;;  %12945 = vst [vmem:[#allocation23_spill] sm:$0xff] %v11046_v7 }
 0x855   : > { %4560 = vst.msk [vmem:[#allocation3 + $0xa0] sm:$0xff] %vm2615_vm14, %v4485_v61  ;;  %v11053_v61 = vld [vmem:[#allocation2 + $0xda] sm:$0xff] }
 0x856   : > { %12947 = vst [vmem:[#allocation15_spill] sm:$0xff] %v11053_v61 }
 0x85a   : > { %4666 = vrot.lane.b32.xlu1 %v11040_v29, %s8351_s10  ;;  %4662 = vrot.lane.b32.xlu2 %v11046_v7, %s8351_s10  ;;  %v11064_v7 = vld [vmem:[#allocation2 + $0xca] sm:$0xff] }
 0x85b   : > { %4658 = vrot.lane.b32.xlu0 %v11038_v40, %s8351_s10  ;;  %v11059_v40 = vld [vmem:[#allocation2 + $0xc2] sm:$0xff]  ;;  %12949 = vst [vmem:[#allocation18_spill] sm:$0xff] %v11064_v7 }
 0x85c   : > { %v4493_v34 = vpop.permute.xlu2 %4492  ;;  %12948 = vst [vmem:[#allocation26_spill] sm:$0xff] %v11059_v40 }
 0x85d   : > { %4564 = vst.msk [vmem:[#allocation3 + $0xc0] sm:$0xff] %vm2615_vm14, %v4493_v34  ;;  %v11066_v34 = vld [vmem:[#allocation2 + $0xfa] sm:$0xff] }
 0x85e   : > { %12950 = vst [vmem:[#allocation19_spill] sm:$0xff] %v11066_v34 }
 0x862   : > { %4672 = vrot.lane.b32.xlu1 %v11053_v61, %s8351_s10  ;;  %4668 = vrot.lane.b32.xlu2 %v11059_v40, %s8351_s10  ;;  %v11077_v40 = vld [vmem:[#allocation2 + $0xf2] sm:$0xff] }
 0x863   : > { %4664 = vrot.lane.b32.xlu0 %v11051_v4, %s8351_s10  ;;  %v11072_v4 = vld [vmem:[#allocation2 + $0xe2] sm:$0xff]  ;;  %12952 = vst [vmem:[#allocation22_spill] sm:$0xff] %v11077_v40 }
 0x864   : > { %v4489_v29 = vpop.permute.xlu0 %4488  ;;  %12951 = vst [vmem:[#allocation21_spill] sm:$0xff] %v11072_v4 }
 0x865   : > { %4562 = vst.msk [vmem:[#allocation3 + $0xb0] sm:$0xff] %vm2615_vm14, %v4489_v29  ;;  %v11079_v29 = vld [vmem:[#allocation2 + $0x122] sm:$0xff] }
 0x866   : > { %12953 = vst [vmem:[#allocation24_spill] sm:$0xff] %v11079_v29 }
 0x86a   : > { %4678 = vrot.lane.b32.xlu1 %v11066_v34, %s8351_s10  ;;  %4674 = vrot.lane.b32.xlu2 %v11072_v4, %s8351_s10  ;;  %v11090_v4 = vld [vmem:[#allocation2 + $0x112] sm:$0xff] }
 0x86b   : > { %4670 = vrot.lane.b32.xlu0 %v11064_v7, %s8351_s10  ;;  %v11085_v7 = vld [vmem:[#allocation2 + $0x10a] sm:$0xff]  ;;  %12955 = vst [vmem:[#allocation27_spill] sm:$0xff] %v11090_v4 }
 0x86c   : > { %v4491_v61 = vpop.permute.xlu1 %4490  ;;  %12954 = vst [vmem:[#allocation25_spill] sm:$0xff] %v11085_v7 }
 0x86d   : > { %4563 = vst.msk [vmem:[#allocation3 + $0xb8] sm:$0xff] %vm2615_vm14, %v4491_v61  ;;  %v11092_v61 = vld [vmem:[#allocation2 + $0x142] sm:$0xff] }
 0x86e   : > { %12956 = vst [vmem:[#allocation28_spill] sm:$0xff] %v11092_v61 }
 0x872   : > { %4684 = vrot.lane.b32.xlu1 %v11079_v29, %s8351_s10  ;;  %4680 = vrot.lane.b32.xlu2 %v11085_v7, %s8351_s10  ;;  %v11103_v7 = vld [vmem:[#allocation2 + $0x13a] sm:$0xff] }
 0x873   : > { %4676 = vrot.lane.b32.xlu0 %v11077_v40, %s8351_s10  ;;  %v11098_v40 = vld [vmem:[#allocation2 + $0x12a] sm:$0xff] }
 0x874   : > { %v4499_v34 = vpop.permute.xlu2 %4498  ;;  %12957 = vst [vmem:[#allocation29_spill] sm:$0xff] %v11098_v40 }
 0x875   : > { %4567 = vst.msk [vmem:[#allocation3 + $0xd8] sm:$0xff] %vm2615_vm14, %v4499_v34  ;;  %v11105_v34 = vld [vmem:[#allocation2 + $0x16a] sm:$0xff] }
 0x876   : > { %12958 = vst [vmem:[#allocation30_spill] sm:$0xff] %v11105_v34 }
 0x87a   : > { %4690 = vrot.lane.b32.xlu1 %v11092_v61, %s8351_s10  ;;  %4686 = vrot.lane.b32.xlu2 %v11098_v40, %s8351_s10  ;;  %v11116_v40 = vld [vmem:[#allocation2 + $0x15a] sm:$0xff] }
 0x87b   : > { %4682 = vrot.lane.b32.xlu0 %v11090_v4, %s8351_s10  ;;  %v11111_v4 = vld [vmem:[#allocation2 + $0x152] sm:$0xff] }
 0x87c   : > { %v4495_v29 = vpop.permute.xlu0 %4494 }
 0x87d   : > { %4565 = vst.msk [vmem:[#allocation3 + $0xc8] sm:$0xff] %vm2615_vm14, %v4495_v29  ;;  %v11122_v29 = vld [vmem:[#allocation2 + $0x172] sm:$0xff] }
 0x882   : > { %4696 = vrot.lane.b32.xlu1 %v11105_v34, %s8351_s10  ;;  %4692 = vrot.lane.b32.xlu2 %v11111_v4, %s8351_s10 }
 0x883   : > { %4688 = vrot.lane.b32.xlu0 %v11103_v7, %s8351_s10 }
 0x884   : > { %v4497_v61 = vpop.permute.xlu1 %4496 }
 0x885   : > { %4566 = vst.msk [vmem:[#allocation3 + $0xd0] sm:$0xff] %vm2615_vm14, %v4497_v61 }
 0x88a   : > { %4830 = vrot.lane.b32.xlu1 %v10673_v5, %s8353_s12  ;;  %4698 = vrot.lane.b32.xlu2 %v11122_v29, %s8351_s10 }
 0x88b   : > { %4694 = vrot.lane.b32.xlu0 %v11116_v40, %s8351_s10 }
 0x88c   : > { %v4505_v34 = vpop.permute.xlu2 %4504 }
 0x88d   : > { %4570 = vst.msk [vmem:[#allocation3 + $0xf0] sm:$0xff] %vm2615_vm14, %v4505_v34 }
 0x892   : > { %4836 = vrot.lane.b32.xlu1 %v10705_v58, %s8353_s12  ;;  %4832 = vrot.lane.b32.xlu2 %v10683_v6, %s8353_s12  ;;  %v4245_v6 = vpop.f32.mrf.mxu1 }
 0x893   : > { %4828 = vrot.lane.b32.xlu0 %v10665_v11, %s8353_s12  ;;  %v4246_v34 = vadd.f32 %v10658_v39, %v4245_v6 }
 0x894   : > { %v4501_v61 = vpop.permute.xlu0 %4500  ;;  %v4639_v5 = vpop.permute.xlu2 %4638 }
 0x895   : > { %4568 = vst.msk [vmem:[#allocation3 + $0xe0] sm:$0xff] %vm2615_vm14, %v4501_v61 }
 0x896   : > { %4733 = vst.msk [vmem:[#allocation3 + $0x8] sm:$0xff] %vm2808_vm15, %v4639_v5 }
 0x89a   : > { %4842 = vrot.lane.b32.xlu1 %v10738_v28, %s8353_s12  ;;  %4838 = vrot.lane.b32.xlu2 %v10716_v38, %s8353_s12  ;;  %v4248_v61 = vpop.f32.mrf.mxu1 }
 0x89b   : > { %4834 = vrot.lane.b32.xlu0 %v10694_v56, %s8353_s12  ;;  %v4281_v56 = vmax.f32 %v4246_v34, 0.0  ;;  %v4249_v5 = vadd.f32 %v10658_v39, %v4248_v61  ;;  %v4956_v61 = vld [vmem:[#allocation2 + $0x19] sm:$0xff] }
 0x89c   : > { %v4503_v11 = vpop.permute.xlu1 %4502  ;;  %v4645_v58 = vpop.permute.xlu2 %4644 }
 0x89d   : > { %4569 = vst.msk [vmem:[#allocation3 + $0xe8] sm:$0xff] %vm2615_vm14, %v4503_v11 }
 0x89e   : > { %4736 = vst.msk [vmem:[#allocation3 + $0x20] sm:$0xff] %vm2808_vm15, %v4645_v58 }
 0x89f   : > { %4314 = vst.msk [vmem:[#allocation2 + $0x181] sm:$0xff] %vm252_vm0, %v4281_v56 }
 0x8a2   : > { %4848 = vrot.lane.b32.xlu1 %v10774_v55, %s8353_s12  ;;  %4844 = vrot.lane.b32.xlu2 %v10751_v51, %s8353_s12 }
 0x8a3   : > { %4840 = vrot.lane.b32.xlu0 %v10727_v50, %s8353_s12  ;;  %v4282_v50 = vmax.f32 %v4249_v5, 0.0 }
 0x8a4   : > { %v4637_v38 = vpop.permute.xlu1 %4636  ;;  %v4651_v28 = vpop.permute.xlu2 %4650 }
 0x8a5   : > { %4732 = vst.msk [vmem:[#allocation3] sm:$0xff] %vm2808_vm15, %v4637_v38 }
 0x8a6   : > { %4739 = vst.msk [vmem:[#allocation3 + $0x38] sm:$0xff] %vm2808_vm15, %v4651_v28  ;;  %v11220_v28 = vld [vmem:[#allocation2 + $0x180] sm:$0xff] }
 0x8a7   : > { %4315 = vst.msk [vmem:[#allocation2 + $0x189] sm:$0xff] %vm252_vm0, %v4282_v50  ;;  %vm12992_vm0 = vcmask 195744  }
 0x8aa   : > { %4854 = vrot.lane.b32.xlu1 %v10810_v42, %s8353_s12  ;;  %4850 = vrot.lane.b32.xlu2 %v10786_v54, %s8353_s12 }
 0x8ab   : > { %4846 = vrot.lane.b32.xlu0 %v10762_v2, %s8353_s12 }
 0x8ac   : > { %v4643_v51 = vpop.permute.xlu1 %4642  ;;  %v4657_v11 = vpop.permute.xlu2 %4656 }
 0x8ad   : > { %v4507_v55 = vpop.permute.xlu0 %4506  ;;  %4735 = vst.msk [vmem:[#allocation3 + $0x18] sm:$0xff] %vm2808_vm15, %v4643_v51 }
 0x8ae   : > { %4571 = vst.msk [vmem:[#allocation3 + $0xf8] sm:$0xff] %vm2615_vm14, %v4507_v55  ;;  %v11209_v6 = vld [vmem:[#allocation2 + $0x188] sm:$0xff] }
 0x8af   : > { %4742 = vst.msk [vmem:[#allocation3 + $0x50] sm:$0xff] %vm2808_vm15, %v4657_v11  ;;  %v4957_v55 = vld [vmem:[#allocation2 + $0x21] sm:$0xff] }
 0x8b2   : > { %4860 = vrot.lane.b32.xlu1 %v10842_v15, %s8353_s12  ;;  %4856 = vrot.lane.b32.xlu2 %v10820_v30, %s8353_s12 }
 0x8b3   : > { %4852 = vrot.lane.b32.xlu0 %v10799_v60, %s8353_s12 }
 0x8b4   : > { %v4649_v2 = vpop.permute.xlu1 %4648  ;;  %v4663_v54 = vpop.permute.xlu2 %4662 }
 0x8b5   : > { %v4641_v39 = vpop.permute.xlu0 %4640  ;;  %4738 = vst.msk [vmem:[#allocation3 + $0x30] sm:$0xff] %vm2808_vm15, %v4649_v2 }
 0x8b6   : > { %4734 = vst.msk [vmem:[#allocation3 + $0x10] sm:$0xff] %vm2808_vm15, %v4641_v39 }
 0x8b7   : > { %4745 = vst.msk [vmem:[#allocation3 + $0x68] sm:$0xff] %vm2808_vm15, %v4663_v54  ;;  %v12959_v54 = vld [vmem:[#allocation4_spill] sm:$0xff] }
 0x8ba   : > { %4866 = vrot.lane.b32.xlu1 %v10875_v35, %s8353_s12  ;;  %4862 = vrot.lane.b32.xlu2 %v10853_v0, %s8353_s12 }
 0x8bb   : > { %4858 = vrot.lane.b32.xlu0 %v10831_v44, %s8353_s12 }
 0x8bc   : > { %v4655_v42 = vpop.permute.xlu1 %4654  ;;  %v4669_v30 = vpop.permute.xlu2 %4668 }
 0x8bd   : > { %v4647_v60 = vpop.permute.xlu0 %4646  ;;  %4741 = vst.msk [vmem:[#allocation3 + $0x48] sm:$0xff] %vm2808_vm15, %v4655_v42 }
 0x8be   : > { %4737 = vst.msk [vmem:[#allocation3 + $0x28] sm:$0xff] %vm2808_vm15, %v4647_v60  ;;  %v11314_v60 = vld [vmem:[#allocation2 + $0x181] sm:$0xff] }
 0x8bf   : > { %4748 = vst.msk [vmem:[#allocation3 + $0x80] sm:$0xff] %vm2808_vm15, %v4669_v30  ;;  %v11321_v30 = vld [vmem:[#allocation2 + $0x189] sm:$0xff] }
 0x8c2   : > { %4872 = vrot.lane.b32.xlu1 %v10908_v33, %s8353_s12  ;;  %4868 = vrot.lane.b32.xlu2 %v10886_v43, %s8353_s12 }
 0x8c3   : > { %4864 = vrot.lane.b32.xlu0 %v10864_v9, %s8353_s12 }
 0x8c4   : > { %v4661_v15 = vpop.permute.xlu1 %4660  ;;  %v4675_v0 = vpop.permute.xlu2 %4674 }
 0x8c5   : > { %v4653_v44 = vpop.permute.xlu0 %4652  ;;  %4744 = vst.msk [vmem:[#allocation3 + $0x60] sm:$0xff] %vm2808_vm15, %v4661_v15  ;;  %v12962_v15 = vld [vmem:[#allocation9_spill] sm:$0xff] }
 0x8c6   : > { %4740 = vst.msk [vmem:[#allocation3 + $0x40] sm:$0xff] %vm2808_vm15, %v4653_v44  ;;  %v12961_v44 = vld [vmem:[#allocation6_spill] sm:$0xff] }
 0x8c7   : > { %4751 = vst.msk [vmem:[#allocation3 + $0x98] sm:$0xff] %vm2808_vm15, %v4675_v0 }
 0x8ca   : > { %4878 = vrot.lane.b32.xlu1 %v10942_v24, %s8353_s12  ;;  %4874 = vrot.lane.b32.xlu2 %v10922_v62, %s8353_s12 }
 0x8cb   : > { %4870 = vrot.lane.b32.xlu0 %v10897_v20, %s8353_s12 }
 0x8cc   : > { %v4667_v35 = vpop.permute.xlu1 %4666  ;;  %v4681_v43 = vpop.permute.xlu2 %4680 }
 0x8cd   : > { %v4659_v9 = vpop.permute.xlu0 %4658  ;;  %4747 = vst.msk [vmem:[#allocation3 + $0x78] sm:$0xff] %vm2808_vm15, %v4667_v35 }
 0x8ce   : > { %4743 = vst.msk [vmem:[#allocation3 + $0x58] sm:$0xff] %vm2808_vm15, %v4659_v9 }
 0x8cf   : > { %4754 = vst.msk [vmem:[#allocation3 + $0xb0] sm:$0xff] %vm2808_vm15, %v4681_v43  ;;  %v12963_v43 = vld [vmem:[#allocation12_spill] sm:$0xff] }
 0x8d2   : > { %4884 = vrot.lane.b32.xlu1 %v10976_v14, %s8353_s12  ;;  %4880 = vrot.lane.b32.xlu2 %v10954_v52, %s8353_s12 }
 0x8d3   : > { %4876 = vrot.lane.b32.xlu0 %v10930_v31, %s8353_s12 }
 0x8d4   : > { %v4673_v24 = vpop.permute.xlu1 %4672  ;;  %v4687_v58 = vpop.permute.xlu2 %4686 }
 0x8d5   : > { %v4665_v33 = vpop.permute.xlu0 %4664  ;;  %4750 = vst.msk [vmem:[#allocation3 + $0x90] sm:$0xff] %vm2808_vm15, %v4673_v24  ;;  %v12965_v24 = vld [vmem:[#allocation5_spill] sm:$0xff] }
 0x8d6   : > { %4746 = vst.msk [vmem:[#allocation3 + $0x70] sm:$0xff] %vm2808_vm15, %v4665_v33  ;;  %v12964_v33 = vld [vmem:[#allocation7_spill] sm:$0xff] }
 0x8d7   : > { %4757 = vst.msk [vmem:[#allocation3 + $0xc8] sm:$0xff] %vm2808_vm15, %v4687_v58 }
 0x8da   : > { %4890 = vrot.lane.b32.xlu1 %v11209_v6, %s8353_s12  ;;  %4886 = vrot.lane.b32.xlu2 %v10993_v25, %s8353_s12 }
 0x8db   : > { %4882 = vrot.lane.b32.xlu0 %v10968_v13, %s8353_s12 }
 0x8dc   : > { %v4679_v56 = vpop.permute.xlu1 %4678  ;;  %v4693_v38 = vpop.permute.xlu2 %4692 }
 0x8dd   : > { %v4671_v34 = vpop.permute.xlu0 %4670  ;;  %4753 = vst.msk [vmem:[#allocation3 + $0xa8] sm:$0xff] %vm2808_vm15, %v4679_v56 }
 0x8de   : > { %4749 = vst.msk [vmem:[#allocation3 + $0x88] sm:$0xff] %vm2808_vm15, %v4671_v34 }
 0x8df   : > { %4760 = vst.msk [vmem:[#allocation3 + $0xe0] sm:$0xff] %vm2808_vm15, %v4693_v38  ;;  %v12966_v38 = vld [vmem:[#allocation17_spill] sm:$0xff] }
 0x8e2   : > { %5024 = vrot.lane.b32.xlu1 %v10681_v23, %s8355_s14  ;;  %5020 = vrot.lane.b32.xlu2 %v4956_v61, %s8355_s14  ;;  %v12967_v61 = vld [vmem:[#allocation10_spill] sm:$0xff] }
 0x8e3   : > { %4888 = vrot.lane.b32.xlu0 %v11220_v28, %s8353_s12 }
 0x8e4   : > { %v4685_v50 = vpop.permute.xlu1 %4684  ;;  %v4699_v51 = vpop.permute.xlu2 %4698 }
 0x8e5   : > { %v4677_v5 = vpop.permute.xlu0 %4676  ;;  %4756 = vst.msk [vmem:[#allocation3 + $0xc0] sm:$0xff] %vm2808_vm15, %v4685_v50 }
 0x8e6   : > { %4752 = vst.msk [vmem:[#allocation3 + $0xa0] sm:$0xff] %vm2808_vm15, %v4677_v5  ;;  %v12968_v5 = vld [vmem:[#allocation16_spill] sm:$0xff] }
 0x8e7   : > { %4763 = vst.msk [vmem:[#allocation3 + $0xf8] sm:$0xff] %vm2808_vm15, %v4699_v51 }
 0x8ea   : > { %5030 = vrot.lane.b32.xlu1 %v10714_v37, %s8355_s14  ;;  %5026 = vrot.lane.b32.xlu2 %v10692_v8, %s8355_s14 }
 0x8eb   : > { %5022 = vrot.lane.b32.xlu0 %v4957_v55, %s8355_s14 }
 0x8ec   : > { %v4691_v11 = vpop.permute.xlu1 %4690  ;;  %v4833_v39 = vpop.permute.xlu2 %4832 }
 0x8ed   : > { %v4683_v23 = vpop.permute.xlu0 %4682  ;;  %4759 = vst.msk [vmem:[#allocation3 + $0xd8] sm:$0xff] %vm2808_vm15, %v4691_v11  ;;  %v12970_v11 = vld [vmem:[#allocation14_spill] sm:$0xff] }
 0x8ee   : > { %4755 = vst.msk [vmem:[#allocation3 + $0xb8] sm:$0xff] %vm2808_vm15, %v4683_v23  ;;  %v12969_v23 = vld [vmem:[#allocation20_spill] sm:$0xff] }
 0x8ef   : > { %4926 = vst.msk [vmem:[#allocation3 + $0x10] sm:$0xff] %vm3001_vm1, %v4833_v39  ;;  %v12971_v39 = vld [vmem:[#allocation8_spill] sm:$0xff] }
 0x8f2   : > { %5036 = vrot.lane.b32.xlu1 %v10749_v41, %s8355_s14  ;;  %5032 = vrot.lane.b32.xlu2 %v10725_v3, %s8355_s14 }
 0x8f3   : > { %5028 = vrot.lane.b32.xlu0 %v10703_v45, %s8355_s14 }
 0x8f4   : > { %v4697_v8 = vpop.permute.xlu1 %4696  ;;  %v4839_v2 = vpop.permute.xlu2 %4838 }
 0x8f5   : > { %v4689_v37 = vpop.permute.xlu0 %4688  ;;  %4762 = vst.msk [vmem:[#allocation3 + $0xf0] sm:$0xff] %vm2808_vm15, %v4697_v8 }
 0x8f6   : > { %4758 = vst.msk [vmem:[#allocation3 + $0xd0] sm:$0xff] %vm2808_vm15, %v4689_v37 }
 0x8f7   : > { %4929 = vst.msk [vmem:[#allocation3 + $0x28] sm:$0xff] %vm3001_vm1, %v4839_v2 }
 0x8fa   : > { %5042 = vrot.lane.b32.xlu1 %v10784_v26, %s8355_s14  ;;  %5038 = vrot.lane.b32.xlu2 %v10760_v22, %s8355_s14 }
 0x8fb   : > { %5034 = vrot.lane.b32.xlu0 %v10736_v53, %s8355_s14 }
 0x8fc   : > { %v4831_v3 = vpop.permute.xlu1 %4830  ;;  %v4845_v41 = vpop.permute.xlu2 %4844 }
 0x8fd   : > { %v4695_v45 = vpop.permute.xlu0 %4694  ;;  %4925 = vst.msk [vmem:[#allocation3 + $0x8] sm:$0xff] %vm3001_vm1, %v4831_v3  ;;  %v12973_v3 = vld [vmem:[#allocation18_spill] sm:$0xff] }
 0x8fe   : > { %4761 = vst.msk [vmem:[#allocation3 + $0xe8] sm:$0xff] %vm2808_vm15, %v4695_v45  ;;  %v12972_v45 = vld [vmem:[#allocation23_spill] sm:$0xff] }
 0x8ff   : > { %4932 = vst.msk [vmem:[#allocation3 + $0x40] sm:$0xff] %vm3001_vm1, %v4845_v41  ;;  %v12974_v41 = vld [vmem:[#allocation11_spill] sm:$0xff] }
 0x902   : > { %5048 = vrot.lane.b32.xlu1 %v10818_v12, %s8355_s14  ;;  %5044 = vrot.lane.b32.xlu2 %v10797_v18, %s8355_s14 }
 0x903   : > { %5040 = vrot.lane.b32.xlu0 %v10772_v46, %s8355_s14 }
 0x904   : > { %v4837_v22 = vpop.permute.xlu1 %4836  ;;  %v4851_v26 = vpop.permute.xlu2 %4850 }
 0x905   : > { %v4829_v53 = vpop.permute.xlu0 %4828  ;;  %4928 = vst.msk [vmem:[#allocation3 + $0x20] sm:$0xff] %vm3001_vm1, %v4837_v22 }
 0x906   : > { %4924 = vst.msk [vmem:[#allocation3] sm:$0xff] %vm3001_vm1, %v4829_v53 }
 0x907   : > { %4935 = vst.msk [vmem:[#allocation3 + $0x58] sm:$0xff] %vm3001_vm1, %v4851_v26 }
 0x90a   : > { %5054 = vrot.lane.b32.xlu1 %v10851_v1, %s8355_s14  ;;  %5050 = vrot.lane.b32.xlu2 %v10829_v27, %s8355_s14 }
 0x90b   : > { %5046 = vrot.lane.b32.xlu0 %v10808_v32, %s8355_s14 }
 0x90c   : > { %v4843_v18 = vpop.permute.xlu1 %4842  ;;  %v4857_v12 = vpop.permute.xlu2 %4856 }
 0x90d   : > { %v4835_v46 = vpop.permute.xlu0 %4834  ;;  %4931 = vst.msk [vmem:[#allocation3 + $0x38] sm:$0xff] %vm3001_vm1, %v4843_v18  ;;  %v12976_v18 = vld [vmem:[#allocation22_spill] sm:$0xff] }
 0x90e   : > { %4927 = vst.msk [vmem:[#allocation3 + $0x18] sm:$0xff] %vm3001_vm1, %v4835_v46  ;;  %v12975_v46 = vld [vmem:[#allocation26_spill] sm:$0xff] }
 0x90f   : > { %4938 = vst.msk [vmem:[#allocation3 + $0x70] sm:$0xff] %vm3001_vm1, %v4857_v12  ;;  %v12977_v12 = vld [vmem:[#allocation15_spill] sm:$0xff] }
 0x912   : > { %5060 = vrot.lane.b32.xlu1 %v10884_v21, %s8355_s14  ;;  %5056 = vrot.lane.b32.xlu2 %v10862_v10, %s8355_s14 }
 0x913   : > { %5052 = vrot.lane.b32.xlu0 %v10840_v16, %s8355_s14 }
 0x914   : > { %v4849_v27 = vpop.permute.xlu1 %4848  ;;  %v4863_v1 = vpop.permute.xlu2 %4862 }
 0x915   : > { %v4841_v32 = vpop.permute.xlu0 %4840  ;;  %4934 = vst.msk [vmem:[#allocation3 + $0x50] sm:$0xff] %vm3001_vm1, %v4849_v27 }
 0x916   : > { %4930 = vst.msk [vmem:[#allocation3 + $0x30] sm:$0xff] %vm3001_vm1, %v4841_v32 }
 0x917   : > { %4941 = vst.msk [vmem:[#allocation3 + $0x88] sm:$0xff] %vm3001_vm1, %v4863_v1 }
 0x91a   : > { %5066 = vrot.lane.b32.xlu1 %v10917_v47, %s8355_s14  ;;  %5062 = vrot.lane.b32.xlu2 %v10895_v63, %s8355_s14 }
 0x91b   : > { %5058 = vrot.lane.b32.xlu0 %v10873_v49, %s8355_s14 }
 0x91c   : > { %v4855_v10 = vpop.permute.xlu1 %4854  ;;  %v4869_v21 = vpop.permute.xlu2 %4868 }
 0x91d   : > { %v4847_v16 = vpop.permute.xlu0 %4846  ;;  %4937 = vst.msk [vmem:[#allocation3 + $0x68] sm:$0xff] %vm3001_vm1, %v4855_v10  ;;  %v12979_v10 = vld [vmem:[#allocation27_spill] sm:$0xff] }
 0x91e   : > { %4933 = vst.msk [vmem:[#allocation3 + $0x48] sm:$0xff] %vm3001_vm1, %v4847_v16  ;;  %v12978_v16 = vld [vmem:[#allocation21_spill] sm:$0xff] }
 0x91f   : > { %4944 = vst.msk [vmem:[#allocation3 + $0xa0] sm:$0xff] %vm3001_vm1, %v4869_v21  ;;  %v12980_v21 = vld [vmem:[#allocation19_spill] sm:$0xff] }
 0x922   : > { %5072 = vrot.lane.b32.xlu1 %v10952_v17, %s8355_s14  ;;  %5068 = vrot.lane.b32.xlu2 %v10928_v48, %s8355_s14 }
 0x923   : > { %5064 = vrot.lane.b32.xlu0 %v10906_v19, %s8355_s14 }
 0x924   : > { %v4861_v63 = vpop.permute.xlu1 %4860  ;;  %v4875_v47 = vpop.permute.xlu2 %4874 }
 0x925   : > { %v4853_v49 = vpop.permute.xlu0 %4852  ;;  %4940 = vst.msk [vmem:[#allocation3 + $0x80] sm:$0xff] %vm3001_vm1, %v4861_v63 }
 0x926   : > { %4936 = vst.msk [vmem:[#allocation3 + $0x60] sm:$0xff] %vm3001_vm1, %v4853_v49 }
 0x927   : > { %4947 = vst.msk [vmem:[#allocation3 + $0xb8] sm:$0xff] %vm3001_vm1, %v4875_v47 }
 0x92a   : > { %5078 = vrot.lane.b32.xlu1 %v10987_v36, %s8355_s14  ;;  %5074 = vrot.lane.b32.xlu2 %v10963_v59, %s8355_s14 }
 0x92b   : > { %5070 = vrot.lane.b32.xlu0 %v10940_v57, %s8355_s14  ;;  %v12960_v57 = vld [vmem:[#allocation13_spill] sm:$0xff] }
 0x92c   : > { %v4867_v48 = vpop.permute.xlu1 %4866  ;;  %v4881_v17 = vpop.permute.xlu2 %4880 }
 0x92d   : > { %v4859_v19 = vpop.permute.xlu0 %4858  ;;  %4943 = vst.msk [vmem:[#allocation3 + $0x98] sm:$0xff] %vm3001_vm1, %v4867_v48  ;;  %v12982_v48 = vld [vmem:[#allocation24_spill] sm:$0xff] }
 0x92e   : > { %4939 = vst.msk [vmem:[#allocation3 + $0x78] sm:$0xff] %vm3001_vm1, %v4859_v19  ;;  %v12981_v19 = vld [vmem:[#allocation25_spill] sm:$0xff] }
 0x92f   : > { %4950 = vst.msk [vmem:[#allocation3 + $0xd0] sm:$0xff] %vm3001_vm1, %v4881_v17 }
 0x932   : > { %5212 = vrot.lane.b32.xlu1 %v12960_v57, %s8356_s30  ;;  %5080 = vrot.lane.b32.xlu2 %v11314_v60, %s8355_s14 }
 0x933   : > { %5076 = vrot.lane.b32.xlu0 %v12959_v54, %s8355_s14 }
 0x934   : > { %v4873_v36 = vpop.permute.xlu1 %4872  ;;  %v4887_v42 = vpop.permute.xlu2 %4886 }
 0x935   : > { %v4865_v59 = vpop.permute.xlu0 %4864  ;;  %4946 = vst.msk [vmem:[#allocation3 + $0xb0] sm:$0xff] %vm3001_vm1, %v4873_v36 }
 0x936   : > { %4942 = vst.msk [vmem:[#allocation3 + $0x90] sm:$0xff] %vm3001_vm1, %v4865_v59  ;;  %v12983_v59 = vld [vmem:[#allocation29_spill] sm:$0xff] }
 0x937   : > { %4953 = vst.msk [vmem:[#allocation3 + $0xe8] sm:$0xff] %vm3001_vm1, %v4887_v42 }
 0x93a   : > { %5218 = vrot.lane.b32.xlu1 %v12961_v44, %s8356_s30  ;;  %5214 = vrot.lane.b32.xlu2 %v12962_v15, %s8356_s30  ;;  %v11404_v15 = vld [vmem:[#allocation2 + $0x182] sm:$0xff] }
 0x93b   : > { %5082 = vrot.lane.b32.xlu0 %v11321_v30, %s8355_s14 }
 0x93c   : > { %v4879_v9 = vpop.permute.xlu1 %4878  ;;  %v5021_v35 = vpop.permute.xlu2 %5020 }
 0x93d   : > { %v4871_v0 = vpop.permute.xlu0 %4870  ;;  %4949 = vst.msk [vmem:[#allocation3 + $0xc8] sm:$0xff] %vm3001_vm1, %v4879_v9 }
 0x93e   : > { %4945 = vst.msk [vmem:[#allocation3 + $0xa8] sm:$0xff] %vm3001_vm1, %v4871_v0 }
 0x93f   : > { %5116 = vst.msk [vmem:[#allocation3] sm:$0xff] %vm3194_vm3, %v5021_v35 }
 0x942   : > { %5224 = vrot.lane.b32.xlu1 %v12964_v33, %s8356_s30  ;;  %5220 = vrot.lane.b32.xlu2 %v12965_v24, %s8356_s30 }
 0x943   : > { %5216 = vrot.lane.b32.xlu0 %v12963_v43, %s8356_s30  ;;  %v5341_v43 = vld [vmem:[#allocation2 + $0x38] sm:$0xff] }
 0x944   : > { %v4885_v34 = vpop.permute.xlu1 %4884  ;;  %v5027_v56 = vpop.permute.xlu2 %5026 }
 0x945   : > { %v4877_v58 = vpop.permute.xlu0 %4876  ;;  %4952 = vst.msk [vmem:[#allocation3 + $0xe0] sm:$0xff] %vm3001_vm1, %v4885_v34  ;;  %v5340_v34 = vld [vmem:[#allocation2 + $0x30] sm:$0xff] }
 0x946   : > { %4948 = vst.msk [vmem:[#allocation3 + $0xc0] sm:$0xff] %vm3001_vm1, %v4877_v58 }
 0x947   : > { %5119 = vst.msk [vmem:[#allocation3 + $0x18] sm:$0xff] %vm3194_vm3, %v5027_v56  ;;  %v5344_v56 = vld [vmem:[#allocation2 + $0x60] sm:$0xff] }
 0x94a   : > { %5230 = vrot.lane.b32.xlu1 %v12967_v61, %s8356_s30  ;;  %5226 = vrot.lane.b32.xlu2 %v12968_v5, %s8356_s30 }
 0x94b   : > { %5222 = vrot.lane.b32.xlu0 %v12966_v38, %s8356_s30 }
 0x94c   : > { %v4891_v51 = vpop.permute.xlu1 %4890  ;;  %v5033_v55 = vpop.permute.xlu2 %5032 }
 0x94d   : > { %v4883_v50 = vpop.permute.xlu0 %4882  ;;  %4955 = vst.msk [vmem:[#allocation3 + $0xf8] sm:$0xff] %vm3001_vm1, %v4891_v51  ;;  %v5347_v51 = vld [vmem:[#allocation2 + $0x80] sm:$0xff] }
 0x94e   : > { %4951 = vst.msk [vmem:[#allocation3 + $0xd8] sm:$0xff] %vm3001_vm1, %v4883_v50  ;;  %v5343_v50 = vld [vmem:[#allocation2 + $0x50] sm:$0xff] }
 0x94f   : > { %5122 = vst.msk [vmem:[#allocation3 + $0x30] sm:$0xff] %vm3194_vm3, %v5033_v55  ;;  %v5345_v55 = vld [vmem:[#allocation2 + $0x68] sm:$0xff] }
 0x952   : > { %5236 = vrot.lane.b32.xlu1 %v12970_v11, %s8356_s30  ;;  %5232 = vrot.lane.b32.xlu2 %v12971_v39, %s8356_s30 }
 0x953   : > { %5228 = vrot.lane.b32.xlu0 %v12969_v23, %s8356_s30 }
 0x954   : > { %v5025_v8 = vpop.permute.xlu1 %5024  ;;  %v5039_v2 = vpop.permute.xlu2 %5038 }
 0x955   : > { %v4889_v37 = vpop.permute.xlu0 %4888  ;;  %5118 = vst.msk [vmem:[#allocation3 + $0x10] sm:$0xff] %vm3194_vm3, %v5025_v8  ;;  %v5350_v8 = vld [vmem:[#allocation2 + $0xa8] sm:$0xff] }
 0x956   : > { %4954 = vst.msk [vmem:[#allocation3 + $0xf0] sm:$0xff] %vm3001_vm1, %v4889_v37  ;;  %v5346_v37 = vld [vmem:[#allocation2 + $0x78] sm:$0xff] }
 0x957   : > { %5125 = vst.msk [vmem:[#allocation3 + $0x48] sm:$0xff] %vm3194_vm3, %v5039_v2  ;;  %v5348_v2 = vld [vmem:[#allocation2 + $0x90] sm:$0xff] }
 0x95a   : > { %5242 = vrot.lane.b32.xlu1 %v12973_v3, %s8356_s30  ;;  %5238 = vrot.lane.b32.xlu2 %v12974_v41, %s8356_s30 }
 0x95b   : > { %5234 = vrot.lane.b32.xlu0 %v12972_v45, %s8356_s30 }
 0x95c   : > { %v5031_v22 = vpop.permute.xlu1 %5030  ;;  %v5045_v26 = vpop.permute.xlu2 %5044 }
 0x95d   : > { %v5023_v53 = vpop.permute.xlu0 %5022  ;;  %5121 = vst.msk [vmem:[#allocation3 + $0x28] sm:$0xff] %vm3194_vm3, %v5031_v22  ;;  %v5353_v22 = vld [vmem:[#allocation2 + $0xc8] sm:$0xff] }
 0x95e   : > { %5117 = vst.msk [vmem:[#allocation3 + $0x8] sm:$0xff] %vm3194_vm3, %v5023_v53  ;;  %v5349_v53 = vld [vmem:[#allocation2 + $0x98] sm:$0xff] }
 0x95f   : > { %5128 = vst.msk [vmem:[#allocation3 + $0x60] sm:$0xff] %vm3194_vm3, %v5045_v26  ;;  %v5351_v26 = vld [vmem:[#allocation2 + $0xb0] sm:$0xff] }
 0x962   : > { %5248 = vrot.lane.b32.xlu1 %v12976_v18, %s8356_s30  ;;  %5244 = vrot.lane.b32.xlu2 %v12977_v12, %s8356_s30 }
 0x963   : > { %5240 = vrot.lane.b32.xlu0 %v12975_v46, %s8356_s30 }
 0x964   : > { %v5037_v27 = vpop.permute.xlu1 %5036  ;;  %v5051_v1 = vpop.permute.xlu2 %5050 }
 0x965   : > { %v5029_v32 = vpop.permute.xlu0 %5028  ;;  %5124 = vst.msk [vmem:[#allocation3 + $0x40] sm:$0xff] %vm3194_vm3, %v5037_v27  ;;  %v5356_v27 = vld [vmem:[#allocation2 + $0xf0] sm:$0xff] }
 0x966   : > { %5120 = vst.msk [vmem:[#allocation3 + $0x20] sm:$0xff] %vm3194_vm3, %v5029_v32  ;;  %v5352_v32 = vld [vmem:[#allocation2 + $0xc0] sm:$0xff] }
 0x967   : > { %5131 = vst.msk [vmem:[#allocation3 + $0x78] sm:$0xff] %vm3194_vm3, %v5051_v1  ;;  %v5354_v1 = vld [vmem:[#allocation2 + $0xd8] sm:$0xff] }
 0x96a   : > { %5254 = vrot.lane.b32.xlu1 %v12979_v10, %s8356_s30  ;;  %5250 = vrot.lane.b32.xlu2 %v12980_v21, %s8356_s30 }
 0x96b   : > { %5246 = vrot.lane.b32.xlu0 %v12978_v16, %s8356_s30 }
 0x96c   : > { %v5043_v63 = vpop.permute.xlu1 %5042  ;;  %v5057_v47 = vpop.permute.xlu2 %5056 }
 0x96d   : > { %v5035_v49 = vpop.permute.xlu0 %5034  ;;  %5127 = vst.msk [vmem:[#allocation3 + $0x58] sm:$0xff] %vm3194_vm3, %v5043_v63  ;;  %v5357_v63 = vld [vmem:[#allocation2 + $0xf8] sm:$0xff] }
 0x96e   : > { %5123 = vst.msk [vmem:[#allocation3 + $0x38] sm:$0xff] %vm3194_vm3, %v5035_v49  ;;  %v5355_v49 = vld [vmem:[#allocation2 + $0xe0] sm:$0xff] }
 0x96f   : > { %5134 = vst.msk [vmem:[#allocation3 + $0x90] sm:$0xff] %vm3194_vm3, %v5057_v47 }
 0x972   : > { %5260 = vrot.lane.b32.xlu1 %v11103_v7, %s8356_s30  ;;  %5256 = vrot.lane.b32.xlu2 %v12982_v48, %s8356_s30  ;;  %v12984_v7 = vld [vmem:[#allocation28_spill] sm:$0xff] }
 0x973   : > { %5252 = vrot.lane.b32.xlu0 %v12981_v19, %s8356_s30 }
 0x974   : > { %v5049_v54 = vpop.permute.xlu1 %5048  ;;  %v5063_v57 = vpop.permute.xlu2 %5062 }
 0x975   : > { %v5041_v17 = vpop.permute.xlu0 %5040  ;;  %5130 = vst.msk [vmem:[#allocation3 + $0x70] sm:$0xff] %vm3194_vm3, %v5049_v54  ;;  %v5360_v54 = vld [vmem:[#allocation2 + $0x120] sm:$0xff] }
 0x976   : > { %5126 = vst.msk [vmem:[#allocation3 + $0x50] sm:$0xff] %vm3194_vm3, %v5041_v17  ;;  %v5358_v17 = vld [vmem:[#allocation2 + $0x108] sm:$0xff] }
 0x977   : > { %5137 = vst.msk [vmem:[#allocation3 + $0xa8] sm:$0xff] %vm3194_vm3, %v5063_v57 }
 0x97a   : > { %5266 = vrot.lane.b32.xlu1 %v11116_v40, %s8356_s30  ;;  %5262 = vrot.lane.b32.xlu2 %v12984_v7, %s8356_s30  ;;  %v12985_v40 = vld [vmem:[#allocation30_spill] sm:$0xff] }
 0x97b   : > { %5258 = vrot.lane.b32.xlu0 %v12983_v59, %s8356_s30  ;;  %v5363_v7 = vld [vmem:[#allocation2 + $0x140] sm:$0xff] }
 0x97c   : > { %v5055_v42 = vpop.permute.xlu1 %5054  ;;  %v5069_v44 = vpop.permute.xlu2 %5068 }
 0x97d   : > { %v5047_v36 = vpop.permute.xlu0 %5046  ;;  %5133 = vst.msk [vmem:[#allocation3 + $0x88] sm:$0xff] %vm3194_vm3, %v5055_v42 }
 0x97e   : > { %5129 = vst.msk [vmem:[#allocation3 + $0x68] sm:$0xff] %vm3194_vm3, %v5047_v36 }
 0x97f   : > { %5140 = vst.msk [vmem:[#allocation3 + $0xc0] sm:$0xff] %vm3194_vm3, %v5069_v44 }
 0x982   : > { %5272 = vrot.lane.b32.xlu1 %v11404_v15, %s8356_s30  ;;  %5268 = vrot.lane.b32.xlu2 %v12985_v40, %s8356_s30  ;;  %v5371_v40 = vld [vmem:[#allocation2 + $0x1a0] sm:$0xff] }
 0x983   : > { %5264 = vrot.lane.b32.xlu0 %v11111_v4, %s8356_s30  ;;  %v11418_v4 = vld [vmem:[#allocation2 + $0x18a] sm:$0xff] }
 0x984   : > { %v5061_v9 = vpop.permute.xlu1 %5060  ;;  %v5075_v35 = vpop.permute.xlu2 %5074 }
 0x985   : > { %v5053_v0 = vpop.permute.xlu0 %5052  ;;  %5136 = vst.msk [vmem:[#allocation3 + $0xa0] sm:$0xff] %vm3194_vm3, %v5061_v9  ;;  %v5534_v9 = vld [vmem:[#allocation2 + $0x49] sm:$0xff] }
 0x986   : > { %5132 = vst.msk [vmem:[#allocation3 + $0x80] sm:$0xff] %vm3194_vm3, %v5053_v0  ;;  %v5370_v0 = vld [vmem:[#allocation2 + $0x198] sm:$0xff] }
 0x987   : > { %5143 = vst.msk [vmem:[#allocation3 + $0xd8] sm:$0xff] %vm3194_vm3, %v5075_v35 }
 0x98a   : > { %5406 = vrot.lane.b32.xlu1 %v5341_v43, %s8357_s15  ;;  %5274 = vrot.lane.b32.xlu2 %v11418_v4, %s8356_s30 }
 0x98b   : > { %5270 = vrot.lane.b32.xlu0 %v11122_v29, %s8356_s30  ;;  %v5342_v29 = vld [vmem:[#allocation2 + $0x48] sm:$0xff] }
 0x98c   : > { %v5067_v24 = vpop.permute.xlu1 %5066  ;;  %v5081_v58 = vpop.permute.xlu2 %5080 }
 0x98d   : > { %v5059_v33 = vpop.permute.xlu0 %5058  ;;  %5139 = vst.msk [vmem:[#allocation3 + $0xb8] sm:$0xff] %vm3194_vm3, %v5067_v24  ;;  %v5537_v24 = vld [vmem:[#allocation2 + $0x69] sm:$0xff] }
 0x98e   : > { %5135 = vst.msk [vmem:[#allocation3 + $0x98] sm:$0xff] %vm3194_vm3, %v5059_v33  ;;  %v5533_v33 = vld [vmem:[#allocation2 + $0x39] sm:$0xff] }
 0x98f   : > { %5146 = vst.msk [vmem:[#allocation3 + $0xf0] sm:$0xff] %vm3194_vm3, %v5081_v58  ;;  %v5535_v58 = vld [vmem:[#allocation2 + $0x51] sm:$0xff] }
 0x992   : > { %5412 = vrot.lane.b32.xlu1 %v5344_v56, %s8357_s15  ;;  %5408 = vrot.lane.b32.xlu2 %v5342_v29, %s8357_s15 }
 0x993   : > { %5404 = vrot.lane.b32.xlu0 %v5340_v34, %s8357_s15 }
 0x994   : > { %v5073_v61 = vpop.permute.xlu1 %5072  ;;  %v5215_v5 = vpop.permute.xlu2 %5214 }
 0x995   : > { %v5065_v38 = vpop.permute.xlu0 %5064  ;;  %5142 = vst.msk [vmem:[#allocation3 + $0xd0] sm:$0xff] %vm3194_vm3, %v5073_v61  ;;  %v5540_v61 = vld [vmem:[#allocation2 + $0x91] sm:$0xff] }
 0x996   : > { %5138 = vst.msk [vmem:[#allocation3 + $0xb0] sm:$0xff] %vm3194_vm3, %v5065_v38  ;;  %v5536_v38 = vld [vmem:[#allocation2 + $0x61] sm:$0xff] }
 0x997   : > { %5309 = vst.msk [vmem:[#allocation3 + $0x8] sm:$0xff] %vm3387_vm13, %v5215_v5  ;;  %v5538_v5 = vld [vmem:[#allocation2 + $0x79] sm:$0xff] }
 0x99a   : > { %5418 = vrot.lane.b32.xlu1 %v5347_v51, %s8357_s15  ;;  %5414 = vrot.lane.b32.xlu2 %v5345_v55, %s8357_s15 }
 0x99b   : > { %5410 = vrot.lane.b32.xlu0 %v5343_v50, %s8357_s15 }
 0x99c   : > { %v5079_v11 = vpop.permute.xlu1 %5078  ;;  %v5221_v39 = vpop.permute.xlu2 %5220 }
 0x99d   : > { %v5071_v23 = vpop.permute.xlu0 %5070  ;;  %5145 = vst.msk [vmem:[#allocation3 + $0xe8] sm:$0xff] %vm3194_vm3, %v5079_v11  ;;  %v5543_v11 = vld [vmem:[#allocation2 + $0xb1] sm:$0xff] }
 0x99e   : > { %5141 = vst.msk [vmem:[#allocation3 + $0xc8] sm:$0xff] %vm3194_vm3, %v5071_v23  ;;  %v5539_v23 = vld [vmem:[#allocation2 + $0x81] sm:$0xff] }
 0x99f   : > { %5312 = vst.msk [vmem:[#allocation3 + $0x20] sm:$0xff] %vm3387_vm13, %v5221_v39  ;;  %v5541_v39 = vld [vmem:[#allocation2 + $0x99] sm:$0xff] }
 0x9a2   : > { %5424 = vrot.lane.b32.xlu1 %v5350_v8, %s8357_s15  ;;  %5420 = vrot.lane.b32.xlu2 %v5348_v2, %s8357_s15 }
 0x9a3   : > { %5416 = vrot.lane.b32.xlu0 %v5346_v37, %s8357_s15 }
 0x9a4   : > { %v5213_v3 = vpop.permute.xlu1 %5212  ;;  %v5227_v41 = vpop.permute.xlu2 %5226 }
 0x9a5   : > { %v5077_v45 = vpop.permute.xlu0 %5076  ;;  %5308 = vst.msk [vmem:[#allocation3] sm:$0xff] %vm3387_vm13, %v5213_v3  ;;  %v5546_v3 = vld [vmem:[#allocation2 + $0xd9] sm:$0xff] }
 0x9a6   : > { %5144 = vst.msk [vmem:[#allocation3 + $0xe0] sm:$0xff] %vm3194_vm3, %v5077_v45  ;;  %v5542_v45 = vld [vmem:[#allocation2 + $0xa9] sm:$0xff] }
 0x9a7   : > { %5315 = vst.msk [vmem:[#allocation3 + $0x38] sm:$0xff] %vm3387_vm13, %v5227_v41  ;;  %v5544_v41 = vld [vmem:[#allocation2 + $0xc1] sm:$0xff] }
 0x9aa   : > { %5430 = vrot.lane.b32.xlu1 %v5353_v22, %s8357_s15  ;;  %5426 = vrot.lane.b32.xlu2 %v5351_v26, %s8357_s15 }
 0x9ab   : > { %5422 = vrot.lane.b32.xlu0 %v5349_v53, %s8357_s15 }
 0x9ac   : > { %v5219_v18 = vpop.permute.xlu1 %5218  ;;  %v5233_v12 = vpop.permute.xlu2 %5232 }
 0x9ad   : > { %v5083_v46 = vpop.permute.xlu0 %5082  ;;  %5311 = vst.msk [vmem:[#allocation3 + $0x18] sm:$0xff] %vm3387_vm13, %v5219_v18  ;;  %v5549_v18 = vld [vmem:[#allocation2 + $0xf9] sm:$0xff] }
 0x9ae   : > { %5147 = vst.msk [vmem:[#allocation3 + $0xf8] sm:$0xff] %vm3194_vm3, %v5083_v46  ;;  %v5545_v46 = vld [vmem:[#allocation2 + $0xc9] sm:$0xff] }
 0x9af   : > { %5318 = vst.msk [vmem:[#allocation3 + $0x50] sm:$0xff] %vm3387_vm13, %v5233_v12  ;;  %v5547_v12 = vld [vmem:[#allocation2 + $0xe1] sm:$0xff] }
 0x9b2   : > { %5436 = vrot.lane.b32.xlu1 %v5356_v27, %s8357_s15  ;;  %5432 = vrot.lane.b32.xlu2 %v5354_v1, %s8357_s15 }
 0x9b3   : > { %5428 = vrot.lane.b32.xlu0 %v5352_v32, %s8357_s15 }
 0x9b4   : > { %v5225_v10 = vpop.permute.xlu1 %5224  ;;  %v5239_v21 = vpop.permute.xlu2 %5238 }
 0x9b5   : > { %v5217_v16 = vpop.permute.xlu0 %5216  ;;  %5314 = vst.msk [vmem:[#allocation3 + $0x30] sm:$0xff] %vm3387_vm13, %v5225_v10  ;;  %v5552_v10 = vld [vmem:[#allocation2 + $0x121] sm:$0xff] }
 0x9b6   : > { %5310 = vst.msk [vmem:[#allocation3 + $0x10] sm:$0xff] %vm3387_vm13, %v5217_v16  ;;  %v5548_v16 = vld [vmem:[#allocation2 + $0xf1] sm:$0xff] }
 0x9b7   : > { %5321 = vst.msk [vmem:[#allocation3 + $0x68] sm:$0xff] %vm3387_vm13, %v5239_v21  ;;  %v5550_v21 = vld [vmem:[#allocation2 + $0x109] sm:$0xff] }
 0x9ba   : > { %5442 = vrot.lane.b32.xlu1 %v10897_v20, %s8357_s15  ;;  %5438 = vrot.lane.b32.xlu2 %v5357_v63, %s8357_s15 }
 0x9bb   : > { %5434 = vrot.lane.b32.xlu0 %v5355_v49, %s8357_s15 }
 0x9bc   : > { %v5231_v19 = vpop.permute.xlu1 %5230  ;;  %v5245_v48 = vpop.permute.xlu2 %5244 }
 0x9bd   : > { %v5223_v47 = vpop.permute.xlu0 %5222  ;;  %5317 = vst.msk [vmem:[#allocation3 + $0x48] sm:$0xff] %vm3387_vm13, %v5231_v19  ;;  %v5551_v19 = vld [vmem:[#allocation2 + $0x111] sm:$0xff] }
 0x9be   : > { %5313 = vst.msk [vmem:[#allocation3 + $0x28] sm:$0xff] %vm3387_vm13, %v5223_v47 }
 0x9bf   : > { %5324 = vst.msk [vmem:[#allocation3 + $0x80] sm:$0xff] %vm3387_vm13, %v5245_v48  ;;  %v5555_v48 = vld [vmem:[#allocation2 + $0x141] sm:$0xff] }
 0x9c2   : > { %5448 = vrot.lane.b32.xlu1 %v10930_v31, %s8357_s15  ;;  %5444 = vrot.lane.b32.xlu2 %v5360_v54, %s8357_s15 }
 0x9c3   : > { %5440 = vrot.lane.b32.xlu0 %v5358_v17, %s8357_s15  ;;  %v5553_v17 = vld [vmem:[#allocation2 + $0x129] sm:$0xff] }
 0x9c4   : > { %v5237_v57 = vpop.permute.xlu1 %5236  ;;  %v5251_v59 = vpop.permute.xlu2 %5250 }
 0x9c5   : > { %v5229_v20 = vpop.permute.xlu0 %5228  ;;  %5320 = vst.msk [vmem:[#allocation3 + $0x60] sm:$0xff] %vm3387_vm13, %v5237_v57 }
 0x9c6   : > { %5316 = vst.msk [vmem:[#allocation3 + $0x40] sm:$0xff] %vm3387_vm13, %v5229_v20 }
 0x9c7   : > { %5327 = vst.msk [vmem:[#allocation3 + $0x98] sm:$0xff] %vm3387_vm13, %v5251_v59  ;;  %v5554_v59 = vld [vmem:[#allocation2 + $0x139] sm:$0xff] }
 0x9ca   : > { %5454 = vrot.lane.b32.xlu1 %v10968_v13, %s8357_s15  ;;  %5450 = vrot.lane.b32.xlu2 %v5363_v7, %s8357_s15  ;;  %v5558_v7 = vld [vmem:[#allocation2 + $0x169] sm:$0xff] }
 0x9cb   : > { %5446 = vrot.lane.b32.xlu0 %v10922_v62, %s8357_s15 }
 0x9cc   : > { %v5243_v36 = vpop.permute.xlu1 %5242  ;;  %v5257_v42 = vpop.permute.xlu2 %5256 }
 0x9cd   : > { %v5235_v31 = vpop.permute.xlu0 %5234  ;;  %5323 = vst.msk [vmem:[#allocation3 + $0x78] sm:$0xff] %vm3387_vm13, %v5243_v36 }
 0x9ce   : > { %5319 = vst.msk [vmem:[#allocation3 + $0x58] sm:$0xff] %vm3387_vm13, %v5235_v31  ;;  %v5556_v31 = vld [vmem:[#allocation2 + $0x151] sm:$0xff] }
 0x9cf   : > { %5330 = vst.msk [vmem:[#allocation3 + $0xb0] sm:$0xff] %vm3387_vm13, %v5257_v42 }
 0x9d2   : > { %5460 = vrot.lane.b32.xlu1 %v11220_v28, %s8357_s15  ;;  %5456 = vrot.lane.b32.xlu2 %v10976_v14, %s8357_s15 }
 0x9d3   : > { %5452 = vrot.lane.b32.xlu0 %v10954_v52, %s8357_s15 }
 0x9d4   : > { %v5249_v13 = vpop.permute.xlu1 %5248  ;;  %v5263_v44 = vpop.permute.xlu2 %5262 }
 0x9d5   : > { %v5241_v62 = vpop.permute.xlu0 %5240  ;;  %5326 = vst.msk [vmem:[#allocation3 + $0x90] sm:$0xff] %vm3387_vm13, %v5249_v13  ;;  %v5557_v13 = vld [vmem:[#allocation2 + $0x159] sm:$0xff] }
 0x9d6   : > { %5322 = vst.msk [vmem:[#allocation3 + $0x70] sm:$0xff] %vm3387_vm13, %v5241_v62 }
 0x9d7   : > { %5333 = vst.msk [vmem:[#allocation3 + $0xc8] sm:$0xff] %vm3387_vm13, %v5263_v44  ;;  %v5559_v44 = vld [vmem:[#allocation2 + $0x171] sm:$0xff] }
 0x9da   : > { %5466 = vrot.lane.b32.xlu1 %v5371_v40, %s8357_s15  ;;  %5462 = vrot.lane.b32.xlu2 %v11209_v6, %s8357_s15 }
 0x9db   : > { %5458 = vrot.lane.b32.xlu0 %v10993_v25, %s8357_s15  ;;  %v5532_v25 = vld [vmem:[#allocation2 + $0x31] sm:$0xff] }
 0x9dc   : > { %v5255_v14 = vpop.permute.xlu1 %5254  ;;  %v5269_v28 = vpop.permute.xlu2 %5268 }
 0x9dd   : > { %v5247_v52 = vpop.permute.xlu0 %5246  ;;  %5329 = vst.msk [vmem:[#allocation3 + $0xa8] sm:$0xff] %vm3387_vm13, %v5255_v14 }
 0x9de   : > { %5325 = vst.msk [vmem:[#allocation3 + $0x88] sm:$0xff] %vm3387_vm13, %v5247_v52 }
 0x9df   : > { %5336 = vst.msk [vmem:[#allocation3 + $0xe0] sm:$0xff] %vm3387_vm13, %v5269_v28  ;;  %v5562_v28 = vld [vmem:[#allocation2 + $0x199] sm:$0xff] }
 0x9e2   : > { %5600 = vrot.lane.b32.xlu1 %v5534_v9, %s8358_s16  ;;  %5596 = vrot.lane.b32.xlu2 %v5532_v25, %s8358_s16 }
 0x9e3   : > { %5464 = vrot.lane.b32.xlu0 %v5370_v0, %s8357_s15  ;;  %v5724_v0 = vld [vmem:[#allocation2 + $0x32] sm:$0xff] }
 0x9e4   : > { %v5261_v6 = vpop.permute.xlu1 %5260  ;;  %v5275_v43 = vpop.permute.xlu2 %5274 }
 0x9e5   : > { %v5253_v35 = vpop.permute.xlu0 %5252  ;;  %5332 = vst.msk [vmem:[#allocation3 + $0xc0] sm:$0xff] %vm3387_vm13, %v5261_v6  ;;  %v5727_v6 = vld [vmem:[#allocation2 + $0x52] sm:$0xff] }
 0x9e6   : > { %5328 = vst.msk [vmem:[#allocation3 + $0xa0] sm:$0xff] %vm3387_vm13, %v5253_v35  ;;  %v5563_v35 = vld [vmem:[#allocation2 + $0x1a1] sm:$0xff] }
 0x9e7   : > { %5339 = vst.msk [vmem:[#allocation3 + $0xf8] sm:$0xff] %vm3387_vm13, %v5275_v43 }
 0x9ea   : > { %5606 = vrot.lane.b32.xlu1 %v5537_v24, %s8358_s16  ;;  %5602 = vrot.lane.b32.xlu2 %v5535_v58, %s8358_s16  ;;  %v5726_v58 = vld [vmem:[#allocation2 + $0x4a] sm:$0xff] }
 0x9eb   : > { %5598 = vrot.lane.b32.xlu0 %v5533_v33, %s8358_s16 }
 0x9ec   : > { %v5267_v56 = vpop.permute.xlu1 %5266  ;;  %v5409_v29 = vpop.permute.xlu2 %5408 }
 0x9ed   : > { %v5259_v34 = vpop.permute.xlu0 %5258  ;;  %5335 = vst.msk [vmem:[#allocation3 + $0xd8] sm:$0xff] %vm3387_vm13, %v5267_v56  ;;  %v5728_v56 = vld [vmem:[#allocation2 + $0x62] sm:$0xff] }
 0x9ee   : > { %5331 = vst.msk [vmem:[#allocation3 + $0xb8] sm:$0xff] %vm3387_vm13, %v5259_v34  ;;  %v5730_v34 = vld [vmem:[#allocation2 + $0x7a] sm:$0xff] }
 0x9ef   : > { %5502 = vst.msk [vmem:[#allocation3 + $0x10] sm:$0xff] %vm3580_vm12, %v5409_v29 }
 0x9f2   : > { %5612 = vrot.lane.b32.xlu1 %v5540_v61, %s8358_s16  ;;  %5608 = vrot.lane.b32.xlu2 %v5538_v5, %s8358_s16  ;;  %v5729_v5 = vld [vmem:[#allocation2 + $0x6a] sm:$0xff] }
 0x9f3   : > { %5604 = vrot.lane.b32.xlu0 %v5536_v38, %s8358_s16 }
 0x9f4   : > { %v5273_v51 = vpop.permute.xlu1 %5272  ;;  %v5415_v55 = vpop.permute.xlu2 %5414 }
 0x9f5   : > { %v5265_v50 = vpop.permute.xlu0 %5264  ;;  %5338 = vst.msk [vmem:[#allocation3 + $0xf0] sm:$0xff] %vm3387_vm13, %v5273_v51  ;;  %v5731_v51 = vld [vmem:[#allocation2 + $0x82] sm:$0xff] }
 0x9f6   : > { %5334 = vst.msk [vmem:[#allocation3 + $0xd0] sm:$0xff] %vm3387_vm13, %v5265_v50  ;;  %v5733_v50 = vld [vmem:[#allocation2 + $0x9a] sm:$0xff] }
 0x9f7   : > { %5505 = vst.msk [vmem:[#allocation3 + $0x28] sm:$0xff] %vm3580_vm12, %v5415_v55 }
 0x9fa   : > { %5618 = vrot.lane.b32.xlu1 %v5543_v11, %s8358_s16  ;;  %5614 = vrot.lane.b32.xlu2 %v5541_v39, %s8358_s16  ;;  %v5732_v39 = vld [vmem:[#allocation2 + $0x92] sm:$0xff] }
 0x9fb   : > { %5610 = vrot.lane.b32.xlu0 %v5539_v23, %s8358_s16 }
 0x9fc   : > { %v5407_v8 = vpop.permute.xlu1 %5406  ;;  %v5421_v2 = vpop.permute.xlu2 %5420 }
 0x9fd   : > { %v5271_v37 = vpop.permute.xlu0 %5270  ;;  %5501 = vst.msk [vmem:[#allocation3 + $0x8] sm:$0xff] %vm3580_vm12, %v5407_v8  ;;  %v5734_v8 = vld [vmem:[#allocation2 + $0xaa] sm:$0xff] }
 0x9fe   : > { %5337 = vst.msk [vmem:[#allocation3 + $0xe8] sm:$0xff] %vm3387_vm13, %v5271_v37  ;;  %v5736_v37 = vld [vmem:[#allocation2 + $0xc2] sm:$0xff]  ;;  %vm13004_vm13 = vcmask 293888  }
 0x9ff   : > { %5508 = vst.msk [vmem:[#allocation3 + $0x40] sm:$0xff] %vm3580_vm12, %v5421_v2 }
 0xa02   : > { %5624 = vrot.lane.b32.xlu1 %v5546_v3, %s8358_s16  ;;  %5620 = vrot.lane.b32.xlu2 %v5544_v41, %s8358_s16  ;;  %v5735_v41 = vld [vmem:[#allocation2 + $0xb2] sm:$0xff] }
 0xa03   : > { %5616 = vrot.lane.b32.xlu0 %v5542_v45, %s8358_s16 }
 0xa04   : > { %v5413_v22 = vpop.permute.xlu1 %5412  ;;  %v5427_v26 = vpop.permute.xlu2 %5426 }
 0xa05   : > { %v5405_v53 = vpop.permute.xlu0 %5404  ;;  %5504 = vst.msk [vmem:[#allocation3 + $0x20] sm:$0xff] %vm3580_vm12, %v5413_v22  ;;  %v5737_v22 = vld [vmem:[#allocation2 + $0xca] sm:$0xff] }
 0xa06   : > { %5500 = vst.msk [vmem:[#allocation3] sm:$0xff] %vm3580_vm12, %v5405_v53  ;;  %v5739_v53 = vld [vmem:[#allocation2 + $0xe2] sm:$0xff] }
 0xa07   : > { %5511 = vst.msk [vmem:[#allocation3 + $0x58] sm:$0xff] %vm3580_vm12, %v5427_v26 }
 0xa0a   : > { %5630 = vrot.lane.b32.xlu1 %v5549_v18, %s8358_s16  ;;  %5626 = vrot.lane.b32.xlu2 %v5547_v12, %s8358_s16  ;;  %v5738_v12 = vld [vmem:[#allocation2 + $0xda] sm:$0xff] }
 0xa0b   : > { %5622 = vrot.lane.b32.xlu0 %v5545_v46, %s8358_s16 }
 0xa0c   : > { %v5419_v27 = vpop.permute.xlu1 %5418  ;;  %v5433_v1 = vpop.permute.xlu2 %5432 }
 0xa0d   : > { %v5411_v32 = vpop.permute.xlu0 %5410  ;;  %5507 = vst.msk [vmem:[#allocation3 + $0x38] sm:$0xff] %vm3580_vm12, %v5419_v27  ;;  %v5740_v27 = vld [vmem:[#allocation2 + $0xf2] sm:$0xff] }
 0xa0e   : > { %5503 = vst.msk [vmem:[#allocation3 + $0x18] sm:$0xff] %vm3580_vm12, %v5411_v32  ;;  %v5742_v32 = vld [vmem:[#allocation2 + $0x10a] sm:$0xff] }
 0xa0f   : > { %5514 = vst.msk [vmem:[#allocation3 + $0x70] sm:$0xff] %vm3580_vm12, %v5433_v1 }
 0xa12   : > { %5636 = vrot.lane.b32.xlu1 %v5552_v10, %s8358_s16  ;;  %5632 = vrot.lane.b32.xlu2 %v5550_v21, %s8358_s16  ;;  %v5741_v21 = vld [vmem:[#allocation2 + $0xfa] sm:$0xff] }
 0xa13   : > { %5628 = vrot.lane.b32.xlu0 %v5548_v16, %s8358_s16 }
 0xa14   : > { %v5425_v63 = vpop.permute.xlu1 %5424  ;;  %v5439_v47 = vpop.permute.xlu2 %5438 }
 0xa15   : > { %v5417_v49 = vpop.permute.xlu0 %5416  ;;  %5510 = vst.msk [vmem:[#allocation3 + $0x50] sm:$0xff] %vm3580_vm12, %v5425_v63  ;;  %v5743_v63 = vld [vmem:[#allocation2 + $0x112] sm:$0xff] }
 0xa16   : > { %5506 = vst.msk [vmem:[#allocation3 + $0x30] sm:$0xff] %vm3580_vm12, %v5417_v49  ;;  %v5745_v49 = vld [vmem:[#allocation2 + $0x12a] sm:$0xff] }
 0xa17   : > { %5517 = vst.msk [vmem:[#allocation3 + $0x88] sm:$0xff] %vm3580_vm12, %v5439_v47 }
 0xa1a   : > { %5642 = vrot.lane.b32.xlu1 %v5555_v48, %s8358_s16  ;;  %5638 = vrot.lane.b32.xlu2 %v5553_v17, %s8358_s16  ;;  %v5744_v17 = vld [vmem:[#allocation2 + $0x122] sm:$0xff] }
 0xa1b   : > { %5634 = vrot.lane.b32.xlu0 %v5551_v19, %s8358_s16 }
 0xa1c   : > { %v5431_v20 = vpop.permute.xlu1 %5430  ;;  %v5445_v57 = vpop.permute.xlu2 %5444 }
 0xa1d   : > { %v5423_v54 = vpop.permute.xlu0 %5422  ;;  %5513 = vst.msk [vmem:[#allocation3 + $0x68] sm:$0xff] %vm3580_vm12, %v5431_v20  ;;  %v5746_v20 = vld [vmem:[#allocation2 + $0x13a] sm:$0xff] }
 0xa1e   : > { %5509 = vst.msk [vmem:[#allocation3 + $0x48] sm:$0xff] %vm3580_vm12, %v5423_v54  ;;  %v5748_v54 = vld [vmem:[#allocation2 + $0x152] sm:$0xff] }
 0xa1f   : > { %5520 = vst.msk [vmem:[#allocation3 + $0xa0] sm:$0xff] %vm3580_vm12, %v5445_v57 }
 0xa22   : > { %5648 = vrot.lane.b32.xlu1 %v5558_v7, %s8358_s16  ;;  %5644 = vrot.lane.b32.xlu2 %v5556_v31, %s8358_s16  ;;  %v5956_v31 = vld [vmem:[%s12772_s4 + $0x40] sm:$0xff] }
 0xa23   : > { %5640 = vrot.lane.b32.xlu0 %v5554_v59, %s8358_s16  ;;  %6061 = vmatpush.msra.mxu2 %v5956_v31 }
 0xa24   : > { %v5437_v42 = vpop.permute.xlu1 %5436  ;;  %v5451_v62 = vpop.permute.xlu2 %5450 }
 0xa25   : > { %v5429_v36 = vpop.permute.xlu0 %5428  ;;  %5516 = vst.msk [vmem:[#allocation3 + $0x80] sm:$0xff] %vm3580_vm12, %v5437_v42  ;;  %v5751_v42 = vld [vmem:[#allocation2 + $0x172] sm:$0xff] }
 0xa26   : > { %5512 = vst.msk [vmem:[#allocation3 + $0x60] sm:$0xff] %vm3580_vm12, %v5429_v36  ;;  %v5747_v36 = vld [vmem:[#allocation2 + $0x142] sm:$0xff] }
 0xa27   : > { %5523 = vst.msk [vmem:[#allocation3 + $0xb8] sm:$0xff] %vm3580_vm12, %v5451_v62  ;;  %v5749_v62 = vld [vmem:[#allocation2 + $0x15a] sm:$0xff] }
 0xa2a   : > { %5654 = vrot.lane.b32.xlu1 %v11321_v30, %s8358_s16  ;;  %5650 = vrot.lane.b32.xlu2 %v5559_v44, %s8358_s16 }
 0xa2b   : > { %5646 = vrot.lane.b32.xlu0 %v5557_v13, %s8358_s16 }
 0xa2c   : > { %v5443_v52 = vpop.permute.xlu1 %5442  ;;  %v5457_v14 = vpop.permute.xlu2 %5456 }
 0xa2d   : > { %v5435_v40 = vpop.permute.xlu0 %5434  ;;  %5519 = vst.msk [vmem:[#allocation3 + $0x98] sm:$0xff] %vm3580_vm12, %v5443_v52  ;;  %v5955_v52 = vld [vmem:[%s12772_s4 + $0x38] sm:$0xff] }
 0xa2e   : > { %5515 = vst.msk [vmem:[#allocation3 + $0x78] sm:$0xff] %vm3580_vm12, %v5435_v40  ;;  %6062 = vmatpush.msra.mxu2 %v5955_v52 }
 0xa2f   : > { %5526 = vst.msk [vmem:[#allocation3 + $0xd0] sm:$0xff] %vm3580_vm12, %v5457_v14  ;;  %v5954_v14 = vld [vmem:[%s12772_s4 + $0x30] sm:$0xff] }
 0xa30   : > { %6063 = vmatpush.msra.mxu2 %v5954_v14  ;;  %v5755_v14 = vld [vmem:[#allocation2 + $0x1a2] sm:$0xff] }
 0xa32   : > { %5788 = vrot.lane.b32.xlu1 %v5724_v0, %s8359_s17  ;;  %5656 = vrot.lane.b32.xlu2 %v5562_v28, %s8358_s16  ;;  %v5750_v28 = vld [vmem:[#allocation2 + $0x16a] sm:$0xff] }
 0xa33   : > { %5652 = vrot.lane.b32.xlu0 %v11314_v60, %s8358_s16  ;;  %v5725_v60 = vld [vmem:[#allocation2 + $0x3a] sm:$0xff]  ;;  %v5953_v0 = vld [vmem:[%s12772_s4 + $0x28] sm:$0xff] }
 0xa34   : > { %v5449_v9 = vpop.permute.xlu1 %5448  ;;  %v5463_v25 = vpop.permute.xlu2 %5462  ;;  %6064 = vmatpush.msra.mxu2 %v5953_v0  ;;  %v6296_v0 = vld [vmem:[#allocation2 + $0x1] sm:$0xff] }
 0xa35   : > { %v5441_v30 = vpop.permute.xlu0 %5440  ;;  %5522 = vst.msk [vmem:[#allocation3 + $0xb0] sm:$0xff] %vm3580_vm12, %v5449_v9 }
 0xa36   : > { %5518 = vst.msk [vmem:[#allocation3 + $0x90] sm:$0xff] %vm3580_vm12, %v5441_v30  ;;  %v5952_v30 = vld [vmem:[%s12772_s4 + $0x20] sm:$0xff] }
 0xa37   : > { %5529 = vst.msk [vmem:[#allocation3 + $0xe8] sm:$0xff] %vm3580_vm12, %v5463_v25  ;;  %6065 = vmatpush.msra.mxu2 %v5952_v30  ;;  %v5754_v30 = vld [vmem:[#allocation2 + $0x19a] sm:$0xff] }
 0xa3a   : > { %5794 = vrot.lane.b32.xlu1 %v5727_v6, %s8359_s17  ;;  %5790 = vrot.lane.b32.xlu2 %v5725_v60, %s8359_s17  ;;  %v5951_v6 = vld [vmem:[%s12772_s4 + $0x18] sm:$0xff]  ;;  %v5949_v60 = vld [vmem:[%s12772_s4 + $0x8] sm:$0xff] }
 0xa3b   : > { %5658 = vrot.lane.b32.xlu0 %v5563_v35, %s8358_s16  ;;  %6066 = vmatpush.msra.mxu2 %v5951_v6  ;;  %v11714_v6 = vld [vmem:[%s12769_s1 + $0x4] ss:$0 sm:$0xff] }
 0xa3c   : > { %v5455_v33 = vpop.permute.xlu1 %5454  ;;  %v5597_v24 = vpop.permute.xlu2 %5596 }
 0xa3d   : > { %v5447_v43 = vpop.permute.xlu0 %5446  ;;  %5525 = vst.msk [vmem:[#allocation3 + $0xc8] sm:$0xff] %vm3580_vm12, %v5455_v33 }
 0xa3e   : > { %5521 = vst.msk [vmem:[#allocation3 + $0xa8] sm:$0xff] %vm3580_vm12, %v5447_v43  ;;  %v5948_v43 = vld [vmem:[%s12772_s4] sm:$0xff] }
 0xa3f   : > { %5692 = vst.msk [vmem:[#allocation3] sm:$0xff] %vm3773_vm10, %v5597_v24 }
 0xa42   : > { %5800 = vrot.lane.b32.xlu1 %v5730_v34, %s8359_s17  ;;  %5796 = vrot.lane.b32.xlu2 %v5728_v56, %s8359_s17 }
 0xa43   : > { %5792 = vrot.lane.b32.xlu0 %v5726_v58, %s8359_s17 }
 0xa44   : > { %v5461_v38 = vpop.permute.xlu1 %5460  ;;  %v5603_v61 = vpop.permute.xlu2 %5602 }
 0xa45   : > { %v5453_v29 = vpop.permute.xlu0 %5452  ;;  %5528 = vst.msk [vmem:[#allocation3 + $0xe0] sm:$0xff] %vm3580_vm12, %v5461_v38 }
 0xa46   : > { %5524 = vst.msk [vmem:[#allocation3 + $0xc0] sm:$0xff] %vm3580_vm12, %v5453_v29 }
 0xa47   : > { %5695 = vst.msk [vmem:[#allocation3 + $0x18] sm:$0xff] %vm3773_vm10, %v5603_v61 }
 0xa4a   : > { %5806 = vrot.lane.b32.xlu1 %v5733_v50, %s8359_s17  ;;  %5802 = vrot.lane.b32.xlu2 %v5731_v51, %s8359_s17 }
 0xa4b   : > { %5798 = vrot.lane.b32.xlu0 %v5729_v5, %s8359_s17 }
 0xa4c   : > { %v5467_v23 = vpop.permute.xlu1 %5466  ;;  %v5609_v11 = vpop.permute.xlu2 %5608 }
 0xa4d   : > { %v5459_v55 = vpop.permute.xlu0 %5458  ;;  %5531 = vst.msk [vmem:[#allocation3 + $0xf8] sm:$0xff] %vm3580_vm12, %v5467_v23 }
 0xa4e   : > { %5527 = vst.msk [vmem:[#allocation3 + $0xd8] sm:$0xff] %vm3580_vm12, %v5459_v55 }
 0xa4f   : > { %5698 = vst.msk [vmem:[#allocation3 + $0x30] sm:$0xff] %vm3773_vm10, %v5609_v11 }
 0xa52   : > { %5812 = vrot.lane.b32.xlu1 %v5736_v37, %s8359_s17  ;;  %5808 = vrot.lane.b32.xlu2 %v5734_v8, %s8359_s17 }
 0xa53   : > { %5804 = vrot.lane.b32.xlu0 %v5732_v39, %s8359_s17 }
 0xa54   : > { %v5601_v45 = vpop.permute.xlu1 %5600  ;;  %v5615_v3 = vpop.permute.xlu2 %5614 }
 0xa55   : > { %v5465_v2 = vpop.permute.xlu0 %5464  ;;  %5694 = vst.msk [vmem:[#allocation3 + $0x10] sm:$0xff] %vm3773_vm10, %v5601_v45 }
 0xa56   : > { %5530 = vst.msk [vmem:[#allocation3 + $0xf0] sm:$0xff] %vm3580_vm12, %v5465_v2 }
 0xa57   : > { %5701 = vst.msk [vmem:[#allocation3 + $0x48] sm:$0xff] %vm3773_vm10, %v5615_v3 }
 0xa5a   : > { %5818 = vrot.lane.b32.xlu1 %v5739_v53, %s8359_s17  ;;  %5814 = vrot.lane.b32.xlu2 %v5737_v22, %s8359_s17 }
 0xa5b   : > { %5810 = vrot.lane.b32.xlu0 %v5735_v41, %s8359_s17 }
 0xa5c   : > { %v5607_v46 = vpop.permute.xlu1 %5606  ;;  %v5621_v18 = vpop.permute.xlu2 %5620 }
 0xa5d   : > { %v5599_v26 = vpop.permute.xlu0 %5598  ;;  %5697 = vst.msk [vmem:[#allocation3 + $0x28] sm:$0xff] %vm3773_vm10, %v5607_v46 }
 0xa5e   : > { %5693 = vst.msk [vmem:[#allocation3 + $0x8] sm:$0xff] %vm3773_vm10, %v5599_v26 }
 0xa5f   : > { %5704 = vst.msk [vmem:[#allocation3 + $0x60] sm:$0xff] %vm3773_vm10, %v5621_v18 }
 0xa62   : > { %5824 = vrot.lane.b32.xlu1 %v5742_v32, %s8359_s17  ;;  %5820 = vrot.lane.b32.xlu2 %v5740_v27, %s8359_s17 }
 0xa63   : > { %5816 = vrot.lane.b32.xlu0 %v5738_v12, %s8359_s17 }
 0xa64   : > { %v5613_v16 = vpop.permute.xlu1 %5612  ;;  %v5627_v10 = vpop.permute.xlu2 %5626 }
 0xa65   : > { %v5605_v1 = vpop.permute.xlu0 %5604  ;;  %5700 = vst.msk [vmem:[#allocation3 + $0x40] sm:$0xff] %vm3773_vm10, %v5613_v16 }
 0xa66   : > { %5696 = vst.msk [vmem:[#allocation3 + $0x20] sm:$0xff] %vm3773_vm10, %v5605_v1 }
 0xa67   : > { %5707 = vst.msk [vmem:[#allocation3 + $0x78] sm:$0xff] %vm3773_vm10, %v5627_v10 }
 0xa6a   : > { %5830 = vrot.lane.b32.xlu1 %v5745_v49, %s8359_s17  ;;  %5826 = vrot.lane.b32.xlu2 %v5743_v63, %s8359_s17 }
 0xa6b   : > { %5822 = vrot.lane.b32.xlu0 %v5741_v21, %s8359_s17 }
 0xa6c   : > { %v5619_v19 = vpop.permute.xlu1 %5618  ;;  %v5633_v48 = vpop.permute.xlu2 %5632 }
 0xa6d   : > { %v5611_v47 = vpop.permute.xlu0 %5610  ;;  %5703 = vst.msk [vmem:[#allocation3 + $0x58] sm:$0xff] %vm3773_vm10, %v5619_v19 }
 0xa6e   : > { %5699 = vst.msk [vmem:[#allocation3 + $0x38] sm:$0xff] %vm3773_vm10, %v5611_v47 }
 0xa6f   : > { %5710 = vst.msk [vmem:[#allocation3 + $0x90] sm:$0xff] %vm3773_vm10, %v5633_v48 }
 0xa72   : > { %5836 = vrot.lane.b32.xlu1 %v5748_v54, %s8359_s17  ;;  %5832 = vrot.lane.b32.xlu2 %v5746_v20, %s8359_s17 }
 0xa73   : > { %5828 = vrot.lane.b32.xlu0 %v5744_v17, %s8359_s17 }
 0xa74   : > { %v5625_v59 = vpop.permute.xlu1 %5624  ;;  %v5639_v7 = vpop.permute.xlu2 %5638 }
 0xa75   : > { %v5617_v57 = vpop.permute.xlu0 %5616  ;;  %5706 = vst.msk [vmem:[#allocation3 + $0x70] sm:$0xff] %vm3773_vm10, %v5625_v59 }
 0xa76   : > { %5702 = vst.msk [vmem:[#allocation3 + $0x50] sm:$0xff] %vm3773_vm10, %v5617_v57 }
 0xa77   : > { %5713 = vst.msk [vmem:[#allocation3 + $0xa8] sm:$0xff] %vm3773_vm10, %v5639_v7 }
 0xa7a   : > { %5842 = vrot.lane.b32.xlu1 %v5751_v42, %s8359_s17  ;;  %5838 = vrot.lane.b32.xlu2 %v5749_v62, %s8359_s17 }
 0xa7b   : > { %5834 = vrot.lane.b32.xlu0 %v5747_v36, %s8359_s17 }
 0xa7c   : > { %v5631_v44 = vpop.permute.xlu1 %5630  ;;  %v5645_v40 = vpop.permute.xlu2 %5644 }
 0xa7d   : > { %v5623_v13 = vpop.permute.xlu0 %5622  ;;  %5709 = vst.msk [vmem:[#allocation3 + $0x88] sm:$0xff] %vm3773_vm10, %v5631_v44 }
 0xa7e   : > { %5705 = vst.msk [vmem:[#allocation3 + $0x68] sm:$0xff] %vm3773_vm10, %v5623_v13 }
 0xa7f   : > { %5716 = vst.msk [vmem:[#allocation3 + $0xc0] sm:$0xff] %vm3773_vm10, %v5645_v40 }
 0xa82   : > { %5844 = vrot.lane.b32.xlu2 %v11404_v15, %s8359_s17  ;;  %v5950_v15 = vld [vmem:[%s12772_s4 + $0x10] sm:$0xff]  ;;  %5848 = vrot.lane.b32.xlu1 %v5754_v30, %s8359_s17 }
 0xa83   : > { %5840 = vrot.lane.b32.xlu0 %v5750_v28, %s8359_s17  ;;  %6067 = vmatpush.msra.mxu2 %v5950_v15 }
 0xa84   : > { %v5637_v25 = vpop.permute.xlu1 %5636  ;;  %v5651_v35 = vpop.permute.xlu2 %5650 }
 0xa85   : > { %v5629_v9 = vpop.permute.xlu0 %5628  ;;  %5712 = vst.msk [vmem:[#allocation3 + $0xa0] sm:$0xff] %vm3773_vm10, %v5637_v25  ;;  %6068 = vmatpush.msra.mxu2 %v5949_v60  ;;  %v6297_v25 = vld [vmem:[#allocation2 + $0x9] sm:$0xff] }
 0xa86   : > { %5708 = vst.msk [vmem:[#allocation3 + $0x80] sm:$0xff] %vm3773_vm10, %v5629_v9 }
 0xa87   : > { %5719 = vst.msk [vmem:[#allocation3 + $0xd8] sm:$0xff] %vm3773_vm10, %v5651_v35  ;;  %6069 = vmatpush.msra.mxu2 %v5948_v43 }
 0xa8a   : > { %5850 = vrot.lane.b32.xlu2 %v5755_v14, %s8359_s17  ;;  %6362 = vrot.lane.b32.xlu1 %v6297_v25, %s8348_s7 }
 0xa8b   : > { %5846 = vrot.lane.b32.xlu0 %v11418_v4, %s8359_s17 }
 0xa8c   : > { %v5643_v24 = vpop.permute.xlu1 %5642  ;;  %v5657_v58 = vpop.permute.xlu2 %5656 }
 0xa8d   : > { %v5635_v33 = vpop.permute.xlu0 %5634  ;;  %5715 = vst.msk [vmem:[#allocation3 + $0xb8] sm:$0xff] %vm3773_vm10, %v5643_v24 }
 0xa8e   : > { %5711 = vst.msk [vmem:[#allocation3 + $0x98] sm:$0xff] %vm3773_vm10, %v5635_v33 }
 0xa8f   : > { %5722 = vst.msk [vmem:[#allocation3 + $0xf0] sm:$0xff] %vm3773_vm10, %v5657_v58 }
 0xa93   : > { %6360 = vrot.lane.b32.xlu0 %v6296_v0, %s8348_s7 }
 0xa94   : > { %v5649_v56 = vpop.permute.xlu1 %5648  ;;  %v5791_v4 = vpop.permute.xlu2 %5790 }
 0xa95   : > { %v5641_v34 = vpop.permute.xlu0 %5640  ;;  %5718 = vst.msk [vmem:[#allocation3 + $0xd0] sm:$0xff] %vm3773_vm10, %v5649_v56 }
 0xa96   : > { %5714 = vst.msk [vmem:[#allocation3 + $0xb0] sm:$0xff] %vm3773_vm10, %v5641_v34 }
 0xa97   : > { %5885 = vst.msk [vmem:[#allocation3 + $0x8] sm:$0xff] %vm3966_vm9, %v5791_v4 }
 0xa9c   : > { %v5655_v38 = vpop.permute.xlu1 %5654  ;;  %v5797_v61 = vpop.permute.xlu2 %5796 }
 0xa9d   : > { %v5647_v29 = vpop.permute.xlu0 %5646  ;;  %5721 = vst.msk [vmem:[#allocation3 + $0xe8] sm:$0xff] %vm3773_vm10, %v5655_v38 }
 0xa9e   : > { %5717 = vst.msk [vmem:[#allocation3 + $0xc8] sm:$0xff] %vm3773_vm10, %v5647_v29  ;;  %v5917_v45 = vld [vmem:[#allocation3 + $0x8] sm:$0xff] }
 0xa9f   : > { %5888 = vst.msk [vmem:[#allocation3 + $0x20] sm:$0xff] %vm3966_vm9, %v5797_v61 }
 0xaa4   : > { %v5789_v50 = vpop.permute.xlu1 %5788  ;;  %v5803_v51 = vpop.permute.xlu2 %5802 }
 0xaa5   : > { %v5653_v5 = vpop.permute.xlu0 %5652  ;;  %5884 = vst.msk [vmem:[#allocation3] sm:$0xff] %vm3966_vm9, %v5789_v50 }
 0xaa6   : > { %5720 = vst.msk [vmem:[#allocation3 + $0xe0] sm:$0xff] %vm3773_vm10, %v5653_v5  ;;  %v5920_v16 = vld [vmem:[#allocation3 + $0x20] sm:$0xff] }
 0xaa7   : > { %5891 = vst.msk [vmem:[#allocation3 + $0x38] sm:$0xff] %vm3966_vm9, %v5803_v51 }
 0xaac   : > { %v5795_v23 = vpop.permute.xlu1 %5794  ;;  %v5809_v11 = vpop.permute.xlu2 %5808  ;;  %v5916_v39 = vld [vmem:[#allocation3] sm:$0xff] }
 0xaad   : > { %v5659_v55 = vpop.permute.xlu0 %5658  ;;  %5887 = vst.msk [vmem:[#allocation3 + $0x18] sm:$0xff] %vm3966_vm9, %v5795_v23  ;;  %8243 = vmatmul.msk.f32.vlgmr.msra.gmra.mxu2 %vm4041_vm8, %v5916_v39 }
 0xaae   : > { %5723 = vst.msk [vmem:[#allocation3 + $0xf8] sm:$0xff] %vm3773_vm10, %v5659_v55  ;;  %v5923_v57 = vld [vmem:[#allocation3 + $0x38] sm:$0xff]  ;;  %vm13001_vm10 = vmmov %vm12992_vm0 }
 0xaaf   : > { %5894 = vst.msk [vmem:[#allocation3 + $0x50] sm:$0xff] %vm3966_vm9, %v5809_v11 }
 0xab4   : > { %v5801_v8 = vpop.permute.xlu1 %5800  ;;  %v5815_v2 = vpop.permute.xlu2 %5814  ;;  %v5919_v12 = vld [vmem:[#allocation3 + $0x18] sm:$0xff] }
 0xab5   : > { %v5793_v37 = vpop.permute.xlu0 %5792  ;;  %5890 = vst.msk [vmem:[#allocation3 + $0x30] sm:$0xff] %vm3966_vm9, %v5801_v8  ;;  %8244 = vmatmul.msk.f32.gmra.mxu2 %vm4041_vm8, %v5917_v45 }
 0xab6   : > { %5886 = vst.msk [vmem:[#allocation3 + $0x10] sm:$0xff] %vm3966_vm9, %v5793_v37  ;;  %v5926_v13 = vld [vmem:[#allocation3 + $0x50] sm:$0xff] }
 0xab7   : > { %5897 = vst.msk [vmem:[#allocation3 + $0x68] sm:$0xff] %vm3966_vm9, %v5815_v2 }
 0xabc   : > { %v5807_v41 = vpop.permute.xlu1 %5806  ;;  %v5821_v22 = vpop.permute.xlu2 %5820  ;;  %v5922_v17 = vld [vmem:[#allocation3 + $0x30] sm:$0xff] }
 0xabd   : > { %v5799_v3 = vpop.permute.xlu0 %5798  ;;  %v5918_v53 = vld [vmem:[#allocation3 + $0x10] sm:$0xff]  ;;  %5893 = vst.msk [vmem:[#allocation3 + $0x48] sm:$0xff] %vm3966_vm9, %v5807_v41 }
 0xabe   : > { %5889 = vst.msk [vmem:[#allocation3 + $0x28] sm:$0xff] %vm3966_vm9, %v5799_v3  ;;  %8245 = vmatmul.msk.f32.gmra.mxu2 %vm4041_vm8, %v5918_v53  ;;  %v5929_v52 = vld [vmem:[#allocation3 + $0x68] sm:$0xff] }
 0xabf   : > { %5900 = vst.msk [vmem:[#allocation3 + $0x80] sm:$0xff] %vm3966_vm9, %v5821_v22 }
 0xac4   : > { %v5813_v46 = vpop.permute.xlu1 %5812  ;;  %v5827_v18 = vpop.permute.xlu2 %5826  ;;  %v5925_v42 = vld [vmem:[#allocation3 + $0x48] sm:$0xff] }
 0xac5   : > { %v5805_v26 = vpop.permute.xlu0 %5804  ;;  %5896 = vst.msk [vmem:[#allocation3 + $0x60] sm:$0xff] %vm3966_vm9, %v5813_v46  ;;  %v5921_v63 = vld [vmem:[#allocation3 + $0x28] sm:$0xff] }
 0xac6   : > { %5892 = vst.msk [vmem:[#allocation3 + $0x40] sm:$0xff] %vm3966_vm9, %v5805_v26  ;;  %8246 = vmatmul.msk.f32.gmra.mxu2 %vm4041_vm8, %v5919_v12  ;;  %v5932_v35 = vld [vmem:[#allocation3 + $0x80] sm:$0xff] }
 0xac7   : > { %5903 = vst.msk [vmem:[#allocation3 + $0x98] sm:$0xff] %vm3966_vm9, %v5827_v18 }
 0xacc   : > { %v5819_v27 = vpop.permute.xlu1 %5818  ;;  %v5833_v1 = vpop.permute.xlu2 %5832  ;;  %v5928_v40 = vld [vmem:[#allocation3 + $0x60] sm:$0xff] }
 0xacd   : > { %v5811_v32 = vpop.permute.xlu0 %5810  ;;  %5899 = vst.msk [vmem:[#allocation3 + $0x78] sm:$0xff] %vm3966_vm9, %v5819_v27  ;;  %v5924_v31 = vld [vmem:[#allocation3 + $0x40] sm:$0xff] }
 0xace   : > { %5895 = vst.msk [vmem:[#allocation3 + $0x58] sm:$0xff] %vm3966_vm9, %v5811_v32  ;;  %8247 = vmatmul.msk.f32.gmra.mxu2 %vm4041_vm8, %v5920_v16  ;;  %v5935_v51 = vld [vmem:[#allocation3 + $0x98] sm:$0xff] }
 0xacf   : > { %5906 = vst.msk [vmem:[#allocation3 + $0xb0] sm:$0xff] %vm3966_vm9, %v5833_v1 }
 0xad4   : > { %v5825_v21 = vpop.permute.xlu1 %5824  ;;  %v5839_v49 = vpop.permute.xlu2 %5838  ;;  %v5931_v9 = vld [vmem:[#allocation3 + $0x78] sm:$0xff] }
 0xad5   : > { %v5817_v10 = vpop.permute.xlu0 %5816  ;;  %5902 = vst.msk [vmem:[#allocation3 + $0x90] sm:$0xff] %vm3966_vm9, %v5825_v21  ;;  %v5927_v44 = vld [vmem:[#allocation3 + $0x58] sm:$0xff] }
 0xad6   : > { %5898 = vst.msk [vmem:[#allocation3 + $0x70] sm:$0xff] %vm3966_vm9, %v5817_v10  ;;  %8248 = vmatmul.msk.f32.gmra.mxu2 %vm4041_vm8, %v5921_v63  ;;  %v5938_v27 = vld [vmem:[#allocation3 + $0xb0] sm:$0xff] }
 0xad7   : > { %5909 = vst.msk [vmem:[#allocation3 + $0xc8] sm:$0xff] %vm3966_vm9, %v5839_v49 }
 0xadc   : > { %v5831_v19 = vpop.permute.xlu1 %5830  ;;  %v5845_v48 = vpop.permute.xlu2 %5844  ;;  %v5934_v4 = vld [vmem:[#allocation3 + $0x90] sm:$0xff] }
 0xadd   : > { %v5823_v47 = vpop.permute.xlu0 %5822  ;;  %5905 = vst.msk [vmem:[#allocation3 + $0xa8] sm:$0xff] %vm3966_vm9, %v5831_v19  ;;  %v5930_v28 = vld [vmem:[#allocation3 + $0x70] sm:$0xff] }
 0xade   : > { %5901 = vst.msk [vmem:[#allocation3 + $0x88] sm:$0xff] %vm3966_vm9, %v5823_v47  ;;  %8249 = vmatmul.msk.f32.gmra.mxu2 %vm4041_vm8, %v5922_v17 }
 0xadf   : > { %5912 = vst.msk [vmem:[#allocation3 + $0xe0] sm:$0xff] %vm3966_vm9, %v5845_v48 }
 0xae4   : > { %v5837_v20 = vpop.permute.xlu1 %5836  ;;  %v5937_v22 = vld [vmem:[#allocation3 + $0xa8] sm:$0xff] }
 0xae5   : > { %v5829_v54 = vpop.permute.xlu0 %5828  ;;  %5908 = vst.msk [vmem:[#allocation3 + $0xc0] sm:$0xff] %vm3966_vm9, %v5837_v20  ;;  %v5933_v33 = vld [vmem:[#allocation3 + $0x88] sm:$0xff] }
 0xae6   : > { %5904 = vst.msk [vmem:[#allocation3 + $0xa0] sm:$0xff] %vm3966_vm9, %v5829_v54  ;;  %8250 = vmatmul.msk.f32.gmra.mxu2 %vm4041_vm8, %v5923_v57 }
 0xaec   : > { %v5843_v7 = vpop.permute.xlu1 %5842  ;;  %v5940_v54 = vld [vmem:[#allocation3 + $0xc0] sm:$0xff] }
 0xaed   : > { %v5835_v59 = vpop.permute.xlu0 %5834  ;;  %5911 = vst.msk [vmem:[#allocation3 + $0xd8] sm:$0xff] %vm3966_vm9, %v5843_v7  ;;  %v5936_v8 = vld [vmem:[#allocation3 + $0xa0] sm:$0xff]  ;;  %v5851_v7 = vpop.permute.xlu2 %5850 }
 0xaee   : > { %5907 = vst.msk [vmem:[#allocation3 + $0xb8] sm:$0xff] %vm3966_vm9, %v5835_v59  ;;  %8251 = vmatmul.msk.f32.gmra.mxu2 %vm4041_vm8, %v5924_v31 }
 0xaef   : > { %5915 = vst.msk [vmem:[#allocation3 + $0xf8] sm:$0xff] %vm3966_vm9, %v5851_v7 }
 0xaf5   : > { %v5841_v36 = vpop.permute.xlu0 %5840  ;;  %v5939_v63 = vld [vmem:[#allocation3 + $0xb8] sm:$0xff] }
 0xaf6   : > { %5910 = vst.msk [vmem:[#allocation3 + $0xd0] sm:$0xff] %vm3966_vm9, %v5841_v36  ;;  %8252 = vmatmul.msk.f32.gmra.mxu2 %vm4041_vm8, %v5925_v42  ;;  %v5941_v42 = vld [vmem:[#allocation3 + $0xc8] sm:$0xff] }
 0xafd   : > { %v5847_v62 = vpop.permute.xlu0 %5846  ;;  %v5942_v14 = vld [vmem:[#allocation3 + $0xd0] sm:$0xff] }
 0xafe   : > { %5913 = vst.msk [vmem:[#allocation3 + $0xe8] sm:$0xff] %vm3966_vm9, %v5847_v62  ;;  %8253 = vmatmul.msk.f32.gmra.mxu2 %vm4041_vm8, %v5926_v13 }
 0xb06   : > { %8254 = vmatmul.msk.f32.gmra.mxu2 %vm4041_vm8, %v5927_v44 }
 0xb0e   : > { %8255 = vmatmul.msk.f32.gmra.mxu2 %vm4041_vm8, %v5928_v40 }
 0xb16   : > { %8256 = vmatmul.msk.f32.gmra.mxu2 %vm4041_vm8, %v5929_v52 }
 0xb1e   : > { %8257 = vmatmul.msk.f32.gmra.mxu2 %vm4041_vm8, %v5930_v28 }
 0xb26   : > { %8258 = vmatmul.msk.f32.gmra.mxu2 %vm4041_vm8, %v5931_v9 }
 0xb2e   : > { %8259 = vmatmul.msk.f32.gmra.mxu2 %vm4041_vm8, %v5932_v35  ;;  %v5943_v35 = vld [vmem:[#allocation3 + $0xd8] sm:$0xff] }
 0xb30   : > { %v6071_v15 = vpop.f32.mrf.mxu2 }
 0xb31   : > { %v6072_v60 = vadd.f32 %v11714_v6, %v6071_v15 }
 0xb33   : > { %v6167_v43 = vmax.f32 %v6072_v60, 0.0 }
 0xb35   : > { %6200 = vst.msk [vmem:[#allocation2 + $0x19] sm:$0xff] %vm432_vm2, %v6167_v43 }
 0xb36   : > { %8260 = vmatmul.msk.f32.gmra.mxu2 %vm4041_vm8, %v5933_v33 }
 0xb38   : > { %v6074_v24 = vpop.f32.mrf.mxu2 }
 0xb39   : > { %v6075_v58 = vadd.f32 %v11714_v6, %v6074_v24 }
 0xb3b   : > { %v6168_v34 = vmax.f32 %v6075_v58, 0.0  ;;  %v5944_v58 = vld [vmem:[#allocation3 + $0xe0] sm:$0xff] }
 0xb3c   : > { %v6298_v56 = vld [vmem:[#allocation2 + $0x19] sm:$0xff] }
 0xb3d   : > { %v11720_v29 = vld [vmem:[#allocation2 + $0x18] sm:$0xff]  ;;  %6201 = vst.msk [vmem:[#allocation2 + $0x21] sm:$0xff] %vm432_vm2, %v6168_v34  ;;  %6364 = vrot.lane.b32.xlu2 %v6298_v56, %s8348_s7 }
 0xb3e   : > { %8261 = vmatmul.msk.f32.gmra.mxu2 %vm4041_vm8, %v5934_v4  ;;  %6266 = vst.msk [vmem:[#allocation3 + $0x10] sm:$0xff] %vm432_vm2, %v11720_v29  ;;  %v6232_v4 = vld [vmem:[#allocation2] sm:$0xff] }
 0xb3f   : > { %6264 = vst.msk [vmem:[#allocation3] sm:$0xff] %vm432_vm2, %v6232_v4 }
 0xb41   : > { %v6077_v38 = vpop.f32.mrf.mxu2 }
 0xb42   : > { %v6078_v61 = vadd.f32 %v11714_v6, %v6077_v38 }
 0xb44   : > { %v6169_v5 = vmax.f32 %v6078_v61, 0.0  ;;  %v6299_v50 = vld [vmem:[#allocation2 + $0x21] sm:$0xff]  ;;  %v6361_v61 = vpop.permute.xlu0 %6360 }
 0xb45   : > { %v11728_v55 = vld [vmem:[#allocation2 + $0x20] sm:$0xff]  ;;  %6366 = vrot.lane.b32.xlu0 %v6299_v50, %s8348_s7  ;;  %6456 = vst.msk [vmem:[#allocation3] sm:$0xff] %vm689_vm4, %v6361_v61  ;;  %v5849_v50 = vpop.permute.xlu1 %5848 }
 0xb46   : > { %6202 = vst.msk [vmem:[#allocation2 + $0x31] sm:$0xff] %vm432_vm2, %v6169_v5  ;;  %8262 = vmatmul.msk.f32.gmra.mxu2 %vm4041_vm8, %v5935_v51 }
 0xb47   : > { %6267 = vst.msk [vmem:[#allocation3 + $0x18] sm:$0xff] %vm432_vm2, %v11728_v55 }
 0xb48   : > { %5914 = vst.msk [vmem:[#allocation3 + $0xf0] sm:$0xff] %vm3966_vm9, %v5849_v50  ;;  %vm13000_vm9 = vcmask 294144  }
 0xb49   : > { %v6080_v23 = vpop.f32.mrf.mxu2  ;;  %vm13005_vm14 = vmmov %vm13000_vm9 }
 0xb4a   : > { %v6081_v11 = vadd.f32 %v11714_v6, %v6080_v23  ;;  %v5945_v23 = vld [vmem:[#allocation3 + $0xe8] sm:$0xff]  ;;  %vm13010_vm3 = vmmov %vm13000_vm9 }
 0xb4c   : > { %v6170_v39 = vmax.f32 %v6081_v11, 0.0 }
 0xb4d   : > { %v11736_v37 = vld [vmem:[#allocation2 + $0x31] sm:$0xff] }
 0xb4e   : > { %v11738_v2 = vld [vmem:[#allocation2 + $0x30] sm:$0xff]  ;;  %6203 = vst.msk [vmem:[#allocation2 + $0x39] sm:$0xff] %vm432_vm2, %v6170_v39  ;;  %6368 = vrot.lane.b32.xlu1 %v11736_v37, %s8348_s7  ;;  %8263 = vmatmul.msk.f32.gmra.mxu2 %vm4041_vm8, %v5936_v8  ;;  %v6233_v8 = vld [vmem:[#allocation2 + $0x8] sm:$0xff] }
 0xb4f   : > { %6268 = vst.msk [vmem:[#allocation3 + $0x20] sm:$0xff] %vm432_vm2, %v11738_v2 }
 0xb50   : > { %6265 = vst.msk [vmem:[#allocation3 + $0x8] sm:$0xff] %vm432_vm2, %v6233_v8 }
 0xb51   : > { %v6083_v45 = vpop.f32.mrf.mxu2 }
 0xb52   : > { %v6084_v3 = vadd.f32 %v11714_v6, %v6083_v45 }
 0xb54   : > { %v6171_v41 = vmax.f32 %v6084_v3, 0.0 }
 0xb55   : > { %v11747_v53 = vld [vmem:[#allocation2 + $0x39] sm:$0xff] }
 0xb56   : > { %v11749_v26 = vld [vmem:[#allocation2 + $0x38] sm:$0xff]  ;;  %6204 = vst.msk [vmem:[#allocation2 + $0x49] sm:$0xff] %vm432_vm2, %v6171_v41  ;;  %6370 = vrot.lane.b32.xlu2 %v11747_v53, %s8348_s7  ;;  %8264 = vmatmul.msk.f32.gmra.mxu2 %vm4041_vm8, %v5937_v22  ;;  %v6363_v22 = vpop.permute.xlu1 %6362 }
 0xb57   : > { %6269 = vst.msk [vmem:[#allocation3 + $0x28] sm:$0xff] %vm432_vm2, %v11749_v26 }
 0xb58   : > { %6457 = vst.msk [vmem:[#allocation3 + $0x8] sm:$0xff] %vm689_vm4, %v6363_v22 }
 0xb59   : > { %v6086_v46 = vpop.f32.mrf.mxu2 }
 0xb5a   : > { %v6087_v18 = vadd.f32 %v11714_v6, %v6086_v46 }
 0xb5c   : > { %v6172_v12 = vmax.f32 %v6087_v18, 0.0 }
 0xb5d   : > { %v11758_v32 = vld [vmem:[#allocation2 + $0x49] sm:$0xff] }
 0xb5e   : > { %v11760_v1 = vld [vmem:[#allocation2 + $0x48] sm:$0xff]  ;;  %6205 = vst.msk [vmem:[#allocation2 + $0x51] sm:$0xff] %vm432_vm2, %v6172_v12  ;;  %6372 = vrot.lane.b32.xlu0 %v11758_v32, %s8348_s7  ;;  %8265 = vmatmul.msk.f32.gmra.mxu2 %vm4041_vm8, %v5938_v27 }
 0xb5f   : > { %6270 = vst.msk [vmem:[#allocation3 + $0x30] sm:$0xff] %vm432_vm2, %v11760_v1 }
 0xb61   : > { %v6089_v16 = vpop.f32.mrf.mxu2 }
 0xb62   : > { %v6090_v10 = vadd.f32 %v11714_v6, %v6089_v16 }
 0xb64   : > { %v6173_v21 = vmax.f32 %v6090_v10, 0.0 }
 0xb65   : > { %v11769_v49 = vld [vmem:[#allocation2 + $0x51] sm:$0xff] }
 0xb66   : > { %v11771_v47 = vld [vmem:[#allocation2 + $0x50] sm:$0xff]  ;;  %6206 = vst.msk [vmem:[#allocation2 + $0x61] sm:$0xff] %vm432_vm2, %v6173_v21  ;;  %6374 = vrot.lane.b32.xlu1 %v11769_v49, %s8348_s7  ;;  %8266 = vmatmul.msk.f32.gmra.mxu2 %vm4041_vm8, %v5939_v63 }
 0xb67   : > { %6271 = vst.msk [vmem:[#allocation3 + $0x38] sm:$0xff] %vm432_vm2, %v11771_v47 }
 0xb69   : > { %v6092_v19 = vpop.f32.mrf.mxu2 }
 0xb6a   : > { %v6093_v48 = vadd.f32 %v11714_v6, %v6092_v19 }
 0xb6c   : > { %v6174_v17 = vmax.f32 %v6093_v48, 0.0 }
 0xb6d   : > { %v11780_v20 = vld [vmem:[#allocation2 + $0x61] sm:$0xff] }
 0xb6e   : > { %v11782_v57 = vld [vmem:[#allocation2 + $0x60] sm:$0xff]  ;;  %6207 = vst.msk [vmem:[#allocation2 + $0x69] sm:$0xff] %vm432_vm2, %v6174_v17  ;;  %8267 = vmatmul.msk.f32.gmra.mxu2 %vm4041_vm8, %v5940_v54  ;;  %6376 = vrot.lane.b32.xlu2 %v11780_v20, %s8348_s7 }
 0xb6f   : > { %6272 = vst.msk [vmem:[#allocation3 + $0x40] sm:$0xff] %vm432_vm2, %v11782_v57 }
 0xb71   : > { %v6095_v59 = vpop.f32.mrf.mxu2 }
 0xb72   : > { %v6096_v31 = vadd.f32 %v11714_v6, %v6095_v59 }
 0xb74   : > { %v6175_v36 = vmax.f32 %v6096_v31, 0.0 }
 0xb75   : > { %v11792_v62 = vld [vmem:[#allocation2 + $0x69] sm:$0xff] }
 0xb76   : > { %v11794_v13 = vld [vmem:[#allocation2 + $0x68] sm:$0xff]  ;;  %6208 = vst.msk [vmem:[#allocation2 + $0x79] sm:$0xff] %vm432_vm2, %v6175_v36  ;;  %8268 = vmatmul.msk.f32.gmra.mxu2 %vm4041_vm8, %v5941_v42  ;;  %6378 = vrot.lane.b32.xlu0 %v11792_v62, %s8348_s7 }
 0xb77   : > { %6273 = vst.msk [vmem:[#allocation3 + $0x48] sm:$0xff] %vm432_vm2, %v11794_v13 }
 0xb79   : > { %v6098_v44 = vpop.f32.mrf.mxu2 }
 0xb7a   : > { %v6099_v40 = vadd.f32 %v11714_v6, %v6098_v44 }
 0xb7c   : > { %v6176_v52 = vmax.f32 %v6099_v40, 0.0 }
 0xb7d   : > { %v11803_v28 = vld [vmem:[#allocation2 + $0x79] sm:$0xff] }
 0xb7e   : > { %v11805_v0 = vld [vmem:[#allocation2 + $0x78] sm:$0xff]  ;;  %6209 = vst.msk [vmem:[#allocation2 + $0x81] sm:$0xff] %vm432_vm2, %v6176_v52  ;;  %8269 = vmatmul.msk.f32.gmra.mxu2 %vm4041_vm8, %v5942_v14  ;;  %6380 = vrot.lane.b32.xlu1 %v11803_v28, %s8348_s7 }
 0xb7f   : > { %6274 = vst.msk [vmem:[#allocation3 + $0x50] sm:$0xff] %vm432_vm2, %v11805_v0 }
 0xb81   : > { %v6101_v30 = vpop.f32.mrf.mxu2 }
 0xb82   : > { %v6102_v9 = vadd.f32 %v11714_v6, %v6101_v30 }
 0xb84   : > { %v6177_v25 = vmax.f32 %v6102_v9, 0.0 }
 0xb85   : > { %v11814_v15 = vld [vmem:[#allocation2 + $0x81] sm:$0xff] }
 0xb86   : > { %v11816_v60 = vld [vmem:[#allocation2 + $0x80] sm:$0xff]  ;;  %6210 = vst.msk [vmem:[#allocation2 + $0x91] sm:$0xff] %vm432_vm2, %v6177_v25  ;;  %8270 = vmatmul.msk.f32.gmra.mxu2 %vm4041_vm8, %v5943_v35  ;;  %6382 = vrot.lane.b32.xlu2 %v11814_v15, %s8348_s7 }
 0xb87   : > { %6275 = vst.msk [vmem:[#allocation3 + $0x58] sm:$0xff] %vm432_vm2, %v11816_v60 }
 0xb89   : > { %v6104_v43 = vpop.f32.mrf.mxu2 }
 0xb8a   : > { %v6105_v33 = vadd.f32 %v11714_v6, %v6104_v43 }
 0xb8c   : > { %v6178_v24 = vmax.f32 %v6105_v33, 0.0 }
 0xb8d   : > { %v11825_v34 = vld [vmem:[#allocation2 + $0x91] sm:$0xff] }
 0xb8e   : > { %v11827_v56 = vld [vmem:[#allocation2 + $0x90] sm:$0xff]  ;;  %6211 = vst.msk [vmem:[#allocation2 + $0x99] sm:$0xff] %vm432_vm2, %v6178_v24  ;;  %8271 = vmatmul.msk.f32.gmra.mxu2 %vm4041_vm8, %v5944_v58  ;;  %6384 = vrot.lane.b32.xlu0 %v11825_v34, %s8348_s7 }
 0xb8f   : > { %6276 = vst.msk [vmem:[#allocation3 + $0x60] sm:$0xff] %vm432_vm2, %v11827_v56 }
 0xb91   : > { %v6107_v38 = vpop.f32.mrf.mxu2 }
 0xb92   : > { %v6108_v5 = vadd.f32 %v11714_v6, %v6107_v38 }
 0xb94   : > { %v6179_v51 = vmax.f32 %v6108_v5, 0.0 }
 0xb95   : > { %v11839_v11 = vld [vmem:[#allocation2 + $0x99] sm:$0xff] }
 0xb96   : > { %v11841_v39 = vld [vmem:[#allocation2 + $0x98] sm:$0xff]  ;;  %6212 = vst.msk [vmem:[#allocation2 + $0xa9] sm:$0xff] %vm432_vm2, %v6179_v51  ;;  %8272 = vmatmul.msk.f32.gmra.mxu2 %vm4041_vm8, %v5945_v23  ;;  %6386 = vrot.lane.b32.xlu1 %v11839_v11, %s8348_s7 }
 0xb97   : > { %v6365_v45 = vpop.permute.xlu2 %6364  ;;  %6277 = vst.msk [vmem:[#allocation3 + $0x68] sm:$0xff] %vm432_vm2, %v11841_v39 }
 0xb98   : > { %6458 = vst.msk [vmem:[#allocation3 + $0x10] sm:$0xff] %vm689_vm4, %v6365_v45 }
 0xb99   : > { %v6110_v3 = vpop.f32.mrf.mxu2 }
 0xb9a   : > { %v6111_v41 = vadd.f32 %v11714_v6, %v6110_v3 }
 0xb9c   : > { %v6180_v46 = vmax.f32 %v6111_v41, 0.0 }
 0xb9d   : > { %v11853_v18 = vld [vmem:[#allocation2 + $0xa9] sm:$0xff] }
 0xb9e   : > { %v11855_v12 = vld [vmem:[#allocation2 + $0xa8] sm:$0xff]  ;;  %6213 = vst.msk [vmem:[#allocation2 + $0xb1] sm:$0xff] %vm432_vm2, %v6180_v46  ;;  %6388 = vrot.lane.b32.xlu2 %v11853_v18, %s8348_s7 }
 0xb9f   : > { %6278 = vst.msk [vmem:[#allocation3 + $0x70] sm:$0xff] %vm432_vm2, %v11855_v12 }
 0xba1   : > { %v6113_v27 = vpop.f32.mrf.mxu2 }
 0xba2   : > { %v6114_v16 = vadd.f32 %v11714_v6, %v6113_v27 }
 0xba4   : > { %v6181_v10 = vmax.f32 %v6114_v16, 0.0 }
 0xba5   : > { %v11863_v21 = vld [vmem:[#allocation2 + $0xb1] sm:$0xff] }
 0xba6   : > { %v11865_v63 = vld [vmem:[#allocation2 + $0xb0] sm:$0xff]  ;;  %6214 = vst.msk [vmem:[#allocation2 + $0xc1] sm:$0xff] %vm432_vm2, %v6181_v10  ;;  %6390 = vrot.lane.b32.xlu0 %v11863_v21, %s8348_s7 }
 0xba7   : > { %6279 = vst.msk [vmem:[#allocation3 + $0x78] sm:$0xff] %vm432_vm2, %v11865_v63 }
 0xba9   : > { %v6116_v19 = vpop.f32.mrf.mxu2 }
 0xbaa   : > { %v6117_v48 = vadd.f32 %v11714_v6, %v6116_v19 }
 0xbac   : > { %v6182_v17 = vmax.f32 %v6117_v48, 0.0 }
 0xbad   : > { %v11873_v54 = vld [vmem:[#allocation2 + $0xc1] sm:$0xff] }
 0xbae   : > { %v11875_v59 = vld [vmem:[#allocation2 + $0xc0] sm:$0xff]  ;;  %6215 = vst.msk [vmem:[#allocation2 + $0xc9] sm:$0xff] %vm432_vm2, %v6182_v17  ;;  %6392 = vrot.lane.b32.xlu1 %v11873_v54, %s8348_s7 }
 0xbaf   : > { %6280 = vst.msk [vmem:[#allocation3 + $0x80] sm:$0xff] %vm432_vm2, %v11875_v59 }
 0xbb0   : > { %v6371_v7 = vpop.permute.xlu2 %6370 }
 0xbb1   : > { %6461 = vst.msk [vmem:[#allocation3 + $0x28] sm:$0xff] %vm689_vm4, %v6371_v7  ;;  %v6119_v31 = vpop.f32.mrf.mxu2 }
 0xbb2   : > { %v6120_v36 = vadd.f32 %v11714_v6, %v6119_v31 }
 0xbb4   : > { %v6183_v42 = vmax.f32 %v6120_v36, 0.0 }
 0xbb5   : > { %v11884_v44 = vld [vmem:[#allocation2 + $0xc9] sm:$0xff] }
 0xbb6   : > { %v11886_v40 = vld [vmem:[#allocation2 + $0xc8] sm:$0xff]  ;;  %6216 = vst.msk [vmem:[#allocation2 + $0xd9] sm:$0xff] %vm432_vm2, %v6183_v42  ;;  %6394 = vrot.lane.b32.xlu2 %v11884_v44, %s8348_s7 }
 0xbb7   : > { %6281 = vst.msk [vmem:[#allocation3 + $0x88] sm:$0xff] %vm432_vm2, %v11886_v40  ;;  %v6367_v52 = vpop.permute.xlu0 %6366 }
 0xbb8   : > { %6459 = vst.msk [vmem:[#allocation3 + $0x18] sm:$0xff] %vm689_vm4, %v6367_v52 }
 0xbb9   : > { %v6122_v14 = vpop.f32.mrf.mxu2 }
 0xbba   : > { %v6123_v30 = vadd.f32 %v11714_v6, %v6122_v14 }
 0xbbc   : > { %v6184_v9 = vmax.f32 %v6123_v30, 0.0 }
 0xbbd   : > { %v6314_v25 = vld [vmem:[#allocation2 + $0xd9] sm:$0xff] }
 0xbbe   : > { %v11895_v35 = vld [vmem:[#allocation2 + $0xd8] sm:$0xff]  ;;  %6217 = vst.msk [vmem:[#allocation2 + $0xe1] sm:$0xff] %vm432_vm2, %v6184_v9  ;;  %6396 = vrot.lane.b32.xlu0 %v6314_v25, %s8348_s7 }
 0xbbf   : > { %6282 = vst.msk [vmem:[#allocation3 + $0x90] sm:$0xff] %vm432_vm2, %v11895_v35 }
 0xbc0   : > { %v6369_v43 = vpop.permute.xlu1 %6368 }
 0xbc1   : > { %6460 = vst.msk [vmem:[#allocation3 + $0x20] sm:$0xff] %vm689_vm4, %v6369_v43  ;;  %v6125_v33 = vpop.f32.mrf.mxu2 }
 0xbc2   : > { %v6126_v24 = vadd.f32 %v11714_v6, %v6125_v33 }
 0xbc4   : > { %v6185_v58 = vmax.f32 %v6126_v24, 0.0 }
 0xbc5   : > { %v6315_v4 = vld [vmem:[#allocation2 + $0xe1] sm:$0xff] }
 0xbc6   : > { %v11903_v38 = vld [vmem:[#allocation2 + $0xe0] sm:$0xff]  ;;  %6218 = vst.msk [vmem:[#allocation2 + $0xf1] sm:$0xff] %vm432_vm2, %v6185_v58  ;;  %6398 = vrot.lane.b32.xlu1 %v6315_v4, %s8348_s7 }
 0xbc7   : > { %6283 = vst.msk [vmem:[#allocation3 + $0x98] sm:$0xff] %vm432_vm2, %v11903_v38 }
 0xbc8   : > { %v6377_v61 = vpop.permute.xlu2 %6376 }
 0xbc9   : > { %6464 = vst.msk [vmem:[#allocation3 + $0x40] sm:$0xff] %vm689_vm4, %v6377_v61  ;;  %v6128_v5 = vpop.f32.mrf.mxu2 }
 0xbca   : > { %v6129_v50 = vadd.f32 %v11714_v6, %v6128_v5 }
 0xbcc   : > { %v6186_v51 = vmax.f32 %v6129_v50, 0.0 }
 0xbcd   : > { %v6316_v23 = vld [vmem:[#allocation2 + $0xf1] sm:$0xff] }
 0xbce   : > { %v11911_v8 = vld [vmem:[#allocation2 + $0xf0] sm:$0xff]  ;;  %6219 = vst.msk [vmem:[#allocation2 + $0xf9] sm:$0xff] %vm432_vm2, %v6186_v51  ;;  %6400 = vrot.lane.b32.xlu2 %v6316_v23, %s8348_s7 }
 0xbcf   : > { %6284 = vst.msk [vmem:[#allocation3 + $0xa0] sm:$0xff] %vm432_vm2, %v11911_v8 }
 0xbd0   : > { %v6373_v45 = vpop.permute.xlu0 %6372 }
 0xbd1   : > { %6462 = vst.msk [vmem:[#allocation3 + $0x30] sm:$0xff] %vm689_vm4, %v6373_v45  ;;  %v6131_v3 = vpop.f32.mrf.mxu2 }
 0xbd2   : > { %v6132_v41 = vadd.f32 %v11714_v6, %v6131_v3 }
 0xbd4   : > { %v6187_v22 = vmax.f32 %v6132_v41, 0.0 }
 0xbd5   : > { %v6317_v46 = vld [vmem:[#allocation2 + $0xf9] sm:$0xff] }
 0xbd6   : > { %v11919_v27 = vld [vmem:[#allocation2 + $0xf8] sm:$0xff]  ;;  %6220 = vst.msk [vmem:[#allocation2 + $0x109] sm:$0xff] %vm432_vm2, %v6187_v22  ;;  %6402 = vrot.lane.b32.xlu0 %v6317_v46, %s8348_s7 }
 0xbd7   : > { %6285 = vst.msk [vmem:[#allocation3 + $0xa8] sm:$0xff] %vm432_vm2, %v11919_v27 }
 0xbd8   : > { %v6375_v16 = vpop.permute.xlu1 %6374 }
 0xbd9   : > { %6463 = vst.msk [vmem:[#allocation3 + $0x38] sm:$0xff] %vm689_vm4, %v6375_v16  ;;  %v6134_v10 = vpop.f32.mrf.mxu2 }
 0xbda   : > { %v6135_v19 = vadd.f32 %v11714_v6, %v6134_v10  ;;  %v5946_v10 = vld [vmem:[#allocation3 + $0xf0] sm:$0xff] }
 0xbdb   : > { %8273 = vmatmul.msk.f32.gmra.mxu2 %vm4041_vm8, %v5946_v10 }
 0xbdc   : > { %v6188_v48 = vmax.f32 %v6135_v19, 0.0 }
 0xbdd   : > { %v6318_v17 = vld [vmem:[#allocation2 + $0x109] sm:$0xff] }
 0xbde   : > { %v11927_v7 = vld [vmem:[#allocation2 + $0x108] sm:$0xff]  ;;  %6221 = vst.msk [vmem:[#allocation2 + $0x111] sm:$0xff] %vm432_vm2, %v6188_v48  ;;  %6404 = vrot.lane.b32.xlu1 %v6318_v17, %s8348_s7 }
 0xbdf   : > { %6286 = vst.msk [vmem:[#allocation3 + $0xb0] sm:$0xff] %vm432_vm2, %v11927_v7 }
 0xbe0   : > { %v6383_v31 = vpop.permute.xlu2 %6382 }
 0xbe1   : > { %6467 = vst.msk [vmem:[#allocation3 + $0x58] sm:$0xff] %vm689_vm4, %v6383_v31  ;;  %v6137_v36 = vpop.f32.mrf.mxu2 }
 0xbe2   : > { %v6138_v42 = vadd.f32 %v11714_v6, %v6137_v36 }
 0xbe4   : > { %v6189_v52 = vmax.f32 %v6138_v42, 0.0 }
 0xbe5   : > { %v6319_v14 = vld [vmem:[#allocation2 + $0x111] sm:$0xff] }
 0xbe6   : > { %v11935_v30 = vld [vmem:[#allocation2 + $0x110] sm:$0xff]  ;;  %6222 = vst.msk [vmem:[#allocation2 + $0x121] sm:$0xff] %vm432_vm2, %v6189_v52  ;;  %6406 = vrot.lane.b32.xlu2 %v6319_v14, %s8348_s7  ;;  %v5947_v52 = vld [vmem:[#allocation3 + $0xf8] sm:$0xff] }
 0xbe7   : > { %6287 = vst.msk [vmem:[#allocation3 + $0xb8] sm:$0xff] %vm432_vm2, %v11935_v30  ;;  %8274 = vmatmul.msk.f32.gmra.mxu2 %vm4041_vm8, %v5947_v52  ;;  %v12003_v52 = vld [vmem:[#allocation2 + $0x22] sm:$0xff] }
 0xbe8   : > { %v6379_v9 = vpop.permute.xlu0 %6378 }
 0xbe9   : > { %6465 = vst.msk [vmem:[#allocation3 + $0x48] sm:$0xff] %vm689_vm4, %v6379_v9  ;;  %v6140_v25 = vpop.f32.mrf.mxu2 }
 0xbea   : > { %v6141_v43 = vadd.f32 %v11714_v6, %v6140_v25 }
 0xbec   : > { %v6190_v33 = vmax.f32 %v6141_v43, 0.0 }
 0xbed   : > { %v6320_v24 = vld [vmem:[#allocation2 + $0x121] sm:$0xff] }
 0xbee   : > { %v11943_v58 = vld [vmem:[#allocation2 + $0x120] sm:$0xff]  ;;  %6223 = vst.msk [vmem:[#allocation2 + $0x129] sm:$0xff] %vm432_vm2, %v6190_v33  ;;  %6408 = vrot.lane.b32.xlu0 %v6320_v24, %s8348_s7 }
 0xbef   : > { %6288 = vst.msk [vmem:[#allocation3 + $0xc0] sm:$0xff] %vm432_vm2, %v11943_v58 }
 0xbf0   : > { %v6381_v4 = vpop.permute.xlu1 %6380 }
 0xbf1   : > { %6466 = vst.msk [vmem:[#allocation3 + $0x50] sm:$0xff] %vm689_vm4, %v6381_v4  ;;  %v6143_v61 = vpop.f32.mrf.mxu2 }
 0xbf2   : > { %v6144_v5 = vadd.f32 %v11714_v6, %v6143_v61 }
 0xbf4   : > { %v6191_v50 = vmax.f32 %v6144_v5, 0.0 }
 0xbf5   : > { %v6321_v51 = vld [vmem:[#allocation2 + $0x129] sm:$0xff] }
 0xbf6   : > { %6224 = vst.msk [vmem:[#allocation2 + $0x139] sm:$0xff] %vm432_vm2, %v6191_v50  ;;  %6410 = vrot.lane.b32.xlu1 %v6321_v51, %s8348_s7  ;;  %v11953_v23 = vld [vmem:[#allocation2 + $0x128] sm:$0xff] }
 0xbf7   : > { %6289 = vst.msk [vmem:[#allocation3 + $0xc8] sm:$0xff] %vm432_vm2, %v11953_v23 }
 0xbf8   : > { %v6389_v45 = vpop.permute.xlu2 %6388 }
 0xbf9   : > { %6470 = vst.msk [vmem:[#allocation3 + $0x70] sm:$0xff] %vm689_vm4, %v6389_v45  ;;  %v6146_v3 = vpop.f32.mrf.mxu2 }
 0xbfa   : > { %v6147_v41 = vadd.f32 %v11714_v6, %v6146_v3 }
 0xbfc   : > { %v6192_v22 = vmax.f32 %v6147_v41, 0.0 }
 0xbfd   : > { %v6322_v46 = vld [vmem:[#allocation2 + $0x139] sm:$0xff] }
 0xbfe   : > { %v11959_v16 = vld [vmem:[#allocation2 + $0x138] sm:$0xff]  ;;  %6225 = vst.msk [vmem:[#allocation2 + $0x141] sm:$0xff] %vm432_vm2, %v6192_v22  ;;  %6412 = vrot.lane.b32.xlu2 %v6322_v46, %s8348_s7  ;;  %v6488_v46 = vld [vmem:[#allocation2 + $0x2] sm:$0xff] }
 0xbff   : > { %6290 = vst.msk [vmem:[#allocation3 + $0xd0] sm:$0xff] %vm432_vm2, %v11959_v16 }
 0xc00   : > { %v6385_v19 = vpop.permute.xlu0 %6384 }
 0xc01   : > { %6468 = vst.msk [vmem:[#allocation3 + $0x60] sm:$0xff] %vm689_vm4, %v6385_v19  ;;  %v6149_v48 = vpop.f32.mrf.mxu2 }
 0xc02   : > { %v6150_v17 = vadd.f32 %v11714_v6, %v6149_v48 }
 0xc04   : > { %v6193_v31 = vmax.f32 %v6150_v17, 0.0 }
 0xc05   : > { %v6323_v36 = vld [vmem:[#allocation2 + $0x141] sm:$0xff] }
 0xc06   : > { %6226 = vst.msk [vmem:[#allocation2 + $0x151] sm:$0xff] %vm432_vm2, %v6193_v31  ;;  %6414 = vrot.lane.b32.xlu0 %v6323_v36, %s8348_s7  ;;  %v11970_v42 = vld [vmem:[#allocation2 + $0x140] sm:$0xff]  ;;  %v6489_v31 = vld [vmem:[#allocation2 + $0xa] sm:$0xff] }
 0xc07   : > { %6291 = vst.msk [vmem:[#allocation3 + $0xd8] sm:$0xff] %vm432_vm2, %v11970_v42 }
 0xc08   : > { %v6387_v14 = vpop.permute.xlu1 %6386 }
 0xc09   : > { %6469 = vst.msk [vmem:[#allocation3 + $0x68] sm:$0xff] %vm689_vm4, %v6387_v14  ;;  %v6152_v9 = vpop.f32.mrf.mxu2 }
 0xc0a   : > { %v6153_v25 = vadd.f32 %v11714_v6, %v6152_v9 }
 0xc0c   : > { %v6194_v43 = vmax.f32 %v6153_v25, 0.0  ;;  %v12012_v25 = vld [vmem:[#allocation2 + $0x1a] sm:$0xff] }
 0xc0d   : > { %v6324_v33 = vld [vmem:[#allocation2 + $0x151] sm:$0xff] }
 0xc0e   : > { %v11977_v24 = vld [vmem:[#allocation2 + $0x150] sm:$0xff]  ;;  %6227 = vst.msk [vmem:[#allocation2 + $0x159] sm:$0xff] %vm432_vm2, %v6194_v43  ;;  %6416 = vrot.lane.b32.xlu1 %v6324_v33, %s8348_s7 }
 0xc0f   : > { %6292 = vst.msk [vmem:[#allocation3 + $0xe0] sm:$0xff] %vm432_vm2, %v11977_v24  ;;  %v12014_v43 = vld [vmem:[#allocation2 + $0x32] sm:$0xff]  ;;  %v12020_v33 = vld [vmem:[#allocation2 + $0x4a] sm:$0xff] }
 0xc10   : > { %v6395_v4 = vpop.permute.xlu2 %6394 }
 0xc11   : > { %6473 = vst.msk [vmem:[#allocation3 + $0x88] sm:$0xff] %vm689_vm4, %v6395_v4  ;;  %v6155_v61 = vpop.f32.mrf.mxu2 }
 0xc12   : > { %v6156_v5 = vadd.f32 %v11714_v6, %v6155_v61  ;;  %v12025_v61 = vld [vmem:[#allocation2 + $0x3a] sm:$0xff] }
 0xc14   : > { %v6195_v50 = vmax.f32 %v6156_v5, 0.0  ;;  %v12027_v5 = vld [vmem:[#allocation2 + $0x52] sm:$0xff] }
 0xc15   : > { %v6325_v51 = vld [vmem:[#allocation2 + $0x159] sm:$0xff] }
 0xc16   : > { %v11985_v45 = vld [vmem:[#allocation2 + $0x158] sm:$0xff]  ;;  %6228 = vst.msk [vmem:[#allocation2 + $0x169] sm:$0xff] %vm432_vm2, %v6195_v50  ;;  %6418 = vrot.lane.b32.xlu2 %v6325_v51, %s8348_s7  ;;  %v12033_v50 = vld [vmem:[#allocation2 + $0x6a] sm:$0xff] }
 0xc17   : > { %6293 = vst.msk [vmem:[#allocation3 + $0xe8] sm:$0xff] %vm432_vm2, %v11985_v45 }
 0xc18   : > { %v6391_v3 = vpop.permute.xlu0 %6390 }
 0xc19   : > { %6471 = vst.msk [vmem:[#allocation3 + $0x78] sm:$0xff] %vm689_vm4, %v6391_v3  ;;  %v6158_v41 = vpop.f32.mrf.mxu2  ;;  %v12038_v3 = vld [vmem:[#allocation2 + $0x7a] sm:$0xff] }
 0xc1a   : > { %v6159_v22 = vadd.f32 %v11714_v6, %v6158_v41  ;;  %v12040_v41 = vld [vmem:[#allocation2 + $0x62] sm:$0xff] }
 0xc1c   : > { %v6196_v10 = vmax.f32 %v6159_v22, 0.0  ;;  %v12046_v22 = vld [vmem:[#allocation2 + $0x92] sm:$0xff] }
 0xc1d   : > { %v6326_v19 = vld [vmem:[#allocation2 + $0x169] sm:$0xff] }
 0xc1e   : > { %v11993_v48 = vld [vmem:[#allocation2 + $0x168] sm:$0xff]  ;;  %6229 = vst.msk [vmem:[#allocation2 + $0x171] sm:$0xff] %vm432_vm2, %v6196_v10  ;;  %6420 = vrot.lane.b32.xlu0 %v6326_v19, %s8348_s7  ;;  %6552 = vrot.lane.b32.xlu2 %v6488_v46, %s8349_s8  ;;  %v12051_v10 = vld [vmem:[#allocation2 + $0x9a] sm:$0xff] }
 0xc1f   : > { %6294 = vst.msk [vmem:[#allocation3 + $0xf0] sm:$0xff] %vm432_vm2, %v11993_v48  ;;  %v12053_v19 = vld [vmem:[#allocation2 + $0x82] sm:$0xff] }
 0xc20   : > { %v6393_v17 = vpop.permute.xlu1 %6392  ;;  %12986 = vst [vmem:[#allocation4_spill] sm:$0xff] %v12051_v10 }
 0xc21   : > { %6472 = vst.msk [vmem:[#allocation3 + $0x80] sm:$0xff] %vm689_vm4, %v6393_v17  ;;  %v12059_v17 = vld [vmem:[#allocation2 + $0xb2] sm:$0xff] }
 0xc22   : > { %12987 = vst [vmem:[#allocation13_spill] sm:$0xff] %v12059_v17 }
 0xc25   : > { %v6327_v36 = vld [vmem:[#allocation2 + $0x171] sm:$0xff] }
 0xc26   : > { %6422 = vrot.lane.b32.xlu1 %v6327_v36, %s8348_s7  ;;  %6554 = vrot.lane.b32.xlu0 %v6489_v31, %s8349_s8  ;;  %v12005_v14 = vld [vmem:[#allocation2 + $0x170] sm:$0xff]  ;;  %v12064_v36 = vld [vmem:[#allocation2 + $0xc2] sm:$0xff] }
 0xc27   : > { %6558 = vrot.lane.b32.xlu2 %v12003_v52, %s8349_s8  ;;  %6295 = vst.msk [vmem:[#allocation3 + $0xf8] sm:$0xff] %vm432_vm2, %v12005_v14 }
 0xc28   : > { %v6401_v9 = vpop.permute.xlu2 %6400  ;;  %12988 = vst [vmem:[#allocation6_spill] sm:$0xff] %v12064_v36 }
 0xc29   : > { %6476 = vst.msk [vmem:[#allocation3 + $0xa0] sm:$0xff] %vm689_vm4, %v6401_v9  ;;  %v12066_v9 = vld [vmem:[#allocation2 + $0xaa] sm:$0xff] }
 0xc2a   : > { %12989 = vst [vmem:[#allocation9_spill] sm:$0xff] %v12066_v9 }
 0xc2e   : > { %6556 = vrot.lane.b32.xlu1 %v12012_v25, %s8349_s8  ;;  %6560 = vrot.lane.b32.xlu0 %v12014_v43, %s8349_s8 }
 0xc2f   : > { %6564 = vrot.lane.b32.xlu2 %v12020_v33, %s8349_s8 }
 0xc30   : > { %v6397_v4 = vpop.permute.xlu0 %6396 }
 0xc31   : > { %6474 = vst.msk [vmem:[#allocation3 + $0x90] sm:$0xff] %vm689_vm4, %v6397_v4  ;;  %v12072_v4 = vld [vmem:[#allocation2 + $0xda] sm:$0xff] }
 0xc32   : > { %12990 = vst [vmem:[#allocation12_spill] sm:$0xff] %v12072_v4 }
 0xc36   : > { %6562 = vrot.lane.b32.xlu1 %v12025_v61, %s8349_s8  ;;  %6566 = vrot.lane.b32.xlu0 %v12027_v5, %s8349_s8 }
 0xc37   : > { %6570 = vrot.lane.b32.xlu2 %v12033_v50, %s8349_s8 }
 0xc38   : > { %v6399_v51 = vpop.permute.xlu1 %6398 }
 0xc39   : > { %6475 = vst.msk [vmem:[#allocation3 + $0x98] sm:$0xff] %vm689_vm4, %v6399_v51 }
 0xc3e   : > { %6572 = vrot.lane.b32.xlu0 %v12038_v3, %s8349_s8  ;;  %6568 = vrot.lane.b32.xlu1 %v12040_v41, %s8349_s8 }
 0xc3f   : > { %6576 = vrot.lane.b32.xlu2 %v12046_v22, %s8349_s8 }
 0xc40   : > { %v6407_v46 = vpop.permute.xlu2 %6406 }
 0xc41   : > { %6479 = vst.msk [vmem:[#allocation3 + $0xb8] sm:$0xff] %vm689_vm4, %v6407_v46  ;;  %v6507_v46 = vld [vmem:[#allocation2 + $0xe2] sm:$0xff] }
 0xc46   : > { %6578 = vrot.lane.b32.xlu0 %v12051_v10, %s8349_s8  ;;  %6574 = vrot.lane.b32.xlu1 %v12053_v19, %s8349_s8  ;;  %v6508_v10 = vld [vmem:[#allocation2 + $0xf2] sm:$0xff] }
 0xc47   : > { %6582 = vrot.lane.b32.xlu2 %v12059_v17, %s8349_s8 }
 0xc48   : > { %v6403_v31 = vpop.permute.xlu0 %6402 }
 0xc49   : > { %6477 = vst.msk [vmem:[#allocation3 + $0xa8] sm:$0xff] %vm689_vm4, %v6403_v31  ;;  %v12077_v31 = vld [vmem:[#allocation2 + $0xca] sm:$0xff] }
 0xc4a   : > { %12991 = vst [vmem:[#allocation7_spill] sm:$0xff] %v12077_v31 }
 0xc4e   : > { %6584 = vrot.lane.b32.xlu0 %v12064_v36, %s8349_s8  ;;  %6580 = vrot.lane.b32.xlu1 %v12066_v9, %s8349_s8  ;;  %v6509_v36 = vld [vmem:[#allocation2 + $0xfa] sm:$0xff]  ;;  %v6510_v9 = vld [vmem:[#allocation2 + $0x10a] sm:$0xff] }
 0xc4f   : > { %6588 = vrot.lane.b32.xlu2 %v12072_v4, %s8349_s8 }
 0xc50   : > { %v6405_v51 = vpop.permute.xlu1 %6404 }
 0xc51   : > { %6478 = vst.msk [vmem:[#allocation3 + $0xb0] sm:$0xff] %vm689_vm4, %v6405_v51  ;;  %v6512_v51 = vld [vmem:[#allocation2 + $0x122] sm:$0xff] }
 0xc56   : > { %6590 = vrot.lane.b32.xlu0 %v6507_v46, %s8349_s8  ;;  %6586 = vrot.lane.b32.xlu1 %v12077_v31, %s8349_s8  ;;  %v6513_v46 = vld [vmem:[#allocation2 + $0x12a] sm:$0xff]  ;;  %v6511_v31 = vld [vmem:[#allocation2 + $0x112] sm:$0xff] }
 0xc57   : > { %6594 = vrot.lane.b32.xlu2 %v6509_v36, %s8349_s8  ;;  %v6515_v36 = vld [vmem:[#allocation2 + $0x142] sm:$0xff] }
 0xc58   : > { %v6413_v17 = vpop.permute.xlu2 %6412 }
 0xc59   : > { %6482 = vst.msk [vmem:[#allocation3 + $0xd0] sm:$0xff] %vm689_vm4, %v6413_v17 }
 0xc5e   : > { %6596 = vrot.lane.b32.xlu0 %v6510_v9, %s8349_s8  ;;  %6592 = vrot.lane.b32.xlu1 %v6508_v10, %s8349_s8  ;;  %v6516_v9 = vld [vmem:[#allocation2 + $0x152] sm:$0xff]  ;;  %v6514_v10 = vld [vmem:[#allocation2 + $0x13a] sm:$0xff] }
 0xc5f   : > { %6600 = vrot.lane.b32.xlu2 %v6512_v51, %s8349_s8  ;;  %v6518_v51 = vld [vmem:[#allocation2 + $0x16a] sm:$0xff] }
 0xc60   : > { %v6409_v4 = vpop.permute.xlu0 %6408 }
 0xc61   : > { %6480 = vst.msk [vmem:[#allocation3 + $0xc0] sm:$0xff] %vm689_vm4, %v6409_v4 }
 0xc66   : > { %6602 = vrot.lane.b32.xlu0 %v6513_v46, %s8349_s8  ;;  %6598 = vrot.lane.b32.xlu1 %v6511_v31, %s8349_s8  ;;  %v6519_v46 = vld [vmem:[#allocation2 + $0x172] sm:$0xff]  ;;  %v6517_v31 = vld [vmem:[#allocation2 + $0x15a] sm:$0xff] }
 0xc67   : > { %6606 = vrot.lane.b32.xlu2 %v6515_v36, %s8349_s8 }
 0xc68   : > { %v6411_v17 = vpop.permute.xlu1 %6410 }
 0xc69   : > { %6481 = vst.msk [vmem:[#allocation3 + $0xc8] sm:$0xff] %vm689_vm4, %v6411_v17 }
 0xc6e   : > { %6608 = vrot.lane.b32.xlu0 %v6516_v9, %s8349_s8  ;;  %6604 = vrot.lane.b32.xlu1 %v6514_v10, %s8349_s8 }
 0xc6f   : > { %6612 = vrot.lane.b32.xlu2 %v6518_v51, %s8349_s8 }
 0xc70   : > { %v6419_v4 = vpop.permute.xlu2 %6418 }
 0xc71   : > { %6485 = vst.msk [vmem:[#allocation3 + $0xe8] sm:$0xff] %vm689_vm4, %v6419_v4  ;;  %v6161_v4 = vpop.f32.mrf.mxu2 }
 0xc76   : > { %6614 = vrot.lane.b32.xlu0 %v6519_v46, %s8349_s8  ;;  %6610 = vrot.lane.b32.xlu1 %v6517_v31, %s8349_s8  ;;  %v6162_v46 = vadd.f32 %v11714_v6, %v6161_v4 }
 0xc77   : > { %6746 = vrot.lane.b32.xlu2 %v11728_v55, %s8350_s9 }
 0xc78   : > { %v6415_v36 = vpop.permute.xlu0 %6414  ;;  %v6553_v17 = vpop.permute.xlu2 %6552  ;;  %v6197_v31 = vmax.f32 %v6162_v46, 0.0 }
 0xc79   : > { %6483 = vst.msk [vmem:[#allocation3 + $0xd8] sm:$0xff] %vm689_vm4, %v6415_v36 }
 0xc7a   : > { %6648 = vst.msk [vmem:[#allocation3] sm:$0xff] %vm882_vm5, %v6553_v17 }
 0xc7b   : > { %6230 = vst.msk [vmem:[#allocation2 + $0x181] sm:$0xff] %vm432_vm2, %v6197_v31 }
 0xc7e   : > { %6748 = vrot.lane.b32.xlu0 %v11738_v2, %s8350_s9  ;;  %6744 = vrot.lane.b32.xlu1 %v11720_v29, %s8350_s9 }
 0xc7f   : > { %6752 = vrot.lane.b32.xlu2 %v11760_v1, %s8350_s9 }
 0xc80   : > { %v6417_v9 = vpop.permute.xlu1 %6416 }
 0xc81   : > { %6484 = vst.msk [vmem:[#allocation3 + $0xe0] sm:$0xff] %vm689_vm4, %v6417_v9  ;;  %v6559_v10 = vpop.permute.xlu2 %6558 }
 0xc82   : > { %6651 = vst.msk [vmem:[#allocation3 + $0x18] sm:$0xff] %vm882_vm5, %v6559_v10  ;;  %v6164_v10 = vpop.f32.mrf.mxu2 }
 0xc86   : > { %6754 = vrot.lane.b32.xlu0 %v11771_v47, %s8350_s9  ;;  %6750 = vrot.lane.b32.xlu1 %v11749_v26, %s8350_s9 }
 0xc87   : > { %6758 = vrot.lane.b32.xlu2 %v11794_v13, %s8350_s9 }
 0xc89   : > { %v6565_v55 = vpop.permute.xlu2 %6564 }
 0xc8a   : > { %6654 = vst.msk [vmem:[#allocation3 + $0x30] sm:$0xff] %vm882_vm5, %v6565_v55  ;;  %v6165_v55 = vadd.f32 %v11714_v6, %v6164_v10  ;;  %v6873_v10 = vld [vmem:[#allocation2 + $0x21] sm:$0xff] }
 0xc8e   : > { %6760 = vrot.lane.b32.xlu0 %v11805_v0, %s8350_s9  ;;  %6756 = vrot.lane.b32.xlu1 %v11782_v57, %s8350_s9 }
 0xc8f   : > { %6764 = vrot.lane.b32.xlu2 %v11827_v56, %s8350_s9 }
 0xc90   : > { %v6421_v29 = vpop.permute.xlu0 %6420 }
 0xc91   : > { %6486 = vst.msk [vmem:[#allocation3 + $0xf0] sm:$0xff] %vm689_vm4, %v6421_v29  ;;  %v6571_v51 = vpop.permute.xlu2 %6570  ;;  %v6198_v29 = vmax.f32 %v6165_v55, 0.0 }
 0xc92   : > { %6657 = vst.msk [vmem:[#allocation3 + $0x48] sm:$0xff] %vm882_vm5, %v6571_v51 }
 0xc93   : > { %6231 = vst.msk [vmem:[#allocation2 + $0x189] sm:$0xff] %vm432_vm2, %v6198_v29 }
 0xc96   : > { %6766 = vrot.lane.b32.xlu0 %v11841_v39, %s8350_s9  ;;  %6762 = vrot.lane.b32.xlu1 %v11816_v60, %s8350_s9 }
 0xc97   : > { %6770 = vrot.lane.b32.xlu2 %v11865_v63, %s8350_s9 }
 0xc98   : > { %v6423_v36 = vpop.permute.xlu1 %6422  ;;  %v6555_v17 = vpop.permute.xlu0 %6554 }
 0xc99   : > { %6487 = vst.msk [vmem:[#allocation3 + $0xf8] sm:$0xff] %vm689_vm4, %v6423_v36  ;;  %v6577_v9 = vpop.permute.xlu2 %6576  ;;  %v6710_v36 = vld [vmem:[#allocation2 + $0x180] sm:$0xff]  ;;  %vm12995_vm4 = vmmov %vm12992_vm0 }
 0xc9a   : > { %6649 = vst.msk [vmem:[#allocation3 + $0x8] sm:$0xff] %vm882_vm5, %v6555_v17  ;;  %v6711_v31 = vld [vmem:[#allocation2 + $0x188] sm:$0xff]  ;;  %v6872_v17 = vld [vmem:[#allocation2 + $0x19] sm:$0xff] }
 0xc9b   : > { %6660 = vst.msk [vmem:[#allocation3 + $0x60] sm:$0xff] %vm882_vm5, %v6577_v9 }
 0xc9e   : > { %6772 = vrot.lane.b32.xlu0 %v11875_v59, %s8350_s9  ;;  %6768 = vrot.lane.b32.xlu1 %v11855_v12, %s8350_s9 }
 0xc9f   : > { %6776 = vrot.lane.b32.xlu2 %v11895_v35, %s8350_s9 }
 0xca0   : > { %v6557_v51 = vpop.permute.xlu1 %6556  ;;  %v6561_v4 = vpop.permute.xlu0 %6560 }
 0xca1   : > { %6650 = vst.msk [vmem:[#allocation3 + $0x10] sm:$0xff] %vm882_vm5, %v6557_v51  ;;  %v6583_v46 = vpop.permute.xlu2 %6582 }
 0xca2   : > { %6652 = vst.msk [vmem:[#allocation3 + $0x20] sm:$0xff] %vm882_vm5, %v6561_v4  ;;  %v7448_v4 = vld [vmem:[#allocation2 + $0x31] sm:$0xff] }
 0xca3   : > { %6663 = vst.msk [vmem:[#allocation3 + $0x78] sm:$0xff] %vm882_vm5, %v6583_v46 }
 0xca6   : > { %6778 = vrot.lane.b32.xlu0 %v11903_v38, %s8350_s9  ;;  %6774 = vrot.lane.b32.xlu1 %v11886_v40, %s8350_s9 }
 0xca7   : > { %6782 = vrot.lane.b32.xlu2 %v11919_v27, %s8350_s9 }
 0xca8   : > { %v6563_v6 = vpop.permute.xlu1 %6562  ;;  %v6567_v12 = vpop.permute.xlu0 %6566 }
 0xca9   : > { %6653 = vst.msk [vmem:[#allocation3 + $0x28] sm:$0xff] %vm882_vm5, %v6563_v6  ;;  %v6589_v35 = vpop.permute.xlu2 %6588  ;;  %v7449_v6 = vld [vmem:[#allocation2 + $0x39] sm:$0xff] }
 0xcaa   : > { %6655 = vst.msk [vmem:[#allocation3 + $0x38] sm:$0xff] %vm882_vm5, %v6567_v12 }
 0xcab   : > { %6666 = vst.msk [vmem:[#allocation3 + $0x90] sm:$0xff] %vm882_vm5, %v6589_v35 }
 0xcae   : > { %6784 = vrot.lane.b32.xlu0 %v11927_v7, %s8350_s9  ;;  %6780 = vrot.lane.b32.xlu1 %v11911_v8, %s8350_s9 }
 0xcaf   : > { %6788 = vrot.lane.b32.xlu2 %v11943_v58, %s8350_s9 }
 0xcb0   : > { %v6573_v40 = vpop.permute.xlu0 %6572  ;;  %v6569_v38 = vpop.permute.xlu1 %6568 }
 0xcb1   : > { %6658 = vst.msk [vmem:[#allocation3 + $0x50] sm:$0xff] %vm882_vm5, %v6573_v40  ;;  %v6595_v27 = vpop.permute.xlu2 %6594 }
 0xcb2   : > { %6656 = vst.msk [vmem:[#allocation3 + $0x40] sm:$0xff] %vm882_vm5, %v6569_v38 }
 0xcb3   : > { %6669 = vst.msk [vmem:[#allocation3 + $0xa8] sm:$0xff] %vm882_vm5, %v6595_v27 }
 0xcb6   : > { %6790 = vrot.lane.b32.xlu0 %v11953_v23, %s8350_s9  ;;  %6786 = vrot.lane.b32.xlu1 %v11935_v30, %s8350_s9 }
 0xcb7   : > { %6794 = vrot.lane.b32.xlu2 %v11970_v42, %s8350_s9 }
 0xcb8   : > { %v6579_v8 = vpop.permute.xlu0 %6578  ;;  %v6575_v7 = vpop.permute.xlu1 %6574 }
 0xcb9   : > { %6661 = vst.msk [vmem:[#allocation3 + $0x68] sm:$0xff] %vm882_vm5, %v6579_v8  ;;  %v6601_v58 = vpop.permute.xlu2 %6600  ;;  %v7451_v8 = vld [vmem:[#allocation2 + $0x51] sm:$0xff] }
 0xcba   : > { %6659 = vst.msk [vmem:[#allocation3 + $0x58] sm:$0xff] %vm882_vm5, %v6575_v7 }
 0xcbb   : > { %6672 = vst.msk [vmem:[#allocation3 + $0xc0] sm:$0xff] %vm882_vm5, %v6601_v58 }
 0xcbe   : > { %6796 = vrot.lane.b32.xlu0 %v11977_v24, %s8350_s9  ;;  %6792 = vrot.lane.b32.xlu1 %v11959_v16, %s8350_s9 }
 0xcbf   : > { %6800 = vrot.lane.b32.xlu2 %v11993_v48, %s8350_s9 }
 0xcc0   : > { %v6585_v30 = vpop.permute.xlu0 %6584  ;;  %v6581_v23 = vpop.permute.xlu1 %6580 }
 0xcc1   : > { %6664 = vst.msk [vmem:[#allocation3 + $0x80] sm:$0xff] %vm882_vm5, %v6585_v30  ;;  %v6607_v42 = vpop.permute.xlu2 %6606  ;;  %v7452_v30 = vld [vmem:[#allocation2 + $0x61] sm:$0xff] }
 0xcc2   : > { %6662 = vst.msk [vmem:[#allocation3 + $0x70] sm:$0xff] %vm882_vm5, %v6581_v23 }
 0xcc3   : > { %6675 = vst.msk [vmem:[#allocation3 + $0xd8] sm:$0xff] %vm882_vm5, %v6607_v42 }
 0xcc6   : > { %6802 = vrot.lane.b32.xlu0 %v12005_v14, %s8350_s9  ;;  %6798 = vrot.lane.b32.xlu1 %v11985_v45, %s8350_s9 }
 0xcc7   : > { %6806 = vrot.lane.b32.xlu2 %v6711_v31, %s8350_s9 }
 0xcc8   : > { %v6591_v16 = vpop.permute.xlu0 %6590  ;;  %v6587_v24 = vpop.permute.xlu1 %6586 }
 0xcc9   : > { %6667 = vst.msk [vmem:[#allocation3 + $0x98] sm:$0xff] %vm882_vm5, %v6591_v16  ;;  %v6613_v48 = vpop.permute.xlu2 %6612 }
 0xcca   : > { %6665 = vst.msk [vmem:[#allocation3 + $0x88] sm:$0xff] %vm882_vm5, %v6587_v24 }
 0xccb   : > { %6678 = vst.msk [vmem:[#allocation3 + $0xf0] sm:$0xff] %vm882_vm5, %v6613_v48  ;;  %v7454_v48 = vld [vmem:[#allocation2 + $0x79] sm:$0xff] }
 0xcce   : > { %6936 = vrot.lane.b32.xlu0 %v6872_v17, %s8351_s10  ;;  %6804 = vrot.lane.b32.xlu1 %v6710_v36, %s8350_s9 }
 0xccf   : > { %6940 = vrot.lane.b32.xlu2 %v11736_v37, %s8351_s10 }
 0xcd0   : > { %v6597_v45 = vpop.permute.xlu0 %6596  ;;  %v6593_v14 = vpop.permute.xlu1 %6592 }
 0xcd1   : > { %6670 = vst.msk [vmem:[#allocation3 + $0xb0] sm:$0xff] %vm882_vm5, %v6597_v45  ;;  %v6747_v9 = vpop.permute.xlu2 %6746  ;;  %v7455_v45 = vld [vmem:[#allocation2 + $0x81] sm:$0xff] }
 0xcd2   : > { %6668 = vst.msk [vmem:[#allocation3 + $0xa0] sm:$0xff] %vm882_vm5, %v6593_v14 }
 0xcd3   : > { %6841 = vst.msk [vmem:[#allocation3 + $0x8] sm:$0xff] %vm1075_vm6, %v6747_v9 }
 0xcd6   : > { %6942 = vrot.lane.b32.xlu0 %v11747_v53, %s8351_s10  ;;  %6938 = vrot.lane.b32.xlu1 %v6873_v10, %s8351_s10 }
 0xcd7   : > { %6946 = vrot.lane.b32.xlu2 %v11769_v49, %s8351_s10 }
 0xcd8   : > { %v6603_v55 = vpop.permute.xlu0 %6602  ;;  %v6599_v37 = vpop.permute.xlu1 %6598 }
 0xcd9   : > { %6673 = vst.msk [vmem:[#allocation3 + $0xc8] sm:$0xff] %vm882_vm5, %v6603_v55  ;;  %v6753_v29 = vpop.permute.xlu2 %6752 }
 0xcda   : > { %6671 = vst.msk [vmem:[#allocation3 + $0xb8] sm:$0xff] %vm882_vm5, %v6599_v37 }
 0xcdb   : > { %6844 = vst.msk [vmem:[#allocation3 + $0x20] sm:$0xff] %vm1075_vm6, %v6753_v29 }
 0xcde   : > { %6948 = vrot.lane.b32.xlu0 %v11780_v20, %s8351_s10  ;;  %6944 = vrot.lane.b32.xlu1 %v11758_v32, %s8351_s10 }
 0xcdf   : > { %6952 = vrot.lane.b32.xlu2 %v11803_v28, %s8351_s10 }
 0xce0   : > { %v6609_v53 = vpop.permute.xlu0 %6608  ;;  %v6605_v49 = vpop.permute.xlu1 %6604 }
 0xce1   : > { %6676 = vst.msk [vmem:[#allocation3 + $0xe0] sm:$0xff] %vm882_vm5, %v6609_v53  ;;  %v6759_v51 = vpop.permute.xlu2 %6758  ;;  %v7457_v53 = vld [vmem:[#allocation2 + $0x99] sm:$0xff] }
 0xce2   : > { %6674 = vst.msk [vmem:[#allocation3 + $0xd0] sm:$0xff] %vm882_vm5, %v6605_v49  ;;  %v7865_v49 = vld [vmem:[%s12773_s5 + $0x8] sm:$0xff] }
 0xce3   : > { %6847 = vst.msk [vmem:[#allocation3 + $0x38] sm:$0xff] %vm1075_vm6, %v6759_v51 }
 0xce6   : > { %6954 = vrot.lane.b32.xlu0 %v11814_v15, %s8351_s10  ;;  %6950 = vrot.lane.b32.xlu1 %v11792_v62, %s8351_s10 }
 0xce7   : > { %6958 = vrot.lane.b32.xlu2 %v11839_v11, %s8351_s10 }
 0xce8   : > { %v6615_v32 = vpop.permute.xlu0 %6614  ;;  %v6611_v20 = vpop.permute.xlu1 %6610 }
 0xce9   : > { %6679 = vst.msk [vmem:[#allocation3 + $0xf8] sm:$0xff] %vm882_vm5, %v6615_v32  ;;  %v6765_v28 = vpop.permute.xlu2 %6764 }
 0xcea   : > { %6677 = vst.msk [vmem:[#allocation3 + $0xe8] sm:$0xff] %vm882_vm5, %v6611_v20  ;;  %v7864_v20 = vld [vmem:[%s12773_s5] sm:$0xff]  ;;  %vm12996_vm5 = vcmask 228544  }
 0xceb   : > { %6850 = vst.msk [vmem:[#allocation3 + $0x50] sm:$0xff] %vm1075_vm6, %v6765_v28  ;;  %vm12999_vm8 = vmmov %vm12996_vm5 }
 0xcec   : > { %vm13008_vm15 = vmmov %vm12996_vm5 }
 0xcee   : > { %6960 = vrot.lane.b32.xlu0 %v11853_v18, %s8351_s10  ;;  %6956 = vrot.lane.b32.xlu1 %v11825_v34, %s8351_s10 }
 0xcef   : > { %6964 = vrot.lane.b32.xlu2 %v11873_v54, %s8351_s10 }
 0xcf0   : > { %v6749_v62 = vpop.permute.xlu0 %6748  ;;  %v6745_v15 = vpop.permute.xlu1 %6744 }
 0xcf1   : > { %6842 = vst.msk [vmem:[#allocation3 + $0x10] sm:$0xff] %vm1075_vm6, %v6749_v62  ;;  %v6771_v11 = vpop.permute.xlu2 %6770  ;;  %v12993_v62 = vld [vmem:[#allocation4_spill] sm:$0xff] }
 0xcf2   : > { %6840 = vst.msk [vmem:[#allocation3] sm:$0xff] %vm1075_vm6, %v6745_v15 }
 0xcf3   : > { %6853 = vst.msk [vmem:[#allocation3 + $0x68] sm:$0xff] %vm1075_vm6, %v6771_v11 }
 0xcf6   : > { %6966 = vrot.lane.b32.xlu0 %v11884_v44, %s8351_s10  ;;  %6962 = vrot.lane.b32.xlu1 %v11863_v21, %s8351_s10 }
 0xcf7   : > { %7320 = vrot.lane.b32.xlu2 %v11738_v2, %s8353_s12 }
 0xcf8   : > { %v6755_v34 = vpop.permute.xlu0 %6754  ;;  %v6751_v18 = vpop.permute.xlu1 %6750 }
 0xcf9   : > { %6845 = vst.msk [vmem:[#allocation3 + $0x28] sm:$0xff] %vm1075_vm6, %v6755_v34  ;;  %v6777_v54 = vpop.permute.xlu2 %6776 }
 0xcfa   : > { %6843 = vst.msk [vmem:[#allocation3 + $0x18] sm:$0xff] %vm1075_vm6, %v6751_v18  ;;  %v7458_v18 = vld [vmem:[#allocation2 + $0xa9] sm:$0xff] }
 0xcfb   : > { %6856 = vst.msk [vmem:[#allocation3 + $0x80] sm:$0xff] %vm1075_vm6, %v6777_v54  ;;  %v7459_v54 = vld [vmem:[#allocation2 + $0xb1] sm:$0xff] }
 0xcfe   : > { %7512 = vrot.lane.b32.xlu0 %v7448_v4, %s8354_s13  ;;  %7128 = vrot.lane.b32.xlu1 %v12012_v25, %s8352_s11 }
 0xcff   : > { %7130 = vrot.lane.b32.xlu2 %v12003_v52, %s8352_s11 }
 0xd00   : > { %v6761_v21 = vpop.permute.xlu0 %6760  ;;  %v6757_v2 = vpop.permute.xlu1 %6756 }
 0xd01   : > { %6848 = vst.msk [vmem:[#allocation3 + $0x40] sm:$0xff] %vm1075_vm6, %v6761_v21  ;;  %v6783_v44 = vpop.permute.xlu2 %6782 }
 0xd02   : > { %6846 = vst.msk [vmem:[#allocation3 + $0x30] sm:$0xff] %vm1075_vm6, %v6757_v2 }
 0xd03   : > { %6859 = vst.msk [vmem:[#allocation3 + $0x98] sm:$0xff] %vm1075_vm6, %v6783_v44  ;;  %v12998_v44 = vld [vmem:[#allocation13_spill] sm:$0xff] }
 0xd06   : > { %7322 = vrot.lane.b32.xlu0 %v11749_v26, %s8353_s12  ;;  %7704 = vrot.lane.b32.xlu1 %v12014_v43, %s8355_s14  ;;  %v7450_v26 = vld [vmem:[#allocation2 + $0x49] sm:$0xff] }
 0xd07   : > { %7706 = vrot.lane.b32.xlu2 %v12025_v61, %s8355_s14 }
 0xd08   : > { %v6767_v25 = vpop.permute.xlu0 %6766  ;;  %v6763_v52 = vpop.permute.xlu1 %6762 }
 0xd09   : > { %6851 = vst.msk [vmem:[#allocation3 + $0x58] sm:$0xff] %vm1075_vm6, %v6767_v25  ;;  %v6789_v46 = vpop.permute.xlu2 %6788 }
 0xd0a   : > { %6849 = vst.msk [vmem:[#allocation3 + $0x48] sm:$0xff] %vm1075_vm6, %v6763_v52 }
 0xd0b   : > { %6862 = vst.msk [vmem:[#allocation3 + $0xb0] sm:$0xff] %vm1075_vm6, %v6789_v46 }
 0xd0e   : > { %7132 = vrot.lane.b32.xlu0 %v12014_v43, %s8352_s11  ;;  %7514 = vrot.lane.b32.xlu1 %v7449_v6, %s8354_s13  ;;  %v7460_v6 = vld [vmem:[#allocation2 + $0xc1] sm:$0xff] }
 0xd0f   : > { %7516 = vrot.lane.b32.xlu2 %v7450_v26, %s8354_s13 }
 0xd10   : > { %v6773_v12 = vpop.permute.xlu0 %6772  ;;  %v6769_v35 = vpop.permute.xlu1 %6768 }
 0xd11   : > { %6854 = vst.msk [vmem:[#allocation3 + $0x70] sm:$0xff] %vm1075_vm6, %v6773_v12  ;;  %v6795_v40 = vpop.permute.xlu2 %6794 }
 0xd12   : > { %6852 = vst.msk [vmem:[#allocation3 + $0x60] sm:$0xff] %vm1075_vm6, %v6769_v35  ;;  %v7269_v35 = vld [vmem:[#allocation2 + $0xc8] sm:$0xff] }
 0xd13   : > { %6865 = vst.msk [vmem:[#allocation3 + $0xc8] sm:$0xff] %vm1075_vm6, %v6795_v40  ;;  %v13006_v40 = vld [vmem:[#allocation6_spill] sm:$0xff] }
 0xd16   : > { %7708 = vrot.lane.b32.xlu0 %v12020_v33, %s8355_s14  ;;  %7324 = vrot.lane.b32.xlu1 %v11760_v1, %s8353_s12 }
 0xd17   : > { %7326 = vrot.lane.b32.xlu2 %v11771_v47, %s8353_s12 }
 0xd18   : > { %v6779_v43 = vpop.permute.xlu0 %6778  ;;  %v6775_v38 = vpop.permute.xlu1 %6774 }
 0xd19   : > { %6857 = vst.msk [vmem:[#allocation3 + $0x88] sm:$0xff] %vm1075_vm6, %v6779_v43  ;;  %v6801_v27 = vpop.permute.xlu2 %6800  ;;  %v13007_v43 = vld [vmem:[#allocation7_spill] sm:$0xff] }
 0xd1a   : > { %6855 = vst.msk [vmem:[#allocation3 + $0x78] sm:$0xff] %vm1075_vm6, %v6775_v38 }
 0xd1b   : > { %6868 = vst.msk [vmem:[#allocation3 + $0xe0] sm:$0xff] %vm1075_vm6, %v6801_v27 }
 0xd1e   : > { %7518 = vrot.lane.b32.xlu0 %v7451_v8, %s8354_s13  ;;  %7134 = vrot.lane.b32.xlu1 %v12025_v61, %s8352_s11 }
 0xd1f   : > { %7136 = vrot.lane.b32.xlu2 %v12020_v33, %s8352_s11 }
 0xd20   : > { %v6785_v1 = vpop.permute.xlu0 %6784  ;;  %v6781_v47 = vpop.permute.xlu1 %6780 }
 0xd21   : > { %6860 = vst.msk [vmem:[#allocation3 + $0xa0] sm:$0xff] %vm1075_vm6, %v6785_v1  ;;  %v6807_v7 = vpop.permute.xlu2 %6806 }
 0xd22   : > { %6858 = vst.msk [vmem:[#allocation3 + $0x90] sm:$0xff] %vm1075_vm6, %v6781_v47  ;;  %v7461_v47 = vld [vmem:[#allocation2 + $0xc9] sm:$0xff] }
 0xd23   : > { %6871 = vst.msk [vmem:[#allocation3 + $0xf8] sm:$0xff] %vm1075_vm6, %v6807_v7  ;;  %v7462_v7 = vld [vmem:[#allocation2 + $0xd9] sm:$0xff] }
 0xd26   : > { %7328 = vrot.lane.b32.xlu0 %v11782_v57, %s8353_s12  ;;  %7710 = vrot.lane.b32.xlu1 %v12027_v5, %s8355_s14  ;;  %v7453_v57 = vld [vmem:[#allocation2 + $0x69] sm:$0xff] }
 0xd27   : > { %7712 = vrot.lane.b32.xlu2 %v12040_v41, %s8355_s14 }
 0xd28   : > { %v6791_v61 = vpop.permute.xlu0 %6790  ;;  %v6787_v33 = vpop.permute.xlu1 %6786 }
 0xd29   : > { %6863 = vst.msk [vmem:[#allocation3 + $0xb8] sm:$0xff] %vm1075_vm6, %v6791_v61  ;;  %v6941_v58 = vpop.permute.xlu2 %6940 }
 0xd2a   : > { %6861 = vst.msk [vmem:[#allocation3 + $0xa8] sm:$0xff] %vm1075_vm6, %v6787_v33 }
 0xd2b   : > { %7034 = vst.msk [vmem:[#allocation3 + $0x10] sm:$0xff] %vm1268_vm7, %v6941_v58 }
 0xd2e   : > { %7138 = vrot.lane.b32.xlu0 %v12027_v5, %s8352_s11  ;;  %7520 = vrot.lane.b32.xlu1 %v7452_v30, %s8354_s13 }
 0xd2f   : > { %7522 = vrot.lane.b32.xlu2 %v7453_v57, %s8354_s13  ;;  %v7270_v57 = vld [vmem:[#allocation2 + $0xd8] sm:$0xff] }
 0xd30   : > { %v6797_v23 = vpop.permute.xlu0 %6796  ;;  %v6793_v42 = vpop.permute.xlu1 %6792 }
 0xd31   : > { %6866 = vst.msk [vmem:[#allocation3 + $0xd0] sm:$0xff] %vm1075_vm6, %v6797_v23  ;;  %v6947_v31 = vpop.permute.xlu2 %6946  ;;  %v13014_v23 = vld [vmem:[#allocation12_spill] sm:$0xff] }
 0xd32   : > { %6864 = vst.msk [vmem:[#allocation3 + $0xc0] sm:$0xff] %vm1075_vm6, %v6793_v42  ;;  %v7271_v42 = vld [vmem:[#allocation2 + $0xe0] sm:$0xff] }
 0xd33   : > { %7037 = vst.msk [vmem:[#allocation3 + $0x28] sm:$0xff] %vm1268_vm7, %v6947_v31 }
 0xd36   : > { %7714 = vrot.lane.b32.xlu0 %v12033_v50, %s8355_s14  ;;  %7330 = vrot.lane.b32.xlu1 %v11794_v13, %s8353_s12 }
 0xd37   : > { %7332 = vrot.lane.b32.xlu2 %v11805_v0, %s8353_s12 }
 0xd38   : > { %v6803_v5 = vpop.permute.xlu0 %6802  ;;  %v6799_v16 = vpop.permute.xlu1 %6798 }
 0xd39   : > { %6869 = vst.msk [vmem:[#allocation3 + $0xe8] sm:$0xff] %vm1075_vm6, %v6803_v5  ;;  %v6953_v24 = vpop.permute.xlu2 %6952 }
 0xd3a   : > { %6867 = vst.msk [vmem:[#allocation3 + $0xd8] sm:$0xff] %vm1075_vm6, %v6799_v16 }
 0xd3b   : > { %7040 = vst.msk [vmem:[#allocation3 + $0x40] sm:$0xff] %vm1268_vm7, %v6953_v24  ;;  %v7463_v24 = vld [vmem:[#allocation2 + $0xe1] sm:$0xff] }
 0xd3e   : > { %7524 = vrot.lane.b32.xlu0 %v7454_v48, %s8354_s13  ;;  %7140 = vrot.lane.b32.xlu1 %v12040_v41, %s8352_s11 }
 0xd3f   : > { %7142 = vrot.lane.b32.xlu2 %v12033_v50, %s8352_s11 }
 0xd40   : > { %v6937_v13 = vpop.permute.xlu0 %6936  ;;  %v6805_v0 = vpop.permute.xlu1 %6804 }
 0xd41   : > { %7032 = vst.msk [vmem:[#allocation3] sm:$0xff] %vm1268_vm7, %v6937_v13  ;;  %v6959_v36 = vpop.permute.xlu2 %6958 }
 0xd42   : > { %6870 = vst.msk [vmem:[#allocation3 + $0xf0] sm:$0xff] %vm1075_vm6, %v6805_v0  ;;  %vm12997_vm6 = vcmask 261344  }
 0xd43   : > { %7043 = vst.msk [vmem:[#allocation3 + $0x58] sm:$0xff] %vm1268_vm7, %v6959_v36  ;;  %vm13003_vm12 = vmmov %vm12997_vm6 }
 0xd44   : > { %vm13009_vm1 = vmmov %vm12997_vm6 }
 0xd46   : > { %7334 = vrot.lane.b32.xlu0 %v11816_v60, %s8353_s12  ;;  %7716 = vrot.lane.b32.xlu1 %v12038_v3, %s8355_s14  ;;  %v7456_v60 = vld [vmem:[#allocation2 + $0x91] sm:$0xff] }
 0xd47   : > { %7718 = vrot.lane.b32.xlu2 %v12053_v19, %s8355_s14 }
 0xd48   : > { %v6943_v41 = vpop.permute.xlu0 %6942  ;;  %v6939_v50 = vpop.permute.xlu1 %6938 }
 0xd49   : > { %7035 = vst.msk [vmem:[#allocation3 + $0x18] sm:$0xff] %vm1268_vm7, %v6943_v41  ;;  %v6965_v17 = vpop.permute.xlu2 %6964  ;;  %v7080_v41 = vld [vmem:[#allocation2 + $0xda] sm:$0xff] }
 0xd4a   : > { %7033 = vst.msk [vmem:[#allocation3 + $0x8] sm:$0xff] %vm1268_vm7, %v6939_v50  ;;  %v7655_v50 = vld [vmem:[#allocation2 + $0xe2] sm:$0xff] }
 0xd4b   : > { %7046 = vst.msk [vmem:[#allocation3 + $0x70] sm:$0xff] %vm1268_vm7, %v6965_v17  ;;  %v7464_v17 = vld [vmem:[#allocation2 + $0xf1] sm:$0xff] }
 0xd4e   : > { %7144 = vrot.lane.b32.xlu0 %v12038_v3, %s8352_s11  ;;  %7526 = vrot.lane.b32.xlu1 %v7455_v45, %s8354_s13  ;;  %v7868_v3 = vld [vmem:[%s12773_s5 + $0x20] sm:$0xf] }
 0xd4f   : > { %7528 = vrot.lane.b32.xlu2 %v7456_v60, %s8354_s13  ;;  %8275 = vmatpush.msk.msra.mxu3 %vm2209_vm11, %v7868_v3  ;;  %vm13002_vm11 = vmmov %vm12992_vm0  ;;  %v7272_v3 = vld [vmem:[#allocation2 + $0xf0] sm:$0xff] }
 0xd50   : > { %v6949_v14 = vpop.permute.xlu0 %6948  ;;  %v6945_v9 = vpop.permute.xlu1 %6944 }
 0xd51   : > { %7038 = vst.msk [vmem:[#allocation3 + $0x30] sm:$0xff] %vm1268_vm7, %v6949_v14  ;;  %v7321_v10 = vpop.permute.xlu2 %7320 }
 0xd52   : > { %7036 = vst.msk [vmem:[#allocation3 + $0x20] sm:$0xff] %vm1268_vm7, %v6945_v9 }
 0xd56   : > { %7720 = vrot.lane.b32.xlu0 %v12046_v22, %s8355_s14  ;;  %7336 = vrot.lane.b32.xlu1 %v11827_v56, %s8353_s12  ;;  %v7867_v56 = vld [vmem:[%s12773_s5 + $0x18] sm:$0xff] }
 0xd57   : > { %7338 = vrot.lane.b32.xlu2 %v11841_v39, %s8353_s12  ;;  %7981 = vmatpush.msra.mxu3 %v7867_v56  ;;  %v7866_v39 = vld [vmem:[%s12773_s5 + $0x10] sm:$0xff] }
 0xd58   : > { %v6955_v55 = vpop.permute.xlu0 %6954  ;;  %v6951_v37 = vpop.permute.xlu1 %6950 }
 0xd59   : > { %7041 = vst.msk [vmem:[#allocation3 + $0x48] sm:$0xff] %vm1268_vm7, %v6955_v55  ;;  %v7131_v29 = vpop.permute.xlu2 %7130  ;;  %7982 = vmatpush.msra.mxu3 %v7866_v39  ;;  %v7273_v39 = vld [vmem:[#allocation2 + $0xf8] sm:$0xff] }
 0xd5a   : > { %7039 = vst.msk [vmem:[#allocation3 + $0x38] sm:$0xff] %vm1268_vm7, %v6951_v37 }
 0xd5b   : > { %7225 = vst.msk [vmem:[#allocation3 + $0x8] sm:$0xff] %vm12992_vm0, %v7131_v29  ;;  %7983 = vmatpush.msra.mxu3 %v7865_v49  ;;  %vm13011_vm0 = vmmov %vm13004_vm13 }
 0xd5d   : > { %7984 = vmatpush.msra.mxu3 %v7864_v20  ;;  %v7465_v20 = vld [vmem:[#allocation2 + $0xf9] sm:$0xff] }
 0xd5e   : > { %7530 = vrot.lane.b32.xlu0 %v7457_v53, %s8354_s13  ;;  %7146 = vrot.lane.b32.xlu1 %v12053_v19, %s8352_s11  ;;  %v7266_v19 = vld [vmem:[#allocation2 + $0xa8] sm:$0xff]  ;;  %v7657_v53 = vld [vmem:[#allocation2 + $0xfa] sm:$0xff] }
 0xd5f   : > { %7148 = vrot.lane.b32.xlu2 %v12046_v22, %s8352_s11  ;;  %v12994_v22 = vld [vmem:[#allocation9_spill] sm:$0xff] }
 0xd60   : > { %v6961_v51 = vpop.permute.xlu0 %6960  ;;  %v6957_v32 = vpop.permute.xlu1 %6956 }
 0xd61   : > { %7044 = vst.msk [vmem:[#allocation3 + $0x60] sm:$0xff] %vm1268_vm7, %v6961_v51  ;;  %v7707_v28 = vpop.permute.xlu2 %7706 }
 0xd62   : > { %7042 = vst.msk [vmem:[#allocation3 + $0x50] sm:$0xff] %vm1268_vm7, %v6957_v32 }
 0xd66   : > { %7340 = vrot.lane.b32.xlu0 %v7266_v19, %s8353_s12  ;;  %7722 = vrot.lane.b32.xlu1 %v12993_v62, %s8355_s14 }
 0xd67   : > { %7724 = vrot.lane.b32.xlu2 %v12994_v22, %s8355_s14 }
 0xd68   : > { %v6967_v15 = vpop.permute.xlu0 %6966  ;;  %v6963_v11 = vpop.permute.xlu1 %6962 }
 0xd69   : > { %7047 = vst.msk [vmem:[#allocation3 + $0x78] sm:$0xff] %vm1268_vm7, %v6967_v15  ;;  %v7517_v34 = vpop.permute.xlu2 %7516 }
 0xd6a   : > { %7045 = vst.msk [vmem:[#allocation3 + $0x68] sm:$0xff] %vm1268_vm7, %v6963_v11  ;;  %v7466_v11 = vld [vmem:[#allocation2 + $0x109] sm:$0xff] }
 0xd6e   : > { %7150 = vrot.lane.b32.xlu0 %v12993_v62, %s8352_s11  ;;  %7532 = vrot.lane.b32.xlu1 %v7458_v18, %s8354_s13 }
 0xd6f   : > { %7534 = vrot.lane.b32.xlu2 %v7459_v54, %s8354_s13 }
 0xd70   : > { %v7513_v4 = vpop.permute.xlu0 %7512  ;;  %v7129_v21 = vpop.permute.xlu1 %7128 }
 0xd71   : > { %7224 = vst.msk [vmem:[#allocation3] sm:$0xff] %vm12995_vm4, %v7129_v21  ;;  %v7327_v2 = vpop.permute.xlu2 %7326  ;;  %v7658_v21 = vld [vmem:[#allocation2 + $0x10a] sm:$0xff] }
 0xd72   : > { %7416 = vst.msk [vmem:[#allocation3] sm:$0xff] %vm12996_vm5, %v7321_v10  ;;  %v7656_v10 = vld [vmem:[#allocation2 + $0xf2] sm:$0xff] }
 0xd73   : > { %7608 = vst.msk [vmem:[#allocation3] sm:$0xff] %vm12997_vm6, %v7513_v4  ;;  %vm13012_vm6 = vmmov %vm13009_vm1 }
 0xd76   : > { %7726 = vrot.lane.b32.xlu0 %v12998_v44, %s8355_s14  ;;  %7342 = vrot.lane.b32.xlu1 %v11865_v63, %s8353_s12 }
 0xd77   : > { %7344 = vrot.lane.b32.xlu2 %v11875_v59, %s8353_s12 }
 0xd78   : > { %v7323_v25 = vpop.permute.xlu0 %7322  ;;  %v7705_v52 = vpop.permute.xlu1 %7704 }
 0xd79   : > { %7417 = vst.msk [vmem:[#allocation3 + $0x8] sm:$0xff] %vm12999_vm8, %v7323_v25  ;;  %v7137_v46 = vpop.permute.xlu2 %7136  ;;  %vm13013_vm8 = vmmov %vm13011_vm0 }
 0xd7a   : > { %7800 = vst.msk [vmem:[#allocation3] sm:$0xff] %vm13000_vm9, %v7705_v52  ;;  %vm13015_vm9 = vmmov %vm12996_vm5 }
 0xd7b   : > { %7228 = vst.msk [vmem:[#allocation3 + $0x20] sm:$0xff] %vm13001_vm10, %v7137_v46  ;;  %vm13016_vm10 = vmmov %vm13010_vm3 }
 0xd7e   : > { %7536 = vrot.lane.b32.xlu0 %v7460_v6, %s8354_s13  ;;  %7152 = vrot.lane.b32.xlu1 %v12994_v22, %s8352_s11  ;;  %v7659_v6 = vld [vmem:[#allocation2 + $0x112] sm:$0xff] }
 0xd7f   : > { %7154 = vrot.lane.b32.xlu2 %v12998_v44, %s8352_s11 }
 0xd80   : > { %v7133_v63 = vpop.permute.xlu0 %7132  ;;  %v7515_v59 = vpop.permute.xlu1 %7514 }
 0xd81   : > { %7226 = vst.msk [vmem:[#allocation3 + $0x10] sm:$0xff] %vm13002_vm11, %v7133_v63  ;;  %v7713_v26 = vpop.permute.xlu2 %7712  ;;  %v7832_v12 = vld [vmem:[#allocation3] sm:$0xff]  ;;  %vm13017_vm11 = vmmov %vm12995_vm4 }
 0xd82   : > { %7609 = vst.msk [vmem:[#allocation3 + $0x8] sm:$0xff] %vm13003_vm12, %v7515_v59  ;;  %8276 = vmatmul.msk.f32.vlgmr.msra.gmra.mxu3 %vm13004_vm13, %v7832_v12  ;;  %vm13018_vm12 = vmmov %vm12995_vm4  ;;  %v7275_v63 = vld [vmem:[#allocation2 + $0x110] sm:$0xff] }
 0xd83   : > { %7801 = vst.msk [vmem:[#allocation3 + $0x8] sm:$0xff] %vm13005_vm14, %v7707_v28  ;;  %vm13019_vm13 = vmmov %vm13009_vm1  ;;  %v7274_v28 = vld [vmem:[#allocation2 + $0x108] sm:$0xff] }
 0xd84   : > { %vm13020_vm14 = vmmov %vm13011_vm0 }
 0xd86   : > { %7346 = vrot.lane.b32.xlu0 %v7269_v35, %s8353_s12  ;;  %7728 = vrot.lane.b32.xlu1 %v13006_v40, %s8355_s14  ;;  %v7276_v35 = vld [vmem:[#allocation2 + $0x120] sm:$0xff] }
 0xd87   : > { %7730 = vrot.lane.b32.xlu2 %v13007_v43, %s8355_s14 }
 0xd88   : > { %v7709_v38 = vpop.permute.xlu0 %7708  ;;  %v7325_v27 = vpop.permute.xlu1 %7324 }
 0xd89   : > { %7418 = vst.msk [vmem:[#allocation3 + $0x10] sm:$0xff] %vm13008_vm15, %v7325_v27  ;;  %v7523_v8 = vpop.permute.xlu2 %7522  ;;  %vm13021_vm15 = vmmov %vm13010_vm3 }
 0xd8a   : > { %7610 = vst.msk [vmem:[#allocation3 + $0x10] sm:$0xff] %vm13009_vm1, %v7517_v34  ;;  %v7833_v1 = vld [vmem:[#allocation3 + $0x8] sm:$0xff]  ;;  %vm13022_vm1 = vmmov %vm12996_vm5 }
 0xd8b   : > { %7802 = vst.msk [vmem:[#allocation3 + $0x10] sm:$0xff] %vm13010_vm3, %v7709_v38  ;;  %8277 = vmatmul.msk.f32.gmra.mxu3 %vm13011_vm0, %v7833_v1  ;;  %vm13023_vm3 = vmmov %vm13012_vm6  ;;  %v7468_v1 = vld [vmem:[#allocation2 + $0x121] sm:$0xff] }
 0xd8c   : > { %vm13024_vm0 = vmmov %vm13016_vm10 }
 0xd8e   : > { %7156 = vrot.lane.b32.xlu0 %v13006_v40, %s8352_s11  ;;  %7538 = vrot.lane.b32.xlu1 %v7461_v47, %s8354_s13  ;;  %v7660_v40 = vld [vmem:[#allocation2 + $0x122] sm:$0xff] }
 0xd8f   : > { %7540 = vrot.lane.b32.xlu2 %v7462_v7, %s8354_s13  ;;  %v7277_v47 = vld [vmem:[#allocation2 + $0x128] sm:$0xff] }
 0xd90   : > { %v7519_v61 = vpop.permute.xlu0 %7518  ;;  %v7135_v33 = vpop.permute.xlu1 %7134 }
 0xd91   : > { %7227 = vst.msk [vmem:[#allocation3 + $0x18] sm:$0xff] %vm12995_vm4, %v7135_v33  ;;  %v7333_v58 = vpop.permute.xlu2 %7332  ;;  %vm13025_vm4 = vmmov %vm13013_vm8 }
 0xd92   : > { %7419 = vst.msk [vmem:[#allocation3 + $0x18] sm:$0xff] %vm12996_vm5, %v7327_v2  ;;  %v7834_v30 = vld [vmem:[#allocation3 + $0x10] sm:$0xff]  ;;  %vm13026_vm5 = vmmov %vm13017_vm11  ;;  %v7467_v2 = vld [vmem:[#allocation2 + $0x111] sm:$0xff] }
 0xd93   : > { %7611 = vst.msk [vmem:[#allocation3 + $0x18] sm:$0xff] %vm13012_vm6, %v7519_v61  ;;  %8278 = vmatmul.msk.f32.gmra.mxu3 %vm13013_vm8, %v7834_v30  ;;  %vm13027_vm6 = vmmov %vm13022_vm1  ;;  %v7469_v30 = vld [vmem:[#allocation2 + $0x129] sm:$0xff] }
 0xd94   : > { %vm13028_vm8 = vmmov %vm13023_vm3 }
 0xd96   : > { %7732 = vrot.lane.b32.xlu0 %v13014_v23, %s8355_s14  ;;  %7348 = vrot.lane.b32.xlu1 %v7270_v57, %s8353_s12 }
 0xd97   : > { %7350 = vrot.lane.b32.xlu2 %v7271_v42, %s8353_s12 }
 0xd98   : > { %v7329_v31 = vpop.permute.xlu0 %7328  ;;  %v7711_v5 = vpop.permute.xlu1 %7710 }
 0xd99   : > { %7420 = vst.msk [vmem:[#allocation3 + $0x20] sm:$0xff] %vm13015_vm9, %v7329_v31  ;;  %v7143_v16 = vpop.permute.xlu2 %7142  ;;  %vm13029_vm9 = vmmov %vm13025_vm4 }
 0xd9a   : > { %7803 = vst.msk [vmem:[#allocation3 + $0x18] sm:$0xff] %vm13016_vm10, %v7711_v5  ;;  %vm13030_vm10 = vmmov %vm13022_vm1  ;;  %v7661_v5 = vld [vmem:[#allocation2 + $0x12a] sm:$0xff] }
 0xd9b   : > { %7231 = vst.msk [vmem:[#allocation3 + $0x38] sm:$0xff] %vm13017_vm11, %v7143_v16  ;;  %vm13031_vm11 = vmmov %vm13024_vm0  ;;  %v7470_v16 = vld [vmem:[#allocation2 + $0x139] sm:$0xff] }
 0xd9e   : > { %7542 = vrot.lane.b32.xlu0 %v7463_v24, %s8354_s13  ;;  %7158 = vrot.lane.b32.xlu1 %v13007_v43, %s8352_s11 }
 0xd9f   : > { %6968 = vrot.lane.b32.xlu2 %v7462_v7, %s8351_s10 }
 0xda0   : > { %v7139_v48 = vpop.permute.xlu0 %7138  ;;  %v7521_v13 = vpop.permute.xlu1 %7520 }
 0xda1   : > { %7229 = vst.msk [vmem:[#allocation3 + $0x28] sm:$0xff] %vm13018_vm12, %v7139_v48  ;;  %v7719_v0 = vpop.permute.xlu2 %7718  ;;  %v7835_v36 = vld [vmem:[#allocation3 + $0x18] sm:$0xff]  ;;  %vm13032_vm12 = vmmov %vm13026_vm5 }
 0xda2   : > { %7612 = vst.msk [vmem:[#allocation3 + $0x20] sm:$0xff] %vm13019_vm13, %v7521_v13  ;;  %8279 = vmatmul.msk.f32.gmra.mxu3 %vm13020_vm14, %v7835_v36  ;;  %vm13033_vm13 = vmmov %vm13026_vm5  ;;  %v7278_v36 = vld [vmem:[#allocation2 + $0x138] sm:$0xff] }
 0xda3   : > { %7804 = vst.msk [vmem:[#allocation3 + $0x20] sm:$0xff] %vm13021_vm15, %v7713_v26  ;;  %vm13034_vm14 = vmmov %vm13023_vm3 }
 0xda4   : > { %vm13035_vm15 = vmmov %vm13025_vm4 }
 0xda6   : > { %7160 = vrot.lane.b32.xlu0 %v7080_v41, %s8352_s11  ;;  %7734 = vrot.lane.b32.xlu1 %v7655_v50, %s8355_s14 }
 0xda7   : > { %7544 = vrot.lane.b32.xlu2 %v7464_v17, %s8354_s13 }
 0xda8   : > { %v7715_v45 = vpop.permute.xlu0 %7714  ;;  %v7331_v60 = vpop.permute.xlu1 %7330 }
 0xda9   : > { %7421 = vst.msk [vmem:[#allocation3 + $0x28] sm:$0xff] %vm13022_vm1, %v7331_v60  ;;  %v7529_v14 = vpop.permute.xlu2 %7528  ;;  %vm13036_vm1 = vmmov %vm13024_vm0  ;;  %v12510_v60 = vld [vmem:[%s12769_s1 + $0x5] ss:$0 sm:$0xff] }
 0xdaa   : > { %7613 = vst.msk [vmem:[#allocation3 + $0x28] sm:$0xff] %vm13023_vm3, %v7523_v8  ;;  %v7836_v9 = vld [vmem:[#allocation3 + $0x20] sm:$0xff]  ;;  %vm13037_vm3 = vmmov %vm13027_vm6 }
 0xdab   : > { %7805 = vst.msk [vmem:[#allocation3 + $0x28] sm:$0xff] %vm13024_vm0, %v7715_v45  ;;  %8280 = vmatmul.msk.f32.gmra.mxu3 %vm13025_vm4, %v7836_v9  ;;  %vm13038_vm0 = vmmov %vm13028_vm8  ;;  %v7279_v9 = vld [vmem:[#allocation2 + $0x140] sm:$0xff] }
 0xdac   : > { %vm13039_vm4 = vmmov %vm13036_vm1 }
 0xdae   : > { %7736 = vrot.lane.b32.xlu0 %v7656_v10, %s8355_s14  ;;  %7352 = vrot.lane.b32.xlu1 %v7272_v3, %s8353_s12  ;;  %v7663_v3 = vld [vmem:[#allocation2 + $0x142] sm:$0xff] }
 0xdaf   : > { %7162 = vrot.lane.b32.xlu2 %v7655_v50, %s8352_s11 }
 0xdb0   : > { %v7525_v55 = vpop.permute.xlu0 %7524  ;;  %v7141_v37 = vpop.permute.xlu1 %7140 }
 0xdb1   : > { %7230 = vst.msk [vmem:[#allocation3 + $0x30] sm:$0xff] %vm13026_vm5, %v7141_v37  ;;  %v7339_v29 = vpop.permute.xlu2 %7338  ;;  %vm13040_vm5 = vmmov %vm13029_vm9 }
 0xdb2   : > { %7422 = vst.msk [vmem:[#allocation3 + $0x30] sm:$0xff] %vm13027_vm6, %v7333_v58  ;;  %v7837_v56 = vld [vmem:[#allocation3 + $0x28] sm:$0xff]  ;;  %vm13041_vm6 = vmmov %vm13032_vm12 }
 0xdb3   : > { %7614 = vst.msk [vmem:[#allocation3 + $0x30] sm:$0xff] %vm13028_vm8, %v7525_v55  ;;  %8281 = vmatmul.msk.f32.gmra.mxu3 %vm13029_vm9, %v7837_v56  ;;  %vm13042_vm8 = vmmov %vm13037_vm3 }
 0xdb4   : > { %vm13043_vm9 = vmmov %vm13038_vm0 }
 0xdb6   : > { %7354 = vrot.lane.b32.xlu0 %v7273_v39, %s8353_s12  ;;  %6970 = vrot.lane.b32.xlu1 %v7463_v24, %s8351_s10  ;;  %v7471_v39 = vld [vmem:[#allocation2 + $0x141] sm:$0xff] }
 0xdb7   : > { %7738 = vrot.lane.b32.xlu2 %v7657_v53, %s8355_s14 }
 0xdb8   : > { %v7335_v49 = vpop.permute.xlu0 %7334  ;;  %v7717_v51 = vpop.permute.xlu1 %7716 }
 0xdb9   : > { %7423 = vst.msk [vmem:[#allocation3 + $0x38] sm:$0xff] %vm13030_vm10, %v7335_v49  ;;  %v7149_v32 = vpop.permute.xlu2 %7148  ;;  %vm13044_vm10 = vmmov %vm13040_vm5  ;;  %v7280_v49 = vld [vmem:[#allocation2 + $0x150] sm:$0xff] }
 0xdba   : > { %7806 = vst.msk [vmem:[#allocation3 + $0x30] sm:$0xff] %vm13031_vm11, %v7717_v51  ;;  %vm13045_vm11 = vmmov %vm13037_vm3 }
 0xdbb   : > { %7234 = vst.msk [vmem:[#allocation3 + $0x50] sm:$0xff] %vm13032_vm12, %v7149_v32  ;;  %vm13046_vm12 = vmmov %vm13036_vm1 }
 0xdbe   : > { %6972 = vrot.lane.b32.xlu0 %v7464_v17, %s8351_s10  ;;  %7546 = vrot.lane.b32.xlu1 %v7465_v20, %s8354_s13 }
 0xdbf   : > { %7356 = vrot.lane.b32.xlu2 %v7274_v28, %s8353_s12 }
 0xdc0   : > { %v7145_v19 = vpop.permute.xlu0 %7144  ;;  %v7527_v62 = vpop.permute.xlu1 %7526 }
 0xdc1   : > { %7232 = vst.msk [vmem:[#allocation3 + $0x40] sm:$0xff] %vm13033_vm13, %v7145_v19  ;;  %v7725_v22 = vpop.permute.xlu2 %7724  ;;  %v7838_v15 = vld [vmem:[#allocation3 + $0x30] sm:$0xff]  ;;  %vm13047_vm13 = vmmov %vm13041_vm6 }
 0xdc2   : > { %7615 = vst.msk [vmem:[#allocation3 + $0x38] sm:$0xff] %vm13034_vm14, %v7527_v62  ;;  %8282 = vmatmul.msk.f32.gmra.mxu3 %vm13035_vm15, %v7838_v15  ;;  %vm13048_vm14 = vmmov %vm13041_vm6  ;;  %v7472_v62 = vld [vmem:[#allocation2 + $0x151] sm:$0xff] }
 0xdc3   : > { %7807 = vst.msk [vmem:[#allocation3 + $0x38] sm:$0xff] %vm13036_vm1, %v7719_v0  ;;  %vm13049_vm15 = vmmov %vm13038_vm0  ;;  %v7662_v0 = vld [vmem:[#allocation2 + $0x13a] sm:$0xff] }
 0xdc4   : > { %vm13050_vm1 = vmmov %vm13040_vm5 }
 0xdc6   : > { %7548 = vrot.lane.b32.xlu0 %v7466_v11, %s8354_s13  ;;  %7164 = vrot.lane.b32.xlu1 %v7656_v10, %s8352_s11 }
 0xdc7   : > { %6974 = vrot.lane.b32.xlu2 %v7465_v20, %s8351_s10 }
 0xdc8   : > { %v7721_v34 = vpop.permute.xlu0 %7720  ;;  %v7337_v18 = vpop.permute.xlu1 %7336 }
 0xdc9   : > { %7424 = vst.msk [vmem:[#allocation3 + $0x40] sm:$0xff] %vm13037_vm3, %v7337_v18  ;;  %v7535_v54 = vpop.permute.xlu2 %7534  ;;  %vm13051_vm3 = vmmov %vm13039_vm4 }
 0xdca   : > { %7616 = vst.msk [vmem:[#allocation3 + $0x40] sm:$0xff] %vm13038_vm0, %v7529_v14  ;;  %v7839_v4 = vld [vmem:[#allocation3 + $0x38] sm:$0xff]  ;;  %vm13052_vm0 = vmmov %vm13042_vm8 }
 0xdcb   : > { %7808 = vst.msk [vmem:[#allocation3 + $0x40] sm:$0xff] %vm13039_vm4, %v7721_v34  ;;  %8283 = vmatmul.msk.f32.gmra.mxu3 %vm13040_vm5, %v7839_v4  ;;  %vm13053_vm4 = vmmov %vm13043_vm9  ;;  %v7473_v4 = vld [vmem:[#allocation2 + $0x159] sm:$0xff] }
 0xdcc   : > { %vm13054_vm5 = vmmov %vm13051_vm3 }
 0xdce   : > { %7166 = vrot.lane.b32.xlu0 %v7657_v53, %s8352_s11  ;;  %7740 = vrot.lane.b32.xlu1 %v7658_v21, %s8355_s14 }
 0xdcf   : > { %7550 = vrot.lane.b32.xlu2 %v7467_v2, %s8354_s13 }
 0xdd0   : > { %v7531_v44 = vpop.permute.xlu0 %7530  ;;  %v7147_v25 = vpop.permute.xlu1 %7146 }
 0xdd1   : > { %7233 = vst.msk [vmem:[#allocation3 + $0x48] sm:$0xff] %vm13041_vm6, %v7147_v25  ;;  %v7345_v52 = vpop.permute.xlu2 %7344  ;;  %vm13055_vm6 = vmmov %vm13050_vm1 }
 0xdd2   : > { %7425 = vst.msk [vmem:[#allocation3 + $0x48] sm:$0xff] %vm13042_vm8, %v7339_v29  ;;  %v7840_v46 = vld [vmem:[#allocation3 + $0x40] sm:$0xff]  ;;  %vm13056_vm8 = vmmov %vm13047_vm13 }
 0xdd3   : > { %7617 = vst.msk [vmem:[#allocation3 + $0x48] sm:$0xff] %vm13043_vm9, %v7531_v44  ;;  %8284 = vmatmul.msk.f32.gmra.mxu3 %vm13044_vm10, %v7840_v46  ;;  %vm13057_vm9 = vmmov %vm13052_vm0  ;;  %v7665_v46 = vld [vmem:[#allocation2 + $0x15a] sm:$0xff] }
 0xdd4   : > { %vm13058_vm10 = vmmov %vm13053_vm4 }
 0xdd6   : > { %7742 = vrot.lane.b32.xlu0 %v7659_v6, %s8355_s14  ;;  %7358 = vrot.lane.b32.xlu1 %v7275_v63, %s8353_s12 }
 0xdd7   : > { %7168 = vrot.lane.b32.xlu2 %v7658_v21, %s8352_s11 }
 0xdd8   : > { %v7341_v59 = vpop.permute.xlu0 %7340  ;;  %v7723_v26 = vpop.permute.xlu1 %7722 }
 0xdd9   : > { %7426 = vst.msk [vmem:[#allocation3 + $0x50] sm:$0xff] %vm13045_vm11, %v7341_v59  ;;  %v7155_v12 = vpop.permute.xlu2 %7154  ;;  %vm13059_vm11 = vmmov %vm13050_vm1 }
 0xdda   : > { %7809 = vst.msk [vmem:[#allocation3 + $0x48] sm:$0xff] %vm13046_vm12, %v7723_v26  ;;  %vm13060_vm12 = vmmov %vm13052_vm0 }
 0xddb   : > { %7237 = vst.msk [vmem:[#allocation3 + $0x68] sm:$0xff] %vm13047_vm13, %v7155_v12  ;;  %vm13061_vm13 = vmmov %vm13051_vm3 }
 0xdde   : > { %7360 = vrot.lane.b32.xlu0 %v7276_v35, %s8353_s12  ;;  %6976 = vrot.lane.b32.xlu1 %v7466_v11, %s8351_s10 }
 0xddf   : > { %7744 = vrot.lane.b32.xlu2 %v7660_v40, %s8355_s14 }
 0xde0   : > { %v7151_v43 = vpop.permute.xlu0 %7150  ;;  %v7533_v38 = vpop.permute.xlu1 %7532 }
 0xde1   : > { %7235 = vst.msk [vmem:[#allocation3 + $0x58] sm:$0xff] %vm13048_vm14, %v7151_v43  ;;  %v7731_v27 = vpop.permute.xlu2 %7730  ;;  %v7841_v8 = vld [vmem:[#allocation3 + $0x48] sm:$0xff]  ;;  %vm13062_vm14 = vmmov %vm13056_vm8 }
 0xde2   : > { %7618 = vst.msk [vmem:[#allocation3 + $0x50] sm:$0xff] %vm13049_vm15, %v7533_v38  ;;  %8285 = vmatmul.msk.f32.gmra.mxu3 %vm13050_vm1, %v7841_v8  ;;  %vm13063_vm15 = vmmov %vm13053_vm4  ;;  %v7666_v38 = vld [vmem:[#allocation2 + $0x16a] sm:$0xff] }
 0xde3   : > { %7810 = vst.msk [vmem:[#allocation3 + $0x50] sm:$0xff] %vm13051_vm3, %v7725_v22 }
 0xde6   : > { %6978 = vrot.lane.b32.xlu0 %v7467_v2, %s8351_s10  ;;  %7552 = vrot.lane.b32.xlu1 %v7468_v1, %s8354_s13 }
 0xde7   : > { %7362 = vrot.lane.b32.xlu2 %v7277_v47, %s8353_s12 }
 0xde8   : > { %v7727_v7 = vpop.permute.xlu0 %7726  ;;  %v7343_v61 = vpop.permute.xlu1 %7342 }
 0xde9   : > { %7427 = vst.msk [vmem:[#allocation3 + $0x58] sm:$0xff] %vm13052_vm0, %v7343_v61  ;;  %v7541_v33 = vpop.permute.xlu2 %7540  ;;  %v7283_v61 = vld [vmem:[#allocation2 + $0x170] sm:$0xff] }
 0xdea   : > { %7619 = vst.msk [vmem:[#allocation3 + $0x58] sm:$0xff] %vm13053_vm4, %v7535_v54  ;;  %v7842_v58 = vld [vmem:[#allocation3 + $0x50] sm:$0xff]  ;;  %v7664_v54 = vld [vmem:[#allocation2 + $0x152] sm:$0xff] }
 0xdeb   : > { %7811 = vst.msk [vmem:[#allocation3 + $0x58] sm:$0xff] %vm13054_vm5, %v7727_v7  ;;  %8286 = vmatmul.msk.f32.gmra.mxu3 %vm13055_vm6, %v7842_v58  ;;  %vm13064_vm5 = vmmov %vm13051_vm3  ;;  %v7474_v7 = vld [vmem:[#allocation2 + $0x169] sm:$0xff] }
 0xdec   : > { %vm13065_vm6 = vmmov %vm13050_vm1 }
 0xdee   : > { %7554 = vrot.lane.b32.xlu0 %v7469_v30, %s8354_s13  ;;  %7170 = vrot.lane.b32.xlu1 %v7659_v6, %s8352_s11  ;;  %v7281_v6 = vld [vmem:[#allocation2 + $0x158] sm:$0xff] }
 0xdef   : > { %6980 = vrot.lane.b32.xlu2 %v7468_v1, %s8351_s10 }
 0xdf0   : > { %v7537_v57 = vpop.permute.xlu0 %7536  ;;  %v7153_v23 = vpop.permute.xlu1 %7152 }
 0xdf1   : > { %7236 = vst.msk [vmem:[#allocation3 + $0x60] sm:$0xff] %vm13056_vm8, %v7153_v23  ;;  %v7351_v42 = vpop.permute.xlu2 %7350 }
 0xdf2   : > { %7428 = vst.msk [vmem:[#allocation3 + $0x60] sm:$0xff] %vm13057_vm9, %v7345_v52  ;;  %v7843_v31 = vld [vmem:[#allocation3 + $0x58] sm:$0xff]  ;;  %vm13066_vm9 = vmmov %vm13052_vm0 }
 0xdf3   : > { %7620 = vst.msk [vmem:[#allocation3 + $0x60] sm:$0xff] %vm13058_vm10, %v7537_v57  ;;  %8287 = vmatmul.msk.f32.gmra.mxu3 %vm13059_vm11, %v7843_v31  ;;  %vm13067_vm10 = vmmov %vm13050_vm1  ;;  %v7475_v31 = vld [vmem:[#allocation2 + $0x171] sm:$0xff] }
 0xdf4   : > { %vm13068_vm11 = vmmov %vm13053_vm4 }
 0xdf6   : > { %7172 = vrot.lane.b32.xlu0 %v7660_v40, %s8352_s11  ;;  %7746 = vrot.lane.b32.xlu1 %v7661_v5, %s8355_s14  ;;  %v7282_v40 = vld [vmem:[#allocation2 + $0x168] sm:$0xff] }
 0xdf7   : > { %7556 = vrot.lane.b32.xlu2 %v7470_v16, %s8354_s13 }
 0xdf8   : > { %v7347_v24 = vpop.permute.xlu0 %7346  ;;  %v7729_v48 = vpop.permute.xlu1 %7728 }
 0xdf9   : > { %7429 = vst.msk [vmem:[#allocation3 + $0x68] sm:$0xff] %vm13060_vm12, %v7347_v24  ;;  %v6969_v13 = vpop.permute.xlu2 %6968  ;;  %vm13069_vm12 = vmmov %vm13056_vm8 }
 0xdfa   : > { %7812 = vst.msk [vmem:[#allocation3 + $0x60] sm:$0xff] %vm13061_vm13, %v7729_v48  ;;  %vm13070_vm13 = vmmov %vm13051_vm3 }
 0xdfb   : > { %7048 = vst.msk [vmem:[#allocation3 + $0x80] sm:$0xff] %vm1268_vm7, %v6969_v13  ;;  %v7667_v13 = vld [vmem:[#allocation2 + $0x172] sm:$0xff] }
 0xdfe   : > { %7748 = vrot.lane.b32.xlu0 %v7662_v0, %s8355_s14  ;;  %7364 = vrot.lane.b32.xlu1 %v7278_v36, %s8353_s12  ;;  %v7476_v36 = vld [vmem:[#allocation2 + $0x181] sm:$0xff] }
 0xdff   : > { %7174 = vrot.lane.b32.xlu2 %v7661_v5, %s8352_s11 }
 0xe00   : > { %v7157_v41 = vpop.permute.xlu0 %7156  ;;  %v7539_v50 = vpop.permute.xlu1 %7538 }
 0xe01   : > { %7238 = vst.msk [vmem:[#allocation3 + $0x70] sm:$0xff] %vm13062_vm14, %v7157_v41  ;;  %v7545_v17 = vpop.permute.xlu2 %7544  ;;  %v7844_v45 = vld [vmem:[#allocation3 + $0x60] sm:$0xff]  ;;  %vm13071_vm14 = vmmov %vm13052_vm0 }
 0xe02   : > { %7621 = vst.msk [vmem:[#allocation3 + $0x68] sm:$0xff] %vm13063_vm15, %v7539_v50  ;;  %8288 = vmatmul.msk.f32.gmra.mxu3 %vm13050_vm1, %v7844_v45  ;;  %vm13072_vm15 = vmmov %vm13053_vm4 }
 0xe03   : > { %7813 = vst.msk [vmem:[#allocation3 + $0x68] sm:$0xff] %vm13051_vm3, %v7731_v27  ;;  %vm13073_vm1 = vmmov %vm13051_vm3 }
 0xe04   : > { %vm13074_vm3 = vmmov %vm13065_vm6 }
 0xe05   : > { %v7986_v14 = vpop.f32.mrf.mxu3 }
 0xe06   : > { %v7987_v10 = vadd.f32 %v12510_v60, %v7986_v14  ;;  %7366 = vrot.lane.b32.xlu0 %v7279_v9, %s8353_s12  ;;  %6982 = vrot.lane.b32.xlu1 %v7469_v30, %s8351_s10  ;;  %v7668_v14 = vld [vmem:[#allocation2 + $0x182] sm:$0xff] }
 0xe07   : > { %7750 = vrot.lane.b32.xlu2 %v7663_v3, %s8355_s14  ;;  %v7284_v9 = vld [vmem:[#allocation2 + $0x180] sm:$0xff] }
 0xe08   : > { %8082 = vst.msk [vmem:[%s12518_s26] sm:$0xff] %vm432_vm2, %v7987_v10  ;;  %v7733_v55 = vpop.permute.xlu0 %7732  ;;  %v7349_v37 = vpop.permute.xlu1 %7348 }
 0xe09   : > { %7430 = vst.msk [vmem:[#allocation3 + $0x70] sm:$0xff] %vm13052_vm0, %v7349_v37  ;;  %v7163_v29 = vpop.permute.xlu2 %7162  ;;  %vm13075_vm0 = vmmov %vm13056_vm8 }
 0xe0a   : > { %7622 = vst.msk [vmem:[#allocation3 + $0x70] sm:$0xff] %vm13053_vm4, %v7541_v33  ;;  %v7845_v56 = vld [vmem:[#allocation3 + $0x68] sm:$0xff]  ;;  %vm13076_vm4 = vmmov %vm13066_vm9 }
 0xe0b   : > { %7814 = vst.msk [vmem:[#allocation3 + $0x70] sm:$0xff] %vm13064_vm5, %v7733_v55  ;;  %8289 = vmatmul.msk.f32.gmra.mxu3 %vm13065_vm6, %v7845_v56  ;;  %vm13077_vm5 = vmmov %vm13074_vm3 }
 0xe0c   : > { %vm13078_vm6 = vmmov %vm13068_vm11 }
 0xe0e   : > { %v7989_v53 = vpop.f32.mrf.mxu3  ;;  %6984 = vrot.lane.b32.xlu0 %v7470_v16, %s8351_s10  ;;  %7558 = vrot.lane.b32.xlu1 %v7471_v39, %s8354_s13 }
 0xe0f   : > { %v7990_v51 = vadd.f32 %v12510_v60, %v7989_v53  ;;  %7368 = vrot.lane.b32.xlu2 %v7280_v49, %s8353_s12  ;;  %v7669_v53 = vld [vmem:[#allocation2 + $0x18a] sm:$0xff] }
 0xe10   : > { %v7543_v32 = vpop.permute.xlu0 %7542  ;;  %v7159_v20 = vpop.permute.xlu1 %7158 }
 0xe11   : > { %8083 = vst.msk [vmem:[%s12518_s26 + $0x8] sm:$0xff] %vm432_vm2, %v7990_v51  ;;  %v7739_v28 = vpop.permute.xlu2 %7738 }
 0xe12   : > { %7239 = vst.msk [vmem:[#allocation3 + $0x78] sm:$0xff] %vm13056_vm8, %v7159_v20  ;;  %v7846_v19 = vld [vmem:[#allocation3 + $0x70] sm:$0xff]  ;;  %vm13079_vm8 = vmmov %vm13073_vm1 }
 0xe13   : > { %7431 = vst.msk [vmem:[#allocation3 + $0x78] sm:$0xff] %vm13066_vm9, %v7351_v42  ;;  %8290 = vmatmul.msk.f32.gmra.mxu3 %vm13067_vm10, %v7846_v19  ;;  %vm13080_vm9 = vmmov %vm13075_vm0  ;;  %v7286_v19 = vld [vmem:[#allocation2 + $0x198] sm:$0xff] }
 0xe14   : > { %7623 = vst.msk [vmem:[#allocation3 + $0x78] sm:$0xff] %vm13068_vm11, %v7543_v32  ;;  %vm13081_vm10 = vmmov %vm13076_vm4 }
 0xe15   : > { %vm13082_vm11 = vmmov %vm13078_vm6 }
 0xe16   : > { %7560 = vrot.lane.b32.xlu0 %v7472_v62, %s8354_s13  ;;  %7176 = vrot.lane.b32.xlu1 %v7662_v0, %s8352_s11  ;;  %v7992_v22 = vpop.f32.mrf.mxu3 }
 0xe17   : > { %6986 = vrot.lane.b32.xlu2 %v7471_v39, %s8351_s10  ;;  %v7993_v15 = vadd.f32 %v12510_v60, %v7992_v22  ;;  %v7285_v39 = vld [vmem:[#allocation2 + $0x188] sm:$0xff] }
 0xe18   : > { %v7161_v11 = vpop.permute.xlu0 %7160  ;;  %v7735_v34 = vpop.permute.xlu1 %7734 }
 0xe19   : > { %8084 = vst.msk [vmem:[%s12518_s26 + $0x10] sm:$0xff] %vm432_vm2, %v7993_v15  ;;  %v7357_v18 = vpop.permute.xlu2 %7356 }
 0xe1a   : > { %7240 = vst.msk [vmem:[#allocation3 + $0x80] sm:$0xff] %vm13069_vm12, %v7161_v11  ;;  %vm13083_vm12 = vmmov %vm13074_vm3 }
 0xe1b   : > { %7815 = vst.msk [vmem:[#allocation3 + $0x78] sm:$0xff] %vm13070_vm13, %v7735_v34  ;;  %vm13084_vm13 = vmmov %vm13075_vm0 }
 0xe1e   : > { %7178 = vrot.lane.b32.xlu0 %v7663_v3, %s8352_s11  ;;  %7752 = vrot.lane.b32.xlu1 %v7664_v54, %s8355_s14 }
 0xe1f   : > { %7562 = vrot.lane.b32.xlu2 %v7473_v4, %s8354_s13 }
 0xe20   : > { %v7737_v21 = vpop.permute.xlu0 %7736  ;;  %v7353_v2 = vpop.permute.xlu1 %7352 }
 0xe21   : > { %7432 = vst.msk [vmem:[#allocation3 + $0x80] sm:$0xff] %vm13071_vm14, %v7353_v2  ;;  %v6975_v44 = vpop.permute.xlu2 %6974  ;;  %vm13085_vm14 = vmmov %vm13073_vm1 }
 0xe22   : > { %7624 = vst.msk [vmem:[#allocation3 + $0x80] sm:$0xff] %vm13072_vm15, %v7545_v17  ;;  %v7847_v25 = vld [vmem:[#allocation3 + $0x78] sm:$0xff]  ;;  %vm13086_vm15 = vmmov %vm13076_vm4 }
 0xe23   : > { %7816 = vst.msk [vmem:[#allocation3 + $0x80] sm:$0xff] %vm13073_vm1, %v7737_v21  ;;  %8291 = vmatmul.msk.f32.gmra.mxu3 %vm13074_vm3, %v7847_v25  ;;  %vm13087_vm1 = vmmov %vm13078_vm6  ;;  %v7670_v25 = vld [vmem:[#allocation2 + $0x19a] sm:$0xff] }
 0xe24   : > { %7051 = vst.msk [vmem:[#allocation3 + $0x98] sm:$0xff] %vm1268_vm7, %v6975_v44 }
 0xe25   : > { %v7995_v52 = vpop.f32.mrf.mxu3 }
 0xe26   : > { %v7996_v63 = vadd.f32 %v12510_v60, %v7995_v52  ;;  %7754 = vrot.lane.b32.xlu0 %v7665_v46, %s8355_s14  ;;  %7370 = vrot.lane.b32.xlu1 %v7281_v6, %s8353_s12 }
 0xe27   : > { %7180 = vrot.lane.b32.xlu2 %v7664_v54, %s8352_s11 }
 0xe28   : > { %8085 = vst.msk [vmem:[%s12518_s26 + $0x18] sm:$0xff] %vm432_vm2, %v7996_v63  ;;  %v7355_v59 = vpop.permute.xlu0 %7354  ;;  %v6971_v26 = vpop.permute.xlu1 %6970 }
 0xe29   : > { %7049 = vst.msk [vmem:[#allocation3 + $0x88] sm:$0xff] %vm1268_vm7, %v6971_v26  ;;  %v7551_v12 = vpop.permute.xlu2 %7550 }
 0xe2a   : > { %7241 = vst.msk [vmem:[#allocation3 + $0x88] sm:$0xff] %vm13075_vm0, %v7163_v29  ;;  %v7848_v35 = vld [vmem:[#allocation3 + $0x80] sm:$0xff]  ;;  %vm13088_vm0 = vmmov %vm13079_vm8 }
 0xe2b   : > { %7433 = vst.msk [vmem:[#allocation3 + $0x88] sm:$0xff] %vm13076_vm4, %v7355_v59  ;;  %8292 = vmatmul.msk.f32.gmra.mxu3 %vm13077_vm5, %v7848_v35  ;;  %vm13089_vm4 = vmmov %vm13080_vm9  ;;  %v7287_v35 = vld [vmem:[#allocation2 + $0x1a0] sm:$0xff] }
 0xe2c   : > { %vm13090_vm5 = vmmov %vm13074_vm3 }
 0xe2e   : > { %v7998_v43 = vpop.f32.mrf.mxu3  ;;  %7372 = vrot.lane.b32.xlu0 %v7282_v40, %s8353_s12  ;;  %6988 = vrot.lane.b32.xlu1 %v7472_v62, %s8351_s10  ;;  %v7477_v62 = vld [vmem:[#allocation2 + $0x189] sm:$0xff] }
 0xe2f   : > { %v7999_v27 = vadd.f32 %v12510_v60, %v7998_v43  ;;  %7756 = vrot.lane.b32.xlu2 %v7666_v38, %s8355_s14  ;;  %v7671_v40 = vld [vmem:[#allocation2 + $0x1a2] sm:$0xff] }
 0xe30   : > { %v6973_v8 = vpop.permute.xlu0 %6972  ;;  %v7547_v1 = vpop.permute.xlu1 %7546 }
 0xe31   : > { %8086 = vst.msk [vmem:[%s12518_s26 + $0x20] sm:$0xff] %vm432_vm2, %v7999_v27  ;;  %v7169_v47 = vpop.permute.xlu2 %7168 }
 0xe32   : > { %7050 = vst.msk [vmem:[#allocation3 + $0x90] sm:$0xff] %vm1268_vm7, %v6973_v8 }
 0xe33   : > { %7625 = vst.msk [vmem:[#allocation3 + $0x88] sm:$0xff] %vm13078_vm6, %v7547_v1  ;;  %vm13091_vm6 = vmmov %vm13081_vm10 }
 0xe34   : > { %7817 = vst.msk [vmem:[#allocation3 + $0x88] sm:$0xff] %vm13079_vm8, %v7739_v28  ;;  %vm13092_vm8 = vmmov %vm13087_vm1 }
 0xe36   : > { %6990 = vrot.lane.b32.xlu0 %v7473_v4, %s8351_s10  ;;  %7564 = vrot.lane.b32.xlu1 %v7474_v7, %s8354_s13  ;;  %v8001_v33 = vpop.f32.mrf.mxu3 }
 0xe37   : > { %7374 = vrot.lane.b32.xlu2 %v7283_v61, %s8353_s12  ;;  %v8002_v58 = vadd.f32 %v12510_v60, %v8001_v33 }
 0xe38   : > { %v7549_v30 = vpop.permute.xlu0 %7548  ;;  %v7165_v57 = vpop.permute.xlu1 %7164 }
 0xe39   : > { %8087 = vst.msk [vmem:[%s12518_s26 + $0x28] sm:$0xff] %vm432_vm2, %v8002_v58  ;;  %v7745_v23 = vpop.permute.xlu2 %7744 }
 0xe3a   : > { %7242 = vst.msk [vmem:[#allocation3 + $0x90] sm:$0xff] %vm13080_vm9, %v7165_v57  ;;  %vm13093_vm9 = vmmov %vm13088_vm0 }
 0xe3b   : > { %7434 = vst.msk [vmem:[#allocation3 + $0x90] sm:$0xff] %vm13081_vm10, %v7357_v18  ;;  %v7849_v42 = vld [vmem:[#allocation3 + $0x88] sm:$0xff]  ;;  %vm13094_vm10 = vmmov %vm13089_vm4 }
 0xe3c   : > { %7626 = vst.msk [vmem:[#allocation3 + $0x90] sm:$0xff] %vm13082_vm11, %v7549_v30  ;;  %8293 = vmatmul.msk.f32.gmra.mxu3 %vm13083_vm12, %v7849_v42  ;;  %vm13095_vm11 = vmmov %vm13091_vm6  ;;  %v7478_v18 = vld [vmem:[#allocation2 + $0x199] sm:$0xff] }
 0xe3d   : > { %vm13096_vm12 = vmmov %vm13087_vm1 }
 0xe3e   : > { %7566 = vrot.lane.b32.xlu0 %v7475_v31, %s8354_s13  ;;  %7182 = vrot.lane.b32.xlu1 %v7665_v46, %s8352_s11 }
 0xe3f   : > { %6992 = vrot.lane.b32.xlu2 %v7474_v7, %s8351_s10 }
 0xe40   : > { %v7167_v5 = vpop.permute.xlu0 %7166  ;;  %v7741_v16 = vpop.permute.xlu1 %7740 }
 0xe41   : > { %7243 = vst.msk [vmem:[#allocation3 + $0x98] sm:$0xff] %vm13084_vm13, %v7167_v5  ;;  %v7363_v24 = vpop.permute.xlu2 %7362  ;;  %vm13097_vm13 = vmmov %vm13074_vm3 }
 0xe42   : > { %7818 = vst.msk [vmem:[#allocation3 + $0x90] sm:$0xff] %vm13085_vm14, %v7741_v16  ;;  %vm13098_vm14 = vmmov %vm13089_vm4 }
 0xe45   : > { %v8004_v48 = vpop.f32.mrf.mxu3 }
 0xe46   : > { %v8005_v0 = vadd.f32 %v12510_v60, %v8004_v48  ;;  %7184 = vrot.lane.b32.xlu0 %v7666_v38, %s8352_s11  ;;  %7758 = vrot.lane.b32.xlu1 %v7667_v13, %s8355_s14 }
 0xe47   : > { %7568 = vrot.lane.b32.xlu2 %v7476_v36, %s8354_s13 }
 0xe48   : > { %8088 = vst.msk [vmem:[%s12518_s26 + $0x30] sm:$0xff] %vm432_vm2, %v8005_v0  ;;  %v7743_v41 = vpop.permute.xlu0 %7742  ;;  %v7359_v50 = vpop.permute.xlu1 %7358 }
 0xe49   : > { %7435 = vst.msk [vmem:[#allocation3 + $0x98] sm:$0xff] %vm13086_vm15, %v7359_v50  ;;  %v6981_v17 = vpop.permute.xlu2 %6980  ;;  %v7850_v45 = vld [vmem:[#allocation3 + $0x90] sm:$0xff]  ;;  %vm13099_vm15 = vmmov %vm13088_vm0 }
 0xe4a   : > { %7627 = vst.msk [vmem:[#allocation3 + $0x98] sm:$0xff] %vm13087_vm1, %v7551_v12  ;;  %8294 = vmatmul.msk.f32.gmra.mxu3 %vm13074_vm3, %v7850_v45  ;;  %v7479_v12 = vld [vmem:[#allocation2 + $0x1a1] sm:$0xff]  ;;  %vm13100_vm1 = vmmov %vm13091_vm6 }
 0xe4b   : > { %7819 = vst.msk [vmem:[#allocation3 + $0x98] sm:$0xff] %vm13088_vm0, %v7743_v41  ;;  %vm13101_vm0 = vmmov %vm13092_vm8 }
 0xe4c   : > { %7054 = vst.msk [vmem:[#allocation3 + $0xb0] sm:$0xff] %vm1268_vm7, %v6981_v17 }
 0xe4e   : > { %v8007_v10 = vpop.f32.mrf.mxu3  ;;  %7760 = vrot.lane.b32.xlu0 %v7668_v14, %s8355_s14  ;;  %7376 = vrot.lane.b32.xlu1 %v7284_v9, %s8353_s12 }
 0xe4f   : > { %v8008_v3 = vadd.f32 %v12510_v60, %v8007_v10  ;;  %7186 = vrot.lane.b32.xlu2 %v7667_v13, %s8352_s11 }
 0xe50   : > { %v7361_v55 = vpop.permute.xlu0 %7360  ;;  %v6977_v37 = vpop.permute.xlu1 %6976 }
 0xe51   : > { %8089 = vst.msk [vmem:[%s12518_s26 + $0x38] sm:$0xff] %vm432_vm2, %v8008_v3  ;;  %v7557_v29 = vpop.permute.xlu2 %7556 }
 0xe52   : > { %7052 = vst.msk [vmem:[#allocation3 + $0xa0] sm:$0xff] %vm1268_vm7, %v6977_v37  ;;  %v7851_v56 = vld [vmem:[#allocation3 + $0x98] sm:$0xff] }
 0xe53   : > { %7244 = vst.msk [vmem:[#allocation3 + $0xa0] sm:$0xff] %vm13089_vm4, %v7169_v47  ;;  %8295 = vmatmul.msk.f32.gmra.mxu3 %vm13090_vm5, %v7851_v56  ;;  %vm13102_vm4 = vmmov %vm13093_vm9 }
 0xe54   : > { %7436 = vst.msk [vmem:[#allocation3 + $0xa0] sm:$0xff] %vm13091_vm6, %v7361_v55  ;;  %vm13103_vm5 = vmmov %vm13094_vm10 }
 0xe55   : > { %vm13104_vm6 = vmmov %vm13100_vm1 }
 0xe56   : > { %7378 = vrot.lane.b32.xlu0 %v7285_v39, %s8353_s12  ;;  %6994 = vrot.lane.b32.xlu1 %v7475_v31, %s8351_s10  ;;  %v8010_v49 = vpop.f32.mrf.mxu3 }
 0xe57   : > { %7762 = vrot.lane.b32.xlu2 %v7669_v53, %s8355_s14  ;;  %v8011_v51 = vadd.f32 %v12510_v60, %v8010_v49 }
 0xe58   : > { %v6979_v32 = vpop.permute.xlu0 %6978  ;;  %v7553_v20 = vpop.permute.xlu1 %7552 }
 0xe59   : > { %8090 = vst.msk [vmem:[%s12518_s26 + $0x40] sm:$0xff] %vm432_vm2, %v8011_v51  ;;  %v7175_v28 = vpop.permute.xlu2 %7174 }
 0xe5a   : > { %7053 = vst.msk [vmem:[#allocation3 + $0xa8] sm:$0xff] %vm1268_vm7, %v6979_v32 }
 0xe5b   : > { %7628 = vst.msk [vmem:[#allocation3 + $0xa0] sm:$0xff] %vm13092_vm8, %v7553_v20  ;;  %vm13105_vm8 = vmmov %vm13074_vm3 }
 0xe5c   : > { %7820 = vst.msk [vmem:[#allocation3 + $0xa0] sm:$0xff] %vm13093_vm9, %v7745_v23  ;;  %vm13106_vm9 = vmmov %vm13101_vm0 }
 0xe5e   : > { %6996 = vrot.lane.b32.xlu0 %v7476_v36, %s8351_s10  ;;  %7570 = vrot.lane.b32.xlu1 %v7477_v62, %s8354_s13 }
 0xe5f   : > { %7380 = vrot.lane.b32.xlu2 %v7286_v19, %s8353_s12 }
 0xe60   : > { %v7555_v22 = vpop.permute.xlu0 %7554  ;;  %v7171_v15 = vpop.permute.xlu1 %7170 }
 0xe61   : > { %7245 = vst.msk [vmem:[#allocation3 + $0xa8] sm:$0xff] %vm13094_vm10, %v7171_v15  ;;  %v7751_v11 = vpop.permute.xlu2 %7750  ;;  %vm13107_vm10 = vmmov %vm13102_vm4 }
 0xe62   : > { %7437 = vst.msk [vmem:[#allocation3 + $0xa8] sm:$0xff] %vm13095_vm11, %v7363_v24  ;;  %vm13108_vm11 = vmmov %vm13103_vm5 }
 0xe63   : > { %7629 = vst.msk [vmem:[#allocation3 + $0xa8] sm:$0xff] %vm13096_vm12, %v7555_v22  ;;  %v7852_v34 = vld [vmem:[#allocation3 + $0xa0] sm:$0xff]  ;;  %vm13109_vm12 = vmmov %vm13100_vm1 }
 0xe64   : > { %8296 = vmatmul.msk.f32.gmra.mxu3 %vm13097_vm13, %v7852_v34  ;;  %vm13110_vm13 = vmmov %vm13101_vm0 }
 0xe65   : > { %v8013_v54 = vpop.f32.mrf.mxu3 }
 0xe66   : > { %v8014_v4 = vadd.f32 %v12510_v60, %v8013_v54  ;;  %7572 = vrot.lane.b32.xlu0 %v7478_v18, %s8354_s13  ;;  %7188 = vrot.lane.b32.xlu1 %v7668_v14, %s8352_s11 }
 0xe67   : > { %6998 = vrot.lane.b32.xlu2 %v7477_v62, %s8351_s10 }
 0xe68   : > { %8091 = vst.msk [vmem:[%s12518_s26 + $0x48] sm:$0xff] %vm432_vm2, %v8014_v4  ;;  %v7173_v21 = vpop.permute.xlu0 %7172  ;;  %v7747_v2 = vpop.permute.xlu1 %7746 }
 0xe69   : > { %7246 = vst.msk [vmem:[#allocation3 + $0xb0] sm:$0xff] %vm13098_vm14, %v7173_v21  ;;  %v7369_v44 = vpop.permute.xlu2 %7368  ;;  %vm13111_vm14 = vmmov %vm13074_vm3 }
 0xe6a   : > { %7821 = vst.msk [vmem:[#allocation3 + $0xa8] sm:$0xff] %vm13099_vm15, %v7747_v2  ;;  %vm13112_vm15 = vmmov %vm13103_vm5 }
 0xe6e   : > { %v8016_v52 = vpop.f32.mrf.mxu3  ;;  %7190 = vrot.lane.b32.xlu0 %v7669_v53, %s8352_s11  ;;  %7764 = vrot.lane.b32.xlu1 %v7670_v25, %s8355_s14 }
 0xe6f   : > { %v8017_v46 = vadd.f32 %v12510_v60, %v8016_v52  ;;  %7574 = vrot.lane.b32.xlu2 %v7479_v12, %s8354_s13 }
 0xe70   : > { %v7749_v6 = vpop.permute.xlu0 %7748  ;;  %v7365_v63 = vpop.permute.xlu1 %7364 }
 0xe71   : > { %8092 = vst.msk [vmem:[%s12518_s26 + $0x50] sm:$0xff] %vm432_vm2, %v8017_v46  ;;  %v6987_v59 = vpop.permute.xlu2 %6986  ;;  %v7853_v26 = vld [vmem:[#allocation3 + $0xa8] sm:$0xff] }
 0xe72   : > { %7438 = vst.msk [vmem:[#allocation3 + $0xb0] sm:$0xff] %vm13100_vm1, %v7365_v63  ;;  %8297 = vmatmul.msk.f32.gmra.mxu3 %vm13074_vm3, %v7853_v26  ;;  %vm13113_vm1 = vmmov %vm13102_vm4 }
 0xe73   : > { %7630 = vst.msk [vmem:[#allocation3 + $0xb0] sm:$0xff] %vm13101_vm0, %v7557_v29  ;;  %vm13114_vm3 = vmmov %vm13104_vm6 }
 0xe74   : > { %7822 = vst.msk [vmem:[#allocation3 + $0xb0] sm:$0xff] %vm13102_vm4, %v7749_v6  ;;  %vm13115_vm4 = vmmov %vm13105_vm8 }
 0xe75   : > { %7057 = vst.msk [vmem:[#allocation3 + $0xc8] sm:$0xff] %vm1268_vm7, %v6987_v59 }
 0xe76   : > { %7382 = vrot.lane.b32.xlu1 %v7287_v35, %s8353_s12  ;;  %v8019_v43 = vpop.f32.mrf.mxu3  ;;  %7766 = vrot.lane.b32.xlu0 %v7671_v40, %s8355_s14 }
 0xe77   : > { %v8020_v38 = vadd.f32 %v12510_v60, %v8019_v43 }
 0xe78   : > { %v7367_v27 = vpop.permute.xlu0 %7366  ;;  %v6983_v8 = vpop.permute.xlu1 %6982 }
 0xe79   : > { %8093 = vst.msk [vmem:[%s12518_s26 + $0x58] sm:$0xff] %vm432_vm2, %v8020_v38  ;;  %v7563_v1 = vpop.permute.xlu2 %7562 }
 0xe7a   : > { %7055 = vst.msk [vmem:[#allocation3 + $0xb8] sm:$0xff] %vm1268_vm7, %v6983_v8 }
 0xe7b   : > { %7247 = vst.msk [vmem:[#allocation3 + $0xb8] sm:$0xff] %vm13103_vm5, %v7175_v28  ;;  %v7854_v47 = vld [vmem:[#allocation3 + $0xb0] sm:$0xff]  ;;  %vm13116_vm5 = vmmov %vm13113_vm1 }
 0xe7c   : > { %7439 = vst.msk [vmem:[#allocation3 + $0xb8] sm:$0xff] %vm13104_vm6, %v7367_v27  ;;  %8298 = vmatmul.msk.f32.gmra.mxu3 %vm13105_vm8, %v7854_v47  ;;  %vm13117_vm6 = vmmov %vm13108_vm11 }
 0xe7d   : > { %vm13118_vm8 = vmmov %vm13114_vm3 }
 0xe80   : > { %v6985_v7 = vpop.permute.xlu0 %6984  ;;  %v7559_v61 = vpop.permute.xlu1 %7558 }
 0xe81   : > { %7056 = vst.msk [vmem:[#allocation3 + $0xc0] sm:$0xff] %vm1268_vm7, %v6985_v7  ;;  %v7181_v33 = vpop.permute.xlu2 %7180 }
 0xe82   : > { %7631 = vst.msk [vmem:[#allocation3 + $0xb8] sm:$0xff] %vm13106_vm9, %v7559_v61  ;;  %vm13119_vm9 = vmmov %vm13115_vm4 }
 0xe83   : > { %7823 = vst.msk [vmem:[#allocation3 + $0xb8] sm:$0xff] %vm13107_vm10, %v7751_v11  ;;  %vm13120_vm10 = vmmov %vm13101_vm0 }
 0xe85   : > { %v8022_v58 = vpop.f32.mrf.mxu3 }
 0xe86   : > { %v8023_v30 = vadd.f32 %v12510_v60, %v8022_v58 }
 0xe88   : > { %8094 = vst.msk [vmem:[%s12518_s26 + $0x60] sm:$0xff] %vm432_vm2, %v8023_v30  ;;  %v7561_v57 = vpop.permute.xlu0 %7560  ;;  %v7177_v23 = vpop.permute.xlu1 %7176 }
 0xe89   : > { %7248 = vst.msk [vmem:[#allocation3 + $0xc0] sm:$0xff] %vm13108_vm11, %v7177_v23  ;;  %v7757_v42 = vpop.permute.xlu2 %7756  ;;  %vm13121_vm11 = vmmov %vm13113_vm1 }
 0xe8a   : > { %7440 = vst.msk [vmem:[#allocation3 + $0xc0] sm:$0xff] %vm13109_vm12, %v7369_v44  ;;  %v7855_v31 = vld [vmem:[#allocation3 + $0xb8] sm:$0xff]  ;;  %vm13122_vm12 = vmmov %vm13117_vm6 }
 0xe8b   : > { %7632 = vst.msk [vmem:[#allocation3 + $0xc0] sm:$0xff] %vm13110_vm13, %v7561_v57  ;;  %8299 = vmatmul.msk.f32.gmra.mxu3 %vm13111_vm14, %v7855_v31  ;;  %vm13123_vm13 = vmmov %vm13114_vm3 }
 0xe8c   : > { %vm13124_vm14 = vmmov %vm13101_vm0 }
 0xe8e   : > { %v8025_v5 = vpop.f32.mrf.mxu3 }
 0xe8f   : > { %v8026_v16 = vadd.f32 %v12510_v60, %v8025_v5 }
 0xe90   : > { %v7179_v24 = vpop.permute.xlu0 %7178  ;;  %v7753_v48 = vpop.permute.xlu1 %7752 }
 0xe91   : > { %8095 = vst.msk [vmem:[%s12518_s26 + $0x68] sm:$0xff] %vm432_vm2, %v8026_v16  ;;  %v7375_v13 = vpop.permute.xlu2 %7374 }
 0xe92   : > { %7249 = vst.msk [vmem:[#allocation3 + $0xc8] sm:$0xff] %vm13112_vm15, %v7179_v24  ;;  %vm13125_vm15 = vmmov %vm13115_vm4 }
 0xe93   : > { %7824 = vst.msk [vmem:[#allocation3 + $0xc0] sm:$0xff] %vm13113_vm1, %v7753_v48  ;;  %vm13126_vm1 = vmmov %vm13117_vm6 }
 0xe96   : > { %v8028_v0 = vpop.f32.mrf.mxu3 }
 0xe97   : > { %v8029_v36 = vadd.f32 %v12510_v60, %v8028_v0 }
 0xe98   : > { %v7755_v41 = vpop.permute.xlu0 %7754  ;;  %v7371_v50 = vpop.permute.xlu1 %7370 }
 0xe99   : > { %8096 = vst.msk [vmem:[%s12518_s26 + $0x70] sm:$0xff] %vm432_vm2, %v8029_v36  ;;  %v6993_v17 = vpop.permute.xlu2 %6992 }
 0xe9a   : > { %7441 = vst.msk [vmem:[#allocation3 + $0xc8] sm:$0xff] %vm13114_vm3, %v7371_v50  ;;  %v7856_v45 = vld [vmem:[#allocation3 + $0xc0] sm:$0xff]  ;;  %vm13127_vm3 = vmmov %vm13116_vm5 }
 0xe9b   : > { %7633 = vst.msk [vmem:[#allocation3 + $0xc8] sm:$0xff] %vm13101_vm0, %v7563_v1  ;;  %8300 = vmatmul.msk.f32.gmra.mxu3 %vm13115_vm4, %v7856_v45  ;;  %vm13128_vm0 = vmmov %vm13118_vm8 }
 0xe9c   : > { %7825 = vst.msk [vmem:[#allocation3 + $0xc8] sm:$0xff] %vm13116_vm5, %v7755_v41  ;;  %vm13129_vm5 = vmmov %vm13120_vm10 }
 0xe9d   : > { %7060 = vst.msk [vmem:[#allocation3 + $0xe0] sm:$0xff] %vm1268_vm7, %v6993_v17 }
 0xea0   : > { %v7373_v14 = vpop.permute.xlu0 %7372  ;;  %v6989_v9 = vpop.permute.xlu1 %6988 }
 0xea1   : > { %7058 = vst.msk [vmem:[#allocation3 + $0xd0] sm:$0xff] %vm1268_vm7, %v6989_v9  ;;  %v7569_v10 = vpop.permute.xlu2 %7568 }
 0xea2   : > { %7250 = vst.msk [vmem:[#allocation3 + $0xd0] sm:$0xff] %vm13117_vm6, %v7181_v33  ;;  %vm13130_vm6 = vmmov %vm13127_vm3 }
 0xea3   : > { %7442 = vst.msk [vmem:[#allocation3 + $0xd0] sm:$0xff] %vm13118_vm8, %v7373_v14  ;;  %v7857_v3 = vld [vmem:[#allocation3 + $0xc8] sm:$0xff]  ;;  %vm13131_vm8 = vmmov %vm13126_vm1 }
 0xea4   : > { %8301 = vmatmul.msk.f32.gmra.mxu3 %vm13119_vm9, %v7857_v3  ;;  %vm13132_vm9 = vmmov %vm13128_vm0 }
 0xea6   : > { %v8031_v55 = vpop.f32.mrf.mxu3 }
 0xea7   : > { %v8032_v37 = vadd.f32 %v12510_v60, %v8031_v55 }
 0xea8   : > { %v6991_v29 = vpop.permute.xlu0 %6990  ;;  %v7565_v56 = vpop.permute.xlu1 %7564 }
 0xea9   : > { %8097 = vst.msk [vmem:[%s12518_s26 + $0x78] sm:$0xff] %vm432_vm2, %v8032_v37  ;;  %v7187_v39 = vpop.permute.xlu2 %7186 }
 0xeaa   : > { %7059 = vst.msk [vmem:[#allocation3 + $0xd8] sm:$0xff] %vm1268_vm7, %v6991_v29 }
 0xeab   : > { %7634 = vst.msk [vmem:[#allocation3 + $0xd0] sm:$0xff] %vm13120_vm10, %v7565_v56  ;;  %vm13133_vm10 = vmmov %vm13115_vm4 }
 0xeac   : > { %7826 = vst.msk [vmem:[#allocation3 + $0xd0] sm:$0xff] %vm13121_vm11, %v7757_v42  ;;  %vm13134_vm11 = vmmov %vm13129_vm5 }
 0xeae   : > { %v8034_v53 = vpop.f32.mrf.mxu3 }
 0xeaf   : > { %v8035_v49 = vadd.f32 %v12510_v60, %v8034_v53 }
 0xeb0   : > { %v7567_v51 = vpop.permute.xlu0 %7566  ;;  %v7183_v32 = vpop.permute.xlu1 %7182 }
 0xeb1   : > { %8098 = vst.msk [vmem:[%s12518_s26 + $0x80] sm:$0xff] %vm432_vm2, %v8035_v49  ;;  %v7763_v20 = vpop.permute.xlu2 %7762 }
 0xeb2   : > { %7251 = vst.msk [vmem:[#allocation3 + $0xd8] sm:$0xff] %vm13122_vm12, %v7183_v32  ;;  %vm13135_vm12 = vmmov %vm13127_vm3 }
 0xeb3   : > { %7443 = vst.msk [vmem:[#allocation3 + $0xd8] sm:$0xff] %vm13123_vm13, %v7375_v13  ;;  %v7858_v28 = vld [vmem:[#allocation3 + $0xd0] sm:$0xff]  ;;  %vm13136_vm13 = vmmov %vm13126_vm1 }
 0xeb4   : > { %7635 = vst.msk [vmem:[#allocation3 + $0xd8] sm:$0xff] %vm13124_vm14, %v7567_v51  ;;  %8302 = vmatmul.msk.f32.gmra.mxu3 %vm13125_vm15, %v7858_v28  ;;  %vm13137_vm14 = vmmov %vm13128_vm0 }
 0xeb5   : > { %vm13138_vm15 = vmmov %vm13115_vm4 }
 0xeb8   : > { %v7185_v19 = vpop.permute.xlu0 %7184  ;;  %v7759_v62 = vpop.permute.xlu1 %7758 }
 0xeb9   : > { %7252 = vst.msk [vmem:[#allocation3 + $0xe0] sm:$0xff] %vm13126_vm1, %v7185_v19  ;;  %v7381_v22 = vpop.permute.xlu2 %7380 }
 0xeba   : > { %7827 = vst.msk [vmem:[#allocation3 + $0xd8] sm:$0xff] %vm13127_vm3, %v7759_v62 }
 0xebf   : > { %v8037_v15 = vpop.f32.mrf.mxu3 }
 0xec0   : > { %v8038_v11 = vadd.f32 %v12510_v60, %v8037_v15  ;;  %v7761_v34 = vpop.permute.xlu0 %7760  ;;  %v7377_v18 = vpop.permute.xlu1 %7376 }
 0xec1   : > { %7444 = vst.msk [vmem:[#allocation3 + $0xe0] sm:$0xff] %vm13128_vm0, %v7377_v18  ;;  %v7859_v54 = vld [vmem:[#allocation3 + $0xd8] sm:$0xff]  ;;  %v6999_v4 = vpop.permute.xlu2 %6998 }
 0xec2   : > { %8099 = vst.msk [vmem:[%s12518_s26 + $0x88] sm:$0xff] %vm432_vm2, %v8038_v11  ;;  %8303 = vmatmul.msk.f32.gmra.mxu3 %vm13115_vm4, %v7859_v54 }
 0xec3   : > { %7636 = vst.msk [vmem:[#allocation3 + $0xe0] sm:$0xff] %vm13129_vm5, %v7569_v10 }
 0xec4   : > { %7828 = vst.msk [vmem:[#allocation3 + $0xe0] sm:$0xff] %vm13130_vm6, %v7761_v34  ;;  %vm13140_vm6 = vmmov %vm13127_vm3 }
 0xec5   : > { %7063 = vst.msk [vmem:[#allocation3 + $0xf8] sm:$0xff] %vm1268_vm7, %v6999_v4 }
 0xec8   : > { %v7379_v21 = vpop.permute.xlu0 %7378  ;;  %v6995_v2 = vpop.permute.xlu1 %6994 }
 0xec9   : > { %7061 = vst.msk [vmem:[#allocation3 + $0xe8] sm:$0xff] %vm1268_vm7, %v6995_v2  ;;  %v7575_v1 = vpop.permute.xlu2 %7574 }
 0xeca   : > { %7253 = vst.msk [vmem:[#allocation3 + $0xe8] sm:$0xff] %vm13131_vm8, %v7187_v39  ;;  %vm13141_vm8 = vmmov %vm13115_vm4 }
 0xecb   : > { %7445 = vst.msk [vmem:[#allocation3 + $0xe8] sm:$0xff] %vm13132_vm9, %v7379_v21  ;;  %v7860_v44 = vld [vmem:[#allocation3 + $0xe0] sm:$0xff] }
 0xecc   : > { %8304 = vmatmul.msk.f32.gmra.mxu3 %vm13133_vm10, %v7860_v44 }
 0xecd   : > { %v8040_v25 = vpop.f32.mrf.mxu3 }
 0xece   : > { %v8041_v52 = vadd.f32 %v12510_v60, %v8040_v25 }
 0xed0   : > { %8100 = vst.msk [vmem:[%s12518_s26 + $0x90] sm:$0xff] %vm432_vm2, %v8041_v52  ;;  %v6997_v46 = vpop.permute.xlu0 %6996  ;;  %v7571_v6 = vpop.permute.xlu1 %7570 }
 0xed1   : > { %7062 = vst.msk [vmem:[#allocation3 + $0xf0] sm:$0xff] %vm1268_vm7, %v6997_v46  ;;  %vm13139_vm7 = vmmov %vm13129_vm5 }
 0xed2   : > { %7637 = vst.msk [vmem:[#allocation3 + $0xe8] sm:$0xff] %vm13134_vm11, %v7571_v6 }
 0xed3   : > { %7829 = vst.msk [vmem:[#allocation3 + $0xe8] sm:$0xff] %vm13135_vm12, %v7763_v20 }
 0xed6   : > { %v8043_v63 = vpop.f32.mrf.mxu3 }
 0xed7   : > { %v8044_v59 = vadd.f32 %v12510_v60, %v8043_v63 }
 0xed8   : > { %v7573_v26 = vpop.permute.xlu0 %7572  ;;  %v7189_v12 = vpop.permute.xlu1 %7188 }
 0xed9   : > { %8101 = vst.msk [vmem:[%s12518_s26 + $0x98] sm:$0xff] %vm432_vm2, %v8044_v59 }
 0xeda   : > { %7254 = vst.msk [vmem:[#allocation3 + $0xf0] sm:$0xff] %vm13136_vm13, %v7189_v12  ;;  %v7861_v35 = vld [vmem:[#allocation3 + $0xe8] sm:$0xff] }
 0xedb   : > { %7446 = vst.msk [vmem:[#allocation3 + $0xf0] sm:$0xff] %vm13137_vm14, %v7381_v22  ;;  %8305 = vmatmul.msk.f32.gmra.mxu3 %vm13138_vm15, %v7861_v35 }
 0xedc   : > { %7638 = vst.msk [vmem:[#allocation3 + $0xf0] sm:$0xff] %vm13139_vm7, %v7573_v26 }
 0xee0   : > { %v7191_v40 = vpop.permute.xlu0 %7190  ;;  %v7765_v43 = vpop.permute.xlu1 %7764 }
 0xee1   : > { %7255 = vst.msk [vmem:[#allocation3 + $0xf8] sm:$0xff] %vm13126_vm1, %v7191_v40 }
 0xee2   : > { %7830 = vst.msk [vmem:[#allocation3 + $0xf0] sm:$0xff] %vm13127_vm3, %v7765_v43 }
 0xee7   : > { %v8046_v38 = vpop.f32.mrf.mxu3 }
 0xee8   : > { %v8047_v27 = vadd.f32 %v12510_v60, %v8046_v38  ;;  %v7383_v8 = vpop.permute.xlu1 %7382  ;;  %v7767_v7 = vpop.permute.xlu0 %7766 }
 0xee9   : > { %7447 = vst.msk [vmem:[#allocation3 + $0xf8] sm:$0xff] %vm13128_vm0, %v7383_v8  ;;  %v7862_v47 = vld [vmem:[#allocation3 + $0xf0] sm:$0xff] }
 0xeea   : > { %8102 = vst.msk [vmem:[%s12518_s26 + $0xa0] sm:$0xff] %vm432_vm2, %v8047_v27  ;;  %8306 = vmatmul.msk.f32.gmra.mxu3 %vm13115_vm4, %v7862_v47 }
 0xeeb   : > { %7639 = vst.msk [vmem:[#allocation3 + $0xf8] sm:$0xff] %vm13129_vm5, %v7575_v1 }
 0xeec   : > { %7831 = vst.msk [vmem:[#allocation3 + $0xf8] sm:$0xff] %vm13140_vm6, %v7767_v7 }
 0xef3   : > { %v7863_v61 = vld [vmem:[#allocation3 + $0xf8] sm:$0xff] }
 0xef4   : > { %8307 = vmatmul.msk.f32.gmra.mxu3 %vm13141_vm8, %v7863_v61 }
 0xef5   : > { %v8049_v33 = vpop.f32.mrf.mxu3 }
 0xef6   : > { %v8050_v58 = vadd.f32 %v12510_v60, %v8049_v33 }
 0xef8   : > { %8103 = vst.msk [vmem:[%s12518_s26 + $0xa8] sm:$0xff] %vm432_vm2, %v8050_v58 }
 0xeff   : > { %v8052_v30 = vpop.f32.mrf.mxu3 }
 0xf00   : > { %v8053_v57 = vadd.f32 %v12510_v60, %v8052_v30 }
 0xf02   : > { %8104 = vst.msk [vmem:[%s12518_s26 + $0xb0] sm:$0xff] %vm432_vm2, %v8053_v57 }
 0xf0e   : > { %v8055_v23 = vpop.f32.mrf.mxu3 }
 0xf0f   : > { %v8056_v42 = vadd.f32 %v12510_v60, %v8055_v23 }
 0xf11   : > { %8105 = vst.msk [vmem:[%s12518_s26 + $0xb8] sm:$0xff] %vm432_vm2, %v8056_v42 }
 0xf1e   : > { %v8058_v31 = vpop.f32.mrf.mxu3 }
 0xf1f   : > { %v8059_v5 = vadd.f32 %v12510_v60, %v8058_v31 }
 0xf21   : > { %8106 = vst.msk [vmem:[%s12518_s26 + $0xc0] sm:$0xff] %vm432_vm2, %v8059_v5 }
 0xf27   : > { %v8061_v16 = vpop.f32.mrf.mxu3 }
 0xf28   : > { %v8062_v24 = vadd.f32 %v12510_v60, %v8061_v16 }
 0xf2a   : > { %8107 = vst.msk [vmem:[%s12518_s26 + $0xc8] sm:$0xff] %vm432_vm2, %v8062_v24 }
 0xf37   : > { %v8064_v48 = vpop.f32.mrf.mxu3 }
 0xf38   : > { %v8065_v13 = vadd.f32 %v12510_v60, %v8064_v48 }
 0xf3a   : > { %8108 = vst.msk [vmem:[%s12518_s26 + $0xd0] sm:$0xff] %vm432_vm2, %v8065_v13 }
 0xf45   : > { %v8067_v0 = vpop.f32.mrf.mxu3 }
 0xf46   : > { %v8068_v36 = vadd.f32 %v12510_v60, %v8067_v0 }
 0xf48   : > { %8109 = vst.msk [vmem:[%s12518_s26 + $0xd8] sm:$0xff] %vm432_vm2, %v8068_v36 }
 0xf4f   : > { %v8070_v41 = vpop.f32.mrf.mxu3 }
 0xf50   : > { %v8071_v50 = vadd.f32 %v12510_v60, %v8070_v41 }
 0xf52   : > { %8110 = vst.msk [vmem:[%s12518_s26 + $0xe0] sm:$0xff] %vm432_vm2, %v8071_v50 }
 0xf5e   : > { %v8073_v17 = vpop.f32.mrf.mxu3 }
 0xf5f   : > { %v8074_v45 = vadd.f32 %v12510_v60, %v8073_v17 }
 0xf61   : > { %8111 = vst.msk [vmem:[%s12518_s26 + $0xe8] sm:$0xff] %vm432_vm2, %v8074_v45 }
 0xf6d   : > { %v8076_v14 = vpop.f32.mrf.mxu3 }
 0xf6e   : > { %v8077_v9 = vadd.f32 %v12510_v60, %v8076_v14 }
 0xf70   : > { %8112 = vst.msk [vmem:[%s12518_s26 + $0xf0] sm:$0xff] %vm432_vm2, %v8077_v9 }
 0xf77   : > { %v8079_v10 = vpop.f32.mrf.mxu3 }
 0xf78   : > { %v8080_v3 = vadd.f32 %v12510_v60, %v8079_v10 }
 0xf7a   : > { %8113 = vst.msk [vmem:[%s12518_s26 + $0xf8] sm:$0xff] %vm432_vm2, %v8080_v3 }
 0xf7b PF: > { %s16_s21 = sadd.s32 1, %s8345_s21  }
 0xf7c   : > { %p13_p4 = scmp.ge.s32.totalorder %s16_s21, 4  }
 0xf7e   :  { %15 = sbr.rel (!%p13_p4) target bundleno = 1 (0x1), region = 77 }

</bundles_post_ra>
